<compile_context>
chip_gen: v7x
topology: tpu7x:2x2x1
jax: 0.10.0
libtpu: 0.0.40
codegen_flags: <defaults>
</compile_context>

<pallas_src>
import jax
import jax.numpy as jnp
from jax import lax
from jax.experimental import pallas as pl
from jax.experimental.pallas import tpu as pltpu


# --------------------------------------------------------------------------
# Fused kernel: conv1+relu+pool -> conv2+relu+pool -> deconv1+relu ->
#               deconv2+sigmoid, one batch block per grid step.
# --------------------------------------------------------------------------
def _fused_autoencoder_kernel(x_ref, w1_ref, b1_ref, w2_ref, b2_ref,
                              w3_ref, b3_ref, w4_ref, b4_ref,
                              o_ref, pad1_ref, pad2_ref):
    B, H, W, Cin = x_ref.shape                   # (bb, H, W, 3)
    H2, W2 = H // 2, W // 2
    H4, W4 = H // 4, W // 4
    C1 = w1_ref.shape[-1]                        # 64
    C2 = w2_ref.shape[-1]                        # 128

    def zero_halo(pad_ref, h, w, c):
        # Zero only the 1-pixel border strips; the interior is fully
        # overwritten right after.  Deliberately NOT gated on program_id==0:
        # under dimension_semantics=("parallel",) the second TensorCore never
        # executes step 0, so the halo must be (cheaply) re-zeroed each step.
        pad_ref[:, 0:1, :, :] = jnp.zeros((B, 1, w + 2, c), jnp.float32)
        pad_ref[:, h + 1:h + 2, :, :] = jnp.zeros((B, 1, w + 2, c), jnp.float32)
        pad_ref[:, :, 0:1, :] = jnp.zeros((B, h + 2, 1, c), jnp.float32)
        pad_ref[:, :, w + 1:w + 2, :] = jnp.zeros((B, h + 2, 1, c), jnp.float32)

    def im2col(pad_ref, h, w, c):
        # (B*h*w, 9*c) patch matrix; column order (ky, kx, ci) matches the
        # wrapper-side weight reshape.  One wide-K matmul replaces 9 K=c
        # tap matmuls (and their accumulator adds).
        pieces = [pad_ref[:, ky:ky + h, kx:kx + w, :].reshape(B * h * w, c)
                  for ky in range(3) for kx in range(3)]
        return jnp.concatenate(pieces, axis=-1)

    def maxpool2x2(y, h, w, c):
        y = y.reshape(B, h // 2, 2, w, c)
        y = jnp.maximum(y[:, :, 0], y[:, :, 1])          # pool rows
        y = y.reshape(B, h // 2, w // 2, 2, c)
        return jnp.maximum(y[:, :, :, 0], y[:, :, :, 1])  # pool cols

    # ---- conv1 (single matmul, K=9*Cin) + bias + ReLU + 2x2 maxpool ------
    zero_halo(pad1_ref, H, W, Cin)
    pad1_ref[:, 1:H + 1, 1:W + 1, :] = x_ref[...]
    y1 = jnp.dot(im2col(pad1_ref, H, W, Cin), w1_ref[...],
                 preferred_element_type=jnp.float32)           # (B*H*W, 64)
    y1 = jnp.maximum(y1.reshape(B, H, W, C1) + b1_ref[0], 0.0)
    # Pool epilogue writes straight into conv2's padded scratch interior.
    zero_halo(pad2_ref, H2, W2, C1)
    pad2_ref[:, 1:H2 + 1, 1:W2 + 1, :] = maxpool2x2(y1, H, W, C1)

    # ---- conv2 (single matmul, K=576) + bias + ReLU + 2x2 maxpool --------
    y2 = jnp.dot(im2col(pad2_ref, H2, W2, C1), w2_ref[...],
                 preferred_element_type=jnp.float32)           # (B*H2*W2, 128)
    y2 = jnp.maximum(y2.reshape(B, H2, W2, C2) + b2_ref[0], 0.0)
    p2 = maxpool2x2(y2, H2, W2, C2).reshape(B * H4 * W4, C2)   # (M4, 128)

    # ---- deconv1: 4 (dy,dx) taps packed into one (128, 256) matmul -------
    d1 = jnp.dot(p2, w3_ref[...], preferred_element_type=jnp.float32)
    d1 = jnp.maximum(d1 + b3_ref[0], 0.0)                      # (M4, 256)

    # ---- deconv2: one block-diagonal (256, 48) matmul on the packed
    #      sub-pixel layout (pointwise per input pixel, no interleave) ------
    z = jnp.dot(d1, w4_ref[...], preferred_element_type=jnp.float32) + b4_ref[0]
    o_ref[...] = (1.0 / (1.0 + jnp.exp(-z))).astype(o_ref.dtype)  # (M4, 48)


# --------------------------------------------------------------------------
# Wrapper: weight packing, pallas_call, and depth-to-space on the tiny
# 3-channel output (layout plumbing left to XLA).
# --------------------------------------------------------------------------
def _pack_params(params):
    c1 = params["w1"].shape[-1]
    c2 = params["w2"].shape[-1]
    c3 = params["w3"].shape[-1]
    c4 = params["w4"].shape[-1]
    # conv weights -> (9*Cin, Cout), row order (ky, kx, ci) == im2col order.
    w1 = params["w1"].astype(jnp.float32).reshape(-1, c1)                  # (27, 64)
    w2 = params["w2"].astype(jnp.float32).reshape(-1, c2)                  # (576, 128)
    # deconv1 weights -> (Cin, 4*Cout), column order (dy, dx, co).
    w3 = jnp.transpose(params["w3"].astype(jnp.float32),
                       (2, 0, 1, 3)).reshape(c2, 4 * c3)                   # (128, 256)
    # deconv2 weights -> block-diagonal (4*Cin, 16*Cout): consumes the packed
    # (dy1,dx1,co) layout directly, emits (dy1,dx1,dy2,dx2,c) columns.
    w4p = jnp.transpose(params["w4"].astype(jnp.float32),
                        (2, 0, 1, 3)).reshape(c3, 4 * c4)                  # (64, 12)
    w4 = jnp.kron(jnp.eye(4, dtype=w4p.dtype), w4p)                        # (256, 48)
    return {
        "w1": w1, "b1": params["b1"].astype(jnp.float32).reshape(1, -1),
        "w2": w2, "b2": params["b2"].astype(jnp.float32).reshape(1, -1),
        "w3": w3, "b3": jnp.tile(params["b3"].astype(jnp.float32), 4).reshape(1, -1),
        "w4": w4, "b4": jnp.tile(params["b4"].astype(jnp.float32), 16).reshape(1, -1),
    }


def autoencoder_forward(x_nchw, params, batch_block=None):
    x = jnp.transpose(x_nchw, (0, 2, 3, 1)).astype(jnp.float32)   # NCHW -> NHWC
    N, H, W, Cin = x.shape
    assert H % 4 == 0 and W % 4 == 0, "H and W must be multiples of 4"
    H2, W2, H4, W4 = H // 2, W // 2, H // 4, W // 4

    p = _pack_params(params)
    C1, C2 = p["w1"].shape[-1], p["w2"].shape[-1]
    NC3, NC4 = p["w3"].shape[-1], p["w4"].shape[-1]       # 256, 48
    C4 = NC4 // 16                                        # 3

    # Batch blocking: raise matmul M and grid-step granularity.
    if batch_block is None:
        batch_block = next(c for c in (8, 4, 2, 1) if N % c == 0)
    bb = batch_block
    assert N % bb == 0

    out_packed = pl.pallas_call(
        _fused_autoencoder_kernel,
        out_shape=jax.ShapeDtypeStruct((N * H4 * W4, NC4), jnp.float32),
        grid=(N // bb,),
        in_specs=[
            pl.BlockSpec((bb, H, W, Cin), lambda n: (n, 0, 0, 0)),
            pl.BlockSpec((9 * Cin, C1), lambda n: (0, 0)),
            pl.BlockSpec((1, C1), lambda n: (0, 0)),
            pl.BlockSpec((9 * C1, C2), lambda n: (0, 0)),
            pl.BlockSpec((1, C2), lambda n: (0, 0)),
            pl.BlockSpec((C2, NC3), lambda n: (0, 0)),
            pl.BlockSpec((1, NC3), lambda n: (0, 0)),
            pl.BlockSpec((NC3, NC4), lambda n: (0, 0)),
            pl.BlockSpec((1, NC4), lambda n: (0, 0)),
        ],
        # Lane-dense packed output slab: 48 channels per (H/4, W/4) pixel.
        out_specs=pl.BlockSpec((bb * H4 * W4, NC4), lambda n: (n, 0)),
        scratch_shapes=[
            pltpu.VMEM((bb, H + 2, W + 2, Cin), jnp.float32),      # conv1 pad
            pltpu.VMEM((bb, H2 + 2, W2 + 2, C1), jnp.float32),     # conv2 pad
        ],
        compiler_params=pltpu.CompilerParams(
            dimension_semantics=("parallel",),   # batch blocks -> 2 TCs on v7x
            vmem_limit_bytes=32 * 1024 * 1024),  # plenty here; keep < v7x 64MiB
    )(x, p["w1"], p["b1"], p["w2"], p["b2"],
      p["w3"], p["b3"], p["w4"], p["b4"])

    # Two depth-to-space shuffles + NHWC->NCHW on the tiny 3-channel tensor.
    out = out_packed.reshape(N, H4, W4, 2, 2, 2, 2, C4)
    out = jnp.transpose(out, (0, 7, 1, 3, 5, 2, 4, 6))
    return out.reshape(N, C4, H, W)


# --------------------------------------------------------------------------
# Pure-JAX reference for correctness checking
# --------------------------------------------------------------------------
def reference_forward(x_nchw, params):
    x = jnp.transpose(x_nchw, (0, 2, 3, 1))

    def conv_block(x, w, b):
        y = lax.conv_general_dilated(
            x, w, window_strides=(1, 1), padding="SAME",
            dimension_numbers=("NHWC", "HWIO", "NHWC"))
        y = jax.nn.relu(y + b)
        return lax.reduce_window(y, -jnp.inf, lax.max,
                                 (1, 2, 2, 1), (1, 2, 2, 1), "VALID")

    def deconv_block(x, w, b):
        N, H, W, Cin = x.shape
        Cout = w.shape[-1]
        out = jnp.zeros((N, 2 * H, 2 * W, Cout), x.dtype)
        for dy in range(2):
            for dx in range(2):
                out = out.at[:, dy::2, dx::2, :].set(
                    jnp.einsum("nhwc,cd->nhwd", x, w[dy, dx]) + b)
        return out

    x = conv_block(x, params["w1"], params["b1"])
    x = conv_block(x, params["w2"], params["b2"])
    x = jax.nn.relu(deconv_block(x, params["w3"], params["b3"]))
    x = jax.nn.sigmoid(deconv_block(x, params["w4"], params["b4"]))
    return jnp.transpose(x, (0, 3, 1, 2))


def init_params(key):
    # PyTorch layouts mapped to channels-last style:
    #   Conv2d weight (Cout,Cin,3,3)          -> stored as (3,3,Cin,Cout)
    #   ConvTranspose2d weight (Cin,Cout,2,2) -> stored as (2,2,Cin,Cout)
    ks = jax.random.split(key, 8)

    def w(k, shape, fan_in):
        return jax.random.normal(k, shape, jnp.float32) / jnp.sqrt(fan_in)

    return {
        "w1": w(ks[0], (3, 3, 3, 64), 3 * 9),
        "b1": 0.01 * jax.random.normal(ks[1], (64,), jnp.float32),
        "w2": w(ks[2], (3, 3, 64, 128), 64 * 9),
        "b2": 0.01 * jax.random.normal(ks[3], (128,), jnp.float32),
        "w3": w(ks[4], (2, 2, 128, 64), 128 * 4),
        "b3": 0.01 * jax.random.normal(ks[5], (64,), jnp.float32),
        "w4": w(ks[6], (2, 2, 64, 3), 64 * 4),
        "b4": 0.01 * jax.random.normal(ks[7], (3,), jnp.float32),
    }


if __name__ == "__main__":
    key = jax.random.PRNGKey(0)
    k_x, k_p = jax.random.split(key)
    # NCHW input, same convention as the PyTorch module.
    x = jax.random.uniform(k_x, (2, 3, 16, 16), jnp.float32)
    params = init_params(k_p)

    out = jax.block_until_ready(jax.jit(autoencoder_forward)(x, params))
    ref = jax.block_until_ready(reference_forward(x, params))

    assert out.shape == (2, 3, 16, 16), out.shape
    assert jnp.allclose(out, ref, atol=1e-4, rtol=1e-4), (
        float(jnp.max(jnp.abs(out - ref))))
    print("KERNEL_OK")
</pallas_src>

<mosaic_0001>
module attributes {stable_mosaic.version = 11 : i64} {
  func.func @_fused_autoencoder_kernel(%arg0: i32, %arg1: memref<2x16x16x3xf32, #tpu.memory_space<vmem>>, %arg2: memref<27x64xf32, #tpu.memory_space<vmem>>, %arg3: memref<1x64xf32, #tpu.memory_space<vmem>>, %arg4: memref<576x128xf32, #tpu.memory_space<vmem>>, %arg5: memref<1x128xf32, #tpu.memory_space<vmem>>, %arg6: memref<128x256xf32, #tpu.memory_space<vmem>>, %arg7: memref<1x256xf32, #tpu.memory_space<vmem>>, %arg8: memref<256x48xf32, #tpu.memory_space<vmem>>, %arg9: memref<1x48xf32, #tpu.memory_space<vmem>>, %arg10: memref<32x48xf32, #tpu.memory_space<vmem>>, %arg11: memref<2x18x18x3xf32, #tpu.memory_space<vmem>>, %arg12: memref<2x10x10x64xf32, #tpu.memory_space<vmem>>) attributes {dimension_semantics = [#tpu.dimension_semantics<parallel>], iteration_bounds = array<i64: 1>, scalar_prefetch = 0 : i64, scratch_operands = 2 : i64, tpu.core_type = #tpu.core_type<tc>, window_params = [{transform_indices = @transform_0, window_bounds = array<i64: 2, 16, 16, 3>}, {pipeline_mode = #tpu.pipeline_mode<synchronous>, transform_indices = @transform_1, window_bounds = array<i64: 27, 64>}, {pipeline_mode = #tpu.pipeline_mode<synchronous>, transform_indices = @transform_2, window_bounds = array<i64: 1, 64>}, {pipeline_mode = #tpu.pipeline_mode<synchronous>, transform_indices = @transform_3, window_bounds = array<i64: 576, 128>}, {pipeline_mode = #tpu.pipeline_mode<synchronous>, transform_indices = @transform_4, window_bounds = array<i64: 1, 128>}, {pipeline_mode = #tpu.pipeline_mode<synchronous>, transform_indices = @transform_5, window_bounds = array<i64: 128, 256>}, {pipeline_mode = #tpu.pipeline_mode<synchronous>, transform_indices = @transform_6, window_bounds = array<i64: 1, 256>}, {pipeline_mode = #tpu.pipeline_mode<synchronous>, transform_indices = @transform_7, window_bounds = array<i64: 256, 48>}, {pipeline_mode = #tpu.pipeline_mode<synchronous>, transform_indices = @transform_8, window_bounds = array<i64: 1, 48>}, {transform_indices = @transform_9, window_bounds = array<i64: 32, 48>}]} {
    %cst = arith.constant 0.000000e+00 : f32
    %0 = vector.broadcast %cst : f32 to vector<2x1x18x3xf32>
    %c0 = arith.constant 0 : index
    %c0_0 = arith.constant 0 : index
    %c0_1 = arith.constant 0 : index
    %c0_2 = arith.constant 0 : index
    %1 = vector.load %arg11[%c0, %c0_0, %c0_1, %c0_2] : memref<2x18x18x3xf32, #tpu.memory_space<vmem>>, vector<2x1x18x3xf32>
    tpu.vector_store %arg11[%c0, %c0_0, %c0_1, %c0_2], %0 {strides = array<i32>} : memref<2x18x18x3xf32, #tpu.memory_space<vmem>>, vector<2x1x18x3xf32>,
    %cst_3 = arith.constant 0.000000e+00 : f32
    %2 = vector.broadcast %cst_3 : f32 to vector<2x1x18x3xf32>
    %c0_4 = arith.constant 0 : index
    %c17 = arith.constant 17 : index
    %c0_5 = arith.constant 0 : index
    %c0_6 = arith.constant 0 : index
    %3 = vector.load %arg11[%c0_4, %c17, %c0_5, %c0_6] : memref<2x18x18x3xf32, #tpu.memory_space<vmem>>, vector<2x1x18x3xf32>
    tpu.vector_store %arg11[%c0_4, %c17, %c0_5, %c0_6], %2 {strides = array<i32>} : memref<2x18x18x3xf32, #tpu.memory_space<vmem>>, vector<2x1x18x3xf32>,
    %cst_7 = arith.constant 0.000000e+00 : f32
    %4 = vector.broadcast %cst_7 : f32 to vector<2x18x1x3xf32>
    %c0_8 = arith.constant 0 : index
    %c0_9 = arith.constant 0 : index
    %c0_10 = arith.constant 0 : index
    %c0_11 = arith.constant 0 : index
    %5 = vector.load %arg11[%c0_8, %c0_9, %c0_10, %c0_11] : memref<2x18x18x3xf32, #tpu.memory_space<vmem>>, vector<2x18x1x3xf32>
    tpu.vector_store %arg11[%c0_8, %c0_9, %c0_10, %c0_11], %4 {strides = array<i32>} : memref<2x18x18x3xf32, #tpu.memory_space<vmem>>, vector<2x18x1x3xf32>,
    %cst_12 = arith.constant 0.000000e+00 : f32
    %6 = vector.broadcast %cst_12 : f32 to vector<2x18x1x3xf32>
    %c0_13 = arith.constant 0 : index
    %c0_14 = arith.constant 0 : index
    %c17_15 = arith.constant 17 : index
    %c0_16 = arith.constant 0 : index
    %7 = vector.load %arg11[%c0_13, %c0_14, %c17_15, %c0_16] : memref<2x18x18x3xf32, #tpu.memory_space<vmem>>, vector<2x18x1x3xf32>
    tpu.vector_store %arg11[%c0_13, %c0_14, %c17_15, %c0_16], %6 {strides = array<i32>} : memref<2x18x18x3xf32, #tpu.memory_space<vmem>>, vector<2x18x1x3xf32>,
    %c0_17 = arith.constant 0 : index
    %c0_18 = arith.constant 0 : index
    %c0_19 = arith.constant 0 : index
    %c0_20 = arith.constant 0 : index
    %8 = vector.load %arg1[%c0_17, %c0_18, %c0_19, %c0_20] : memref<2x16x16x3xf32, #tpu.memory_space<vmem>>, vector<2x16x16x3xf32>
    %c0_21 = arith.constant 0 : index
    %c1 = arith.constant 1 : index
    %c1_22 = arith.constant 1 : index
    %c0_23 = arith.constant 0 : index
    %9 = vector.load %arg11[%c0_21, %c1, %c1_22, %c0_23] : memref<2x18x18x3xf32, #tpu.memory_space<vmem>>, vector<2x16x16x3xf32>
    tpu.vector_store %arg11[%c0_21, %c1, %c1_22, %c0_23], %8 {strides = array<i32>} : memref<2x18x18x3xf32, #tpu.memory_space<vmem>>, vector<2x16x16x3xf32>,
    %c0_24 = arith.constant 0 : index
    %c0_25 = arith.constant 0 : index
    %c0_26 = arith.constant 0 : index
    %c0_27 = arith.constant 0 : index
    %10 = vector.load %arg11[%c0_24, %c0_25, %c0_26, %c0_27] : memref<2x18x18x3xf32, #tpu.memory_space<vmem>>, vector<2x16x16x3xf32>
    %11 = vector.shape_cast %10 : vector<2x16x16x3xf32> to vector<512x3xf32>
    %c0_28 = arith.constant 0 : index
    %c0_29 = arith.constant 0 : index
    %c1_30 = arith.constant 1 : index
    %c0_31 = arith.constant 0 : index
    %12 = vector.load %arg11[%c0_28, %c0_29, %c1_30, %c0_31] : memref<2x18x18x3xf32, #tpu.memory_space<vmem>>, vector<2x16x16x3xf32>
    %13 = vector.shape_cast %12 : vector<2x16x16x3xf32> to vector<512x3xf32>
    %c0_32 = arith.constant 0 : index
    %c0_33 = arith.constant 0 : index
    %c2 = arith.constant 2 : index
    %c0_34 = arith.constant 0 : index
    %14 = vector.load %arg11[%c0_32, %c0_33, %c2, %c0_34] : memref<2x18x18x3xf32, #tpu.memory_space<vmem>>, vector<2x16x16x3xf32>
    %15 = vector.shape_cast %14 : vector<2x16x16x3xf32> to vector<512x3xf32>
    %c0_35 = arith.constant 0 : index
    %c1_36 = arith.constant 1 : index
    %c0_37 = arith.constant 0 : index
    %c0_38 = arith.constant 0 : index
    %16 = vector.load %arg11[%c0_35, %c1_36, %c0_37, %c0_38] : memref<2x18x18x3xf32, #tpu.memory_space<vmem>>, vector<2x16x16x3xf32>
    %17 = vector.shape_cast %16 : vector<2x16x16x3xf32> to vector<512x3xf32>
    %c0_39 = arith.constant 0 : index
    %c1_40 = arith.constant 1 : index
    %c1_41 = arith.constant 1 : index
    %c0_42 = arith.constant 0 : index
    %18 = vector.load %arg11[%c0_39, %c1_40, %c1_41, %c0_42] : memref<2x18x18x3xf32, #tpu.memory_space<vmem>>, vector<2x16x16x3xf32>
    %19 = vector.shape_cast %18 : vector<2x16x16x3xf32> to vector<512x3xf32>
    %c0_43 = arith.constant 0 : index
    %c1_44 = arith.constant 1 : index
    %c2_45 = arith.constant 2 : index
    %c0_46 = arith.constant 0 : index
    %20 = vector.load %arg11[%c0_43, %c1_44, %c2_45, %c0_46] : memref<2x18x18x3xf32, #tpu.memory_space<vmem>>, vector<2x16x16x3xf32>
    %21 = vector.shape_cast %20 : vector<2x16x16x3xf32> to vector<512x3xf32>
    %c0_47 = arith.constant 0 : index
    %c2_48 = arith.constant 2 : index
    %c0_49 = arith.constant 0 : index
    %c0_50 = arith.constant 0 : index
    %22 = vector.load %arg11[%c0_47, %c2_48, %c0_49, %c0_50] : memref<2x18x18x3xf32, #tpu.memory_space<vmem>>, vector<2x16x16x3xf32>
    %23 = vector.shape_cast %22 : vector<2x16x16x3xf32> to vector<512x3xf32>
    %c0_51 = arith.constant 0 : index
    %c2_52 = arith.constant 2 : index
    %c1_53 = arith.constant 1 : index
    %c0_54 = arith.constant 0 : index
    %24 = vector.load %arg11[%c0_51, %c2_52, %c1_53, %c0_54] : memref<2x18x18x3xf32, #tpu.memory_space<vmem>>, vector<2x16x16x3xf32>
    %25 = vector.shape_cast %24 : vector<2x16x16x3xf32> to vector<512x3xf32>
    %c0_55 = arith.constant 0 : index
    %c2_56 = arith.constant 2 : index
    %c2_57 = arith.constant 2 : index
    %c0_58 = arith.constant 0 : index
    %26 = vector.load %arg11[%c0_55, %c2_56, %c2_57, %c0_58] : memref<2x18x18x3xf32, #tpu.memory_space<vmem>>, vector<2x16x16x3xf32>
    %27 = vector.shape_cast %26 : vector<2x16x16x3xf32> to vector<512x3xf32>
    %28 = tpu.concatenate %11, %13, %15, %17, %19, %21, %23, %25, %27 in 1 : vector<512x3xf32>, vector<512x3xf32>, vector<512x3xf32>, vector<512x3xf32>, vector<512x3xf32>, vector<512x3xf32>, vector<512x3xf32>, vector<512x3xf32>, vector<512x3xf32> -> vector<512x27xf32>
    %c0_59 = arith.constant 0 : index
    %c0_60 = arith.constant 0 : index
    %29 = vector.load %arg2[%c0_59, %c0_60] : memref<27x64xf32, #tpu.memory_space<vmem>>, vector<27x64xf32>
    %cst_61 = arith.constant dense<0.000000e+00> : vector<512x64xf32>
    %30 = tpu.matmul %28, %29, %cst_61 {dimension_numbers = #tpu.dot_dimension_numbers<[1], [0], [0], [1], [0, 0, 1, 1], [], []>} : vector<512x27xf32>, vector<27x64xf32>, vector<512x64xf32> -> vector<512x64xf32>
    %31 = vector.shape_cast %30 : vector<512x64xf32> to vector<2x16x16x64xf32>
    %c0_62 = arith.constant 0 : index
    %c0_63 = arith.constant 0 : index
    %32 = vector.load %arg3[%c0_62, %c0_63] : memref<1x64xf32, #tpu.memory_space<vmem>>, vector<1x64xf32>
    %33 = vector.shape_cast %32 : vector<1x64xf32> to vector<64xf32>
    %34 = vector.shape_cast %33 : vector<64xf32> to vector<1x1x1x64xf32>
    %35 = vector.broadcast %34 : vector<1x1x1x64xf32> to vector<2x16x16x64xf32>
    %36 = arith.addf %31, %35 : vector<2x16x16x64xf32>
    %cst_64 = arith.constant 0.000000e+00 : f32
    %37 = vector.broadcast %cst_64 : f32 to vector<2x16x16x64xf32>
    %38 = arith.maximumf %36, %37 : vector<2x16x16x64xf32>
    %cst_65 = arith.constant 0.000000e+00 : f32
    %39 = vector.broadcast %cst_65 : f32 to vector<2x1x10x64xf32>
    %c0_66 = arith.constant 0 : index
    %c0_67 = arith.constant 0 : index
    %c0_68 = arith.constant 0 : index
    %c0_69 = arith.constant 0 : index
    %40 = vector.load %arg12[%c0_66, %c0_67, %c0_68, %c0_69] : memref<2x10x10x64xf32, #tpu.memory_space<vmem>>, vector<2x1x10x64xf32>
    tpu.vector_store %arg12[%c0_66, %c0_67, %c0_68, %c0_69], %39 {strides = array<i32>} : memref<2x10x10x64xf32, #tpu.memory_space<vmem>>, vector<2x1x10x64xf32>,
    %cst_70 = arith.constant 0.000000e+00 : f32
    %41 = vector.broadcast %cst_70 : f32 to vector<2x1x10x64xf32>
    %c0_71 = arith.constant 0 : index
    %c9 = arith.constant 9 : index
    %c0_72 = arith.constant 0 : index
    %c0_73 = arith.constant 0 : index
    %42 = vector.load %arg12[%c0_71, %c9, %c0_72, %c0_73] : memref<2x10x10x64xf32, #tpu.memory_space<vmem>>, vector<2x1x10x64xf32>
    tpu.vector_store %arg12[%c0_71, %c9, %c0_72, %c0_73], %41 {strides = array<i32>} : memref<2x10x10x64xf32, #tpu.memory_space<vmem>>, vector<2x1x10x64xf32>,
    %cst_74 = arith.constant 0.000000e+00 : f32
    %43 = vector.broadcast %cst_74 : f32 to vector<2x10x1x64xf32>
    %c0_75 = arith.constant 0 : index
    %c0_76 = arith.constant 0 : index
    %c0_77 = arith.constant 0 : index
    %c0_78 = arith.constant 0 : index
    %44 = vector.load %arg12[%c0_75, %c0_76, %c0_77, %c0_78] : memref<2x10x10x64xf32, #tpu.memory_space<vmem>>, vector<2x10x1x64xf32>
    tpu.vector_store %arg12[%c0_75, %c0_76, %c0_77, %c0_78], %43 {strides = array<i32>} : memref<2x10x10x64xf32, #tpu.memory_space<vmem>>, vector<2x10x1x64xf32>,
    %cst_79 = arith.constant 0.000000e+00 : f32
    %45 = vector.broadcast %cst_79 : f32 to vector<2x10x1x64xf32>
    %c0_80 = arith.constant 0 : index
    %c0_81 = arith.constant 0 : index
    %c9_82 = arith.constant 9 : index
    %c0_83 = arith.constant 0 : index
    %46 = vector.load %arg12[%c0_80, %c0_81, %c9_82, %c0_83] : memref<2x10x10x64xf32, #tpu.memory_space<vmem>>, vector<2x10x1x64xf32>
    tpu.vector_store %arg12[%c0_80, %c0_81, %c9_82, %c0_83], %45 {strides = array<i32>} : memref<2x10x10x64xf32, #tpu.memory_space<vmem>>, vector<2x10x1x64xf32>,
    %47 = vector.shape_cast %38 : vector<2x16x16x64xf32> to vector<2x8x2x16x64xf32>
    %48 = vector.extract_strided_slice %47 {offsets = [0, 0, 0, 0, 0], sizes = [2, 8, 1, 16, 64], strides = [1, 1, 1, 1, 1]} : vector<2x8x2x16x64xf32> to vector<2x8x1x16x64xf32>
    %49 = vector.shape_cast %48 : vector<2x8x1x16x64xf32> to vector<2x8x16x64xf32>
    %50 = vector.extract_strided_slice %47 {offsets = [0, 0, 1, 0, 0], sizes = [2, 8, 1, 16, 64], strides = [1, 1, 1, 1, 1]} : vector<2x8x2x16x64xf32> to vector<2x8x1x16x64xf32>
    %51 = vector.shape_cast %50 : vector<2x8x1x16x64xf32> to vector<2x8x16x64xf32>
    %52 = arith.maximumf %49, %51 : vector<2x8x16x64xf32>
    %53 = vector.shape_cast %52 : vector<2x8x16x64xf32> to vector<2x8x8x2x64xf32>
    %54 = vector.extract_strided_slice %53 {offsets = [0, 0, 0, 0, 0], sizes = [2, 8, 8, 1, 64], strides = [1, 1, 1, 1, 1]} : vector<2x8x8x2x64xf32> to vector<2x8x8x1x64xf32>
    %55 = vector.shape_cast %54 : vector<2x8x8x1x64xf32> to vector<2x8x8x64xf32>
    %56 = vector.extract_strided_slice %53 {offsets = [0, 0, 0, 1, 0], sizes = [2, 8, 8, 1, 64], strides = [1, 1, 1, 1, 1]} : vector<2x8x8x2x64xf32> to vector<2x8x8x1x64xf32>
    %57 = vector.shape_cast %56 : vector<2x8x8x1x64xf32> to vector<2x8x8x64xf32>
    %58 = arith.maximumf %55, %57 : vector<2x8x8x64xf32>
    %c0_84 = arith.constant 0 : index
    %c1_85 = arith.constant 1 : index
    %c1_86 = arith.constant 1 : index
    %c0_87 = arith.constant 0 : index
    %59 = vector.load %arg12[%c0_84, %c1_85, %c1_86, %c0_87] : memref<2x10x10x64xf32, #tpu.memory_space<vmem>>, vector<2x8x8x64xf32>
    tpu.vector_store %arg12[%c0_84, %c1_85, %c1_86, %c0_87], %58 {strides = array<i32>} : memref<2x10x10x64xf32, #tpu.memory_space<vmem>>, vector<2x8x8x64xf32>,
    %c0_88 = arith.constant 0 : index
    %c0_89 = arith.constant 0 : index
    %c0_90 = arith.constant 0 : index
    %c0_91 = arith.constant 0 : index
    %60 = vector.load %arg12[%c0_88, %c0_89, %c0_90, %c0_91] : memref<2x10x10x64xf32, #tpu.memory_space<vmem>>, vector<2x8x8x64xf32>
    %61 = vector.shape_cast %60 : vector<2x8x8x64xf32> to vector<128x64xf32>
    %c0_92 = arith.constant 0 : index
    %c0_93 = arith.constant 0 : index
    %c1_94 = arith.constant 1 : index
    %c0_95 = arith.constant 0 : index
    %62 = vector.load %arg12[%c0_92, %c0_93, %c1_94, %c0_95] : memref<2x10x10x64xf32, #tpu.memory_space<vmem>>, vector<2x8x8x64xf32>
    %63 = vector.shape_cast %62 : vector<2x8x8x64xf32> to vector<128x64xf32>
    %c0_96 = arith.constant 0 : index
    %c0_97 = arith.constant 0 : index
    %c2_98 = arith.constant 2 : index
    %c0_99 = arith.constant 0 : index
    %64 = vector.load %arg12[%c0_96, %c0_97, %c2_98, %c0_99] : memref<2x10x10x64xf32, #tpu.memory_space<vmem>>, vector<2x8x8x64xf32>
    %65 = vector.shape_cast %64 : vector<2x8x8x64xf32> to vector<128x64xf32>
    %c0_100 = arith.constant 0 : index
    %c1_101 = arith.constant 1 : index
    %c0_102 = arith.constant 0 : index
    %c0_103 = arith.constant 0 : index
    %66 = vector.load %arg12[%c0_100, %c1_101, %c0_102, %c0_103] : memref<2x10x10x64xf32, #tpu.memory_space<vmem>>, vector<2x8x8x64xf32>
    %67 = vector.shape_cast %66 : vector<2x8x8x64xf32> to vector<128x64xf32>
    %c0_104 = arith.constant 0 : index
    %c1_105 = arith.constant 1 : index
    %c1_106 = arith.constant 1 : index
    %c0_107 = arith.constant 0 : index
    %68 = vector.load %arg12[%c0_104, %c1_105, %c1_106, %c0_107] : memref<2x10x10x64xf32, #tpu.memory_space<vmem>>, vector<2x8x8x64xf32>
    %69 = vector.shape_cast %68 : vector<2x8x8x64xf32> to vector<128x64xf32>
    %c0_108 = arith.constant 0 : index
    %c1_109 = arith.constant 1 : index
    %c2_110 = arith.constant 2 : index
    %c0_111 = arith.constant 0 : index
    %70 = vector.load %arg12[%c0_108, %c1_109, %c2_110, %c0_111] : memref<2x10x10x64xf32, #tpu.memory_space<vmem>>, vector<2x8x8x64xf32>
    %71 = vector.shape_cast %70 : vector<2x8x8x64xf32> to vector<128x64xf32>
    %c0_112 = arith.constant 0 : index
    %c2_113 = arith.constant 2 : index
    %c0_114 = arith.constant 0 : index
    %c0_115 = arith.constant 0 : index
    %72 = vector.load %arg12[%c0_112, %c2_113, %c0_114, %c0_115] : memref<2x10x10x64xf32, #tpu.memory_space<vmem>>, vector<2x8x8x64xf32>
    %73 = vector.shape_cast %72 : vector<2x8x8x64xf32> to vector<128x64xf32>
    %c0_116 = arith.constant 0 : index
    %c2_117 = arith.constant 2 : index
    %c1_118 = arith.constant 1 : index
    %c0_119 = arith.constant 0 : index
    %74 = vector.load %arg12[%c0_116, %c2_117, %c1_118, %c0_119] : memref<2x10x10x64xf32, #tpu.memory_space<vmem>>, vector<2x8x8x64xf32>
    %75 = vector.shape_cast %74 : vector<2x8x8x64xf32> to vector<128x64xf32>
    %c0_120 = arith.constant 0 : index
    %c2_121 = arith.constant 2 : index
    %c2_122 = arith.constant 2 : index
    %c0_123 = arith.constant 0 : index
    %76 = vector.load %arg12[%c0_120, %c2_121, %c2_122, %c0_123] : memref<2x10x10x64xf32, #tpu.memory_space<vmem>>, vector<2x8x8x64xf32>
    %77 = vector.shape_cast %76 : vector<2x8x8x64xf32> to vector<128x64xf32>
    %78 = tpu.concatenate %61, %63, %65, %67, %69, %71, %73, %75, %77 in 1 : vector<128x64xf32>, vector<128x64xf32>, vector<128x64xf32>, vector<128x64xf32>, vector<128x64xf32>, vector<128x64xf32>, vector<128x64xf32>, vector<128x64xf32>, vector<128x64xf32> -> vector<128x576xf32>
    %c0_124 = arith.constant 0 : index
    %c0_125 = arith.constant 0 : index
    %79 = vector.load %arg4[%c0_124, %c0_125] : memref<576x128xf32, #tpu.memory_space<vmem>>, vector<576x128xf32>
    %cst_126 = arith.constant dense<0.000000e+00> : vector<128x128xf32>
    %80 = tpu.matmul %78, %79, %cst_126 {dimension_numbers = #tpu.dot_dimension_numbers<[1], [0], [0], [1], [0, 0, 1, 1], [], []>} : vector<128x576xf32>, vector<576x128xf32>, vector<128x128xf32> -> vector<128x128xf32>
    %81 = vector.shape_cast %80 : vector<128x128xf32> to vector<2x8x8x128xf32>
    %c0_127 = arith.constant 0 : index
    %c0_128 = arith.constant 0 : index
    %82 = vector.load %arg5[%c0_127, %c0_128] : memref<1x128xf32, #tpu.memory_space<vmem>>, vector<1x128xf32>
    %83 = vector.shape_cast %82 : vector<1x128xf32> to vector<128xf32>
    %84 = vector.shape_cast %83 : vector<128xf32> to vector<1x1x1x128xf32>
    %85 = vector.broadcast %84 : vector<1x1x1x128xf32> to vector<2x8x8x128xf32>
    %86 = arith.addf %81, %85 : vector<2x8x8x128xf32>
    %cst_129 = arith.constant 0.000000e+00 : f32
    %87 = vector.broadcast %cst_129 : f32 to vector<2x8x8x128xf32>
    %88 = arith.maximumf %86, %87 : vector<2x8x8x128xf32>
    %89 = vector.shape_cast %88 : vector<2x8x8x128xf32> to vector<2x4x2x8x128xf32>
    %90 = vector.extract_strided_slice %89 {offsets = [0, 0, 0, 0, 0], sizes = [2, 4, 1, 8, 128], strides = [1, 1, 1, 1, 1]} : vector<2x4x2x8x128xf32> to vector<2x4x1x8x128xf32>
    %91 = vector.shape_cast %90 : vector<2x4x1x8x128xf32> to vector<2x4x8x128xf32>
    %92 = vector.extract_strided_slice %89 {offsets = [0, 0, 1, 0, 0], sizes = [2, 4, 1, 8, 128], strides = [1, 1, 1, 1, 1]} : vector<2x4x2x8x128xf32> to vector<2x4x1x8x128xf32>
    %93 = vector.shape_cast %92 : vector<2x4x1x8x128xf32> to vector<2x4x8x128xf32>
    %94 = arith.maximumf %91, %93 : vector<2x4x8x128xf32>
    %95 = vector.shape_cast %94 : vector<2x4x8x128xf32> to vector<2x4x4x2x128xf32>
    %96 = vector.extract_strided_slice %95 {offsets = [0, 0, 0, 0, 0], sizes = [2, 4, 4, 1, 128], strides = [1, 1, 1, 1, 1]} : vector<2x4x4x2x128xf32> to vector<2x4x4x1x128xf32>
    %97 = vector.shape_cast %96 : vector<2x4x4x1x128xf32> to vector<2x4x4x128xf32>
    %98 = vector.extract_strided_slice %95 {offsets = [0, 0, 0, 1, 0], sizes = [2, 4, 4, 1, 128], strides = [1, 1, 1, 1, 1]} : vector<2x4x4x2x128xf32> to vector<2x4x4x1x128xf32>
    %99 = vector.shape_cast %98 : vector<2x4x4x1x128xf32> to vector<2x4x4x128xf32>
    %100 = arith.maximumf %97, %99 : vector<2x4x4x128xf32>
    %101 = vector.shape_cast %100 : vector<2x4x4x128xf32> to vector<32x128xf32>
    %c0_130 = arith.constant 0 : index
    %c0_131 = arith.constant 0 : index
    %102 = vector.load %arg6[%c0_130, %c0_131] : memref<128x256xf32, #tpu.memory_space<vmem>>, vector<128x256xf32>
    %cst_132 = arith.constant dense<0.000000e+00> : vector<32x256xf32>
    %103 = tpu.matmul %101, %102, %cst_132 {dimension_numbers = #tpu.dot_dimension_numbers<[1], [0], [0], [1], [0, 0, 1, 1], [], []>} : vector<32x128xf32>, vector<128x256xf32>, vector<32x256xf32> -> vector<32x256xf32>
    %c0_133 = arith.constant 0 : index
    %c0_134 = arith.constant 0 : index
    %104 = vector.load %arg7[%c0_133, %c0_134] : memref<1x256xf32, #tpu.memory_space<vmem>>, vector<1x256xf32>
    %105 = vector.shape_cast %104 : vector<1x256xf32> to vector<256xf32>
    %106 = vector.shape_cast %105 : vector<256xf32> to vector<1x256xf32>
    %107 = vector.broadcast %106 : vector<1x256xf32> to vector<32x256xf32>
    %108 = arith.addf %103, %107 : vector<32x256xf32>
    %cst_135 = arith.constant 0.000000e+00 : f32
    %109 = vector.broadcast %cst_135 : f32 to vector<32x256xf32>
    %110 = arith.maximumf %108, %109 : vector<32x256xf32>
    %c0_136 = arith.constant 0 : index
    %c0_137 = arith.constant 0 : index
    %111 = vector.load %arg8[%c0_136, %c0_137] : memref<256x48xf32, #tpu.memory_space<vmem>>, vector<256x48xf32>
    %cst_138 = arith.constant dense<0.000000e+00> : vector<32x48xf32>
    %112 = tpu.matmul %110, %111, %cst_138 {dimension_numbers = #tpu.dot_dimension_numbers<[1], [0], [0], [1], [0, 0, 1, 1], [], []>} : vector<32x256xf32>, vector<256x48xf32>, vector<32x48xf32> -> vector<32x48xf32>
    %c0_139 = arith.constant 0 : index
    %c0_140 = arith.constant 0 : index
    %113 = vector.load %arg9[%c0_139, %c0_140] : memref<1x48xf32, #tpu.memory_space<vmem>>, vector<1x48xf32>
    %114 = vector.shape_cast %113 : vector<1x48xf32> to vector<48xf32>
    %115 = vector.shape_cast %114 : vector<48xf32> to vector<1x48xf32>
    %116 = vector.broadcast %115 : vector<1x48xf32> to vector<32x48xf32>
    %117 = arith.addf %112, %116 : vector<32x48xf32>
    %cst_141 = arith.constant 0.000000e+00 : f32
    %118 = vector.broadcast %cst_141 : f32 to vector<32x48xf32>
    %119 = arith.subf %118, %117 : vector<32x48xf32>
    %120 = math.exp %119 : vector<32x48xf32>
    %cst_142 = arith.constant 1.000000e+00 : f32
    %121 = vector.broadcast %cst_142 : f32 to vector<32x48xf32>
    %122 = arith.addf %121, %120 : vector<32x48xf32>
    %cst_143 = arith.constant 1.000000e+00 : f32
    %123 = vector.broadcast %cst_143 : f32 to vector<32x48xf32>
    %124 = arith.divf %123, %122 : vector<32x48xf32>
    %c0_144 = arith.constant 0 : index
    %c0_145 = arith.constant 0 : index
    %125 = vector.load %arg10[%c0_144, %c0_145] : memref<32x48xf32, #tpu.memory_space<vmem>>, vector<32x48xf32>
    tpu.vector_store %arg10[%c0_144, %c0_145], %124 {strides = array<i32>} : memref<32x48xf32, #tpu.memory_space<vmem>>, vector<32x48xf32>,
    return
  }
  func.func @transform_0(%arg0: i32) -> (i32, i32, i32, i32) {
    %c0_i32 = arith.constant 0 : i32
    %c0_i32_0 = arith.constant 0 : i32
    %c0_i32_1 = arith.constant 0 : i32
    %c0_i32_2 = arith.constant 0 : i32
    return %arg0, %c0_i32, %c0_i32_0, %c0_i32_1 : i32, i32, i32, i32
  }
  func.func @transform_1(%arg0: i32) -> (i32, i32) {
    %c0_i32 = arith.constant 0 : i32
    %c0_i32_0 = arith.constant 0 : i32
    %c0_i32_1 = arith.constant 0 : i32
    return %c0_i32, %c0_i32_0 : i32, i32
  }
  func.func @transform_2(%arg0: i32) -> (i32, i32) {
    %c0_i32 = arith.constant 0 : i32
    %c0_i32_0 = arith.constant 0 : i32
    %c0_i32_1 = arith.constant 0 : i32
    return %c0_i32, %c0_i32_0 : i32, i32
  }
  func.func @transform_3(%arg0: i32) -> (i32, i32) {
    %c0_i32 = arith.constant 0 : i32
    %c0_i32_0 = arith.constant 0 : i32
    %c0_i32_1 = arith.constant 0 : i32
    return %c0_i32, %c0_i32_0 : i32, i32
  }
  func.func @transform_4(%arg0: i32) -> (i32, i32) {
    %c0_i32 = arith.constant 0 : i32
    %c0_i32_0 = arith.constant 0 : i32
    %c0_i32_1 = arith.constant 0 : i32
    return %c0_i32, %c0_i32_0 : i32, i32
  }
  func.func @transform_5(%arg0: i32) -> (i32, i32) {
    %c0_i32 = arith.constant 0 : i32
    %c0_i32_0 = arith.constant 0 : i32
    %c0_i32_1 = arith.constant 0 : i32
    return %c0_i32, %c0_i32_0 : i32, i32
  }
  func.func @transform_6(%arg0: i32) -> (i32, i32) {
    %c0_i32 = arith.constant 0 : i32
    %c0_i32_0 = arith.constant 0 : i32
    %c0_i32_1 = arith.constant 0 : i32
    return %c0_i32, %c0_i32_0 : i32, i32
  }
  func.func @transform_7(%arg0: i32) -> (i32, i32) {
    %c0_i32 = arith.constant 0 : i32
    %c0_i32_0 = arith.constant 0 : i32
    %c0_i32_1 = arith.constant 0 : i32
    return %c0_i32, %c0_i32_0 : i32, i32
  }
  func.func @transform_8(%arg0: i32) -> (i32, i32) {
    %c0_i32 = arith.constant 0 : i32
    %c0_i32_0 = arith.constant 0 : i32
    %c0_i32_1 = arith.constant 0 : i32
    return %c0_i32, %c0_i32_0 : i32, i32
  }
  func.func @transform_9(%arg0: i32) -> (i32, i32) {
    %c0_i32 = arith.constant 0 : i32
    %c0_i32_0 = arith.constant 0 : i32
    return %arg0, %c0_i32 : i32, i32
  }
}

</mosaic_0001>

<bundles_post_ra>
// kernel: tile.18
= control target key start
LH: loop header
LB: loop body
LE: loop exit
PB: predicated region body
PF: predicated region fallthrough
CT: control target
= control target key end

     0   :  { %s28_s0 = inlined_call_operand.vmem [shape: f32[3], index: 0, kind: input, shape index: {}]   ;;  %s29_s1 = inlined_call_operand.vmem [shape: f32[16,3], index: 1, kind: output, shape index: {}]  }
   0x1   :  { %v4_v0 = vld [vmem:[%s28_s0] ss:$0 sm:$0xff] }
   0x2   :  { %5 = vst [vmem:[%s29_s1] sm:$0xff] %v4_v0  ;;  %8 = vst [vmem:[%s29_s1 + $0x8] sm:$0xff] %v4_v0 }

// kernel: tile.13
= control target key start
LH: loop header
LB: loop body
LE: loop exit
PB: predicated region body
PF: predicated region fallthrough
CT: control target
= control target key end

     0   :  { %s22_s0 = inlined_call_operand.vmem [shape: f32[64], index: 0, kind: input, shape index: {}]   ;;  %s23_s1 = inlined_call_operand.vmem [shape: f32[4,64], index: 1, kind: output, shape index: {}]  }
   0x1   :  { %v4_v0 = vld [vmem:[%s22_s0] ss:$0 sm:$0xff] }
   0x2   :  { %5 = vst [vmem:[%s23_s1] sm:$0xf] %v4_v0 }

// kernel: tile.14
= control target key start
LH: loop header
LB: loop body
LE: loop exit
PB: predicated region body
PF: predicated region fallthrough
CT: control target
= control target key end

     0   :  { %s6_s8 = smov 3  ;;  %vm8_vm0 = vcmask 523264   ;;  %s30_s9 = smov 64   ;;  %vm15_vm1 = vcmask 1048064   ;;  %s50_s0 = inlined_call_operand.vmem [shape: f32[4,64], index: 0, kind: input, shape index: {}]   ;;  %s51_s1 = inlined_call_operand.vmem [shape: f32[1,256], index: 1, kind: output, shape index: {}]  }
   0x1   :  { %v4_v0 = vld [vmem:[%s50_s0] sm:$0xf]  ;;  %s11_s0 = smov 3 }
   0x2   :  { %5 = vst [vmem:[#allocation1] sm:$0xf] %v4_v0 }
   0x9   :  { %v12_v1 = vld [vmem:[#allocation1 + $0x1] ss:$2 sm:%s11_s0]   ;;  %v7_v2 = vld [vmem:[#allocation1] ss:$2 sm:%s6_s8]  }
   0xa   :  { %13 = vrot.lane.b32.xlu0 %v12_v1, %s30_s9  ;;  %9 = vst.msk [vmem:[#allocation0] ss:$8 sm:$0x3] %vm8_vm0, %v7_v2  }
  0x7c   :  { %v14_v3 = vpop.permute.xlu0 %13  }
  0x7d   :  { %16 = vst.msk [vmem:[#allocation0] ss:$8 sm:$0x3] %vm15_vm1, %v14_v3  }
  0x84   :  { %v20_v4 = vld [vmem:[#allocation0] sm:$0x1]  ;;  %v24_v5 = vld [vmem:[#allocation0 + $0x8] sm:$0x1] }
  0x85   :  { %22 = vst [vmem:[%s51_s1] sm:$0x1] %v20_v4  ;;  %28 = vst [vmem:[%s51_s1 + $0x1] sm:$0x1] %v24_v5 }

// kernel: mul.4
= control target key start
LH: loop header
LB: loop body
LE: loop exit
PB: predicated region body
PF: predicated region fallthrough
CT: control target
= control target key end

     0   :  { %vm21_vm0 = vcmask 523264   ;;  %s80_s0 = inlined_call_operand.vmem [shape: f32[64,2,2,3], index: 0, kind: input, shape index: {}]   ;;  %s81_s1 = inlined_call_operand.vmem [shape: f32[64,12], index: 1, kind: output, shape index: {}]  }
   0x1   :  { %v40_v0 = vld [vmem:[%s80_s0 + $0xc] sm:$0xf]  ;;  %v41_v1 = vld [vmem:[%s80_s0 + $0x8] sm:$0xf]  ;;  %v42_v2 = vld [vmem:[%s80_s0 + $0x4] sm:$0xf] }
   0x2   :  { %8 = vst [vmem:[#allocation0 + $0x18] sm:$0xf] %v40_v0  ;;  %13 = vst [vmem:[#allocation0 + $0x10] sm:$0xf] %v41_v1  ;;  %v18_v3 = vld [vmem:[%s80_s0] sm:$0xf] }
   0x3   :  { %17 = vst [vmem:[#allocation0 + $0x8] sm:$0xf] %v42_v2  ;;  %19 = vst [vmem:[#allocation0] sm:$0xf] %v18_v3 }
   0x9   :  { %v29_v5 = vld [vmem:[#allocation0 + $0x10] sm:$0x7]   ;;  %v34_v6 = vld [vmem:[#allocation0 + $0x18] sm:$0x7]  }
   0xa   :  { %v24_v4 = vld [vmem:[#allocation0 + $0x8] sm:$0x7]   ;;  %v20_v7 = vld [vmem:[#allocation0] sm:$0x7]   ;;  %44 = vst.msk [vmem:[%s81_s1 + $0x6] sm:$0x7] %vm21_vm0, %v29_v5  }
   0xb   :  { %43 = vst.msk [vmem:[%s81_s1 + $0x3] sm:$0x7] %vm21_vm0, %v24_v4   ;;  %45 = vst.msk [vmem:[%s81_s1 + $0x9] sm:$0x7] %vm21_vm0, %v34_v6  }
   0xc   :  { %22 = vst.msk [vmem:[%s81_s1] sm:$0x7] %vm21_vm0, %v20_v7  }

// kernel: tile.19
= control target key start
LH: loop header
LB: loop body
LE: loop exit
PB: predicated region body
PF: predicated region fallthrough
CT: control target
= control target key end

     0   :  { %s131_s10 = smov 45   ;;  %s132_s11 = smov 39   ;;  %vm3_vm0 = vcmask 23552   ;;  %vm9_vm1 = vcmask 392552   ;;  %vm15_vm2 = vcmask 367952   ;;  %vm21_vm3 = vcmask 343352   ;;  %s207_s0 = inlined_call_operand.vmem [shape: f32[16,3], index: 0, kind: input, shape index: {}]   ;;  %s208_s1 = inlined_call_operand.vmem [shape: f32[1,48], index: 1, kind: output, shape index: {}]  }
   0x1   :  { %v101_v0 = vld [vmem:[%s207_s0 + $0xf] sm:$0x1]   ;;  %v103_v1 = vld [vmem:[%s207_s0 + $0xd] sm:$0x1]   ;;  %v102_v2 = vld [vmem:[%s207_s0 + $0xe] sm:$0x1]  }
   0x2   :  { %7 = vrot.lane.b32.xlu0 %v101_v0, %s131_s10  ;;  %19 = vrot.lane.b32.xlu1 %v103_v1, %s132_s11  ;;  %v104_v3 = vld [vmem:[%s207_s0 + $0xc] sm:$0x1]   ;;  %s133_s16 = smov 42   ;;  %s134_s17 = smov 36   ;;  %v105_v4 = vld [vmem:[%s207_s0 + $0xb] sm:$0x1]  }
   0x3   :  { %v106_v5 = vld [vmem:[%s207_s0 + $0xa] sm:$0x1]   ;;  %v2_v6 = vld [vmem:[%s207_s0] sm:$0x1]   ;;  %s135_s24 = smov 33   ;;  %s136_s25 = smov 30  }
   0x4   :  { %4 = vst.msk [vmem:[#allocation0] sm:$0x1] %vm3_vm0, %v2_v6   ;;  %v107_v7 = vld [vmem:[%s207_s0 + $0x9] sm:$0x1]   ;;  %v108_v8 = vld [vmem:[%s207_s0 + $0x8] sm:$0x1]  }
   0x5   :  { %s137_s30 = smov 27   ;;  %s138_s2 = smov 24   ;;  %v109_v9 = vld [vmem:[%s207_s0 + $0x7] sm:$0x1]   ;;  %v110_v10 = vld [vmem:[%s207_s0 + $0x6] sm:$0x1]  }
   0x6   :  { %13 = vrot.lane.b32.xlu0 %v102_v2, %s133_s16  ;;  %25 = vrot.lane.b32.xlu1 %v104_v3, %s134_s17  ;;  %s139_s7 = smov 21   ;;  %s140_s8 = smov 18   ;;  %v111_v11 = vld [vmem:[%s207_s0 + $0x5] sm:$0x1]   ;;  %v112_v12 = vld [vmem:[%s207_s0 + $0x4] sm:$0x1]  }
   0x7   :  { %s141_s13 = smov 15   ;;  %s142_s14 = smov 12   ;;  %v113_v13 = vld [vmem:[%s207_s0 + $0x3] sm:$0x1]   ;;  %v114_v14 = vld [vmem:[%s207_s0 + $0x2] sm:$0x1]  }
   0x8   :  { %s143_s19 = smov 9   ;;  %s144_s20 = smov 6   ;;  %v115_v15 = vld [vmem:[%s207_s0 + $0x1] sm:$0x1]   ;;  %vm27_vm4 = vcmask 318752   ;;  %vm33_vm5 = vcmask 294152  }
   0x9   :  { %s145_s0 = smov 3   ;;  %vm39_vm6 = vcmask 269552   ;;  %vm45_vm7 = vcmask 244952   ;;  %vm51_vm8 = vcmask 220352   ;;  %vm57_vm9 = vcmask 195752  }
   0xa   :  { %31 = vrot.lane.b32.xlu0 %v105_v4, %s135_s24  ;;  %37 = vrot.lane.b32.xlu1 %v106_v5, %s136_s25  ;;  %vm63_vm10 = vcmask 171152   ;;  %vm69_vm11 = vcmask 146552   ;;  %vm75_vm12 = vcmask 121952   ;;  %vm81_vm13 = vcmask 97352  }
   0xb   :  { %vm87_vm14 = vcmask 72752   ;;  %vm93_vm15 = vcmask 48152  }
   0xe   :  { %43 = vrot.lane.b32.xlu0 %v107_v7, %s137_s30  ;;  %49 = vrot.lane.b32.xlu1 %v108_v8, %s138_s2 }
  0x12   :  { %55 = vrot.lane.b32.xlu0 %v109_v9, %s139_s7  ;;  %61 = vrot.lane.b32.xlu1 %v110_v10, %s140_s8 }
  0x16   :  { %67 = vrot.lane.b32.xlu0 %v111_v11, %s141_s13  ;;  %73 = vrot.lane.b32.xlu1 %v112_v12, %s142_s14 }
  0x1a   :  { %79 = vrot.lane.b32.xlu0 %v113_v13, %s143_s19  ;;  %85 = vrot.lane.b32.xlu1 %v114_v14, %s144_s20 }
  0x1e   :  { %91 = vrot.lane.b32.xlu0 %v115_v15, %s145_s0 }
  0x74   :  { %v8_v16 = vpop.permute.xlu0 %7   ;;  %v20_v17 = vpop.permute.xlu1 %19  }
  0x75   :  { %10 = vst.msk [vmem:[#allocation0] sm:$0x1] %vm9_vm1, %v8_v16  }
  0x78   :  { %v14_v18 = vpop.permute.xlu0 %13   ;;  %v26_v19 = vpop.permute.xlu1 %25  }
  0x79   :  { %16 = vst.msk [vmem:[#allocation0] sm:$0x1] %vm15_vm2, %v14_v18  }
  0x7a   :  { %22 = vst.msk [vmem:[#allocation0] sm:$0x1] %vm21_vm3, %v20_v17  }
  0x7b   :  { %28 = vst.msk [vmem:[#allocation0] sm:$0x1] %vm27_vm4, %v26_v19  }
  0x7c   :  { %v32_v20 = vpop.permute.xlu0 %31   ;;  %v38_v21 = vpop.permute.xlu1 %37  }
  0x7d   :  { %34 = vst.msk [vmem:[#allocation0] sm:$0x1] %vm33_vm5, %v32_v20  }
  0x7e   :  { %40 = vst.msk [vmem:[#allocation0] sm:$0x1] %vm39_vm6, %v38_v21  }
  0x80   :  { %v44_v22 = vpop.permute.xlu0 %43   ;;  %v50_v23 = vpop.permute.xlu1 %49  }
  0x81   :  { %46 = vst.msk [vmem:[#allocation0] sm:$0x1] %vm45_vm7, %v44_v22  }
  0x82   :  { %52 = vst.msk [vmem:[#allocation0] sm:$0x1] %vm51_vm8, %v50_v23  }
  0x84   :  { %v56_v24 = vpop.permute.xlu0 %55   ;;  %v62_v25 = vpop.permute.xlu1 %61  }
  0x85   :  { %58 = vst.msk [vmem:[#allocation0] sm:$0x1] %vm57_vm9, %v56_v24  }
  0x86   :  { %64 = vst.msk [vmem:[#allocation0] sm:$0x1] %vm63_vm10, %v62_v25  }
  0x88   :  { %v68_v26 = vpop.permute.xlu0 %67   ;;  %v74_v27 = vpop.permute.xlu1 %73  }
  0x89   :  { %70 = vst.msk [vmem:[#allocation0] sm:$0x1] %vm69_vm11, %v68_v26  }
  0x8a   :  { %76 = vst.msk [vmem:[#allocation0] sm:$0x1] %vm75_vm12, %v74_v27  }
  0x8c   :  { %v80_v28 = vpop.permute.xlu0 %79   ;;  %v86_v29 = vpop.permute.xlu1 %85  }
  0x8d   :  { %82 = vst.msk [vmem:[#allocation0] sm:$0x1] %vm81_vm13, %v80_v28  }
  0x8e   :  { %88 = vst.msk [vmem:[#allocation0] sm:$0x1] %vm87_vm14, %v86_v29  }
  0x90   :  { %v92_v30 = vpop.permute.xlu0 %91  }
  0x91   :  { %94 = vst.msk [vmem:[#allocation0] sm:$0x1] %vm93_vm15, %v92_v30  }
  0x98   :  { %v98_v31 = vld [vmem:[#allocation0] sm:$0x1] }
  0x99   :  { %100 = vst [vmem:[%s208_s1] sm:$0x1] %v98_v31 }

// kernel: autoencoder_forward.1
= control target key start
LH: loop header
LB: loop body
LE: loop exit
PB: predicated region body
PF: predicated region fallthrough
CT: control target
= control target key end

     0   :  { %vm32_vm0 = vcmask 23552   ;;  %vm35_vm1 = vcmask 17408   ;;  %vm47_vm2 = vcmask 16384   ;;  %v9133_v0 = vmov 0.0   ;;  %s9134_s29 = smov 6   ;;  %s9135_s30 = smov 3   ;;  %s13153_s0 = inlined_call_operand.vmem [shape: f32[2,16,16,3], index: 0, kind: input, shape index: {}]   ;;  %s13154_s1 = inlined_call_operand.vmem [shape: f32[27,64], index: 1, kind: input, shape index: {}]   ;;  %s13155_s2 = inlined_call_operand.vmem [shape: f32[1,64], index: 2, kind: input, shape index: {}]   ;;  %s13156_s3 = inlined_call_operand.vmem [shape: f32[576,128], index: 3, kind: input, shape index: {}]   ;;  %s13157_s5 = inlined_call_operand.vmem [shape: f32[128,256], index: 5, kind: input, shape index: {}]   ;;  %s13158_s7 = inlined_call_operand.vmem [shape: f32[256,48], index: 7, kind: input, shape index: {}]   ;;  %s13159_s4 = inlined_call_operand.vmem [shape: f32[1,128], index: 4, kind: input, shape index: {}]   ;;  %s13160_s6 = inlined_call_operand.vmem [shape: f32[1,256], index: 6, kind: input, shape index: {}]   ;;  %s13161_s8 = inlined_call_operand.vmem [shape: f32[1,48], index: 8, kind: input, shape index: {}]   ;;  %s13162_s9 = inlined_call_operand.vmem [shape: f32[32,48], index: 9, kind: output, shape index: {}]  }
   0x1   :  { %33 = vst.msk [vmem:[#allocation2] sm:$0xff] %vm32_vm0, %v9133_v0  ;;  %34 = vst.msk [vmem:[#allocation2 + $0x8] sm:$0xff] %vm32_vm0, %v9133_v0  ;;  %v120_v1 = vld [vmem:[%s13153_s0] sm:$0xff]  ;;  %v121_v2 = vld [vmem:[%s13153_s0 + $0x8] sm:$0xff]  ;;  %s9136_s10 = smov 9   ;;  %s9137_s11 = smov 12  }
   0x2   :  { %37 = vst.msk [vmem:[#allocation2 + $0x1b0] sm:$0xff] %vm32_vm0, %v9133_v0  ;;  %38 = vst.msk [vmem:[#allocation2 + $0x1b8] sm:$0xff] %vm32_vm0, %v9133_v0  ;;  %v122_v3 = vld [vmem:[%s13153_s0 + $0x10] sm:$0xff]  ;;  %v123_v4 = vld [vmem:[%s13153_s0 + $0x18] sm:$0xff]  ;;  %s9138_s14 = smov 15   ;;  %s9139_s15 = smov 18  }
   0x3   :  { %41 = vst.msk [vmem:[#allocation2 + $0x198] sm:$0xff] %vm32_vm0, %v9133_v0  ;;  %42 = vst.msk [vmem:[#allocation2 + $0x1a0] sm:$0xff] %vm32_vm0, %v9133_v0  ;;  %v124_v5 = vld [vmem:[%s13153_s0 + $0x20] sm:$0xff]  ;;  %v125_v6 = vld [vmem:[%s13153_s0 + $0x28] sm:$0xff]  ;;  %vm3590_vm3 = vcmask 1042432   ;;  %s9140_s26 = smov 21  }
   0x4   :  { %44 = vst.msk [vmem:[#allocation2 + $0x348] sm:$0xff] %vm32_vm0, %v9133_v0  ;;  %45 = vst.msk [vmem:[#allocation2 + $0x350] sm:$0xff] %vm32_vm0, %v9133_v0  ;;  %v126_v7 = vld [vmem:[%s13153_s0 + $0x30] sm:$0xff]  ;;  %v127_v8 = vld [vmem:[%s13153_s0 + $0x38] sm:$0xff]  ;;  %vm9141_vm4 = vmmov 1   ;;  %vm2938_vm6 = vcmask 48128  }
   0x5   :  { %36 = vst.msk [vmem:[#allocation2 + $0x10] sm:$0x3] %vm35_vm1, %v9133_v0  ;;  %39 = vst.msk [vmem:[#allocation2 + $0x1c0] sm:$0x3] %vm35_vm1, %v9133_v0  ;;  %v128_v9 = vld [vmem:[%s13153_s0 + $0x40] sm:$0xff]  ;;  %v129_v10 = vld [vmem:[%s13153_s0 + $0x48] sm:$0xff] }
   0x6   :  { %43 = vst.msk [vmem:[#allocation2 + $0x1a8] sm:$0x3] %vm35_vm1, %v9133_v0  ;;  %46 = vst.msk [vmem:[#allocation2 + $0x358] sm:$0x3] %vm35_vm1, %v9133_v0  ;;  %v130_v20 = vld [vmem:[%s13153_s0 + $0x50] sm:$0xff]  ;;  %v131_v23 = vld [vmem:[%s13153_s0 + $0x58] sm:$0xff] }
   0x7   :  { %49 = vst.msk [vmem:[#allocation2 + $0x18] sm:$0x1] %vm47_vm2, %v9133_v0  ;;  %50 = vst.msk [vmem:[#allocation2 + $0x30] sm:$0x1] %vm47_vm2, %v9133_v0  ;;  %v3393_v24 = vld [vmem:[%s13154_s1] sm:$0xff]  ;;  %v3394_v25 = vld [vmem:[%s13154_s1 + $0x8] sm:$0xff] }
   0x8   :  { %51 = vst.msk [vmem:[#allocation2 + $0x48] sm:$0x1] %vm47_vm2, %v9133_v0  ;;  %52 = vst.msk [vmem:[#allocation2 + $0x60] sm:$0x1] %vm47_vm2, %v9133_v0  ;;  %v377_v11 = vld [vmem:[#allocation2 + $0x2] sm:$0xff]  ;;  %v8751_v26 = vpack.c.bf16 %v3394_v25, %v3393_v24  ;;  %v3395_v29 = vld [vmem:[%s13154_s1 + $0x10] sm:$0xff] }
   0x9   :  { %53 = vst.msk [vmem:[#allocation2 + $0x78] sm:$0x1] %vm47_vm2, %v9133_v0  ;;  %54 = vst.msk [vmem:[#allocation2 + $0x90] sm:$0x1] %vm47_vm2, %v9133_v0  ;;  %v313_v12 = vld [vmem:[#allocation2 + $0x1] sm:$0xff]  ;;  %1146 = vrot.lane.b32.xlu1 %v377_v11, %s9134_s29  ;;  %v134_v43 = vld [vmem:[%s13153_s0 + $0x70] sm:$0xff] }
   0xa   :  { %55 = vst.msk [vmem:[#allocation2 + $0xa8] sm:$0x1] %vm47_vm2, %v9133_v0  ;;  %56 = vst.msk [vmem:[#allocation2 + $0xc0] sm:$0x1] %vm47_vm2, %v9133_v0  ;;  %890 = vrot.lane.b32.xlu0 %v313_v12, %s9135_s30  ;;  %8752 = vmatprep.subr.bf16.mxu0 %v8751_v26  ;;  %v3396_v30 = vld [vmem:[%s13154_s1 + $0x18] sm:$0x7] }
   0xb   :  { %57 = vst.msk [vmem:[#allocation2 + $0xd8] sm:$0x1] %vm47_vm2, %v9133_v0  ;;  %58 = vst.msk [vmem:[#allocation2 + $0xf0] sm:$0x1] %vm47_vm2, %v9133_v0  ;;  %8754 = vmatpush3.bf16.msra.mxu0 %v8751_v26  ;;  %v8755_v31 = vpack.c.bf16 %v3396_v30, %v3395_v29  ;;  %s9142_s1 = smov 24   ;;  %v132_v35 = vld [vmem:[%s13153_s0 + $0x60] sm:$0xff] }
   0xc   :  { %59 = vst.msk [vmem:[#allocation2 + $0x108] sm:$0x1] %vm47_vm2, %v9133_v0  ;;  %60 = vst.msk [vmem:[#allocation2 + $0x120] sm:$0x1] %vm47_vm2, %v9133_v0  ;;  %v314_v14 = vld [vmem:[#allocation2 + $0x9] sm:$0xff]  ;;  %v135_v45 = vld [vmem:[%s13153_s0 + $0x78] sm:$0xff] }
   0xd   :  { %61 = vst.msk [vmem:[#allocation2 + $0x138] sm:$0x1] %vm47_vm2, %v9133_v0  ;;  %62 = vst.msk [vmem:[#allocation2 + $0x150] sm:$0x1] %vm47_vm2, %v9133_v0  ;;  %v133_v37 = vld [vmem:[%s13153_s0 + $0x68] sm:$0xff]  ;;  %v136_v51 = vld [vmem:[%s13153_s0 + $0x80] sm:$0xff] }
   0xe   :  { %63 = vst.msk [vmem:[#allocation2 + $0x168] sm:$0x1] %vm47_vm2, %v9133_v0  ;;  %64 = vst.msk [vmem:[#allocation2 + $0x180] sm:$0x1] %vm47_vm2, %v9133_v0  ;;  %892 = vrot.lane.b32.xlu0 %v314_v14, %s9135_s30  ;;  %v137_v57 = vld [vmem:[%s13153_s0 + $0x88] sm:$0xff]  ;;  %vm3003_vm7 = vcmask 72704  }
   0xf   :  { %67 = vst.msk [vmem:[#allocation2 + $0x1c8] sm:$0x1] %vm47_vm2, %v9133_v0  ;;  %68 = vst.msk [vmem:[#allocation2 + $0x1e0] sm:$0x1] %vm47_vm2, %v9133_v0  ;;  %vm3068_vm8 = vcmask 97280   ;;  %vm3133_vm9 = vcmask 121856  }
  0x10   :  { %69 = vst.msk [vmem:[#allocation2 + $0x1f8] sm:$0x1] %vm47_vm2, %v9133_v0  ;;  %70 = vst.msk [vmem:[#allocation2 + $0x210] sm:$0x1] %vm47_vm2, %v9133_v0  ;;  %vm13164_vm10 = vcmask 146432   ;;  %v250_v25 = vld [vmem:[#allocation2 + $0x8] sm:$0xff] }
  0x11   :  { %71 = vst.msk [vmem:[#allocation2 + $0x228] sm:$0x1] %vm47_vm2, %v9133_v0  ;;  %72 = vst.msk [vmem:[#allocation2 + $0x240] sm:$0x1] %vm47_vm2, %v9133_v0  ;;  %vm3263_vm11 = vcmask 171008   ;;  %vm3328_vm12 = vcmask 195584  }
  0x12   :  { %73 = vst.msk [vmem:[#allocation2 + $0x258] sm:$0x1] %vm47_vm2, %v9133_v0  ;;  %74 = vst.msk [vmem:[#allocation2 + $0x270] sm:$0x1] %vm47_vm2, %v9133_v0  ;;  %v139_v29 = vld [vmem:[%s13153_s0 + $0x98] sm:$0xff]  ;;  %vm3397_vm13 = vcmask 220160  }
  0x13   :  { %75 = vst.msk [vmem:[#allocation2 + $0x288] sm:$0x1] %vm47_vm2, %v9133_v0  ;;  %76 = vst.msk [vmem:[#allocation2 + $0x2a0] sm:$0x1] %vm47_vm2, %v9133_v0  ;;  %vm4114_vm14 = vcmask 523264   ;;  %vm4116_vm15 = vcmask 517120  }
  0x14   :  { %77 = vst.msk [vmem:[#allocation2 + $0x2b8] sm:$0x1] %vm47_vm2, %v9133_v0  ;;  %78 = vst.msk [vmem:[#allocation2 + $0x2d0] sm:$0x1] %vm47_vm2, %v9133_v0  ;;  %vm4125_vm1 = vcmask 516096  }
  0x15   :  { %79 = vst.msk [vmem:[#allocation2 + $0x2e8] sm:$0x1] %vm47_vm2, %v9133_v0  ;;  %80 = vst.msk [vmem:[#allocation2 + $0x300] sm:$0x1] %vm47_vm2, %v9133_v0 }
  0x16   :  { %81 = vst.msk [vmem:[#allocation2 + $0x318] sm:$0x1] %vm47_vm2, %v9133_v0  ;;  %82 = vst.msk [vmem:[#allocation2 + $0x330] sm:$0x1] %vm47_vm2, %v9133_v0 }
  0x17   :  { %85 = vst.msk [vmem:[#allocation2 + $0x29] sm:$0x1] %vm47_vm2, %v9133_v0  ;;  %86 = vst.msk [vmem:[#allocation2 + $0x41] sm:$0x1] %vm47_vm2, %v9133_v0 }
  0x18   :  { %87 = vst.msk [vmem:[#allocation2 + $0x59] sm:$0x1] %vm47_vm2, %v9133_v0  ;;  %88 = vst.msk [vmem:[#allocation2 + $0x71] sm:$0x1] %vm47_vm2, %v9133_v0 }
  0x19   :  { %89 = vst.msk [vmem:[#allocation2 + $0x89] sm:$0x1] %vm47_vm2, %v9133_v0  ;;  %90 = vst.msk [vmem:[#allocation2 + $0xa1] sm:$0x1] %vm47_vm2, %v9133_v0 }
  0x1a   :  { %91 = vst.msk [vmem:[#allocation2 + $0xb9] sm:$0x1] %vm47_vm2, %v9133_v0  ;;  %92 = vst.msk [vmem:[#allocation2 + $0xd1] sm:$0x1] %vm47_vm2, %v9133_v0 }
  0x1b   :  { %93 = vst.msk [vmem:[#allocation2 + $0xe9] sm:$0x1] %vm47_vm2, %v9133_v0  ;;  %94 = vst.msk [vmem:[#allocation2 + $0x101] sm:$0x1] %vm47_vm2, %v9133_v0 }
  0x1c   :  { %95 = vst.msk [vmem:[#allocation2 + $0x119] sm:$0x1] %vm47_vm2, %v9133_v0  ;;  %96 = vst.msk [vmem:[#allocation2 + $0x131] sm:$0x1] %vm47_vm2, %v9133_v0 }
  0x1d   :  { %97 = vst.msk [vmem:[#allocation2 + $0x149] sm:$0x1] %vm47_vm2, %v9133_v0  ;;  %98 = vst.msk [vmem:[#allocation2 + $0x161] sm:$0x1] %vm47_vm2, %v9133_v0 }
  0x1e   :  { %99 = vst.msk [vmem:[#allocation2 + $0x179] sm:$0x1] %vm47_vm2, %v9133_v0  ;;  %100 = vst.msk [vmem:[#allocation2 + $0x191] sm:$0x1] %vm47_vm2, %v9133_v0 }
  0x1f   :  { %103 = vst.msk [vmem:[#allocation2 + $0x1d9] sm:$0x1] %vm47_vm2, %v9133_v0  ;;  %104 = vst.msk [vmem:[#allocation2 + $0x1f1] sm:$0x1] %vm47_vm2, %v9133_v0 }
  0x20   :  { %105 = vst.msk [vmem:[#allocation2 + $0x209] sm:$0x1] %vm47_vm2, %v9133_v0  ;;  %106 = vst.msk [vmem:[#allocation2 + $0x221] sm:$0x1] %vm47_vm2, %v9133_v0 }
  0x21   :  { %107 = vst.msk [vmem:[#allocation2 + $0x239] sm:$0x1] %vm47_vm2, %v9133_v0  ;;  %108 = vst.msk [vmem:[#allocation2 + $0x251] sm:$0x1] %vm47_vm2, %v9133_v0 }
  0x22   :  { %109 = vst.msk [vmem:[#allocation2 + $0x269] sm:$0x1] %vm47_vm2, %v9133_v0  ;;  %110 = vst.msk [vmem:[#allocation2 + $0x281] sm:$0x1] %vm47_vm2, %v9133_v0 }
  0x23   :  { %111 = vst.msk [vmem:[#allocation2 + $0x299] sm:$0x1] %vm47_vm2, %v9133_v0  ;;  %112 = vst.msk [vmem:[#allocation2 + $0x2b1] sm:$0x1] %vm47_vm2, %v9133_v0 }
  0x24   :  { %113 = vst.msk [vmem:[#allocation2 + $0x2c9] sm:$0x1] %vm47_vm2, %v9133_v0  ;;  %114 = vst.msk [vmem:[#allocation2 + $0x2e1] sm:$0x1] %vm47_vm2, %v9133_v0 }
  0x25   :  { %115 = vst.msk [vmem:[#allocation2 + $0x2f9] sm:$0x1] %vm47_vm2, %v9133_v0  ;;  %116 = vst.msk [vmem:[#allocation2 + $0x311] sm:$0x1] %vm47_vm2, %v9133_v0 }
  0x26   :  { %117 = vst.msk [vmem:[#allocation2 + $0x329] sm:$0x1] %vm47_vm2, %v9133_v0  ;;  %118 = vst.msk [vmem:[#allocation2 + $0x341] sm:$0x1] %vm47_vm2, %v9133_v0 }
  0x27   :  { %84 = vst.msk [vmem:[#allocation2 + $0x11] sm:$0x1] %vm47_vm2, %v9133_v0  ;;  %48 = vst.msk [vmem:[#allocation2] sm:$0x1] %vm47_vm2, %v9133_v0 }
  0x28   :  { %65 = vst.msk [vmem:[#allocation2 + $0x198] sm:$0x1] %vm47_vm2, %v9133_v0  ;;  %66 = vst.msk [vmem:[#allocation2 + $0x1b0] sm:$0x1] %vm47_vm2, %v9133_v0 }
  0x29   :  { %83 = vst.msk [vmem:[#allocation2 + $0x348] sm:$0x1] %vm47_vm2, %v9133_v0  ;;  %101 = vst.msk [vmem:[#allocation2 + $0x1a9] sm:$0x1] %vm47_vm2, %v9133_v0 }
  0x2a   :  { %102 = vst.msk [vmem:[#allocation2 + $0x1c1] sm:$0x1] %vm47_vm2, %v9133_v0  ;;  %119 = vst.msk [vmem:[#allocation2 + $0x359] sm:$0x1] %vm47_vm2, %v9133_v0  ;;  %vm13163_vm2 = vcmask 1041409  }
  0x2b   :  { %185 = vst.msk [vmem:[#allocation2 + $0x19] sm:$0xff] %vm32_vm0, %v120_v1  ;;  %186 = vst.msk [vmem:[#allocation2 + $0x21] sm:$0xff] %vm32_vm0, %v121_v2 }
  0x2c   :  { %187 = vst.msk [vmem:[#allocation2 + $0x31] sm:$0xff] %vm32_vm0, %v122_v3  ;;  %188 = vst.msk [vmem:[#allocation2 + $0x39] sm:$0xff] %vm32_vm0, %v123_v4 }
  0x2d   :  { %189 = vst.msk [vmem:[#allocation2 + $0x49] sm:$0xff] %vm32_vm0, %v124_v5  ;;  %190 = vst.msk [vmem:[#allocation2 + $0x51] sm:$0xff] %vm32_vm0, %v125_v6 }
  0x2e   :  { %191 = vst.msk [vmem:[#allocation2 + $0x61] sm:$0xff] %vm32_vm0, %v126_v7  ;;  %192 = vst.msk [vmem:[#allocation2 + $0x69] sm:$0xff] %vm32_vm0, %v127_v8  ;;  %v378_v13 = vld [vmem:[#allocation2 + $0xa] sm:$0xff]  ;;  %v249_v12 = vld [vmem:[#allocation2] sm:$0xff] }
  0x2f   :  { %193 = vst.msk [vmem:[#allocation2 + $0x79] sm:$0xff] %vm32_vm0, %v128_v9  ;;  %194 = vst.msk [vmem:[#allocation2 + $0x81] sm:$0xff] %vm32_vm0, %v129_v10  ;;  %1148 = vrot.lane.b32.xlu1 %v378_v13, %s9134_s29  ;;  %v138_v13 = vld [vmem:[%s13153_s0 + $0x90] sm:$0xff] }
  0x30   :  { %195 = vst.msk [vmem:[#allocation2 + $0x91] sm:$0xff] %vm32_vm0, %v130_v20  ;;  %196 = vst.msk [vmem:[#allocation2 + $0x99] sm:$0xff] %vm32_vm0, %v131_v23 }
  0x31   :  { %vm8756_vm5 = vmpackc.low %vm3590_vm3, %vm9141_vm4  ;;  %197 = vst.msk [vmem:[#allocation2 + $0xa9] sm:$0xff] %vm32_vm0, %v132_v35  ;;  %vm6056_vm3 = vcmask 1042434   ;;  %vm6058_vm4 = vcmask 1043459  }
  0x32   :  { %v9403_v15 = vld [vmem:[#allocation2 + $0x20] sm:$0xff]  ;;  %v9405_v16 = vld [vmem:[#allocation2 + $0x18] sm:$0xff]  ;;  %8757 = vmatprep.subr.msk.bf16.mxu0 %vm8756_vm5, %v8755_v31  ;;  %198 = vst.msk [vmem:[#allocation2 + $0xb1] sm:$0xff] %vm32_vm0, %v133_v37  ;;  %199 = vst.msk [vmem:[#allocation2 + $0xc1] sm:$0xff] %vm32_vm0, %v134_v43 }
  0x33   :  { %1404 = vrot.lane.b32.xlu1 %v9403_v15, %s9136_s10  ;;  %1402 = vrot.lane.b32.xlu0 %v9405_v16, %s9136_s10  ;;  %v505_v17 = vld [vmem:[#allocation2 + $0x19] sm:$0xff]  ;;  %v506_v18 = vld [vmem:[#allocation2 + $0x21] sm:$0xff]  ;;  %v9421_v22 = vld [vmem:[#allocation2 + $0x30] sm:$0xff]  ;;  %200 = vst.msk [vmem:[#allocation2 + $0xc9] sm:$0xff] %vm32_vm0, %v135_v45 }
  0x34   :  { %v569_v19 = vld [vmem:[#allocation2 + $0x1a] sm:$0xff]  ;;  %v570_v21 = vld [vmem:[#allocation2 + $0x22] sm:$0xff]  ;;  %v698_v28 = vld [vmem:[#allocation2 + $0x31] sm:$0xff]  ;;  %8760 = vmatpush3.bf16.msk.msra.mxu0 %vm8756_vm5, %v8755_v31  ;;  %201 = vst.msk [vmem:[#allocation2 + $0xd9] sm:$0xff] %vm32_vm0, %v136_v51  ;;  %vm6060_vm5 = vcmask 1044484  }
  0x35   :  { %v9439_v27 = vld [vmem:[#allocation2 + $0x38] sm:$0xff]  ;;  %v9465_v36 = vld [vmem:[#allocation2 + $0x48] sm:$0xff]  ;;  %v9477_v38 = vld [vmem:[#allocation2 + $0x50] sm:$0xff]  ;;  %202 = vst.msk [vmem:[#allocation2 + $0xe1] sm:$0xff] %vm32_vm0, %v137_v57 }
  0x36   :  { %v699_v32 = vld [vmem:[#allocation2 + $0x39] sm:$0xff]  ;;  %v700_v39 = vld [vmem:[#allocation2 + $0x49] sm:$0xff]  ;;  %v701_v40 = vld [vmem:[#allocation2 + $0x51] sm:$0xff]  ;;  %203 = vst.msk [vmem:[#allocation2 + $0xf1] sm:$0xff] %vm32_vm0, %v138_v13 }
  0x37   :  { %1658 = vrot.lane.b32.xlu0 %v505_v17, %s9137_s11  ;;  %894 = vrot.lane.b32.xlu1 %v505_v17, %s9135_s30  ;;  %v762_v33 = vld [vmem:[#allocation2 + $0x32] sm:$0xff]  ;;  %v763_v34 = vld [vmem:[#allocation2 + $0x3a] sm:$0xff]  ;;  %v764_v41 = vld [vmem:[#allocation2 + $0x4a] sm:$0xff]  ;;  %204 = vst.msk [vmem:[#allocation2 + $0xf9] sm:$0xff] %vm32_vm0, %v139_v29 }
  0x38   :  { %v765_v42 = vld [vmem:[#allocation2 + $0x52] sm:$0xff]  ;;  %v9497_v44 = vld [vmem:[#allocation2 + $0x60] sm:$0xff]  ;;  %v9509_v46 = vld [vmem:[#allocation2 + $0x68] sm:$0xff]  ;;  %4115 = vst.msk [vmem:[#allocation3] sm:$0xff] %vm4114_vm14, %v9133_v0 }
  0x39   :  { %v702_v47 = vld [vmem:[#allocation2 + $0x61] sm:$0xff]  ;;  %v703_v48 = vld [vmem:[#allocation2 + $0x69] sm:$0xff]  ;;  %v9529_v54 = vld [vmem:[#allocation2 + $0x78] sm:$0xff]  ;;  %4118 = vst.msk [vmem:[#allocation3 + $0xa0] sm:$0xff] %vm4114_vm14, %v9133_v0 }
  0x3a   :  { %v766_v49 = vld [vmem:[#allocation2 + $0x62] sm:$0xff]  ;;  %v767_v50 = vld [vmem:[#allocation2 + $0x6a] sm:$0xff]  ;;  %v704_v61 = vld [vmem:[#allocation2 + $0x79] sm:$0xff]  ;;  %4121 = vst.msk [vmem:[#allocation3 + $0x90] sm:$0xff] %vm4114_vm14, %v9133_v0 }
  0x3b   :  { %1660 = vrot.lane.b32.xlu0 %v506_v18, %s9137_s11  ;;  %1914 = vrot.lane.b32.xlu1 %v569_v19, %s9138_s14  ;;  %v9547_v60 = vld [vmem:[#allocation2 + $0x80] sm:$0xff]  ;;  %v9581_v20 = vld [vmem:[#allocation2 + $0x90] sm:$0xff]  ;;  %4123 = vst.msk [vmem:[#allocation3 + $0x130] sm:$0xff] %vm4114_vm14, %v9133_v0 }
  0x3c   :  { %v705_v3 = vld [vmem:[#allocation2 + $0x81] sm:$0xff]  ;;  %4117 = vst.msk [vmem:[#allocation3 + $0x8] sm:$0x3] %vm4116_vm15, %v9133_v0  ;;  %4119 = vst.msk [vmem:[#allocation3 + $0xa8] sm:$0x3] %vm4116_vm15, %v9133_v0 }
  0x3d   :  { %v768_v4 = vld [vmem:[#allocation2 + $0x7a] sm:$0xff]  ;;  %v769_v9 = vld [vmem:[#allocation2 + $0x82] sm:$0xff]  ;;  %4127 = vst.msk [vmem:[#allocation3 + $0x10] sm:$0x1] %vm4125_vm1, %v9133_v0  ;;  %4126 = vst.msk [vmem:[#allocation3] sm:$0x1] %vm4125_vm1, %v9133_v0 }
  0x3e   :  { %4122 = vst.msk [vmem:[#allocation3 + $0x98] sm:$0x3] %vm4116_vm15, %v9133_v0  ;;  %4124 = vst.msk [vmem:[#allocation3 + $0x138] sm:$0x3] %vm4116_vm15, %v9133_v0  ;;  %vm6062_vm15 = vcmask 1045509  }
  0x3f   :  { %896 = vrot.lane.b32.xlu0 %v506_v18, %s9135_s30  ;;  %1150 = vrot.lane.b32.xlu1 %v569_v19, %s9134_s29  ;;  %4128 = vst.msk [vmem:[#allocation3 + $0x20] sm:$0x1] %vm4125_vm1, %v9133_v0  ;;  %4129 = vst.msk [vmem:[#allocation3 + $0x30] sm:$0x1] %vm4125_vm1, %v9133_v0 }
  0x40   :  { %4130 = vst.msk [vmem:[#allocation3 + $0x40] sm:$0x1] %vm4125_vm1, %v9133_v0  ;;  %4131 = vst.msk [vmem:[#allocation3 + $0x50] sm:$0x1] %vm4125_vm1, %v9133_v0 }
  0x41   :  { %4132 = vst.msk [vmem:[#allocation3 + $0x60] sm:$0x1] %vm4125_vm1, %v9133_v0  ;;  %4133 = vst.msk [vmem:[#allocation3 + $0x70] sm:$0x1] %vm4125_vm1, %v9133_v0 }
  0x42   :  { %4134 = vst.msk [vmem:[#allocation3 + $0x80] sm:$0x1] %vm4125_vm1, %v9133_v0  ;;  %4135 = vst.msk [vmem:[#allocation3 + $0x90] sm:$0x1] %vm4125_vm1, %v9133_v0 }
  0x43   :  { %1916 = vrot.lane.b32.xlu0 %v570_v21, %s9138_s14  ;;  %2170 = vrot.lane.b32.xlu1 %v9421_v22, %s9139_s15  ;;  %4136 = vst.msk [vmem:[#allocation3 + $0xa0] sm:$0x1] %vm4125_vm1, %v9133_v0  ;;  %4137 = vst.msk [vmem:[#allocation3 + $0xb0] sm:$0x1] %vm4125_vm1, %v9133_v0 }
  0x44   :  { %4138 = vst.msk [vmem:[#allocation3 + $0xc0] sm:$0x1] %vm4125_vm1, %v9133_v0  ;;  %4139 = vst.msk [vmem:[#allocation3 + $0xd0] sm:$0x1] %vm4125_vm1, %v9133_v0 }
  0x45   :  { %4140 = vst.msk [vmem:[#allocation3 + $0xe0] sm:$0x1] %vm4125_vm1, %v9133_v0  ;;  %4141 = vst.msk [vmem:[#allocation3 + $0xf0] sm:$0x1] %vm4125_vm1, %v9133_v0 }
  0x46   :  { %4142 = vst.msk [vmem:[#allocation3 + $0x100] sm:$0x1] %vm4125_vm1, %v9133_v0  ;;  %4143 = vst.msk [vmem:[#allocation3 + $0x110] sm:$0x1] %vm4125_vm1, %v9133_v0 }
  0x47   :  { %1152 = vrot.lane.b32.xlu0 %v570_v21, %s9134_s29  ;;  %1406 = vrot.lane.b32.xlu1 %v9421_v22, %s9136_s10  ;;  %4144 = vst.msk [vmem:[#allocation3 + $0x120] sm:$0x1] %vm4125_vm1, %v9133_v0  ;;  %4145 = vst.msk [vmem:[#allocation3 + $0x130] sm:$0x1] %vm4125_vm1, %v9133_v0 }
  0x48   :  { %4147 = vst.msk [vmem:[#allocation3 + $0x19] sm:$0x1] %vm4125_vm1, %v9133_v0  ;;  %4148 = vst.msk [vmem:[#allocation3 + $0x29] sm:$0x1] %vm4125_vm1, %v9133_v0 }
  0x49   :  { %4149 = vst.msk [vmem:[#allocation3 + $0x39] sm:$0x1] %vm4125_vm1, %v9133_v0  ;;  %4150 = vst.msk [vmem:[#allocation3 + $0x49] sm:$0x1] %vm4125_vm1, %v9133_v0 }
  0x4a   :  { %4151 = vst.msk [vmem:[#allocation3 + $0x59] sm:$0x1] %vm4125_vm1, %v9133_v0  ;;  %4152 = vst.msk [vmem:[#allocation3 + $0x69] sm:$0x1] %vm4125_vm1, %v9133_v0 }
  0x4b   :  { %2172 = vrot.lane.b32.xlu0 %v9439_v27, %s9139_s15  ;;  %2426 = vrot.lane.b32.xlu1 %v698_v28, %s9140_s26  ;;  %4153 = vst.msk [vmem:[#allocation3 + $0x79] sm:$0x1] %vm4125_vm1, %v9133_v0  ;;  %4154 = vst.msk [vmem:[#allocation3 + $0x89] sm:$0x1] %vm4125_vm1, %v9133_v0 }
  0x4c   :  { %4157 = vst.msk [vmem:[#allocation3 + $0xb9] sm:$0x1] %vm4125_vm1, %v9133_v0  ;;  %4158 = vst.msk [vmem:[#allocation3 + $0xc9] sm:$0x1] %vm4125_vm1, %v9133_v0 }
  0x4d   :  { %4159 = vst.msk [vmem:[#allocation3 + $0xd9] sm:$0x1] %vm4125_vm1, %v9133_v0  ;;  %4160 = vst.msk [vmem:[#allocation3 + $0xe9] sm:$0x1] %vm4125_vm1, %v9133_v0 }
  0x4e   :  { %4161 = vst.msk [vmem:[#allocation3 + $0xf9] sm:$0x1] %vm4125_vm1, %v9133_v0  ;;  %4162 = vst.msk [vmem:[#allocation3 + $0x109] sm:$0x1] %vm4125_vm1, %v9133_v0 }
  0x4f   :  { %1408 = vrot.lane.b32.xlu0 %v9439_v27, %s9136_s10  ;;  %1662 = vrot.lane.b32.xlu1 %v698_v28, %s9137_s11  ;;  %4163 = vst.msk [vmem:[#allocation3 + $0x119] sm:$0x1] %vm4125_vm1, %v9133_v0  ;;  %4164 = vst.msk [vmem:[#allocation3 + $0x129] sm:$0x1] %vm4125_vm1, %v9133_v0 }
  0x50   :  { %4146 = vst.msk [vmem:[#allocation3 + $0x9] sm:$0x1] %vm4125_vm1, %v9133_v0  ;;  %4155 = vst.msk [vmem:[#allocation3 + $0x99] sm:$0x1] %vm4125_vm1, %v9133_v0 }
  0x51   :  { %4156 = vst.msk [vmem:[#allocation3 + $0xa9] sm:$0x1] %vm4125_vm1, %v9133_v0  ;;  %4165 = vst.msk [vmem:[#allocation3 + $0x139] sm:$0x1] %vm4125_vm1, %v9133_v0  ;;  %vm6064_vm1 = vcmask 1046534  }
  0x53   :  { %2428 = vrot.lane.b32.xlu0 %v699_v32, %s9140_s26  ;;  %2682 = vrot.lane.b32.xlu1 %v762_v33, %s9142_s1 }
  0x57   :  { %898 = vrot.lane.b32.xlu0 %v698_v28, %s9135_s30  ;;  %1664 = vrot.lane.b32.xlu1 %v699_v32, %s9137_s11 }
  0x5b   :  { %1918 = vrot.lane.b32.xlu0 %v762_v33, %s9138_s14  ;;  %2684 = vrot.lane.b32.xlu1 %v763_v34, %s9142_s1 }
  0x5f   :  { %900 = vrot.lane.b32.xlu0 %v699_v32, %s9135_s30  ;;  %1154 = vrot.lane.b32.xlu1 %v762_v33, %s9134_s29 }
  0x63   :  { %1920 = vrot.lane.b32.xlu0 %v763_v34, %s9138_s14  ;;  %2174 = vrot.lane.b32.xlu1 %v9465_v36, %s9139_s15 }
  0x67   :  { %1156 = vrot.lane.b32.xlu0 %v763_v34, %s9134_s29  ;;  %1410 = vrot.lane.b32.xlu1 %v9465_v36, %s9136_s10 }
  0x6b   :  { %2176 = vrot.lane.b32.xlu0 %v9477_v38, %s9139_s15  ;;  %2430 = vrot.lane.b32.xlu1 %v700_v39, %s9140_s26 }
  0x6f   :  { %1412 = vrot.lane.b32.xlu0 %v9477_v38, %s9136_s10  ;;  %1666 = vrot.lane.b32.xlu1 %v700_v39, %s9137_s11 }
  0x73   :  { %2432 = vrot.lane.b32.xlu0 %v701_v40, %s9140_s26  ;;  %2686 = vrot.lane.b32.xlu1 %v764_v41, %s9142_s1 }
  0x77   :  { %902 = vrot.lane.b32.xlu0 %v700_v39, %s9135_s30  ;;  %1668 = vrot.lane.b32.xlu1 %v701_v40, %s9137_s11  ;;  %v9608_v39 = vld [vmem:[#allocation2 + $0x98] sm:$0xff] }
  0x7b   :  { %1922 = vrot.lane.b32.xlu0 %v764_v41, %s9138_s14  ;;  %2688 = vrot.lane.b32.xlu1 %v765_v42, %s9142_s1  ;;  %v1147_v52 = vpop.permute.xlu1 %1146 }
  0x7c   :  { %v891_v53 = vpop.permute.xlu0 %890 }
  0x7d   :  { %v2874_v14 = vsel %vm32_vm0, %v249_v12, %v891_v53  ;;  %v707_v53 = vld [vmem:[#allocation2 + $0x99] sm:$0xff] }
  0x7e   :  { %v2939_v19 = vsel %vm2938_vm6, %v2874_v14, %v1147_v52 }
  0x7f   :  { %904 = vrot.lane.b32.xlu0 %v701_v40, %s9135_s30  ;;  %1158 = vrot.lane.b32.xlu1 %v764_v41, %s9134_s29  ;;  %v706_v40 = vld [vmem:[#allocation2 + $0x91] sm:$0xff] }
  0x80   :  { %v9533_v56 = vpop.permute.xlu0 %892 }
  0x81   :  { %v2875_v31 = vsel %vm32_vm0, %v250_v25, %v9533_v56 }
  0x83   :  { %1924 = vrot.lane.b32.xlu0 %v765_v42, %s9138_s14  ;;  %2178 = vrot.lane.b32.xlu1 %v9497_v44, %s9139_s15 }
  0x87   :  { %1160 = vrot.lane.b32.xlu0 %v765_v42, %s9134_s29  ;;  %1414 = vrot.lane.b32.xlu1 %v9497_v44, %s9136_s10 }
  0x8b   :  { %2180 = vrot.lane.b32.xlu0 %v9509_v46, %s9139_s15  ;;  %2434 = vrot.lane.b32.xlu1 %v702_v47, %s9140_s26 }
  0x8f   :  { %1416 = vrot.lane.b32.xlu0 %v9509_v46, %s9136_s10  ;;  %1670 = vrot.lane.b32.xlu1 %v702_v47, %s9137_s11 }
  0x93   :  { %2436 = vrot.lane.b32.xlu0 %v703_v48, %s9140_s26  ;;  %2690 = vrot.lane.b32.xlu1 %v766_v49, %s9142_s1 }
  0x97   :  { %906 = vrot.lane.b32.xlu0 %v702_v47, %s9135_s30  ;;  %1672 = vrot.lane.b32.xlu1 %v703_v48, %s9137_s11 }
  0x9b   :  { %1926 = vrot.lane.b32.xlu0 %v766_v49, %s9138_s14  ;;  %2692 = vrot.lane.b32.xlu1 %v767_v50, %s9142_s1 }
  0x9f   :  { %908 = vrot.lane.b32.xlu0 %v703_v48, %s9135_s30  ;;  %1162 = vrot.lane.b32.xlu1 %v766_v49, %s9134_s29 }
  0xa1   :  { %v9531_v55 = vpop.permute.xlu1 %1148 }
  0xa2   :  { %v2940_v37 = vsel %vm2938_vm6, %v2875_v31, %v9531_v55  ;;  %v770_v55 = vld [vmem:[#allocation2 + $0x92] sm:$0xff] }
  0xa3   :  { %1928 = vrot.lane.b32.xlu0 %v767_v50, %s9138_s14  ;;  %2182 = vrot.lane.b32.xlu1 %v9529_v54, %s9139_s15 }
  0xa5   :  { %v9542_v58 = vpop.permute.xlu1 %1404  ;;  %v1403_v59 = vpop.permute.xlu0 %1402 }
  0xa6   :  { %v3004_v21 = vsel %vm3003_vm7, %v2939_v19, %v1403_v59  ;;  %v3005_v41 = vsel %vm3003_vm7, %v2940_v37, %v9542_v58  ;;  %v772_v37 = vld [vmem:[#allocation2 + $0xaa] sm:$0xff] }
  0xa7   :  { %1164 = vrot.lane.b32.xlu0 %v767_v50, %s9134_s29  ;;  %1418 = vrot.lane.b32.xlu1 %v9529_v54, %s9136_s10 }
  0xa9   :  { %v1659_v62 = vpop.permute.xlu0 %1658  ;;  %v9549_v63 = vpop.permute.xlu1 %894 }
  0xaa   :  { %v3069_v26 = vsel %vm3068_vm8, %v3004_v21, %v1659_v62 }
  0xab   :  { %2184 = vrot.lane.b32.xlu0 %v9547_v60, %s9139_s15  ;;  %2438 = vrot.lane.b32.xlu1 %v704_v61, %s9140_s26 }
  0xad   :  { %v9554_v1 = vpop.permute.xlu0 %1660  ;;  %v1915_v2 = vpop.permute.xlu1 %1914 }
  0xae   :  { %v3134_v28 = vsel %vm3133_vm9, %v3069_v26, %v1915_v2  ;;  %v3070_v45 = vsel %vm3068_vm8, %v3005_v41, %v9554_v1  ;;  %v140_v2 = vld [vmem:[%s13153_s0 + $0xa0] sm:$0xff]  ;;  %v9680_v26 = vld [vmem:[#allocation2 + $0xb0] sm:$0xff] }
  0xaf   :  { %1420 = vrot.lane.b32.xlu0 %v9547_v60, %s9136_s10  ;;  %1674 = vrot.lane.b32.xlu1 %v704_v61, %s9137_s11  ;;  %205 = vst.msk [vmem:[#allocation2 + $0x109] sm:$0xff] %vm32_vm0, %v140_v2 }
  0xb1   :  { %v9559_v5 = vpop.permute.xlu0 %896  ;;  %v9561_v6 = vpop.permute.xlu1 %1150 }
  0xb3   :  { %2440 = vrot.lane.b32.xlu0 %v705_v3, %s9140_s26  ;;  %2694 = vrot.lane.b32.xlu1 %v768_v4, %s9142_s1 }
  0xb5   :  { %v1917_v7 = vpop.permute.xlu0 %1916  ;;  %v2171_v8 = vpop.permute.xlu1 %2170 }
  0xb6   :  { %v3199_v30 = vsel %vm13164_vm10, %v3134_v28, %v2171_v8  ;;  %v3135_v47 = vsel %vm3133_vm9, %v3070_v45, %v1917_v7  ;;  %v2876_v7 = vsel %vm32_vm0, %v9405_v16, %v9549_v63  ;;  %v141_v63 = vld [vmem:[%s13153_s0 + $0xa8] sm:$0xff] }
  0xb7   :  { %910 = vrot.lane.b32.xlu0 %v704_v61, %s9135_s30  ;;  %1676 = vrot.lane.b32.xlu1 %v705_v3, %s9137_s11  ;;  %v771_v61 = vld [vmem:[#allocation2 + $0x9a] sm:$0xff]  ;;  %v2941_v8 = vsel %vm2938_vm6, %v2876_v7, %v9561_v6  ;;  %206 = vst.msk [vmem:[#allocation2 + $0x111] sm:$0xff] %vm32_vm0, %v141_v63  ;;  %v708_v28 = vld [vmem:[#allocation2 + $0xa9] sm:$0xff] }
  0xb9   :  { %v9567_v10 = vpop.permute.xlu0 %1152  ;;  %v9569_v11 = vpop.permute.xlu1 %1406 }
  0xba   :  { %v3006_v12 = vsel %vm3003_vm7, %v2941_v8, %v9569_v11 }
  0xbb   :  { %1930 = vrot.lane.b32.xlu0 %v768_v4, %s9138_s14  ;;  %2696 = vrot.lane.b32.xlu1 %v769_v9, %s9142_s1 }
  0xbd   :  { %v2173_v17 = vpop.permute.xlu0 %2172  ;;  %v2427_v18 = vpop.permute.xlu1 %2426 }
  0xbe   :  { %v3264_v32 = vsel %vm3263_vm11, %v3199_v30, %v2427_v18  ;;  %v3200_v48 = vsel %vm13164_vm10, %v3135_v47, %v2173_v17  ;;  %v773_v47 = vld [vmem:[#allocation2 + $0xb2] sm:$0xff] }
  0xbf   :  { %912 = vrot.lane.b32.xlu0 %v705_v3, %s9135_s30  ;;  %1166 = vrot.lane.b32.xlu1 %v768_v4, %s9134_s29 }
  0xc1   :  { %v9584_v23 = vpop.permute.xlu0 %1408  ;;  %v9586_v24 = vpop.permute.xlu1 %1662 }
  0xc2   :  { %v3071_v17 = vsel %vm3068_vm8, %v3006_v12, %v9586_v24  ;;  %v2877_v24 = vsel %vm32_vm0, %v9403_v15, %v9559_v5 }
  0xc3   :  { %1932 = vrot.lane.b32.xlu0 %v769_v9, %s9138_s14  ;;  %2186 = vrot.lane.b32.xlu1 %v9581_v20, %s9139_s15  ;;  %v2942_v25 = vsel %vm2938_vm6, %v2877_v24, %v9567_v10  ;;  %v711_v24 = vld [vmem:[#allocation2 + $0xc9] sm:$0xff] }
  0xc4   :  { %v3007_v29 = vsel %vm3003_vm7, %v2942_v25, %v9584_v23  ;;  %v774_v25 = vld [vmem:[#allocation2 + $0xc2] sm:$0xff] }
  0xc5   :  { %v2429_v33 = vpop.permute.xlu0 %2428  ;;  %v2683_v34 = vpop.permute.xlu1 %2682 }
  0xc6   :  { %v3329_v35 = vsel %vm3328_vm12, %v3264_v32, %v2683_v34  ;;  %v3265_v49 = vsel %vm3263_vm11, %v3200_v48, %v2429_v33 }
  0xc7   :  { %1168 = vrot.lane.b32.xlu0 %v769_v9, %s9134_s29  ;;  %1422 = vrot.lane.b32.xlu1 %v9581_v20, %s9136_s10  ;;  %v9652_v9 = vld [vmem:[#allocation2 + $0xa8] sm:$0xff] }
  0xc8   :  { %8615 = vmatprep.mubr.msk.f32.mxu0 %vm3397_vm13, %v3329_v35  ;;  %v709_v35 = vld [vmem:[#allocation2 + $0xb1] sm:$0xff] }
  0xc9   :  { %v9612_v42 = vpop.permute.xlu0 %898  ;;  %v1665_v43 = vpop.permute.xlu1 %1664 }
  0xca   :  { %v3072_v15 = vsel %vm3068_vm8, %v3007_v29, %v1665_v43 }
  0xcb   :  { %2188 = vrot.lane.b32.xlu0 %v9608_v39, %s9139_s15  ;;  %2442 = vrot.lane.b32.xlu1 %v706_v40, %s9140_s26 }
  0xcd   :  { %v1919_v50 = vpop.permute.xlu0 %1918  ;;  %v2685_v51 = vpop.permute.xlu1 %2684 }
  0xce   :  { %v3330_v52 = vsel %vm3328_vm12, %v3265_v49, %v2685_v51  ;;  %v3136_v16 = vsel %vm3133_vm9, %v3071_v17, %v1919_v50  ;;  %v142_v50 = vld [vmem:[%s13153_s0 + $0xb0] sm:$0xff]  ;;  %v9750_v17 = vld [vmem:[#allocation2 + $0xc8] sm:$0xff] }
  0xcf   :  { %1424 = vrot.lane.b32.xlu0 %v9608_v39, %s9136_s10  ;;  %1678 = vrot.lane.b32.xlu1 %v706_v40, %s9137_s11  ;;  %207 = vst.msk [vmem:[#allocation2 + $0x121] sm:$0xff] %vm32_vm0, %v142_v50 }
  0xd0   :  { %8616 = vmatmul.mubr.msk.f32.vlgmr.msra.gmra.mrb[0].mxu0 %vm3397_vm13, %v3330_v52 }
  0xd1   :  { %v9627_v56 = vpop.permute.xlu0 %900  ;;  %v9629_v57 = vpop.permute.xlu1 %1154 }
  0xd2   :  { %v2879_v12 = vsel %vm32_vm0, %v9439_v27, %v9627_v56 }
  0xd3   :  { %2444 = vrot.lane.b32.xlu0 %v707_v53, %s9140_s26  ;;  %2698 = vrot.lane.b32.xlu1 %v770_v55, %s9142_s1 }
  0xd5   :  { %v1921_v58 = vpop.permute.xlu0 %1920  ;;  %v2175_v59 = vpop.permute.xlu1 %2174 }
  0xd6   :  { %v3201_v6 = vsel %vm13164_vm10, %v3136_v16, %v2175_v59  ;;  %v3137_v5 = vsel %vm3133_vm9, %v3072_v15, %v1921_v58  ;;  %v9723_v58 = vld [vmem:[#allocation2 + $0xc0] sm:$0xff] }
  0xd7   :  { %914 = vrot.lane.b32.xlu0 %v706_v40, %s9135_s30  ;;  %1680 = vrot.lane.b32.xlu1 %v707_v53, %s9137_s11  ;;  %v710_v16 = vld [vmem:[#allocation2 + $0xc1] sm:$0xff] }
  0xd9   :  { %v9635_v62 = vpop.permute.xlu0 %1156  ;;  %v9637_v1 = vpop.permute.xlu1 %1410 }
  0xdb   :  { %1934 = vrot.lane.b32.xlu0 %v770_v55, %s9138_s14  ;;  %2700 = vrot.lane.b32.xlu1 %v771_v61, %s9142_s1 }
  0xdd   :  { %v2177_v3 = vpop.permute.xlu0 %2176  ;;  %v2431_v4 = vpop.permute.xlu1 %2430 }
  0xde   :  { %v3266_v11 = vsel %vm3263_vm11, %v3201_v6, %v2431_v4  ;;  %v3202_v10 = vsel %vm13164_vm10, %v3137_v5, %v2177_v3  ;;  %v775_v5 = vld [vmem:[#allocation2 + $0xca] sm:$0xff] }
  0xdf   :  { %916 = vrot.lane.b32.xlu0 %v707_v53, %s9135_s30  ;;  %1170 = vrot.lane.b32.xlu1 %v770_v55, %s9134_s29  ;;  %v2878_v53 = vsel %vm32_vm0, %v9421_v22, %v9612_v42  ;;  %v143_v22 = vld [vmem:[%s13153_s0 + $0xb8] sm:$0xff] }
  0xe0   :  { %v2943_v55 = vsel %vm2938_vm6, %v2878_v53, %v9629_v57  ;;  %208 = vst.msk [vmem:[#allocation2 + $0x129] sm:$0xff] %vm32_vm0, %v143_v22 }
  0xe1   :  { %v9656_v13 = vpop.permute.xlu0 %1412  ;;  %v1667_v14 = vpop.permute.xlu1 %1666  ;;  %v3008_v59 = vsel %vm3003_vm7, %v2943_v55, %v9637_v1 }
  0xe2   :  { %v3073_v3 = vsel %vm3068_vm8, %v3008_v59, %v1667_v14  ;;  %v2944_v14 = vsel %vm2938_vm6, %v2879_v12, %v9635_v62  ;;  %v713_v12 = vld [vmem:[#allocation2 + $0xe1] sm:$0xff] }
  0xe3   :  { %1936 = vrot.lane.b32.xlu0 %v771_v61, %s9138_s14  ;;  %2190 = vrot.lane.b32.xlu1 %v9652_v9, %s9139_s15  ;;  %v3009_v63 = vsel %vm3003_vm7, %v2944_v14, %v9656_v13  ;;  %v776_v14 = vld [vmem:[#allocation2 + $0xda] sm:$0xff] }
  0xe5   :  { %v2433_v18 = vpop.permute.xlu0 %2432  ;;  %v2687_v19 = vpop.permute.xlu1 %2686 }
  0xe6   :  { %v3331_v21 = vsel %vm3328_vm12, %v3266_v11, %v2687_v19  ;;  %v3267_v32 = vsel %vm3263_vm11, %v3202_v10, %v2433_v18 }
  0xe7   :  { %1172 = vrot.lane.b32.xlu0 %v771_v61, %s9134_s29  ;;  %1426 = vrot.lane.b32.xlu1 %v9652_v9, %s9136_s10 }
  0xe8   :  { %8618 = vmatprep.mubr.msk.f32.mxu0 %vm3397_vm13, %v3331_v21 }
  0xe9   :  { %v9684_v30 = vpop.permute.xlu0 %902  ;;  %v1669_v31 = vpop.permute.xlu1 %1668 }
  0xea   :  { %v3074_v27 = vsel %vm3068_vm8, %v3009_v63, %v1669_v31 }
  0xeb   :  { %2192 = vrot.lane.b32.xlu0 %v9680_v26, %s9139_s15  ;;  %2446 = vrot.lane.b32.xlu1 %v708_v28, %s9140_s26 }
  0xed   :  { %v1923_v33 = vpop.permute.xlu0 %1922  ;;  %v2689_v34 = vpop.permute.xlu1 %2688 }
  0xee   :  { %v3332_v23 = vsel %vm3328_vm12, %v3267_v32, %v2689_v34  ;;  %v3138_v4 = vsel %vm3133_vm9, %v3073_v3, %v1923_v33  ;;  %v144_v33 = vld [vmem:[%s13153_s0 + $0xc0] sm:$0xff] }
  0xef   :  { %1428 = vrot.lane.b32.xlu0 %v9680_v26, %s9136_s10  ;;  %1682 = vrot.lane.b32.xlu1 %v708_v28, %s9137_s11  ;;  %209 = vst.msk [vmem:[#allocation2 + $0x139] sm:$0xff] %vm32_vm0, %v144_v33  ;;  %v9820_v3 = vld [vmem:[#allocation2 + $0xe0] sm:$0xff] }
  0xf0   :  { %8619 = vmatmul.mubr.msk.f32.gmra.mrb[2].mxu0 %vm3397_vm13, %v3332_v23 }
  0xf1   :  { %v9698_v40 = vpop.permute.xlu0 %904  ;;  %v9700_v41 = vpop.permute.xlu1 %1158 }
  0xf2   :  { %v2881_v59 = vsel %vm32_vm0, %v9477_v38, %v9698_v40 }
  0xf3   :  { %2448 = vrot.lane.b32.xlu0 %v709_v35, %s9140_s26  ;;  %2702 = vrot.lane.b32.xlu1 %v772_v37, %s9142_s1 }
  0xf5   :  { %v1925_v43 = vpop.permute.xlu0 %1924  ;;  %v2179_v45 = vpop.permute.xlu1 %2178 }
  0xf6   :  { %v3203_v42 = vsel %vm13164_vm10, %v3138_v4, %v2179_v45  ;;  %v3139_v56 = vsel %vm3133_vm9, %v3074_v27, %v1925_v43  ;;  %v9793_v43 = vld [vmem:[#allocation2 + $0xd8] sm:$0xff] }
  0xf7   :  { %918 = vrot.lane.b32.xlu0 %v708_v28, %s9135_s30  ;;  %1684 = vrot.lane.b32.xlu1 %v709_v35, %s9137_s11  ;;  %v712_v4 = vld [vmem:[#allocation2 + $0xd9] sm:$0xff] }
  0xf9   :  { %v9706_v48 = vpop.permute.xlu0 %1160  ;;  %v9708_v49 = vpop.permute.xlu1 %1414 }
  0xfb   :  { %1938 = vrot.lane.b32.xlu0 %v772_v37, %s9138_s14  ;;  %2704 = vrot.lane.b32.xlu1 %v773_v47, %s9142_s1 }
  0xfd   :  { %v2181_v51 = vpop.permute.xlu0 %2180  ;;  %v2435_v52 = vpop.permute.xlu1 %2434 }
  0xfe   :  { %v3268_v57 = vsel %vm3263_vm11, %v3203_v42, %v2435_v52  ;;  %v3204_v62 = vsel %vm13164_vm10, %v3139_v56, %v2181_v51  ;;  %v777_v56 = vld [vmem:[#allocation2 + $0xe2] sm:$0xff] }
  0xff   :  { %920 = vrot.lane.b32.xlu0 %v709_v35, %s9135_s30  ;;  %1174 = vrot.lane.b32.xlu1 %v772_v37, %s9134_s29  ;;  %v2880_v35 = vsel %vm32_vm0, %v9465_v36, %v9684_v30  ;;  %v145_v36 = vld [vmem:[%s13153_s0 + $0xc8] sm:$0xff] }
 0x100   :  { %v2945_v37 = vsel %vm2938_vm6, %v2880_v35, %v9700_v41  ;;  %210 = vst.msk [vmem:[#allocation2 + $0x141] sm:$0xff] %vm32_vm0, %v145_v36 }
 0x101   :  { %v9727_v61 = vpop.permute.xlu0 %1416  ;;  %v1671_v2 = vpop.permute.xlu1 %1670  ;;  %v3010_v45 = vsel %vm3003_vm7, %v2945_v37, %v9708_v49 }
 0x102   :  { %v3075_v51 = vsel %vm3068_vm8, %v3010_v45, %v1671_v2  ;;  %v2946_v2 = vsel %vm2938_vm6, %v2881_v59, %v9706_v48  ;;  %v715_v59 = vld [vmem:[#allocation2 + $0xf9] sm:$0xff] }
 0x103   :  { %1940 = vrot.lane.b32.xlu0 %v773_v47, %s9138_s14  ;;  %2194 = vrot.lane.b32.xlu1 %v9723_v58, %s9139_s15  ;;  %v3011_v22 = vsel %vm3003_vm7, %v2946_v2, %v9727_v61  ;;  %v778_v2 = vld [vmem:[#allocation2 + $0xf2] sm:$0xff] }
 0x105   :  { %v2437_v1 = vpop.permute.xlu0 %2436  ;;  %v2691_v7 = vpop.permute.xlu1 %2690 }
 0x106   :  { %v3333_v8 = vsel %vm3328_vm12, %v3268_v57, %v2691_v7  ;;  %v3269_v18 = vsel %vm3263_vm11, %v3204_v62, %v2437_v1 }
 0x107   :  { %1176 = vrot.lane.b32.xlu0 %v773_v47, %s9134_s29  ;;  %1430 = vrot.lane.b32.xlu1 %v9723_v58, %s9136_s10 }
 0x108   :  { %8621 = vmatprep.mubr.msk.f32.mxu0 %vm3397_vm13, %v3333_v8 }
 0x109   :  { %v9754_v6 = vpop.permute.xlu0 %906  ;;  %v1673_v11 = vpop.permute.xlu1 %1672 }
 0x10a   :  { %v3076_v38 = vsel %vm3068_vm8, %v3011_v22, %v1673_v11 }
 0x10b   :  { %2196 = vrot.lane.b32.xlu0 %v9750_v17, %s9139_s15  ;;  %2450 = vrot.lane.b32.xlu1 %v710_v16, %s9140_s26 }
 0x10d   :  { %v1927_v19 = vpop.permute.xlu0 %1926  ;;  %v2693_v21 = vpop.permute.xlu1 %2692 }
 0x10e   :  { %v3334_v13 = vsel %vm3328_vm12, %v3269_v18, %v2693_v21  ;;  %v3140_v52 = vsel %vm3133_vm9, %v3075_v51, %v1927_v19  ;;  %v146_v19 = vld [vmem:[%s13153_s0 + $0xd0] sm:$0xff]  ;;  %v9892_v51 = vld [vmem:[#allocation2 + $0xf8] sm:$0xff] }
 0x10f   :  { %1432 = vrot.lane.b32.xlu0 %v9750_v17, %s9136_s10  ;;  %1686 = vrot.lane.b32.xlu1 %v710_v16, %s9137_s11  ;;  %211 = vst.msk [vmem:[#allocation2 + $0x151] sm:$0xff] %vm32_vm0, %v146_v19 }
 0x110   :  { %8622 = vmatmul.mubr.msk.f32.gmra.mrb[4].mxu0 %vm3397_vm13, %v3334_v13 }
 0x111   :  { %v9768_v28 = vpop.permute.xlu0 %908  ;;  %v9770_v29 = vpop.permute.xlu1 %1162 }
 0x112   :  { %v2883_v45 = vsel %vm32_vm0, %v9509_v46, %v9768_v28 }
 0x113   :  { %2452 = vrot.lane.b32.xlu0 %v711_v24, %s9140_s26  ;;  %2706 = vrot.lane.b32.xlu1 %v774_v25, %s9142_s1 }
 0x115   :  { %v1929_v31 = vpop.permute.xlu0 %1928  ;;  %v2183_v15 = vpop.permute.xlu1 %2182 }
 0x116   :  { %v3205_v30 = vsel %vm13164_vm10, %v3140_v52, %v2183_v15  ;;  %v3141_v40 = vsel %vm3133_vm9, %v3076_v38, %v1929_v31  ;;  %v9863_v31 = vld [vmem:[#allocation2 + $0xf0] sm:$0xff] }
 0x117   :  { %922 = vrot.lane.b32.xlu0 %v710_v16, %s9135_s30  ;;  %1688 = vrot.lane.b32.xlu1 %v711_v24, %s9137_s11  ;;  %v714_v52 = vld [vmem:[#allocation2 + $0xf1] sm:$0xff] }
 0x119   :  { %v9776_v10 = vpop.permute.xlu0 %1164  ;;  %v9778_v32 = vpop.permute.xlu1 %1418 }
 0x11b   :  { %1942 = vrot.lane.b32.xlu0 %v774_v25, %s9138_s14  ;;  %2708 = vrot.lane.b32.xlu1 %v775_v5, %s9142_s1 }
 0x11d   :  { %v2185_v34 = vpop.permute.xlu0 %2184  ;;  %v2439_v23 = vpop.permute.xlu1 %2438 }
 0x11e   :  { %v3270_v41 = vsel %vm3263_vm11, %v3205_v30, %v2439_v23  ;;  %v3206_v48 = vsel %vm13164_vm10, %v3141_v40, %v2185_v34  ;;  %v9934_v40 = vld [vmem:[#allocation2 + $0xfa] sm:$0xff] }
 0x11f   :  { %924 = vrot.lane.b32.xlu0 %v711_v24, %s9135_s30  ;;  %1178 = vrot.lane.b32.xlu1 %v774_v25, %s9134_s29  ;;  %v2882_v24 = vsel %vm32_vm0, %v9497_v44, %v9754_v6  ;;  %v147_v6 = vld [vmem:[%s13153_s0 + $0xd8] sm:$0xff] }
 0x120   :  { %v2947_v25 = vsel %vm2938_vm6, %v2882_v24, %v9770_v29  ;;  %212 = vst.msk [vmem:[#allocation2 + $0x159] sm:$0xff] %vm32_vm0, %v147_v6 }
 0x121   :  { %v9797_v47 = vpop.permute.xlu0 %1420  ;;  %v1675_v50 = vpop.permute.xlu1 %1674  ;;  %v3012_v15 = vsel %vm3003_vm7, %v2947_v25, %v9778_v32 }
 0x122   :  { %v3077_v34 = vsel %vm3068_vm8, %v3012_v15, %v1675_v50  ;;  %v2948_v50 = vsel %vm2938_vm6, %v2883_v45, %v9776_v10  ;;  %v149_v15 = vld [vmem:[%s13153_s0 + $0xe8] sm:$0xff]  ;;  %v717_v45 = vld [vmem:[#allocation2 + $0x111] sm:$0xff] }
 0x123   :  { %1944 = vrot.lane.b32.xlu0 %v775_v5, %s9138_s14  ;;  %2198 = vrot.lane.b32.xlu1 %v9793_v43, %s9139_s15  ;;  %v3013_v36 = vsel %vm3003_vm7, %v2948_v50, %v9797_v47  ;;  %214 = vst.msk [vmem:[#allocation2 + $0x171] sm:$0xff] %vm32_vm0, %v149_v15  ;;  %v780_v50 = vld [vmem:[#allocation2 + $0x10a] sm:$0xff]  ;;  %v782_v15 = vld [vmem:[#allocation2 + $0x122] sm:$0xff] }
 0x125   :  { %v2441_v49 = vpop.permute.xlu0 %2440  ;;  %v2695_v53 = vpop.permute.xlu1 %2694 }
 0x126   :  { %v3335_v55 = vsel %vm3328_vm12, %v3270_v41, %v2695_v53  ;;  %v3271_v1 = vsel %vm3263_vm11, %v3206_v48, %v2441_v49 }
 0x127   :  { %1180 = vrot.lane.b32.xlu0 %v775_v5, %s9134_s29  ;;  %1434 = vrot.lane.b32.xlu1 %v9793_v43, %s9136_s10 }
 0x128   :  { %8624 = vmatprep.mubr.msk.f32.mxu0 %vm3397_vm13, %v3335_v55 }
 0x129   :  { %v9824_v42 = vpop.permute.xlu0 %910  ;;  %v1677_v57 = vpop.permute.xlu1 %1676 }
 0x12a   :  { %v3078_v46 = vsel %vm3068_vm8, %v3013_v36, %v1677_v57 }
 0x12b   :  { %2200 = vrot.lane.b32.xlu0 %v9820_v3, %s9139_s15  ;;  %2454 = vrot.lane.b32.xlu1 %v712_v4, %s9140_s26 }
 0x12d   :  { %v1931_v7 = vpop.permute.xlu0 %1930  ;;  %v2697_v8 = vpop.permute.xlu1 %2696 }
 0x12e   :  { %v3336_v61 = vsel %vm3328_vm12, %v3271_v1, %v2697_v8  ;;  %v3142_v44 = vsel %vm3133_vm9, %v3077_v34, %v1931_v7  ;;  %v10072_v34 = vld [vmem:[#allocation2 + $0x110] sm:$0xff] }
 0x12f   :  { %1436 = vrot.lane.b32.xlu0 %v9820_v3, %s9136_s10  ;;  %1690 = vrot.lane.b32.xlu1 %v712_v4, %s9137_s11 }
 0x130   :  { %8625 = vmatmul.mubr.msk.f32.gmra.mrb[6].mxu0 %vm3397_vm13, %v3336_v61  ;;  %v2884_v61 = vsel %vm32_vm0, %v9529_v54, %v9824_v42 }
 0x131   :  { %v9838_v16 = vpop.permute.xlu0 %912  ;;  %v9840_v63 = vpop.permute.xlu1 %1166 }
 0x132   :  { %v2885_v25 = vsel %vm32_vm0, %v9547_v60, %v9838_v16 }
 0x133   :  { %2456 = vrot.lane.b32.xlu0 %v713_v12, %s9140_s26  ;;  %2710 = vrot.lane.b32.xlu1 %v776_v14, %s9142_s1 }
 0x135   :  { %v1933_v11 = vpop.permute.xlu0 %1932  ;;  %v2187_v27 = vpop.permute.xlu1 %2186 }
 0x136   :  { %v3207_v29 = vsel %vm13164_vm10, %v3142_v44, %v2187_v27  ;;  %v3143_v28 = vsel %vm3133_vm9, %v3078_v46, %v1933_v11  ;;  %v652_v11 = vld [vmem:[#allocation2 + $0x108] sm:$0xff] }
 0x137   :  { %926 = vrot.lane.b32.xlu0 %v712_v4, %s9135_s30  ;;  %1692 = vrot.lane.b32.xlu1 %v713_v12, %s9137_s11  ;;  %v716_v44 = vld [vmem:[#allocation2 + $0x109] sm:$0xff] }
 0x139   :  { %v9846_v62 = vpop.permute.xlu0 %1168  ;;  %v9848_v18 = vpop.permute.xlu1 %1422 }
 0x13b   :  { %1946 = vrot.lane.b32.xlu0 %v776_v14, %s9138_s14  ;;  %2712 = vrot.lane.b32.xlu1 %v777_v56, %s9142_s1 }
 0x13d   :  { %v2189_v21 = vpop.permute.xlu0 %2188  ;;  %v2443_v13 = vpop.permute.xlu1 %2442 }
 0x13e   :  { %v3272_v32 = vsel %vm3263_vm11, %v3207_v29, %v2443_v13  ;;  %v3208_v10 = vsel %vm13164_vm10, %v3143_v28, %v2189_v21  ;;  %v781_v28 = vld [vmem:[#allocation2 + $0x112] sm:$0xff] }
 0x13f   :  { %928 = vrot.lane.b32.xlu0 %v713_v12, %s9135_s30  ;;  %1182 = vrot.lane.b32.xlu1 %v776_v14, %s9134_s29  ;;  %v148_v12 = vld [vmem:[%s13153_s0 + $0xe0] sm:$0xff]  ;;  %v2949_v14 = vsel %vm2938_vm6, %v2884_v61, %v9840_v63 }
 0x140   :  { %213 = vst.msk [vmem:[#allocation2 + $0x169] sm:$0xff] %vm32_vm0, %v148_v12  ;;  %v3014_v54 = vsel %vm3003_vm7, %v2949_v14, %v9848_v18 }
 0x141   :  { %v9867_v5 = vpop.permute.xlu0 %1424  ;;  %v9869_v33 = vpop.permute.xlu1 %1678 }
 0x142   :  { %v3079_v27 = vsel %vm3068_vm8, %v3014_v54, %v9869_v33  ;;  %v2950_v33 = vsel %vm2938_vm6, %v2885_v25, %v9846_v62 }
 0x143   :  { %1948 = vrot.lane.b32.xlu0 %v777_v56, %s9138_s14  ;;  %2202 = vrot.lane.b32.xlu1 %v9863_v31, %s9139_s15  ;;  %v3015_v60 = vsel %vm3003_vm7, %v2950_v33, %v9867_v5 }
 0x145   :  { %v2445_v23 = vpop.permute.xlu0 %2444  ;;  %v2699_v35 = vpop.permute.xlu1 %2698 }
 0x146   :  { %v3337_v37 = vsel %vm3328_vm12, %v3272_v32, %v2699_v35  ;;  %v3273_v49 = vsel %vm3263_vm11, %v3208_v10, %v2445_v23 }
 0x147   :  { %1184 = vrot.lane.b32.xlu0 %v777_v56, %s9134_s29  ;;  %1438 = vrot.lane.b32.xlu1 %v9863_v31, %s9136_s10 }
 0x148   :  { %8627 = vmatprep.mubr.msk.f32.mxu0 %vm3397_vm13, %v3337_v37 }
 0x149   :  { %v9896_v30 = vpop.permute.xlu0 %914  ;;  %v9898_v41 = vpop.permute.xlu1 %1680 }
 0x14a   :  { %v3080_v29 = vsel %vm3068_vm8, %v3015_v60, %v9898_v41 }
 0x14b   :  { %2204 = vrot.lane.b32.xlu0 %v9892_v51, %s9139_s15  ;;  %2458 = vrot.lane.b32.xlu1 %v714_v52, %s9140_s26 }
 0x14d   :  { %v9907_v53 = vpop.permute.xlu0 %1934  ;;  %v2701_v47 = vpop.permute.xlu1 %2700 }
 0x14e   :  { %v3338_v55 = vsel %vm3328_vm12, %v3273_v49, %v2701_v47  ;;  %v3144_v56 = vsel %vm3133_vm9, %v3079_v27, %v9907_v53  ;;  %v718_v27 = vld [vmem:[#allocation2 + $0x121] sm:$0xff] }
 0x14f   :  { %1440 = vrot.lane.b32.xlu0 %v9892_v51, %s9136_s10  ;;  %1694 = vrot.lane.b32.xlu1 %v714_v52, %s9137_s11 }
 0x150   :  { %8628 = vmatmul.mubr.msk.f32.gmra.mrb[8].mxu0 %vm3397_vm13, %v3338_v55  ;;  %v2886_v55 = vsel %vm32_vm0, %v9581_v20, %v9896_v30 }
 0x151   :  { %v9914_v4 = vpop.permute.xlu0 %916  ;;  %v9916_v22 = vpop.permute.xlu1 %1170 }
 0x152   :  { %v2887_v14 = vsel %vm32_vm0, %v9608_v39, %v9914_v4 }
 0x153   :  { %2460 = vrot.lane.b32.xlu0 %v715_v59, %s9140_s26  ;;  %2714 = vrot.lane.b32.xlu1 %v778_v2, %s9142_s1 }
 0x155   :  { %v9920_v57 = vpop.permute.xlu0 %1936  ;;  %v9922_v38 = vpop.permute.xlu1 %2190 }
 0x156   :  { %v3209_v18 = vsel %vm13164_vm10, %v3144_v56, %v9922_v38  ;;  %v3145_v32 = vsel %vm3133_vm9, %v3080_v29, %v9920_v57  ;;  %v10118_v57 = vld [vmem:[#allocation2 + $0x120] sm:$0xff]  ;;  %v783_v29 = vld [vmem:[#allocation2 + $0x12a] sm:$0xff] }
 0x157   :  { %930 = vrot.lane.b32.xlu0 %v714_v52, %s9135_s30  ;;  %1696 = vrot.lane.b32.xlu1 %v715_v59, %s9137_s11 }
 0x159   :  { %v9936_v48 = vpop.permute.xlu0 %1172  ;;  %v9938_v1 = vpop.permute.xlu1 %1426 }
 0x15a   :  { %v2952_v54 = vsel %vm2938_vm6, %v2887_v14, %v9936_v48 }
 0x15b   :  { %1950 = vrot.lane.b32.xlu0 %v778_v2, %s9138_s14  ;;  %2716 = vrot.lane.b32.xlu1 %v9934_v40, %s9142_s1 }
 0x15d   :  { %v9943_v7 = vpop.permute.xlu0 %2192  ;;  %v9945_v8 = vpop.permute.xlu1 %2446 }
 0x15e   :  { %v3274_v19 = vsel %vm3263_vm11, %v3209_v18, %v9945_v8  ;;  %v3210_v62 = vsel %vm13164_vm10, %v3145_v32, %v9943_v7 }
 0x15f   :  { %932 = vrot.lane.b32.xlu0 %v715_v59, %s9135_s30  ;;  %1186 = vrot.lane.b32.xlu1 %v778_v2, %s9134_s29  ;;  %v150_v59 = vld [vmem:[%s13153_s0 + $0xf0] sm:$0xff]  ;;  %v2951_v2 = vsel %vm2938_vm6, %v2886_v55, %v9916_v22 }
 0x160   :  { %215 = vst.msk [vmem:[#allocation2 + $0x181] sm:$0xff] %vm32_vm0, %v150_v59  ;;  %v3016_v38 = vsel %vm3003_vm7, %v2951_v2, %v9938_v1 }
 0x161   :  { %v10036_v42 = vpop.permute.xlu0 %1428  ;;  %v10038_v63 = vpop.permute.xlu1 %1682 }
 0x162   :  { %v3081_v30 = vsel %vm3068_vm8, %v3016_v38, %v10038_v63  ;;  %v655_v63 = vld [vmem:[#allocation2 + $0x128] sm:$0xff]  ;;  %v3017_v39 = vsel %vm3003_vm7, %v2952_v54, %v10036_v42 }
 0x163   :  { %1952 = vrot.lane.b32.xlu0 %v9934_v40, %s9138_s14  ;;  %2206 = vrot.lane.b32.xlu1 %v652_v11, %s9139_s15  ;;  %v719_v42 = vld [vmem:[#allocation2 + $0x129] sm:$0xff]  ;;  %v721_v54 = vld [vmem:[#allocation2 + $0x141] sm:$0xff] }
 0x165   :  { %v2449_v21 = vpop.permute.xlu0 %2448  ;;  %v2703_v13 = vpop.permute.xlu1 %2702 }
 0x166   :  { %v3339_v24 = vsel %vm3328_vm12, %v3274_v19, %v2703_v13  ;;  %v3275_v23 = vsel %vm3263_vm11, %v3210_v62, %v2449_v21 }
 0x167   :  { %1188 = vrot.lane.b32.xlu0 %v9934_v40, %s9134_s29  ;;  %1442 = vrot.lane.b32.xlu1 %v652_v11, %s9136_s10  ;;  %v151_v11 = vld [vmem:[%s13153_s0 + $0xf8] sm:$0xff] }
 0x168   :  { %8630 = vmatprep.mubr.msk.f32.mxu0 %vm3397_vm13, %v3339_v24  ;;  %216 = vst.msk [vmem:[#allocation2 + $0x189] sm:$0xff] %vm32_vm0, %v151_v11 }
 0x169   :  { %v10077_v16 = vpop.permute.xlu0 %918  ;;  %v1685_v6 = vpop.permute.xlu1 %1684 }
 0x16a   :  { %v3082_v18 = vsel %vm3068_vm8, %v3017_v39, %v1685_v6 }
 0x16b   :  { %2208 = vrot.lane.b32.xlu0 %v10072_v34, %s9139_s15  ;;  %2462 = vrot.lane.b32.xlu1 %v716_v44, %s9140_s26 }
 0x16d   :  { %v1939_v5 = vpop.permute.xlu0 %1938  ;;  %v2705_v35 = vpop.permute.xlu1 %2704 }
 0x16e   :  { %v3340_v37 = vsel %vm3328_vm12, %v3275_v23, %v2705_v35  ;;  %v3146_v7 = vsel %vm3133_vm9, %v3081_v30, %v1939_v5  ;;  %v2888_v35 = vsel %vm32_vm0, %v9652_v9, %v10077_v16  ;;  %v152_v16 = vld [vmem:[%s13153_s0 + $0x100] sm:$0xff] }
 0x16f   :  { %1444 = vrot.lane.b32.xlu0 %v10072_v34, %s9136_s10  ;;  %1698 = vrot.lane.b32.xlu1 %v716_v44, %s9137_s11  ;;  %217 = vst.msk [vmem:[#allocation2 + $0x1c9] sm:$0xff] %vm32_vm0, %v152_v16  ;;  %v657_v30 = vld [vmem:[#allocation2 + $0x140] sm:$0xff] }
 0x170   :  { %8631 = vmatmul.mubr.msk.f32.gmra.mrb[10].mxu0 %vm3397_vm13, %v3340_v37 }
 0x171   :  { %v10094_v52 = vpop.permute.xlu0 %920  ;;  %v10096_v36 = vpop.permute.xlu1 %1174 }
 0x172   :  { %v2953_v37 = vsel %vm2938_vm6, %v2888_v35, %v10096_v36  ;;  %v2889_v38 = vsel %vm32_vm0, %v9680_v26, %v10094_v52 }
 0x173   :  { %2464 = vrot.lane.b32.xlu0 %v717_v45, %s9140_s26  ;;  %2718 = vrot.lane.b32.xlu1 %v780_v50, %s9142_s1 }
 0x175   :  { %v1941_v41 = vpop.permute.xlu0 %1940  ;;  %v2195_v46 = vpop.permute.xlu1 %2194 }
 0x176   :  { %v3211_v22 = vsel %vm13164_vm10, %v3146_v7, %v2195_v46  ;;  %v3147_v19 = vsel %vm3133_vm9, %v3082_v18, %v1941_v41  ;;  %v720_v7 = vld [vmem:[#allocation2 + $0x139] sm:$0xff] }
 0x177   :  { %934 = vrot.lane.b32.xlu0 %v716_v44, %s9135_s30  ;;  %1700 = vrot.lane.b32.xlu1 %v717_v45, %s9137_s11 }
 0x179   :  { %v10102_v10 = vpop.permute.xlu0 %1176  ;;  %v10104_v49 = vpop.permute.xlu1 %1430 }
 0x17b   :  { %1954 = vrot.lane.b32.xlu0 %v780_v50, %s9138_s14  ;;  %2720 = vrot.lane.b32.xlu1 %v781_v28, %s9142_s1 }
 0x17d   :  { %v2197_v53 = vpop.permute.xlu0 %2196  ;;  %v2451_v47 = vpop.permute.xlu1 %2450 }
 0x17e   :  { %v3276_v8 = vsel %vm3263_vm11, %v3211_v22, %v2451_v47  ;;  %v3212_v48 = vsel %vm13164_vm10, %v3147_v19, %v2197_v53  ;;  %v785_v19 = vld [vmem:[#allocation2 + $0x142] sm:$0xff] }
 0x17f   :  { %936 = vrot.lane.b32.xlu0 %v717_v45, %s9135_s30  ;;  %1190 = vrot.lane.b32.xlu1 %v780_v50, %s9134_s29  ;;  %v656_v45 = vld [vmem:[#allocation2 + $0x138] sm:$0xff]  ;;  %v3018_v50 = vsel %vm3003_vm7, %v2953_v37, %v10104_v49 }
 0x181   :  { %v10123_v40 = vpop.permute.xlu0 %1432  ;;  %v1687_v20 = vpop.permute.xlu1 %1686 }
 0x183   :  { %1956 = vrot.lane.b32.xlu0 %v781_v28, %s9138_s14  ;;  %2210 = vrot.lane.b32.xlu1 %v10118_v57, %s9139_s15 }
 0x185   :  { %v2453_v61 = vpop.permute.xlu0 %2452  ;;  %v2707_v12 = vpop.permute.xlu1 %2706 }
 0x186   :  { %v3341_v1 = vsel %vm3328_vm12, %v3276_v8, %v2707_v12  ;;  %v3277_v21 = vsel %vm3263_vm11, %v3212_v48, %v2453_v61 }
 0x187   :  { %1192 = vrot.lane.b32.xlu0 %v781_v28, %s9134_s29  ;;  %1446 = vrot.lane.b32.xlu1 %v10118_v57, %s9136_s10  ;;  %v3083_v28 = vsel %vm3068_vm8, %v3018_v50, %v1687_v20  ;;  %v2954_v20 = vsel %vm2938_vm6, %v2889_v38, %v10102_v10  ;;  %v153_v10 = vld [vmem:[%s13153_s0 + $0x108] sm:$0xff] }
 0x188   :  { %8633 = vmatprep.mubr.msk.f32.mxu0 %vm3397_vm13, %v3341_v1  ;;  %v3019_v22 = vsel %vm3003_vm7, %v2954_v20, %v10123_v40  ;;  %218 = vst.msk [vmem:[#allocation2 + $0x1d1] sm:$0xff] %vm32_vm0, %v153_v10  ;;  %v10298_v10 = vld [vmem:[#allocation2 + $0x151] sm:$0xff] }
 0x189   :  { %v10149_v4 = vpop.permute.xlu0 %922  ;;  %v1689_v56 = vpop.permute.xlu1 %1688 }
 0x18a   :  { %v3084_v26 = vsel %vm3068_vm8, %v3019_v22, %v1689_v56  ;;  %v155_v22 = vld [vmem:[%s13153_s0 + $0x118] sm:$0xff] }
 0x18b   :  { %2212 = vrot.lane.b32.xlu0 %v655_v63, %s9139_s15  ;;  %2466 = vrot.lane.b32.xlu1 %v718_v27, %s9140_s26  ;;  %220 = vst.msk [vmem:[#allocation2 + $0x1e9] sm:$0xff] %vm32_vm0, %v155_v22 }
 0x18d   :  { %v1943_v13 = vpop.permute.xlu0 %1942  ;;  %v2709_v24 = vpop.permute.xlu1 %2708 }
 0x18e   :  { %v3342_v25 = vsel %vm3328_vm12, %v3277_v21, %v2709_v24  ;;  %v3148_v53 = vsel %vm3133_vm9, %v3083_v28, %v1943_v13 }
 0x18f   :  { %1448 = vrot.lane.b32.xlu0 %v655_v63, %s9136_s10  ;;  %1702 = vrot.lane.b32.xlu1 %v718_v27, %s9137_s11  ;;  %v784_v63 = vld [vmem:[#allocation2 + $0x13a] sm:$0xff] }
 0x190   :  { %8634 = vmatmul.mubr.msk.f32.gmra.mrb[12].mxu0 %vm3397_vm13, %v3342_v25  ;;  %v9143_v25 = vmov 1983009808  }
 0x191   :  { %v10161_v33 = vpop.permute.xlu0 %924  ;;  %v10163_v44 = vpop.permute.xlu1 %1178 }
 0x193   :  { %2468 = vrot.lane.b32.xlu0 %v719_v42, %s9140_s26  ;;  %2722 = vrot.lane.b32.xlu1 %v782_v15, %s9142_s1 }
 0x195   :  { %v1945_v60 = vpop.permute.xlu0 %1944  ;;  %v2199_v6 = vpop.permute.xlu1 %2198 }
 0x196   :  { %v3213_v36 = vsel %vm13164_vm10, %v3148_v53, %v2199_v6  ;;  %v3149_v52 = vsel %vm3133_vm9, %v3084_v26, %v1945_v60  ;;  %v2890_v60 = vsel %vm32_vm0, %v9723_v58, %v10149_v4  ;;  %v10255_v6 = vld [vmem:[%s13155_s2] ss:$0 sm:$0xff] }
 0x197   :  { %938 = vrot.lane.b32.xlu0 %v718_v27, %s9135_s30  ;;  %1704 = vrot.lane.b32.xlu1 %v719_v42, %s9137_s11 }
 0x199   :  { %v10169_v32 = vpop.permute.xlu0 %1180  ;;  %v10171_v62 = vpop.permute.xlu1 %1434 }
 0x19b   :  { %1958 = vrot.lane.b32.xlu0 %v782_v15, %s9138_s14  ;;  %2724 = vrot.lane.b32.xlu1 %v783_v29, %s9142_s1 }
 0x19d   :  { %v2201_v23 = vpop.permute.xlu0 %2200  ;;  %v2455_v5 = vpop.permute.xlu1 %2454 }
 0x19e   :  { %v3278_v47 = vsel %vm3263_vm11, %v3213_v36, %v2455_v5  ;;  %v3214_v12 = vsel %vm13164_vm10, %v3149_v52, %v2201_v23  ;;  %v2955_v23 = vsel %vm2938_vm6, %v2890_v60, %v10163_v44  ;;  %v658_v5 = vld [vmem:[#allocation2 + $0x150] sm:$0xff]  ;;  %v659_v52 = vld [vmem:[#allocation2 + $0x158] sm:$0xff] }
 0x19f   :  { %940 = vrot.lane.b32.xlu0 %v719_v42, %s9135_s30  ;;  %1194 = vrot.lane.b32.xlu1 %v782_v15, %s9134_s29  ;;  %v4232_v42 = vunpack.c.l.s4 %v9143_v25  ;;  %v4234_v15 = vlaneseq  ;;  %v3020_v58 = vsel %vm3003_vm7, %v2955_v23, %v10171_v62 }
 0x1a1   :  { %v10184_v41 = vpop.permute.xlu0 %1436  ;;  %v10186_v46 = vpop.permute.xlu1 %1690  ;;  %v4233_v50 = vunpack.c.0.s8 %v4232_v42  ;;  %v10275_v28 = vshrl.u32 %v4234_v15, 7 }
 0x1a2   :  { %v3085_v37 = vsel %vm3068_vm8, %v3020_v58, %v10186_v46 }
 0x1a3   :  { %v10190_v9 = vpop.f32.mrb[0].mxu0  ;;  %1960 = vrot.lane.b32.xlu0 %v783_v29, %s9138_s14  ;;  %2214 = vrot.lane.b32.xlu1 %v656_v45, %s9139_s15  ;;  %v10289_v38 = vsub.s32 %v4233_v50, %v10275_v28 }
 0x1a4   :  { %v10198_v49 = vpop.f32.mrb[1].mxu0 }
 0x1a5   :  { %v2457_v55 = vpop.permute.xlu0 %2456  ;;  %v2711_v59 = vpop.permute.xlu1 %2710  ;;  %v3986_v44 = vadd.f32 %v10255_v6, %v10198_v49 }
 0x1a6   :  { %v3343_v2 = vsel %vm3328_vm12, %v3278_v47, %v2711_v59  ;;  %v3279_v40 = vsel %vm3263_vm11, %v3214_v12, %v2457_v55 }
 0x1a7   :  { %1196 = vrot.lane.b32.xlu0 %v783_v29, %s9134_s29  ;;  %1450 = vrot.lane.b32.xlu1 %v656_v45, %s9136_s10  ;;  %v154_v29 = vld [vmem:[%s13153_s0 + $0x110] sm:$0xff]  ;;  %v3987_v45 = vadd.f32 %v10190_v9, %v10255_v6 }
 0x1a8   :  { %8636 = vmatprep.mubr.msk.f32.mxu0 %vm3397_vm13, %v3343_v2  ;;  %219 = vst.msk [vmem:[#allocation2 + $0x1e1] sm:$0xff] %vm32_vm0, %v154_v29 }
 0x1a9   :  { %v10213_v8 = vpop.permute.xlu0 %926  ;;  %v10215_v61 = vpop.permute.xlu1 %1692  ;;  %v4051_v49 = vmax.f32 %v3987_v45, 0.0 }
 0x1ab   :  { %2216 = vrot.lane.b32.xlu0 %v657_v30, %s9139_s15  ;;  %2470 = vrot.lane.b32.xlu1 %v720_v7, %s9140_s26 }
 0x1ad   :  { %v1947_v1 = vpop.permute.xlu0 %1946  ;;  %v2713_v14 = vpop.permute.xlu1 %2712 }
 0x1ae   :  { %v3344_v11 = vsel %vm3328_vm12, %v3279_v40, %v2713_v14  ;;  %v3150_v53 = vsel %vm3133_vm9, %v3085_v37, %v1947_v1  ;;  %v2891_v14 = vsel %vm32_vm0, %v9750_v17, %v10161_v33  ;;  %v10319_v33 = vsub.s32 0, %v10275_v28 }
 0x1af   :  { %1452 = vrot.lane.b32.xlu0 %v657_v30, %s9136_s10  ;;  %1706 = vrot.lane.b32.xlu1 %v720_v7, %s9137_s11  ;;  %v4050_v30 = vmax.f32 %v3986_v44, 0.0 }
 0x1b0   :  { %8637 = vmatmul.mubr.msk.f32.gmra.mrb[14].mxu0 %vm3397_vm13, %v3344_v11 }
 0x1b1   :  { %v10231_v27 = vpop.permute.xlu0 %928  ;;  %v10233_v39 = vpop.permute.xlu1 %1182 }
 0x1b3   :  { %2472 = vrot.lane.b32.xlu0 %v721_v54, %s9140_s26  ;;  %2726 = vrot.lane.b32.xlu1 %v784_v63, %s9142_s1 }
 0x1b5   :  { %v10237_v56 = vpop.permute.xlu0 %1948  ;;  %v2203_v18 = vpop.permute.xlu1 %2202 }
 0x1b6   :  { %v3215_v62 = vsel %vm13164_vm10, %v3150_v53, %v2203_v18 }
 0x1b7   :  { %942 = vrot.lane.b32.xlu0 %v720_v7, %s9135_s30  ;;  %1708 = vrot.lane.b32.xlu1 %v721_v54, %s9137_s11 }
 0x1b9   :  { %v10241_v48 = vpop.permute.xlu0 %1184  ;;  %v10243_v21 = vpop.permute.xlu1 %1438 }
 0x1bb   :  { %1962 = vrot.lane.b32.xlu0 %v784_v63, %s9138_s14  ;;  %2728 = vrot.lane.b32.xlu1 %v785_v19, %s9142_s1 }
 0x1bd   :  { %v10247_v13 = vpop.permute.xlu0 %2204  ;;  %v2459_v24 = vpop.permute.xlu1 %2458 }
 0x1be   :  { %v3280_v9 = vsel %vm3263_vm11, %v3215_v62, %v2459_v24  ;;  %v723_v62 = vld [vmem:[#allocation2 + $0x159] sm:$0xff] }
 0x1bf   :  { %944 = vrot.lane.b32.xlu0 %v721_v54, %s9135_s30  ;;  %1198 = vrot.lane.b32.xlu1 %v784_v63, %s9134_s29  ;;  %v2956_v63 = vsel %vm2938_vm6, %v2891_v14, %v10169_v32 }
 0x1c0   :  { %v3021_v24 = vsel %vm3003_vm7, %v2956_v63, %v10184_v41 }
 0x1c1   :  { %v10267_v4 = vpop.permute.xlu0 %1440  ;;  %v10269_v35 = vpop.permute.xlu1 %1694  ;;  %v3086_v32 = vsel %vm3068_vm8, %v3021_v24, %v10215_v61 }
 0x1c3   :  { %v8620_v16 = vpop.f32.mrb[2].mxu0  ;;  %1964 = vrot.lane.b32.xlu0 %v785_v19, %s9138_s14  ;;  %2218 = vrot.lane.b32.xlu1 %v658_v5, %s9139_s15 }
 0x1c4   :  { %v3989_v46 = vadd.f32 %v8620_v16, %v10255_v6  ;;  %v3670_v36 = vpop.f32.mrb[3].mxu0 }
 0x1c5   :  { %v3988_v47 = vadd.f32 %v10255_v6, %v3670_v36  ;;  %v10286_v55 = vpop.permute.xlu0 %2460  ;;  %v2715_v59 = vpop.permute.xlu1 %2714 }
 0x1c6   :  { %v4053_v2 = vmax.f32 %v3989_v46, 0.0  ;;  %v3345_v20 = vsel %vm3328_vm12, %v3280_v9, %v2715_v59 }
 0x1c7   :  { %v4052_v7 = vmax.f32 %v3988_v47, 0.0  ;;  %1200 = vrot.lane.b32.xlu0 %v785_v19, %s9134_s29  ;;  %1454 = vrot.lane.b32.xlu1 %v658_v5, %s9136_s10  ;;  %v3151_v5 = vsel %vm3133_vm9, %v3086_v32, %v10237_v56 }
 0x1c8   :  { %v4167_v26 = vmax.f32 %v4051_v49, %v4053_v2  ;;  %8639 = vmatprep.mubr.msk.f32.mxu0 %vm3397_vm13, %v3345_v20  ;;  %v3216_v61 = vsel %vm13164_vm10, %v3151_v5, %v10247_v13  ;;  %v786_v49 = vld [vmem:[#allocation2 + $0x152] sm:$0xff]  ;;  %v787_v5 = vld [vmem:[#allocation2 + $0x15a] sm:$0xff] }
 0x1c9   :  { %v4166_v12 = vmax.f32 %v4050_v30, %v4052_v7  ;;  %v10301_v40 = vpop.permute.xlu0 %930  ;;  %v10303_v1 = vpop.permute.xlu1 %1696  ;;  %v3281_v13 = vsel %vm3263_vm11, %v3216_v61, %v10286_v55 }
 0x1ca   :  { %v4247_v11 = vcombine.high %v4167_v26, %v4167_v26  ;;  %v4254_v54 = vrot.slane %v4167_v26, %v10289_v38 }
 0x1cb   :  { %v4230_v18 = vcombine.high %v4166_v12, %v4166_v12  ;;  %v4237_v19 = vrot.slane %v4166_v12, %v10289_v38  ;;  %2220 = vrot.lane.b32.xlu0 %v659_v52, %s9139_s15  ;;  %2474 = vrot.lane.b32.xlu1 %v10298_v10, %s9140_s26 }
 0x1cc   :  { %v4261_v25 = vrot.slane %v4247_v11, %v10289_v38  ;;  %v4262_v17 = vcombine.high %v4254_v54, %v4254_v54  ;;  %v8137_v58 = vrot.slane %v4254_v54, 9 }
 0x1cd   :  { %v4244_v42 = vrot.slane %v4230_v18, %v10289_v38  ;;  %v4245_v15 = vcombine.high %v4237_v19, %v4237_v19  ;;  %v8133_v60 = vrot.slane %v4237_v19, 9  ;;  %v10324_v29 = vpop.permute.xlu0 %1950  ;;  %v2717_v23 = vpop.permute.xlu1 %2716 }
 0x1ce   :  { %v4263_v41 = vcombine.high %v4261_v25, %v4261_v25  ;;  %v8138_v37 = vrot.slane %v4262_v17, 9  ;;  %v8139_v16 = vrot.slane %v4261_v25, 9  ;;  %v5290_v2 = vmax.f32 %v4254_v54, %v8137_v58 }
 0x1cf   :  { %v4246_v45 = vcombine.high %v4244_v42, %v4244_v42  ;;  %v8134_v50 = vrot.slane %v4245_v15, 9  ;;  %v8135_v44 = vrot.slane %v4244_v42, 9  ;;  %v5286_v53 = vmax.f32 %v4237_v19, %v8133_v60  ;;  %1456 = vrot.lane.b32.xlu0 %v659_v52, %s9136_s10  ;;  %1710 = vrot.lane.b32.xlu1 %v10298_v10, %s9137_s11 }
 0x1d0   :  { %v8140_v56 = vrot.slane %v4263_v41, 9  ;;  %v5291_v20 = vmax.f32 %v4262_v17, %v8138_v37  ;;  %v3346_v52 = vsel %vm3328_vm12, %v3281_v13, %v2717_v23  ;;  %v5292_v12 = vmax.f32 %v4261_v25, %v8139_v16  ;;  %v724_v13 = vld [vmem:[#allocation2 + $0x169] sm:$0xff] }
 0x1d1   :  { %v8136_v46 = vrot.slane %v4246_v45, 9  ;;  %v5287_v36 = vmax.f32 %v4245_v15, %v8134_v50  ;;  %v5288_v9 = vmax.f32 %v4244_v42, %v8135_v44  ;;  %v10333_v47 = vpop.permute.xlu0 %932  ;;  %v10335_v59 = vpop.permute.xlu1 %1186  ;;  %v5545_v30 = vrot.slane %v5286_v53, %v10319_v33  ;;  %8640 = vmatmul.mubr.msk.f32.gmra.mrb[16].mxu0 %vm3397_vm13, %v3346_v52  ;;  %v156_v50 = vld [vmem:[%s13153_s0 + $0x120] sm:$0xff] }
 0x1d2   :  { %v5293_v14 = vmax.f32 %v4263_v41, %v8140_v56  ;;  %v5561_v18 = vrot.slane %v5290_v2, %v10319_v33  ;;  %v5565_v24 = vrot.slane %v5291_v20, %v10319_v33  ;;  %v5569_v17 = vrot.slane %v5292_v12, %v10319_v33  ;;  %221 = vst.msk [vmem:[#allocation2 + $0x1f9] sm:$0xff] %vm32_vm0, %v156_v50  ;;  %v661_v20 = vld [vmem:[#allocation2 + $0x170] sm:$0xff] }
 0x1d3   :  { %v5289_v7 = vmax.f32 %v4246_v45, %v8136_v46  ;;  %v5549_v22 = vrot.slane %v5287_v36, %v10319_v33  ;;  %v5553_v26 = vrot.slane %v5288_v9, %v10319_v33  ;;  %2476 = vrot.lane.b32.xlu0 %v723_v62, %s9140_s26  ;;  %2730 = vrot.lane.b32.xlu1 %v786_v49, %s9142_s1 }
 0x1d4   :  { %v5573_v42 = vrot.slane %v5293_v14, %v10319_v33  ;;  %v2892_v45 = vsel %vm32_vm0, %v9793_v43, %v10213_v8  ;;  %v660_v43 = vld [vmem:[#allocation2 + $0x168] sm:$0xff] }
 0x1d5   :  { %v5557_v11 = vrot.slane %v5289_v7, %v10319_v33  ;;  %v6055_v55 = vsel %vm13163_vm2, %v5549_v22, %v5545_v30  ;;  %v1953_v54 = vpop.permute.xlu0 %1952  ;;  %v2207_v63 = vpop.permute.xlu1 %2206  ;;  %vm6066_vm2 = vcmask 1047559   ;;  %v2957_v44 = vsel %vm2938_vm6, %v2892_v45, %v10233_v39 }
 0x1d6   :  { %v6057_v19 = vsel %vm6056_vm3, %v5553_v26, %v6055_v55  ;;  %v3022_v53 = vsel %vm3003_vm7, %v2957_v44, %v10243_v21  ;;  %v788_v55 = vld [vmem:[#allocation2 + $0x16a] sm:$0xff] }
 0x1d7   :  { %v6059_v25 = vsel %vm6058_vm4, %v5557_v11, %v6057_v19  ;;  %946 = vrot.lane.b32.xlu0 %v10298_v10, %s9135_s30  ;;  %1712 = vrot.lane.b32.xlu1 %v723_v62, %s9137_s11  ;;  %v3087_v8 = vsel %vm3068_vm8, %v3022_v53, %v10269_v35  ;;  %v2893_v35 = vsel %vm32_vm0, %v9820_v3, %v10231_v27 }
 0x1d8   :  { %v6061_v32 = vsel %vm6060_vm5, %v5561_v18, %v6059_v25  ;;  %v2958_v2 = vsel %vm2938_vm6, %v2893_v35, %v10241_v48 }
 0x1d9   :  { %v6063_v15 = vsel %vm6062_vm15, %v5565_v24, %v6061_v32  ;;  %v10359_v60 = vpop.permute.xlu0 %1188  ;;  %v10361_v23 = vpop.permute.xlu1 %1442  ;;  %v3023_v30 = vsel %vm3003_vm7, %v2958_v2, %v10267_v4  ;;  %v789_v24 = vld [vmem:[#allocation2 + $0x172] sm:$0xff]  ;;  %v2894_v32 = vsel %vm32_vm0, %v9863_v31, %v10301_v40  ;;  %v662_v31 = vld [vmem:[#allocation2 + $0x180] sm:$0xff] }
 0x1da   :  { %v6065_v41 = vsel %vm6064_vm1, %v5569_v17, %v6063_v15  ;;  %v3088_v7 = vsel %vm3068_vm8, %v3023_v30, %v10303_v1  ;;  %v725_v1 = vld [vmem:[#allocation2 + $0x171] sm:$0xff]  ;;  %v2959_v15 = vsel %vm2938_vm6, %v2894_v32, %v10335_v59  ;;  %v2895_v30 = vsel %vm32_vm0, %v9892_v51, %v10333_v47 }
 0x1db   :  { %v6067_v10 = vsel %vm6066_vm2, %v5573_v42, %v6065_v41  ;;  %1966 = vrot.lane.b32.xlu0 %v786_v49, %s9138_s14  ;;  %2732 = vrot.lane.b32.xlu1 %v787_v5, %s9142_s1  ;;  %v3153_v22 = vsel %vm3133_vm9, %v3088_v7, %v1953_v54  ;;  %v158_v42 = vld [vmem:[%s13153_s0 + $0x130] sm:$0xff] }
 0x1dc   :  { %6190 = vst.msk [vmem:[#allocation3 + $0x11] sm:$0xff] %vm4114_vm14, %v6067_v10 }
 0x1dd   :  { %v2209_v58 = vpop.permute.xlu0 %2208  ;;  %v2463_v37 = vpop.permute.xlu1 %2462  ;;  %223 = vst.msk [vmem:[#allocation2 + $0x211] sm:$0xff] %vm32_vm0, %v158_v42 }
 0x1de   :  { %v3218_v48 = vsel %vm13164_vm10, %v3153_v22, %v2209_v58  ;;  %v2960_v22 = vsel %vm2938_vm6, %v2895_v30, %v10359_v60 }
 0x1df   :  { %948 = vrot.lane.b32.xlu0 %v723_v62, %s9135_s30  ;;  %1202 = vrot.lane.b32.xlu1 %v786_v49, %s9134_s29  ;;  %v3152_v62 = vsel %vm3133_vm9, %v3087_v8, %v10324_v29  ;;  %v157_v29 = vld [vmem:[%s13153_s0 + $0x128] sm:$0xff] }
 0x1e0   :  { %v3217_v39 = vsel %vm13164_vm10, %v3152_v62, %v2207_v63  ;;  %222 = vst.msk [vmem:[#allocation2 + $0x201] sm:$0xff] %vm32_vm0, %v157_v29 }
 0x1e1   :  { %v10381_v61 = vpop.permute.xlu0 %1444  ;;  %v10383_v16 = vpop.permute.xlu1 %1698  ;;  %v3282_v21 = vsel %vm3263_vm11, %v3217_v39, %v2463_v37 }
 0x1e3   :  { %v8623_v56 = vpop.f32.mrb[4].mxu0  ;;  %1968 = vrot.lane.b32.xlu0 %v787_v5, %s9138_s14  ;;  %2222 = vrot.lane.b32.xlu1 %v660_v43, %s9139_s15 }
 0x1e4   :  { %v3680_v46 = vpop.f32.mrb[5].mxu0  ;;  %v3991_v58 = vadd.f32 %v8623_v56, %v10255_v6 }
 0x1e5   :  { %v2465_v36 = vpop.permute.xlu0 %2464  ;;  %v2719_v9 = vpop.permute.xlu1 %2718  ;;  %v3990_v37 = vadd.f32 %v10255_v6, %v3680_v46 }
 0x1e6   :  { %v3347_v49 = vsel %vm3328_vm12, %v3282_v21, %v2719_v9  ;;  %v3283_v26 = vsel %vm3263_vm11, %v3218_v48, %v2465_v36  ;;  %v4055_v62 = vmax.f32 %v3991_v58, 0.0  ;;  %v159_v36 = vld [vmem:[%s13153_s0 + $0x138] sm:$0xff]  ;;  %v727_v58 = vld [vmem:[#allocation2 + $0x189] sm:$0xff] }
 0x1e7   :  { %1204 = vrot.lane.b32.xlu0 %v787_v5, %s9134_s29  ;;  %8642 = vmatprep.mubr.msk.f32.mxu0 %vm3397_vm13, %v3347_v49  ;;  %v3024_v5 = vsel %vm3003_vm7, %v2959_v15, %v10361_v23  ;;  %v4054_v46 = vmax.f32 %v3990_v37, 0.0  ;;  %v663_v49 = vld [vmem:[#allocation2 + $0x188] sm:$0xff]  ;;  %224 = vst.msk [vmem:[#allocation2 + $0x219] sm:$0xff] %vm32_vm0, %v159_v36  ;;  %v345_v36 = vld [vmem:[#allocation2 + $0x1b1] sm:$0xff] }
 0x1e8   :  { %1458 = vrot.lane.b32.xlu1 %v660_v43, %s9136_s10  ;;  %v3089_v40 = vsel %vm3068_vm8, %v3024_v5, %v10383_v16 }
 0x1e9   :  { %v10408_v3 = vpop.permute.xlu0 %934  ;;  %v10410_v27 = vpop.permute.xlu1 %1700 }
 0x1eb   :  { %2224 = vrot.lane.b32.xlu0 %v661_v20, %s9139_s15 }
 0x1ec   :  { %2478 = vrot.lane.b32.xlu1 %v724_v13, %s9140_s26 }
 0x1ed   :  { %v1955_v52 = vpop.permute.xlu0 %1954  ;;  %v2721_v4 = vpop.permute.xlu1 %2720 }
 0x1ee   :  { %v3348_v12 = vsel %vm3328_vm12, %v3283_v26, %v2721_v4  ;;  %v3154_v59 = vsel %vm3133_vm9, %v3089_v40, %v1955_v52  ;;  %v3025_v52 = vsel %vm3003_vm7, %v2960_v22, %v10381_v61 }
 0x1ef   :  { %1460 = vrot.lane.b32.xlu0 %v661_v20, %s9136_s10  ;;  %8643 = vmatmul.mubr.msk.f32.gmra.mrb[18].mxu0 %vm3397_vm13, %v3348_v12  ;;  %v726_v20 = vld [vmem:[#allocation2 + $0x181] sm:$0xff]  ;;  %v3090_v51 = vsel %vm3068_vm8, %v3025_v52, %v10410_v27 }
 0x1f0   :  { %1714 = vrot.lane.b32.xlu1 %v724_v13, %s9137_s11 }
 0x1f1   :  { %v10423_v14 = vpop.permute.xlu0 %936  ;;  %v10425_v11 = vpop.permute.xlu1 %1190 }
 0x1f3   :  { %2480 = vrot.lane.b32.xlu0 %v725_v1, %s9140_s26 }
 0x1f4   :  { %2734 = vrot.lane.b32.xlu1 %v788_v55, %s9142_s1 }
 0x1f5   :  { %v10429_v54 = vpop.permute.xlu0 %1956  ;;  %v2211_v63 = vpop.permute.xlu1 %2210 }
 0x1f6   :  { %v3219_v50 = vsel %vm13164_vm10, %v3154_v59, %v2211_v63 }
 0x1f7   :  { %950 = vrot.lane.b32.xlu0 %v724_v13, %s9135_s30 }
 0x1f8   :  { %1716 = vrot.lane.b32.xlu1 %v725_v1, %s9137_s11 }
 0x1f9   :  { %v10433_v18 = vpop.permute.xlu0 %1192  ;;  %v10435_v19 = vpop.permute.xlu1 %1446 }
 0x1fb   :  { %1970 = vrot.lane.b32.xlu0 %v788_v55, %s9138_s14 }
 0x1fc   :  { %2736 = vrot.lane.b32.xlu1 %v789_v24, %s9142_s1 }
 0x1fd   :  { %v10439_v25 = vpop.permute.xlu0 %2212  ;;  %v2467_v17 = vpop.permute.xlu1 %2466 }
 0x1fe   :  { %v3284_v53 = vsel %vm3263_vm11, %v3219_v50, %v2467_v17 }
 0x1ff   :  { %952 = vrot.lane.b32.xlu0 %v725_v1, %s9135_s30 }
 0x200   :  { %1206 = vrot.lane.b32.xlu1 %v788_v55, %s9134_s29 }
 0x201   :  { %v10454_v41 = vpop.permute.xlu0 %1448  ;;  %v10456_v10 = vpop.permute.xlu1 %1702 }
 0x203   :  { %v8626_v45 = vpop.f32.mrb[6].mxu0  ;;  %1972 = vrot.lane.b32.xlu0 %v789_v24, %s9138_s14 }
 0x204   :  { %v3993_v23 = vadd.f32 %v8626_v45, %v10255_v6  ;;  %2226 = vrot.lane.b32.xlu1 %v662_v31, %s9139_s15  ;;  %v3690_v44 = vpop.f32.mrb[7].mxu0 }
 0x205   :  { %v3992_v16 = vadd.f32 %v10255_v6, %v3690_v44  ;;  %v2469_v43 = vpop.permute.xlu0 %2468  ;;  %v2723_v8 = vpop.permute.xlu1 %2722  ;;  %v790_v44 = vld [vmem:[#allocation2 + $0x182] sm:$0xff] }
 0x206   :  { %v4057_v56 = vmax.f32 %v3993_v23, 0.0  ;;  %v3349_v39 = vsel %vm3328_vm12, %v3284_v53, %v2723_v8 }
 0x207   :  { %v4056_v21 = vmax.f32 %v3992_v16, 0.0  ;;  %1208 = vrot.lane.b32.xlu0 %v789_v24, %s9134_s29  ;;  %8645 = vmatprep.mubr.msk.f32.mxu0 %vm3397_vm13, %v3349_v39  ;;  %v3155_v24 = vsel %vm3133_vm9, %v3090_v51, %v10429_v54 }
 0x208   :  { %v4169_v9 = vmax.f32 %v4055_v62, %v4057_v56  ;;  %1462 = vrot.lane.b32.xlu1 %v662_v31, %s9136_s10  ;;  %v3220_v27 = vsel %vm13164_vm10, %v3155_v24, %v10439_v25  ;;  %vm13165_vm10 = vcmask 1041409  }
 0x209   :  { %v4168_v35 = vmax.f32 %v4054_v46, %v4056_v21  ;;  %v10477_v29 = vpop.permute.xlu0 %938  ;;  %v10479_v2 = vpop.permute.xlu1 %1704  ;;  %v3285_v62 = vsel %vm3263_vm11, %v3220_v27, %v2469_v43 }
 0x20a   :  { %v4281_v13 = vcombine.high %v4169_v9, %v4169_v9  ;;  %v4288_v7 = vrot.slane %v4169_v9, %v10289_v38 }
 0x20b   :  { %v4264_v48 = vcombine.high %v4168_v35, %v4168_v35  ;;  %v4271_v26 = vrot.slane %v4168_v35, %v10289_v38  ;;  %2228 = vrot.lane.b32.xlu0 %v663_v49, %s9139_s15 }
 0x20c   :  { %v4295_v4 = vrot.slane %v4281_v13, %v10289_v38  ;;  %v4296_v12 = vcombine.high %v4288_v7, %v4288_v7  ;;  %2482 = vrot.lane.b32.xlu1 %v726_v20, %s9140_s26  ;;  %v8145_v61 = vrot.slane %v4288_v7, 9 }
 0x20d   :  { %v4278_v47 = vrot.slane %v4264_v48, %v10289_v38  ;;  %v4279_v1 = vcombine.high %v4271_v26, %v4271_v26  ;;  %v8141_v60 = vrot.slane %v4271_v26, 9  ;;  %v10496_v55 = vpop.permute.xlu0 %1958  ;;  %v2725_v63 = vpop.permute.xlu1 %2724 }
 0x20e   :  { %v4297_v17 = vcombine.high %v4295_v4, %v4295_v4  ;;  %v8146_v32 = vrot.slane %v4296_v12, 9  ;;  %v8147_v40 = vrot.slane %v4295_v4, 9  ;;  %v5298_v53 = vmax.f32 %v4288_v7, %v8145_v61  ;;  %v409_v61 = vld [vmem:[#allocation2 + $0x1b2] sm:$0xff] }
 0x20f   :  { %v4280_v42 = vcombine.high %v4278_v47, %v4278_v47  ;;  %v8142_v15 = vrot.slane %v4279_v1, 9  ;;  %v8143_v5 = vrot.slane %v4278_v47, 9  ;;  %v5294_v31 = vmax.f32 %v4271_v26, %v8141_v60  ;;  %1464 = vrot.lane.b32.xlu0 %v663_v49, %s9136_s10 }
 0x210   :  { %1718 = vrot.lane.b32.xlu1 %v726_v20, %s9137_s11  ;;  %v8148_v37 = vrot.slane %v4297_v17, 9  ;;  %v5299_v16 = vmax.f32 %v4296_v12, %v8146_v32  ;;  %v3350_v46 = vsel %vm3328_vm12, %v3285_v62, %v2725_v63  ;;  %v5300_v21 = vmax.f32 %v4295_v4, %v8147_v40  ;;  %v346_v63 = vld [vmem:[#allocation2 + $0x1b9] sm:$0xff]  ;;  %v9093_v32 = vld [vmem:[#allocation2 + $0x108] sm:$0xff] }
 0x211   :  { %v8144_v59 = vrot.slane %v4280_v42, 9  ;;  %v5295_v45 = vmax.f32 %v4279_v1, %v8142_v15  ;;  %v5296_v54 = vmax.f32 %v4278_v47, %v8143_v5  ;;  %v10504_v50 = vpop.permute.xlu0 %940  ;;  %v10506_v23 = vpop.permute.xlu1 %1194  ;;  %v5577_v8 = vrot.slane %v5294_v31, %v10319_v33  ;;  %8646 = vmatmul.mubr.msk.f32.gmra.mrb[20].mxu0 %vm3397_vm13, %v3350_v46  ;;  %v791_v47 = vld [vmem:[#allocation2 + $0x18a] sm:$0xff]  ;;  %v160_v15 = vld [vmem:[%s13153_s0 + $0x140] sm:$0xff] }
 0x212   :  { %v5301_v9 = vmax.f32 %v4297_v17, %v8148_v37  ;;  %v5593_v30 = vrot.slane %v5298_v53, %v10319_v33  ;;  %v5597_v7 = vrot.slane %v5299_v16, %v10319_v33  ;;  %v5601_v48 = vrot.slane %v5300_v21, %v10319_v33  ;;  %225 = vst.msk [vmem:[#allocation2 + $0x229] sm:$0xff] %vm32_vm0, %v160_v15  ;;  %v473_v16 = vld [vmem:[#allocation2 + $0x1c8] sm:$0xff]  ;;  %v666_v15 = vld [vmem:[#allocation2 + $0x1e0] sm:$0xff] }
 0x213   :  { %v5297_v25 = vmax.f32 %v4280_v42, %v8144_v59  ;;  %v5581_v56 = vrot.slane %v5295_v45, %v10319_v33  ;;  %v5585_v39 = vrot.slane %v5296_v54, %v10319_v33  ;;  %2484 = vrot.lane.b32.xlu0 %v727_v58, %s9140_s26  ;;  %v2896_v42 = vsel %vm32_vm0, %v9093_v32, %v10408_v3  ;;  %v664_v3 = vld [vmem:[#allocation2 + $0x198] sm:$0xff] }
 0x214   :  { %2738 = vrot.lane.b32.xlu1 %v790_v44, %s9142_s1  ;;  %v5605_v52 = vrot.slane %v5301_v9, %v10319_v33  ;;  %v2961_v5 = vsel %vm2938_vm6, %v2896_v42, %v10425_v11  ;;  %v410_v45 = vld [vmem:[#allocation2 + $0x1ba] sm:$0xff] }
 0x215   :  { %v5589_v49 = vrot.slane %v5297_v25, %v10319_v33  ;;  %v6068_v43 = vsel %vm13165_vm10, %v5581_v56, %v5577_v8  ;;  %v1961_v35 = vpop.permute.xlu0 %1960  ;;  %v2215_v20 = vpop.permute.xlu1 %2214  ;;  %v3026_v31 = vsel %vm3003_vm7, %v2961_v5, %v10435_v19  ;;  %vm13166_vm10 = vcmask 146432   ;;  %v161_v8 = vld [vmem:[%s13153_s0 + $0x148] sm:$0xff]  ;;  %v665_v25 = vld [vmem:[#allocation2 + $0x1a0] sm:$0xff] }
 0x216   :  { %v6069_v13 = vsel %vm6056_vm3, %v5585_v39, %v6068_v43  ;;  %226 = vst.msk [vmem:[#allocation2 + $0x231] sm:$0xff] %vm32_vm0, %v161_v8  ;;  %v728_v39 = vld [vmem:[#allocation2 + $0x199] sm:$0xff]  ;;  %v537_v43 = vld [vmem:[#allocation2 + $0x1c9] sm:$0xff] }
 0x217   :  { %v6070_v22 = vsel %vm6058_vm4, %v5589_v49, %v6069_v13  ;;  %954 = vrot.lane.b32.xlu0 %v345_v36, %s9135_s30  ;;  %v474_v36 = vld [vmem:[#allocation2 + $0x1d0] sm:$0xff]  ;;  %v792_v13 = vld [vmem:[#allocation2 + $0x19a] sm:$0xff] }
 0x218   :  { %v6071_v26 = vsel %vm6060_vm5, %v5593_v30, %v6070_v22  ;;  %1720 = vrot.lane.b32.xlu1 %v727_v58, %s9137_s11  ;;  %v3091_v58 = vsel %vm3068_vm8, %v3026_v31, %v10456_v10 }
 0x219   :  { %v6072_v4 = vsel %vm6062_vm15, %v5597_v7, %v6071_v26  ;;  %v10528_v12 = vpop.permute.xlu0 %1196  ;;  %v10530_v51 = vpop.permute.xlu1 %1450  ;;  %v3156_v37 = vsel %vm3133_vm9, %v3091_v58, %v10496_v55  ;;  %v2897_v55 = vsel %vm32_vm0, %v10072_v34, %v10423_v14  ;;  %v601_v26 = vld [vmem:[#allocation2 + $0x1ca] sm:$0xff] }
 0x21a   :  { %v6073_v1 = vsel %vm6064_vm1, %v5601_v48, %v6072_v4  ;;  %v3221_v11 = vsel %vm13166_vm10, %v3156_v37, %v2215_v20  ;;  %v2962_v62 = vsel %vm2938_vm6, %v2897_v55, %v10433_v18  ;;  %v538_v48 = vld [vmem:[#allocation2 + $0x1d1] sm:$0xff] }
 0x21b   :  { %v6074_v60 = vsel %vm6066_vm2, %v5605_v52, %v6073_v1  ;;  %1974 = vrot.lane.b32.xlu0 %v790_v44, %s9138_s14  ;;  %v3027_v56 = vsel %vm3003_vm7, %v2962_v62, %v10454_v41 }
 0x21c   :  { %6191 = vst.msk [vmem:[#allocation3 + $0x21] sm:$0xff] %vm4114_vm14, %v6074_v60  ;;  %2740 = vrot.lane.b32.xlu1 %v791_v47, %s9142_s1  ;;  %v3092_v46 = vsel %vm3068_vm8, %v3027_v56, %v10479_v2  ;;  %v729_v2 = vld [vmem:[#allocation2 + $0x1a1] sm:$0xff] }
 0x21d   :  { %v2217_v24 = vpop.permute.xlu0 %2216  ;;  %v2471_v17 = vpop.permute.xlu1 %2470  ;;  %v3157_v21 = vsel %vm3133_vm9, %v3092_v46, %v1961_v35  ;;  %v9094_v56 = vld [vmem:[#allocation2 + $0x128] sm:$0xff] }
 0x21e   :  { %v3286_v54 = vsel %vm3263_vm11, %v3221_v11, %v2471_v17  ;;  %v3222_v18 = vsel %vm13166_vm10, %v3157_v21, %v2217_v24  ;;  %v2898_v24 = vsel %vm32_vm0, %v10118_v57, %v10477_v29  ;;  %v602_v17 = vld [vmem:[#allocation2 + $0x1d2] sm:$0xff] }
 0x21f   :  { %956 = vrot.lane.b32.xlu0 %v346_v63, %s9135_s30  ;;  %v162_v63 = vld [vmem:[%s13153_s0 + $0x150] sm:$0xff] }
 0x220   :  { %1210 = vrot.lane.b32.xlu1 %v409_v61, %s9134_s29  ;;  %227 = vst.msk [vmem:[#allocation2 + $0x241] sm:$0xff] %vm32_vm0, %v162_v63  ;;  %v2963_v61 = vsel %vm2938_vm6, %v2898_v24, %v10506_v23 }
 0x221   :  { %v10549_v27 = vpop.permute.xlu0 %1452  ;;  %v10551_v40 = vpop.permute.xlu1 %1706  ;;  %v3028_v5 = vsel %vm3003_vm7, %v2963_v61, %v10530_v51 }
 0x222   :  { %v3093_v57 = vsel %vm3068_vm8, %v3028_v5, %v10551_v40  ;;  %v731_v5 = vld [vmem:[#allocation2 + $0x1e9] sm:$0xff] }
 0x223   :  { %v10557_v59 = vpop.f32.mrb[8].mxu0  ;;  %1976 = vrot.lane.b32.xlu0 %v791_v47, %s9138_s14  ;;  %v793_v47 = vld [vmem:[#allocation2 + $0x1a2] sm:$0xff] }
 0x224   :  { %2230 = vrot.lane.b32.xlu1 %v664_v3, %s9139_s15  ;;  %v10562_v19 = vpop.f32.mrb[9].mxu0  ;;  %v3995_v31 = vadd.f32 %v10557_v59, %v10255_v6 }
 0x225   :  { %v2473_v44 = vpop.permute.xlu0 %2472  ;;  %v2727_v53 = vpop.permute.xlu1 %2726  ;;  %v3994_v29 = vadd.f32 %v10255_v6, %v10562_v19 }
 0x226   :  { %v3351_v10 = vsel %vm3328_vm12, %v3286_v54, %v2727_v53  ;;  %v3287_v9 = vsel %vm3263_vm11, %v3222_v18, %v2473_v44 }
 0x227   :  { %1212 = vrot.lane.b32.xlu0 %v410_v45, %s9134_s29  ;;  %8648 = vmatprep.mubr.msk.f32.mxu0 %vm3397_vm13, %v3351_v10  ;;  %v4059_v45 = vmax.f32 %v3995_v31, 0.0  ;;  %v4058_v44 = vmax.f32 %v3994_v29, 0.0  ;;  %v163_v10 = vld [vmem:[%s13153_s0 + $0x158] sm:$0xff] }
 0x228   :  { %1466 = vrot.lane.b32.xlu1 %v473_v16, %s9136_s10  ;;  %228 = vst.msk [vmem:[#allocation2 + $0x249] sm:$0xff] %vm32_vm0, %v163_v10 }
 0x229   :  { %v10580_v34 = vpop.permute.xlu0 %942  ;;  %v10582_v14 = vpop.permute.xlu1 %1708 }
 0x22b   :  { %2232 = vrot.lane.b32.xlu0 %v665_v25, %s9139_s15  ;;  %v730_v25 = vld [vmem:[#allocation2 + $0x1e1] sm:$0xff] }
 0x22c   :  { %2486 = vrot.lane.b32.xlu1 %v728_v39, %s9140_s26  ;;  %v2899_v39 = vsel %vm32_vm0, %v9094_v56, %v10504_v50 }
 0x22d   :  { %v1963_v41 = vpop.permute.xlu0 %1962  ;;  %v2729_v49 = vpop.permute.xlu1 %2728 }
 0x22e   :  { %v3352_v20 = vsel %vm3328_vm12, %v3287_v9, %v2729_v49  ;;  %v3158_v23 = vsel %vm3133_vm9, %v3093_v57, %v1963_v41 }
 0x22f   :  { %1468 = vrot.lane.b32.xlu0 %v474_v36, %s9136_s10  ;;  %8649 = vmatmul.mubr.msk.f32.gmra.mrb[22].mxu0 %vm3397_vm13, %v3352_v20  ;;  %v2964_v36 = vsel %vm2938_vm6, %v2899_v39, %v10528_v12 }
 0x230   :  { %1722 = vrot.lane.b32.xlu1 %v537_v43, %s9137_s11  ;;  %v3029_v49 = vsel %vm3003_vm7, %v2964_v36, %v10549_v27 }
 0x231   :  { %v10595_v35 = vpop.permute.xlu0 %944  ;;  %v10597_v30 = vpop.permute.xlu1 %1198  ;;  %v3094_v50 = vsel %vm3068_vm8, %v3029_v49, %v10582_v14  ;;  %v795_v49 = vld [vmem:[#allocation2 + $0x1ea] sm:$0xff] }
 0x233   :  { %2488 = vrot.lane.b32.xlu0 %v729_v2, %s9140_s26 }
 0x234   :  { %2742 = vrot.lane.b32.xlu1 %v792_v13, %s9142_s1 }
 0x235   :  { %v10601_v7 = vpop.permute.xlu0 %1964  ;;  %v2219_v22 = vpop.permute.xlu1 %2218 }
 0x236   :  { %v3223_v51 = vsel %vm13166_vm10, %v3158_v23, %v2219_v22  ;;  %v794_v23 = vld [vmem:[#allocation2 + $0x1e2] sm:$0xff] }
 0x237   :  { %958 = vrot.lane.b32.xlu0 %v537_v43, %s9135_s30 }
 0x238   :  { %1724 = vrot.lane.b32.xlu1 %v538_v48, %s9137_s11 }
 0x239   :  { %v10605_v52 = vpop.permute.xlu0 %1200  ;;  %v10607_v4 = vpop.permute.xlu1 %1454 }
 0x23b   :  { %1978 = vrot.lane.b32.xlu0 %v601_v26, %s9138_s14 }
 0x23c   :  { %2744 = vrot.lane.b32.xlu1 %v793_v47, %s9142_s1 }
 0x23d   :  { %v10611_v1 = vpop.permute.xlu0 %2220  ;;  %v2475_v60 = vpop.permute.xlu1 %2474 }
 0x23e   :  { %v3288_v40 = vsel %vm3263_vm11, %v3223_v51, %v2475_v60 }
 0x23f   :  { %960 = vrot.lane.b32.xlu0 %v538_v48, %s9135_s30  ;;  %v3159_v48 = vsel %vm3133_vm9, %v3094_v50, %v10601_v7 }
 0x240   :  { %1214 = vrot.lane.b32.xlu1 %v601_v26, %s9134_s29  ;;  %v3224_v14 = vsel %vm13166_vm10, %v3159_v48, %v10611_v1  ;;  %vm13167_vm10 = vcmask 1041409  }
 0x241   :  { %v10624_v32 = vpop.permute.xlu0 %1456  ;;  %v10626_v42 = vpop.permute.xlu1 %1710 }
 0x243   :  { %v8632_v3 = vpop.f32.mrb[10].mxu0  ;;  %1980 = vrot.lane.b32.xlu0 %v602_v17, %s9138_s14 }
 0x244   :  { %v3997_v58 = vadd.f32 %v8632_v3, %v10255_v6  ;;  %2234 = vrot.lane.b32.xlu1 %v666_v15, %s9139_s15  ;;  %v3710_v37 = vpop.f32.mrb[11].mxu0 }
 0x245   :  { %v3996_v59 = vadd.f32 %v10255_v6, %v3710_v37  ;;  %v2477_v11 = vpop.permute.xlu0 %2476  ;;  %v2731_v19 = vpop.permute.xlu1 %2730  ;;  %v667_v6 = vld [vmem:[#allocation2 + $0x1e8] sm:$0xff] }
 0x246   :  { %v4061_v54 = vmax.f32 %v3997_v58, 0.0  ;;  %v3353_v16 = vsel %vm3328_vm12, %v3288_v40, %v2731_v19 }
 0x247   :  { %v4060_v53 = vmax.f32 %v3996_v59, 0.0  ;;  %1216 = vrot.lane.b32.xlu0 %v602_v17, %s9134_s29  ;;  %8651 = vmatprep.mubr.msk.f32.mxu0 %vm3397_vm13, %v3353_v16  ;;  %v3289_v59 = vsel %vm3263_vm11, %v3224_v14, %v2477_v11 }
 0x248   :  { %v4171_v55 = vmax.f32 %v4059_v45, %v4061_v54  ;;  %1470 = vrot.lane.b32.xlu1 %v666_v15, %s9136_s10 }
 0x249   :  { %v4170_v8 = vmax.f32 %v4058_v44, %v4060_v53  ;;  %v10651_v62 = vpop.permute.xlu0 %946  ;;  %v10656_v18 = vpop.permute.xlu1 %1712 }
 0x24a   :  { %v4315_v46 = vcombine.high %v4171_v55, %v4171_v55  ;;  %v4322_v21 = vrot.slane %v4171_v55, %v10289_v38 }
 0x24b   :  { %v4298_v9 = vcombine.high %v4170_v8, %v4170_v8  ;;  %v4305_v41 = vrot.slane %v4170_v8, %v10289_v38  ;;  %2236 = vrot.lane.b32.xlu0 %v667_v6, %s9139_s15 }
 0x24c   :  { %v4329_v43 = vrot.slane %v4315_v46, %v10289_v38  ;;  %v4330_v20 = vcombine.high %v4322_v21, %v4322_v21  ;;  %2490 = vrot.lane.b32.xlu1 %v730_v25, %s9140_s26  ;;  %v8153_v47 = vrot.slane %v4322_v21, 9 }
 0x24d   :  { %v4312_v2 = vrot.slane %v4298_v9, %v10289_v38  ;;  %v4313_v13 = vcombine.high %v4305_v41, %v4305_v41  ;;  %v8149_v12 = vrot.slane %v4305_v41, 9  ;;  %v10669_v22 = vpop.permute.xlu0 %1966  ;;  %v2733_v60 = vpop.permute.xlu1 %2732 }
 0x24e   :  { %v4331_v26 = vcombine.high %v4329_v43, %v4329_v43  ;;  %v8154_v27 = vrot.slane %v4330_v20, 9  ;;  %v8155_v15 = vrot.slane %v4329_v43, 9  ;;  %v5306_v58 = vmax.f32 %v4322_v21, %v8153_v47 }
 0x24f   :  { %v4314_v63 = vcombine.high %v4312_v2, %v4312_v2  ;;  %v8150_v24 = vrot.slane %v4313_v13, 9  ;;  %v8151_v17 = vrot.slane %v4312_v2, 9  ;;  %v5302_v61 = vmax.f32 %v4305_v41, %v8149_v12  ;;  %1472 = vrot.lane.b32.xlu0 %v667_v6, %s9136_s10  ;;  %v9095_v12 = vld [vmem:[#allocation2 + $0x138] sm:$0xff] }
 0x250   :  { %1726 = vrot.lane.b32.xlu1 %v730_v25, %s9137_s11  ;;  %v8156_v31 = vrot.slane %v4331_v26, 9  ;;  %v5307_v37 = vmax.f32 %v4330_v20, %v8154_v27  ;;  %v3354_v19 = vsel %vm3328_vm12, %v3289_v59, %v2733_v60  ;;  %v5308_v44 = vmax.f32 %v4329_v43, %v8155_v15  ;;  %v668_v27 = vld [vmem:[#allocation2 + $0x1f8] sm:$0xff] }
 0x251   :  { %v8152_v57 = vrot.slane %v4314_v63, 9  ;;  %v5303_v7 = vmax.f32 %v4313_v13, %v8150_v24  ;;  %v5304_v29 = vmax.f32 %v4312_v2, %v8151_v17  ;;  %v10677_v3 = vpop.permute.xlu0 %948  ;;  %v5609_v51 = vrot.slane %v5302_v61, %v10319_v33  ;;  %v10681_v45 = vpop.permute.xlu1 %1202  ;;  %8652 = vmatmul.mubr.msk.f32.gmra.mrb[24].mxu0 %vm3397_vm13, %v3354_v19  ;;  %v164_v13 = vld [vmem:[%s13153_s0 + $0x160] sm:$0xff] }
 0x252   :  { %v5309_v53 = vmax.f32 %v4331_v26, %v8156_v31  ;;  %v5625_v55 = vrot.slane %v5306_v58, %v10319_v33  ;;  %v5629_v56 = vrot.slane %v5307_v37, %v10319_v33  ;;  %v5633_v46 = vrot.slane %v5308_v44, %v10319_v33  ;;  %229 = vst.msk [vmem:[#allocation2 + $0x259] sm:$0xff] %vm32_vm0, %v164_v13  ;;  %v9096_v31 = vld [vmem:[#allocation2 + $0x140] sm:$0xff] }
 0x253   :  { %v5305_v1 = vmax.f32 %v4314_v63, %v8152_v57  ;;  %v5613_v40 = vrot.slane %v5303_v7, %v10319_v33  ;;  %v5617_v54 = vrot.slane %v5304_v29, %v10319_v33  ;;  %2492 = vrot.lane.b32.xlu0 %v731_v5, %s9140_s26  ;;  %v2900_v48 = vsel %vm32_vm0, %v9095_v12, %v10580_v34  ;;  %v669_v57 = vld [vmem:[#allocation2 + $0x200] sm:$0xff] }
 0x254   :  { %2746 = vrot.lane.b32.xlu1 %v794_v23, %s9142_s1  ;;  %v5637_v36 = vrot.slane %v5309_v53, %v10319_v33  ;;  %v2965_v26 = vsel %vm2938_vm6, %v2900_v48, %v10597_v30  ;;  %v796_v19 = vld [vmem:[#allocation2 + $0x1fa] sm:$0xff] }
 0x255   :  { %v5621_v16 = vrot.slane %v5305_v1, %v10319_v33  ;;  %v6075_v11 = vsel %vm13167_vm10, %v5613_v40, %v5609_v51  ;;  %v1969_v10 = vpop.permute.xlu0 %1968  ;;  %v2223_v8 = vpop.permute.xlu1 %2222  ;;  %v3030_v60 = vsel %vm3003_vm7, %v2965_v26, %v10607_v4  ;;  %vm13168_vm10 = vcmask 146432  }
 0x256   :  { %v6076_v6 = vsel %vm6056_vm3, %v5617_v54, %v6075_v11  ;;  %v3095_v24 = vsel %vm3068_vm8, %v3030_v60, %v10626_v42  ;;  %v165_v42 = vld [vmem:[%s13153_s0 + $0x168] sm:$0xff] }
 0x257   :  { %v6077_v39 = vsel %vm6058_vm4, %v5621_v16, %v6076_v6  ;;  %962 = vrot.lane.b32.xlu0 %v730_v25, %s9135_s30  ;;  %v3160_v34 = vsel %vm3133_vm9, %v3095_v24, %v10669_v22  ;;  %v2901_v22 = vsel %vm32_vm0, %v9096_v31, %v10595_v35  ;;  %230 = vst.msk [vmem:[#allocation2 + $0x261] sm:$0xff] %vm32_vm0, %v165_v42  ;;  %v734_v31 = vld [vmem:[#allocation2 + $0x211] sm:$0xff] }
 0x258   :  { %v6078_v21 = vsel %vm6060_vm5, %v5625_v55, %v6077_v39  ;;  %1728 = vrot.lane.b32.xlu1 %v731_v5, %s9137_s11  ;;  %v3225_v61 = vsel %vm13168_vm10, %v3160_v34, %v2223_v8  ;;  %v2966_v7 = vsel %vm2938_vm6, %v2901_v22, %v10605_v52  ;;  %v9097_v39 = vld [vmem:[#allocation2 + $0x150] sm:$0xff]  ;;  %v9099_v22 = vld [vmem:[#allocation2 + $0x158] sm:$0xff] }
 0x259   :  { %v6079_v9 = vsel %vm6062_vm15, %v5629_v56, %v6078_v21  ;;  %v10701_v41 = vpop.permute.xlu0 %1204  ;;  %v3031_v58 = vsel %vm3003_vm7, %v2966_v7, %v10624_v32  ;;  %v733_v32 = vld [vmem:[#allocation2 + $0x201] sm:$0xff]  ;;  %v166_v56 = vld [vmem:[%s13153_s0 + $0x170] sm:$0xff] }
 0x25a   :  { %v6080_v43 = vsel %vm6064_vm1, %v5633_v46, %v6079_v9  ;;  %v10704_v20 = vpop.permute.xlu1 %1458  ;;  %v3096_v35 = vsel %vm3068_vm8, %v3031_v58, %v10656_v18  ;;  %v2902_v46 = vsel %vm32_vm0, %v9097_v39, %v10651_v62  ;;  %231 = vst.msk [vmem:[#allocation2 + $0x271] sm:$0xff] %vm32_vm0, %v166_v56  ;;  %v670_v9 = vld [vmem:[#allocation2 + $0x210] sm:$0xff] }
 0x25b   :  { %v6081_v50 = vsel %vm6066_vm2, %v5637_v36, %v6080_v43  ;;  %1982 = vrot.lane.b32.xlu0 %v794_v23, %s9138_s14  ;;  %v3161_v51 = vsel %vm3133_vm9, %v3096_v35, %v1969_v10  ;;  %v797_v10 = vld [vmem:[#allocation2 + $0x202] sm:$0xff]  ;;  %v2967_v21 = vsel %vm2938_vm6, %v2902_v46, %v10681_v45  ;;  %v10802_v43 = vld [vmem:[%s13155_s2] ss:$0 sm:$0xff] }
 0x25c   :  { %6192 = vst.msk [vmem:[#allocation3 + $0x31] sm:$0xff] %vm4114_vm14, %v6081_v50  ;;  %2748 = vrot.lane.b32.xlu1 %v795_v49, %s9142_s1 }
 0x25d   :  { %v2225_v25 = vpop.permute.xlu0 %2224 }
 0x25e   :  { %v2479_v2 = vpop.permute.xlu1 %2478  ;;  %v3226_v59 = vsel %vm13168_vm10, %v3161_v51, %v2225_v25 }
 0x25f   :  { %964 = vrot.lane.b32.xlu0 %v731_v5, %s9135_s30  ;;  %v3290_v4 = vsel %vm3263_vm11, %v3225_v61, %v2479_v2 }
 0x260   :  { %1218 = vrot.lane.b32.xlu1 %v794_v23, %s9134_s29  ;;  %v732_v23 = vld [vmem:[#allocation2 + $0x1f9] sm:$0xff] }
 0x261   :  { %v10720_v47 = vpop.permute.xlu0 %1460 }
 0x262   :  { %v10724_v63 = vpop.permute.xlu1 %1714 }
 0x263   :  { %v10728_v17 = vpop.f32.mrb[12].mxu0  ;;  %1984 = vrot.lane.b32.xlu0 %v795_v49, %s9138_s14 }
 0x264   :  { %2238 = vrot.lane.b32.xlu1 %v668_v27, %s9139_s15  ;;  %v10734_v30 = vpop.f32.mrb[13].mxu0  ;;  %v3999_v62 = vadd.f32 %v10802_v43, %v10728_v17 }
 0x265   :  { %v2481_v14 = vpop.permute.xlu0 %2480  ;;  %v3998_v45 = vadd.f32 %v10802_v43, %v10734_v30 }
 0x266   :  { %v2735_v15 = vpop.permute.xlu1 %2734  ;;  %v3291_v1 = vsel %vm3263_vm11, %v3226_v59, %v2481_v14  ;;  %v4063_v60 = vmax.f32 %v3999_v62, 0.0  ;;  %v167_v14 = vld [vmem:[%s13153_s0 + $0x178] sm:$0xff] }
 0x267   :  { %v3355_v5 = vsel %vm3328_vm12, %v3290_v4, %v2735_v15  ;;  %1220 = vrot.lane.b32.xlu0 %v795_v49, %s9134_s29  ;;  %v3032_v49 = vsel %vm3003_vm7, %v2967_v21, %v10704_v20  ;;  %v4062_v34 = vmax.f32 %v3998_v45, 0.0  ;;  %v671_v15 = vld [vmem:[#allocation2 + $0x218] sm:$0xff]  ;;  %232 = vst.msk [vmem:[#allocation2 + $0x279] sm:$0xff] %vm32_vm0, %v167_v14 }
 0x268   :  { %1474 = vrot.lane.b32.xlu1 %v668_v27, %s9136_s10  ;;  %8654 = vmatprep.mubr.msk.f32.mxu0 %vm3397_vm13, %v3355_v5  ;;  %v3097_v25 = vsel %vm3068_vm8, %v3032_v49, %v10724_v63  ;;  %v735_v62 = vld [vmem:[#allocation2 + $0x219] sm:$0xff] }
 0x269   :  { %v10750_v29 = vpop.permute.xlu0 %950 }
 0x26a   :  { %v10754_v37 = vpop.permute.xlu1 %1716 }
 0x26b   :  { %2240 = vrot.lane.b32.xlu0 %v669_v57, %s9139_s15 }
 0x26c   :  { %2494 = vrot.lane.b32.xlu1 %v732_v23, %s9140_s26 }
 0x26d   :  { %v1971_v52 = vpop.permute.xlu0 %1970 }
 0x26e   :  { %v2737_v40 = vpop.permute.xlu1 %2736  ;;  %v3162_v20 = vsel %vm3133_vm9, %v3097_v25, %v1971_v52 }
 0x26f   :  { %v3356_v54 = vsel %vm3328_vm12, %v3291_v1, %v2737_v40  ;;  %1476 = vrot.lane.b32.xlu0 %v669_v57, %s9136_s10  ;;  %v2903_v57 = vsel %vm32_vm0, %v9099_v22, %v10677_v3 }
 0x270   :  { %1730 = vrot.lane.b32.xlu1 %v732_v23, %s9137_s11  ;;  %8655 = vmatmul.mubr.msk.f32.gmra.mrb[26].mxu0 %vm3397_vm13, %v3356_v54  ;;  %v2968_v35 = vsel %vm2938_vm6, %v2903_v57, %v10701_v41 }
 0x271   :  { %v10767_v18 = vpop.permute.xlu0 %952  ;;  %v3033_v52 = vsel %vm3003_vm7, %v2968_v35, %v10720_v47 }
 0x272   :  { %v10769_v44 = vpop.permute.xlu1 %1206  ;;  %v3098_v3 = vsel %vm3068_vm8, %v3033_v52, %v10754_v37 }
 0x273   :  { %2496 = vrot.lane.b32.xlu0 %v733_v32, %s9140_s26 }
 0x274   :  { %2750 = vrot.lane.b32.xlu1 %v796_v19, %s9142_s1 }
 0x275   :  { %v10773_v53 = vpop.permute.xlu0 %1972 }
 0x276   :  { %v2227_v16 = vpop.permute.xlu1 %2226 }
 0x277   :  { %966 = vrot.lane.b32.xlu0 %v732_v23, %s9135_s30  ;;  %v3227_v48 = vsel %vm13168_vm10, %v3162_v20, %v2227_v16  ;;  %v3163_v16 = vsel %vm3133_vm9, %v3098_v3, %v10773_v53 }
 0x278   :  { %1732 = vrot.lane.b32.xlu1 %v733_v32, %s9137_s11 }
 0x279   :  { %v10777_v11 = vpop.permute.xlu0 %1208 }
 0x27a   :  { %v10779_v55 = vpop.permute.xlu1 %1462 }
 0x27b   :  { %1986 = vrot.lane.b32.xlu0 %v796_v19, %s9138_s14 }
 0x27c   :  { %2752 = vrot.lane.b32.xlu1 %v797_v10, %s9142_s1 }
 0x27d   :  { %v10783_v6 = vpop.permute.xlu0 %2228 }
 0x27e   :  { %v2483_v8 = vpop.permute.xlu1 %2482  ;;  %v3228_v37 = vsel %vm13168_vm10, %v3163_v16, %v10783_v6  ;;  %vm13169_vm10 = vcmask 1041409   ;;  %v9100_v16 = vld [vmem:[#allocation2 + $0x168] sm:$0xff] }
 0x27f   :  { %968 = vrot.lane.b32.xlu0 %v733_v32, %s9135_s30  ;;  %v3292_v63 = vsel %vm3263_vm11, %v3227_v48, %v2483_v8 }
 0x280   :  { %1222 = vrot.lane.b32.xlu1 %v796_v19, %s9134_s29 }
 0x281   :  { %v10795_v36 = vpop.permute.xlu0 %1464 }
 0x282   :  { %v10806_v50 = vpop.permute.xlu1 %1718 }
 0x283   :  { %v8638_v2 = vpop.f32.mrb[14].mxu0  ;;  %1988 = vrot.lane.b32.xlu0 %v797_v10, %s9138_s14 }
 0x284   :  { %v4001_v13 = vadd.f32 %v10802_v43, %v8638_v2  ;;  %2242 = vrot.lane.b32.xlu1 %v670_v9, %s9139_s15  ;;  %v3730_v12 = vpop.f32.mrb[15].mxu0 }
 0x285   :  { %v4000_v26 = vadd.f32 %v10802_v43, %v3730_v12  ;;  %v2485_v27 = vpop.permute.xlu0 %2484 }
 0x286   :  { %v4065_v24 = vmax.f32 %v4001_v13, 0.0  ;;  %v2739_v17 = vpop.permute.xlu1 %2738  ;;  %v798_v13 = vld [vmem:[#allocation2 + $0x212] sm:$0xff] }
 0x287   :  { %v4064_v30 = vmax.f32 %v4000_v26, 0.0  ;;  %v3357_v61 = vsel %vm3328_vm12, %v3292_v63, %v2739_v17  ;;  %1224 = vrot.lane.b32.xlu0 %v797_v10, %s9134_s29 }
 0x288   :  { %v4173_v4 = vmax.f32 %v4063_v60, %v4065_v24  ;;  %1478 = vrot.lane.b32.xlu1 %v670_v9, %s9136_s10  ;;  %8657 = vmatprep.mubr.msk.f32.mxu0 %vm3397_vm13, %v3357_v61  ;;  %v3293_v60 = vsel %vm3263_vm11, %v3228_v37, %v2485_v27 }
 0x289   :  { %v4172_v5 = vmax.f32 %v4062_v34, %v4064_v30  ;;  %v10827_v42 = vpop.permute.xlu0 %954 }
 0x28a   :  { %v4349_v7 = vcombine.high %v4173_v4, %v4173_v4  ;;  %v4356_v23 = vrot.slane %v4173_v4, %v10289_v38  ;;  %v10832_v58 = vpop.permute.xlu1 %1720 }
 0x28b   :  { %v4332_v51 = vcombine.high %v4172_v5, %v4172_v5  ;;  %v4339_v59 = vrot.slane %v4172_v5, %v10289_v38  ;;  %2244 = vrot.lane.b32.xlu0 %v671_v15, %s9139_s15 }
 0x28c   :  { %v4363_v1 = vrot.slane %v4349_v7, %v10289_v38  ;;  %v4364_v40 = vcombine.high %v4356_v23, %v4356_v23  ;;  %2498 = vrot.lane.b32.xlu1 %v734_v31, %s9140_s26  ;;  %v8161_v8 = vrot.slane %v4356_v23, 9 }
 0x28d   :  { %v4346_v54 = vrot.slane %v4332_v51, %v10289_v38  ;;  %v4347_v32 = vcombine.high %v4339_v59, %v4339_v59  ;;  %v8157_v41 = vrot.slane %v4339_v59, 9  ;;  %v10845_v19 = vpop.permute.xlu0 %1974 }
 0x28e   :  { %v4365_v10 = vcombine.high %v4363_v1, %v4363_v1  ;;  %v8162_v47 = vrot.slane %v4364_v40, 9  ;;  %v2741_v56 = vpop.permute.xlu1 %2740  ;;  %v8163_v49 = vrot.slane %v4363_v1, 9  ;;  %v5314_v12 = vmax.f32 %v4356_v23, %v8161_v8 }
 0x28f   :  { %v4348_v39 = vcombine.high %v4346_v54, %v4346_v54  ;;  %v8158_v46 = vrot.slane %v4347_v32, 9  ;;  %v8159_v21 = vrot.slane %v4346_v54, 9  ;;  %v5310_v9 = vmax.f32 %v4339_v59, %v8157_v41  ;;  %1480 = vrot.lane.b32.xlu0 %v671_v15, %s9136_s10  ;;  %v168_v41 = vld [vmem:[%s13153_s0 + $0x180] sm:$0xff] }
 0x290   :  { %1734 = vrot.lane.b32.xlu1 %v734_v31, %s9137_s11  ;;  %v8164_v25 = vrot.slane %v4365_v10, 9  ;;  %v5315_v48 = vmax.f32 %v4364_v40, %v8162_v47  ;;  %v3358_v34 = vsel %vm3328_vm12, %v3293_v60, %v2741_v56  ;;  %v5316_v30 = vmax.f32 %v4363_v1, %v8163_v49  ;;  %v799_v1 = vld [vmem:[#allocation2 + $0x21a] sm:$0xff]  ;;  %233 = vst.msk [vmem:[#allocation2 + $0x289] sm:$0xff] %vm32_vm0, %v168_v41  ;;  %v672_v56 = vld [vmem:[#allocation2 + $0x228] sm:$0xff] }
 0x291   :  { %v8160_v45 = vrot.slane %v4348_v39, 9  ;;  %v5311_v53 = vmax.f32 %v4347_v32, %v8158_v46  ;;  %v5312_v2 = vmax.f32 %v4346_v54, %v8159_v21  ;;  %v10853_v20 = vpop.permute.xlu0 %956  ;;  %v5641_v26 = vrot.slane %v5310_v9, %v10319_v33  ;;  %8658 = vmatmul.mubr.msk.f32.gmra.mrb[28].mxu0 %vm3397_vm13, %v3358_v34 }
 0x292   :  { %v10857_v63 = vpop.permute.xlu1 %1210  ;;  %v5317_v61 = vmax.f32 %v4365_v10, %v8164_v25  ;;  %v5657_v15 = vrot.slane %v5314_v12, %v10319_v33  ;;  %v5661_v57 = vrot.slane %v5315_v48, %v10319_v33  ;;  %v5665_v23 = vrot.slane %v5316_v30, %v10319_v33  ;;  %v9101_v25 = vld [vmem:[#allocation2 + $0x170] sm:$0xff] }
 0x293   :  { %v5313_v6 = vmax.f32 %v4348_v39, %v8160_v45  ;;  %v5645_v24 = vrot.slane %v5311_v53, %v10319_v33  ;;  %v5649_v17 = vrot.slane %v5312_v2, %v10319_v33  ;;  %2500 = vrot.lane.b32.xlu0 %v735_v62, %s9140_s26  ;;  %v2904_v10 = vsel %vm32_vm0, %v9100_v16, %v10750_v29  ;;  %v673_v53 = vld [vmem:[#allocation2 + $0x230] sm:$0xff] }
 0x294   :  { %2754 = vrot.lane.b32.xlu1 %v798_v13, %s9142_s1  ;;  %v5669_v51 = vrot.slane %v5317_v61, %v10319_v33  ;;  %v2969_v8 = vsel %vm2938_vm6, %v2904_v10, %v10769_v44  ;;  %v736_v12 = vld [vmem:[#allocation2 + $0x229] sm:$0xff] }
 0x295   :  { %v5653_v14 = vrot.slane %v5313_v6, %v10319_v33  ;;  %v6082_v27 = vsel %vm13169_vm10, %v5645_v24, %v5641_v26  ;;  %v1977_v4 = vpop.permute.xlu0 %1976  ;;  %v3034_v39 = vsel %vm3003_vm7, %v2969_v8, %v10779_v55  ;;  %vm13170_vm10 = vcmask 146432   ;;  %v800_v30 = vld [vmem:[#allocation2 + $0x22a] sm:$0xff] }
 0x296   :  { %v6083_v5 = vsel %vm6056_vm3, %v5649_v17, %v6082_v27  ;;  %v2231_v22 = vpop.permute.xlu1 %2230  ;;  %v3099_v21 = vsel %vm3068_vm8, %v3034_v39, %v10806_v50  ;;  %v169_v50 = vld [vmem:[%s13153_s0 + $0x188] sm:$0xff] }
 0x297   :  { %v6084_v7 = vsel %vm6058_vm4, %v5653_v14, %v6083_v5  ;;  %970 = vrot.lane.b32.xlu0 %v734_v31, %s9135_s30  ;;  %v3164_v29 = vsel %vm3133_vm9, %v3099_v21, %v10845_v19  ;;  %v2905_v19 = vsel %vm32_vm0, %v9101_v25, %v10767_v18  ;;  %234 = vst.msk [vmem:[#allocation2 + $0x291] sm:$0xff] %vm32_vm0, %v169_v50  ;;  %v675_v25 = vld [vmem:[#allocation2 + $0x248] sm:$0xff] }
 0x298   :  { %v6085_v35 = vsel %vm6060_vm5, %v5657_v15, %v6084_v7  ;;  %1736 = vrot.lane.b32.xlu1 %v735_v62, %s9137_s11  ;;  %v3229_v44 = vsel %vm13170_vm10, %v3164_v29, %v2231_v22  ;;  %v2970_v2 = vsel %vm2938_vm6, %v2905_v19, %v10777_v11  ;;  %v801_v15 = vld [vmem:[#allocation2 + $0x232] sm:$0xff] }
 0x299   :  { %v6086_v59 = vsel %vm6062_vm15, %v5661_v57, %v6085_v35  ;;  %v10877_v52 = vpop.permute.xlu0 %1212  ;;  %v3035_v48 = vsel %vm3003_vm7, %v2970_v2, %v10795_v36  ;;  %v737_v36 = vld [vmem:[#allocation2 + $0x231] sm:$0xff] }
 0x29a   :  { %v6087_v40 = vsel %vm6064_vm1, %v5665_v23, %v6086_v59  ;;  %v10880_v3 = vpop.permute.xlu1 %1466  ;;  %v3100_v18 = vsel %vm3068_vm8, %v3035_v48, %v10832_v58  ;;  %v281_v22 = vld [vmem:[#allocation2 + $0x1b0] sm:$0xff]  ;;  %v282_v29 = vld [vmem:[#allocation2 + $0x1b8] sm:$0xff] }
 0x29b   :  { %v6088_v54 = vsel %vm6066_vm2, %v5669_v51, %v6087_v40  ;;  %1990 = vrot.lane.b32.xlu0 %v798_v13, %s9138_s14  ;;  %v3165_v60 = vsel %vm3133_vm9, %v3100_v18, %v1977_v4  ;;  %v170_v23 = vld [vmem:[%s13153_s0 + $0x190] sm:$0xff]  ;;  %v2906_v35 = vsel %vm32_vm0, %v281_v22, %v10827_v42  ;;  %v674_v40 = vld [vmem:[#allocation2 + $0x240] sm:$0xff]  ;;  %v2907_v19 = vsel %vm32_vm0, %v282_v29, %v10853_v20 }
 0x29c   :  { %6193 = vst.msk [vmem:[#allocation3 + $0x41] sm:$0xff] %vm4114_vm14, %v6088_v54  ;;  %2756 = vrot.lane.b32.xlu1 %v799_v1, %s9142_s1  ;;  %v2971_v51 = vsel %vm2938_vm6, %v2906_v35, %v10857_v63  ;;  %v2972_v48 = vsel %vm2938_vm6, %v2907_v19, %v10877_v52 }
 0x29d   :  { %v2233_v31 = vpop.permute.xlu0 %2232  ;;  %235 = vst.msk [vmem:[#allocation2 + $0x2a1] sm:$0xff] %vm32_vm0, %v170_v23  ;;  %v3036_v54 = vsel %vm3003_vm7, %v2971_v51, %v10880_v3 }
 0x29e   :  { %v2487_v32 = vpop.permute.xlu1 %2486  ;;  %v3230_v6 = vsel %vm13170_vm10, %v3165_v60, %v2233_v31 }
 0x29f   :  { %972 = vrot.lane.b32.xlu0 %v735_v62, %s9135_s30  ;;  %v3294_v37 = vsel %vm3263_vm11, %v3229_v44, %v2487_v32 }
 0x2a0   :  { %1226 = vrot.lane.b32.xlu1 %v798_v13, %s9134_s29 }
 0x2a1   :  { %v10896_v47 = vpop.permute.xlu0 %1468 }
 0x2a2   :  { %v10900_v46 = vpop.permute.xlu1 %1722 }
 0x2a3   :  { %1992 = vrot.lane.b32.xlu0 %v799_v1, %s9138_s14  ;;  %v3101_v41 = vsel %vm3068_vm8, %v3036_v54, %v10900_v46 }
 0x2a4   :  { %2246 = vrot.lane.b32.xlu1 %v672_v56, %s9139_s15  ;;  %v8641_v62 = vpop.f32.mrb[16].mxu0 }
 0x2a5   :  { %v2489_v9 = vpop.permute.xlu0 %2488  ;;  %v3740_v45 = vpop.f32.mrb[17].mxu0  ;;  %v4003_v59 = vadd.f32 %v10802_v43, %v8641_v62 }
 0x2a6   :  { %v2743_v49 = vpop.permute.xlu1 %2742  ;;  %v3295_v24 = vsel %vm3263_vm11, %v3230_v6, %v2489_v9  ;;  %v4002_v31 = vadd.f32 %v10802_v43, %v3740_v45 }
 0x2a7   :  { %v3359_v55 = vsel %vm3328_vm12, %v3294_v37, %v2743_v49  ;;  %1228 = vrot.lane.b32.xlu0 %v799_v1, %s9134_s29  ;;  %v4067_v3 = vmax.f32 %v4003_v59, 0.0 }
 0x2a8   :  { %1482 = vrot.lane.b32.xlu1 %v672_v56, %s9136_s10  ;;  %8660 = vmatprep.mubr.msk.f32.mxu0 %vm3397_vm13, %v3359_v55  ;;  %v4066_v44 = vmax.f32 %v4002_v31, 0.0  ;;  %v171_v55 = vld [vmem:[%s13153_s0 + $0x198] sm:$0xff] }
 0x2a9   :  { %v10922_v13 = vpop.permute.xlu0 %958  ;;  %236 = vst.msk [vmem:[#allocation2 + $0x2a9] sm:$0xff] %vm32_vm0, %v171_v55 }
 0x2aa   :  { %v10926_v26 = vpop.permute.xlu1 %1724 }
 0x2ab   :  { %2248 = vrot.lane.b32.xlu0 %v673_v53, %s9139_s15 }
 0x2ac   :  { %2502 = vrot.lane.b32.xlu1 %v736_v12, %s9140_s26 }
 0x2ad   :  { %v1979_v11 = vpop.permute.xlu0 %1978 }
 0x2ae   :  { %v2745_v17 = vpop.permute.xlu1 %2744  ;;  %v3166_v10 = vsel %vm3133_vm9, %v3101_v41, %v1979_v11  ;;  %v3037_v11 = vsel %vm3003_vm7, %v2972_v48, %v10896_v47  ;;  %v739_v41 = vld [vmem:[#allocation2 + $0x249] sm:$0xff] }
 0x2af   :  { %v3360_v34 = vsel %vm3328_vm12, %v3295_v24, %v2745_v17  ;;  %1484 = vrot.lane.b32.xlu0 %v673_v53, %s9136_s10  ;;  %v3102_v17 = vsel %vm3068_vm8, %v3037_v11, %v10926_v26 }
 0x2b0   :  { %1738 = vrot.lane.b32.xlu1 %v736_v12, %s9137_s11  ;;  %8661 = vmatmul.mubr.msk.f32.gmra.mrb[30].mxu0 %vm3397_vm13, %v3360_v34 }
 0x2b1   :  { %v10939_v58 = vpop.permute.xlu0 %960 }
 0x2b2   :  { %v10941_v61 = vpop.permute.xlu1 %1214 }
 0x2b3   :  { %2504 = vrot.lane.b32.xlu0 %v737_v36, %s9140_s26 }
 0x2b4   :  { %2758 = vrot.lane.b32.xlu1 %v800_v30, %s9142_s1 }
 0x2b5   :  { %v10945_v14 = vpop.permute.xlu0 %1980 }
 0x2b6   :  { %v2235_v27 = vpop.permute.xlu1 %2234 }
 0x2b7   :  { %974 = vrot.lane.b32.xlu0 %v736_v12, %s9135_s30  ;;  %v3231_v56 = vsel %vm13170_vm10, %v3166_v10, %v2235_v27  ;;  %v738_v12 = vld [vmem:[#allocation2 + $0x241] sm:$0xff] }
 0x2b8   :  { %1740 = vrot.lane.b32.xlu1 %v737_v36, %s9137_s11 }
 0x2b9   :  { %v10949_v4 = vpop.permute.xlu0 %1216 }
 0x2ba   :  { %v10951_v5 = vpop.permute.xlu1 %1470 }
 0x2bb   :  { %1994 = vrot.lane.b32.xlu0 %v800_v30, %s9138_s14 }
 0x2bc   :  { %2760 = vrot.lane.b32.xlu1 %v801_v15, %s9142_s1 }
 0x2bd   :  { %v10955_v57 = vpop.permute.xlu0 %2236 }
 0x2be   :  { %v2491_v7 = vpop.permute.xlu1 %2490 }
 0x2bf   :  { %976 = vrot.lane.b32.xlu0 %v737_v36, %s9135_s30  ;;  %v3296_v46 = vsel %vm3263_vm11, %v3231_v56, %v2491_v7  ;;  %v802_v56 = vld [vmem:[#allocation2 + $0x242] sm:$0xff] }
 0x2c0   :  { %1230 = vrot.lane.b32.xlu1 %v800_v30, %s9134_s29  ;;  %v3167_v30 = vsel %vm3133_vm9, %v3102_v17, %v10945_v14 }
 0x2c1   :  { %v10968_v1 = vpop.permute.xlu0 %1472  ;;  %v3232_v26 = vsel %vm13170_vm10, %v3167_v30, %v10955_v57  ;;  %vm13171_vm10 = vcmask 1041409   ;;  %v9102_v30 = vld [vmem:[#allocation2 + $0x1c8] sm:$0xff] }
 0x2c2   :  { %v10973_v32 = vpop.permute.xlu1 %1726  ;;  %v8644_v42 = vpop.f32.mrb[18].mxu0 }
 0x2c3   :  { %v4005_v16 = vadd.f32 %v10802_v43, %v8644_v42  ;;  %1996 = vrot.lane.b32.xlu0 %v801_v15, %s9138_s14  ;;  %v3750_v63 = vpop.f32.mrb[19].mxu0 }
 0x2c4   :  { %2250 = vrot.lane.b32.xlu1 %v674_v40, %s9139_s15  ;;  %v4004_v8 = vadd.f32 %v10802_v43, %v3750_v63 }
 0x2c5   :  { %v4069_v39 = vmax.f32 %v4005_v16, 0.0  ;;  %v2493_v21 = vpop.permute.xlu0 %2492 }
 0x2c6   :  { %v4068_v9 = vmax.f32 %v4004_v8, 0.0  ;;  %v2747_v37 = vpop.permute.xlu1 %2746  ;;  %v3297_v8 = vsel %vm3263_vm11, %v3232_v26, %v2493_v21 }
 0x2c7   :  { %v4175_v49 = vmax.f32 %v4067_v3, %v4069_v39  ;;  %v3361_v62 = vsel %vm3328_vm12, %v3296_v46, %v2747_v37  ;;  %1232 = vrot.lane.b32.xlu0 %v801_v15, %s9134_s29 }
 0x2c8   :  { %v4174_v50 = vmax.f32 %v4066_v44, %v4068_v9  ;;  %1486 = vrot.lane.b32.xlu1 %v674_v40, %s9136_s10  ;;  %8663 = vmatprep.mubr.msk.f32.mxu0 %vm3397_vm13, %v3361_v62 }
 0x2c9   :  { %v4383_v45 = vcombine.high %v4175_v49, %v4175_v49  ;;  %v4390_v53 = vrot.slane %v4175_v49, %v10289_v38  ;;  %v10995_v2 = vpop.permute.xlu0 %962 }
 0x2ca   :  { %v4366_v18 = vcombine.high %v4174_v50, %v4174_v50  ;;  %v4373_v60 = vrot.slane %v4174_v50, %v10289_v38  ;;  %v11000_v6 = vpop.permute.xlu1 %1728 }
 0x2cb   :  { %v4397_v24 = vrot.slane %v4383_v45, %v10289_v38  ;;  %v4398_v20 = vcombine.high %v4390_v53, %v4390_v53  ;;  %2252 = vrot.lane.b32.xlu0 %v675_v25, %s9139_s15  ;;  %v8169_v15 = vrot.slane %v4390_v53, 9 }
 0x2cc   :  { %v4380_v34 = vrot.slane %v4366_v18, %v10289_v38  ;;  %v4381_v36 = vcombine.high %v4373_v60, %v4373_v60  ;;  %v8165_v52 = vrot.slane %v4373_v60, 9  ;;  %2506 = vrot.lane.b32.xlu1 %v738_v12, %s9140_s26 }
 0x2cd   :  { %v4399_v27 = vcombine.high %v4397_v24, %v4397_v24  ;;  %v8170_v47 = vrot.slane %v4398_v20, 9  ;;  %v11012_v22 = vpop.permute.xlu0 %1982  ;;  %v8171_v40 = vrot.slane %v4397_v24, 9  ;;  %v5322_v16 = vmax.f32 %v4390_v53, %v8169_v15 }
 0x2ce   :  { %v4382_v7 = vcombine.high %v4380_v34, %v4380_v34  ;;  %v8166_v23 = vrot.slane %v4381_v36, 9  ;;  %v8167_v35 = vrot.slane %v4380_v34, 9  ;;  %v5318_v51 = vmax.f32 %v4373_v60, %v8165_v52  ;;  %v2749_v59 = vpop.permute.xlu1 %2748  ;;  %v172_v52 = vld [vmem:[%s13153_s0 + $0x1a0] sm:$0xff] }
 0x2cf   :  { %1488 = vrot.lane.b32.xlu0 %v675_v25, %s9136_s10  ;;  %v8172_v54 = vrot.slane %v4399_v27, 9  ;;  %v5323_v63 = vmax.f32 %v4398_v20, %v8170_v47  ;;  %v3362_v44 = vsel %vm3328_vm12, %v3297_v8, %v2749_v59  ;;  %v5324_v9 = vmax.f32 %v4397_v24, %v8171_v40  ;;  %v803_v20 = vld [vmem:[#allocation2 + $0x24a] sm:$0xff]  ;;  %237 = vst.msk [vmem:[#allocation2 + $0x2b9] sm:$0xff] %vm32_vm0, %v172_v52 }
 0x2d0   :  { %v8168_v31 = vrot.slane %v4382_v7, 9  ;;  %v5319_v42 = vmax.f32 %v4381_v36, %v8166_v23  ;;  %v5320_v14 = vmax.f32 %v4380_v34, %v8167_v35  ;;  %1742 = vrot.lane.b32.xlu1 %v738_v12, %s9137_s11  ;;  %v5673_v10 = vrot.slane %v5318_v51, %v10319_v33  ;;  %8664 = vmatmul.mubr.msk.f32.gmra.mrb[32].mxu0 %vm3397_vm13, %v3362_v44 }
 0x2d1   :  { %v11020_v3 = vpop.permute.xlu0 %964  ;;  %v5325_v37 = vmax.f32 %v4399_v27, %v8172_v54  ;;  %v5689_v62 = vrot.slane %v5322_v16, %v10319_v33  ;;  %v5693_v25 = vrot.slane %v5323_v63, %v10319_v33  ;;  %v5697_v53 = vrot.slane %v5324_v9, %v10319_v33  ;;  %v740_v63 = vld [vmem:[#allocation2 + $0x259] sm:$0xff] }
 0x2d2   :  { %v5321_v57 = vmax.f32 %v4382_v7, %v8168_v31  ;;  %v5677_v39 = vrot.slane %v5319_v42, %v10319_v33  ;;  %v5681_v29 = vrot.slane %v5320_v14, %v10319_v33  ;;  %v11025_v46 = vpop.permute.xlu1 %1218  ;;  %v2908_v27 = vsel %vm32_vm0, %v9102_v30, %v10922_v13  ;;  %v676_v7 = vld [vmem:[#allocation2 + $0x258] sm:$0xff]  ;;  %v9103_v31 = vld [vmem:[#allocation2 + $0x1d0] sm:$0xff]  ;;  %v677_v14 = vld [vmem:[#allocation2 + $0x260] sm:$0xff] }
 0x2d3   :  { %2508 = vrot.lane.b32.xlu0 %v739_v41, %s9140_s26  ;;  %v5701_v18 = vrot.slane %v5325_v37, %v10319_v33  ;;  %v2973_v15 = vsel %vm2938_vm6, %v2908_v27, %v10941_v61  ;;  %v804_v9 = vld [vmem:[#allocation2 + $0x25a] sm:$0xff] }
 0x2d4   :  { %v5685_v21 = vrot.slane %v5321_v57, %v10319_v33  ;;  %v6089_v49 = vsel %vm13171_vm10, %v5677_v39, %v5673_v10  ;;  %2762 = vrot.lane.b32.xlu1 %v802_v56, %s9142_s1  ;;  %v3038_v23 = vsel %vm3003_vm7, %v2973_v15, %v10951_v5  ;;  %vm13172_vm10 = vcmask 146432  }
 0x2d5   :  { %v6090_v55 = vsel %vm6056_vm3, %v5681_v29, %v6089_v49  ;;  %v1985_v50 = vpop.permute.xlu0 %1984  ;;  %v3103_v51 = vsel %vm3068_vm8, %v3038_v23, %v10973_v32  ;;  %v173_v32 = vld [vmem:[%s13153_s0 + $0x1a8] sm:$0xff] }
 0x2d6   :  { %v6091_v19 = vsel %vm6058_vm4, %v5685_v21, %v6090_v55  ;;  %v2239_v45 = vpop.permute.xlu1 %2238  ;;  %v3168_v13 = vsel %vm3133_vm9, %v3103_v51, %v11012_v22  ;;  %v2909_v22 = vsel %vm32_vm0, %v9103_v31, %v10939_v58  ;;  %238 = vst.msk [vmem:[#allocation2 + $0x2c1] sm:$0xff] %vm32_vm0, %v173_v32  ;;  %v805_v55 = vld [vmem:[#allocation2 + $0x262] sm:$0xff] }
 0x2d7   :  { %v6092_v48 = vsel %vm6060_vm5, %v5689_v62, %v6091_v19  ;;  %978 = vrot.lane.b32.xlu0 %v738_v12, %s9135_s30  ;;  %v3233_v61 = vsel %vm13172_vm10, %v3168_v13, %v2239_v45  ;;  %v174_v45 = vld [vmem:[%s13153_s0 + $0x1b0] sm:$0xff]  ;;  %v9105_v32 = vld [vmem:[#allocation2 + $0x1e8] sm:$0xff] }
 0x2d8   :  { %v6093_v60 = vsel %vm6062_vm15, %v5693_v25, %v6092_v48  ;;  %1744 = vrot.lane.b32.xlu1 %v739_v41, %s9137_s11  ;;  %239 = vst.msk [vmem:[#allocation2 + $0x2d1] sm:$0xff] %vm32_vm0, %v174_v45  ;;  %v2911_v31 = vsel %vm32_vm0, %v9105_v32, %v11020_v3 }
 0x2d9   :  { %v6094_v11 = vsel %vm6064_vm1, %v5697_v53, %v6093_v60  ;;  %v11043_v24 = vpop.permute.xlu0 %1220  ;;  %v9104_v53 = vld [vmem:[#allocation2 + $0x1e0] sm:$0xff] }
 0x2da   :  { %v6095_v17 = vsel %vm6066_vm2, %v5701_v18, %v6094_v11  ;;  %v11046_v34 = vpop.permute.xlu1 %1474  ;;  %v2910_v48 = vsel %vm32_vm0, %v9104_v53, %v10995_v2 }
 0x2db   :  { %6194 = vst.msk [vmem:[#allocation3 + $0x51] sm:$0xff] %vm4114_vm14, %v6095_v17  ;;  %1998 = vrot.lane.b32.xlu0 %v802_v56, %s9138_s14  ;;  %v2975_v18 = vsel %vm2938_vm6, %v2910_v48, %v11025_v46 }
 0x2dc   :  { %2764 = vrot.lane.b32.xlu1 %v803_v20, %s9142_s1  ;;  %v3040_v17 = vsel %vm3003_vm7, %v2975_v18, %v11046_v34 }
 0x2dd   :  { %v2241_v12 = vpop.permute.xlu0 %2240 }
 0x2de   :  { %v2495_v36 = vpop.permute.xlu1 %2494 }
 0x2df   :  { %980 = vrot.lane.b32.xlu0 %v739_v41, %s9135_s30  ;;  %v3298_v26 = vsel %vm3263_vm11, %v3233_v61, %v2495_v36  ;;  %v2974_v41 = vsel %vm2938_vm6, %v2909_v22, %v10949_v4 }
 0x2e0   :  { %1234 = vrot.lane.b32.xlu1 %v802_v56, %s9134_s29  ;;  %v3039_v10 = vsel %vm3003_vm7, %v2974_v41, %v10968_v1  ;;  %v741_v1 = vld [vmem:[#allocation2 + $0x261] sm:$0xff]  ;;  %v742_v41 = vld [vmem:[#allocation2 + $0x271] sm:$0xff] }
 0x2e1   :  { %v11061_v47 = vpop.permute.xlu0 %1476  ;;  %v3104_v58 = vsel %vm3068_vm8, %v3039_v10, %v11000_v6 }
 0x2e2   :  { %v11065_v35 = vpop.permute.xlu1 %1730  ;;  %v3169_v56 = vsel %vm3133_vm9, %v3104_v58, %v1985_v50 }
 0x2e3   :  { %2000 = vrot.lane.b32.xlu0 %v803_v20, %s9138_s14  ;;  %v3234_v57 = vsel %vm13172_vm10, %v3169_v56, %v2241_v12  ;;  %v3105_v52 = vsel %vm3068_vm8, %v3040_v17, %v11065_v35 }
 0x2e4   :  { %2254 = vrot.lane.b32.xlu1 %v676_v7, %s9139_s15  ;;  %v8647_v54 = vpop.f32.mrb[20].mxu0 }
 0x2e5   :  { %v2497_v59 = vpop.permute.xlu0 %2496  ;;  %v3760_v42 = vpop.f32.mrb[21].mxu0  ;;  %v4007_v60 = vadd.f32 %v10802_v43, %v8647_v54  ;;  %v175_v54 = vld [vmem:[%s13153_s0 + $0x1b8] sm:$0xff] }
 0x2e6   :  { %v2751_v40 = vpop.permute.xlu1 %2750  ;;  %v3299_v39 = vsel %vm3263_vm11, %v3234_v57, %v2497_v59  ;;  %v4006_v12 = vadd.f32 %v10802_v43, %v3760_v42  ;;  %240 = vst.msk [vmem:[#allocation2 + $0x2d9] sm:$0xff] %vm32_vm0, %v175_v54 }
 0x2e7   :  { %v3363_v5 = vsel %vm3328_vm12, %v3298_v26, %v2751_v40  ;;  %1236 = vrot.lane.b32.xlu0 %v803_v20, %s9134_s29  ;;  %v678_v20 = vld [vmem:[#allocation2 + $0x270] sm:$0xff]  ;;  %v4071_v34 = vmax.f32 %v4007_v60, 0.0 }
 0x2e8   :  { %1490 = vrot.lane.b32.xlu1 %v676_v7, %s9136_s10  ;;  %8666 = vmatprep.mubr.msk.f32.mxu0 %vm3397_vm13, %v3363_v5  ;;  %v4070_v13 = vmax.f32 %v4006_v12, 0.0  ;;  %v679_v5 = vld [vmem:[#allocation2 + $0x278] sm:$0xff] }
 0x2e9   :  { %v11087_v16 = vpop.permute.xlu0 %966 }
 0x2ea   :  { %v11091_v8 = vpop.permute.xlu1 %1732 }
 0x2eb   :  { %2256 = vrot.lane.b32.xlu0 %v677_v14, %s9139_s15 }
 0x2ec   :  { %2510 = vrot.lane.b32.xlu1 %v740_v63, %s9140_s26 }
 0x2ed   :  { %v1987_v4 = vpop.permute.xlu0 %1986 }
 0x2ee   :  { %v2753_v29 = vpop.permute.xlu1 %2752  ;;  %v3170_v27 = vsel %vm3133_vm9, %v3105_v52, %v1987_v4 }
 0x2ef   :  { %v3364_v44 = vsel %vm3328_vm12, %v3299_v39, %v2753_v29  ;;  %1492 = vrot.lane.b32.xlu0 %v677_v14, %s9136_s10 }
 0x2f0   :  { %1746 = vrot.lane.b32.xlu1 %v740_v63, %s9137_s11  ;;  %8667 = vmatmul.mubr.msk.f32.gmra.mrb[34].mxu0 %vm3397_vm13, %v3364_v44 }
 0x2f1   :  { %v11104_v6 = vpop.permute.xlu0 %968 }
 0x2f2   :  { %v11106_v37 = vpop.permute.xlu1 %1222 }
 0x2f3   :  { %2512 = vrot.lane.b32.xlu0 %v741_v1, %s9140_s26 }
 0x2f4   :  { %2766 = vrot.lane.b32.xlu1 %v804_v9, %s9142_s1 }
 0x2f5   :  { %v11110_v21 = vpop.permute.xlu0 %1988 }
 0x2f6   :  { %v2243_v49 = vpop.permute.xlu1 %2242 }
 0x2f7   :  { %982 = vrot.lane.b32.xlu0 %v740_v63, %s9135_s30  ;;  %v3235_v7 = vsel %vm13172_vm10, %v3170_v27, %v2243_v49  ;;  %v2976_v63 = vsel %vm2938_vm6, %v2911_v31, %v11043_v24 }
 0x2f8   :  { %1748 = vrot.lane.b32.xlu1 %v741_v1, %s9137_s11  ;;  %v3041_v57 = vsel %vm3003_vm7, %v2976_v63, %v11061_v47 }
 0x2f9   :  { %v11114_v62 = vpop.permute.xlu0 %1224  ;;  %v3106_v39 = vsel %vm3068_vm8, %v3041_v57, %v11091_v8 }
 0x2fa   :  { %v11116_v50 = vpop.permute.xlu1 %1478 }
 0x2fb   :  { %2002 = vrot.lane.b32.xlu0 %v804_v9, %s9138_s14 }
 0x2fc   :  { %2768 = vrot.lane.b32.xlu1 %v805_v55, %s9142_s1 }
 0x2fd   :  { %v11120_v25 = vpop.permute.xlu0 %2244 }
 0x2fe   :  { %v2499_v19 = vpop.permute.xlu1 %2498 }
 0x2ff   :  { %984 = vrot.lane.b32.xlu0 %v741_v1, %s9135_s30  ;;  %v3300_v61 = vsel %vm3263_vm11, %v3235_v7, %v2499_v19  ;;  %v3171_v1 = vsel %vm3133_vm9, %v3106_v39, %v11110_v21 }
 0x300   :  { %1238 = vrot.lane.b32.xlu1 %v804_v9, %s9134_s29  ;;  %v3236_v8 = vsel %vm13172_vm10, %v3171_v1, %v11120_v25  ;;  %vm13173_vm10 = vcmask 1041409  }
 0x301   :  { %v11133_v11 = vpop.permute.xlu0 %1480 }
 0x302   :  { %v11138_v36 = vpop.permute.xlu1 %1734  ;;  %v8650_v2 = vpop.f32.mrb[22].mxu0 }
 0x303   :  { %v4009_v30 = vadd.f32 %v10802_v43, %v8650_v2  ;;  %2004 = vrot.lane.b32.xlu0 %v805_v55, %s9138_s14  ;;  %v3770_v46 = vpop.f32.mrb[23].mxu0  ;;  %v743_v2 = vld [vmem:[#allocation2 + $0x279] sm:$0xff] }
 0x304   :  { %2258 = vrot.lane.b32.xlu1 %v678_v20, %s9139_s15  ;;  %v4008_v15 = vadd.f32 %v10802_v43, %v3770_v46 }
 0x305   :  { %v4073_v23 = vmax.f32 %v4009_v30, 0.0  ;;  %v2501_v51 = vpop.permute.xlu0 %2500 }
 0x306   :  { %v4072_v35 = vmax.f32 %v4008_v15, 0.0  ;;  %v2755_v59 = vpop.permute.xlu1 %2754  ;;  %v3301_v27 = vsel %vm3263_vm11, %v3236_v8, %v2501_v51 }
 0x307   :  { %v4177_v26 = vmax.f32 %v4071_v34, %v4073_v23  ;;  %v3365_v40 = vsel %vm3328_vm12, %v3300_v61, %v2755_v59  ;;  %1240 = vrot.lane.b32.xlu0 %v805_v55, %s9134_s29  ;;  %v806_v34 = vld [vmem:[#allocation2 + $0x272] sm:$0xff] }
 0x308   :  { %v4176_v43 = vmax.f32 %v4070_v13, %v4072_v35  ;;  %1494 = vrot.lane.b32.xlu1 %v678_v20, %s9136_s10  ;;  %8669 = vmatprep.mubr.msk.f32.mxu0 %vm3397_vm13, %v3365_v40 }
 0x309   :  { %v4417_v22 = vcombine.high %v4177_v26, %v4177_v26  ;;  %v4424_v42 = vrot.slane %v4177_v26, %v10289_v38  ;;  %v11160_v14 = vpop.permute.xlu0 %970 }
 0x30a   :  { %v4400_v10 = vcombine.high %v4176_v43, %v4176_v43  ;;  %v4407_v58 = vrot.slane %v4176_v43, %v10289_v38  ;;  %v11165_v56 = vpop.permute.xlu1 %1736 }
 0x30b   :  { %v4431_v4 = vrot.slane %v4417_v22, %v10289_v38  ;;  %v4432_v3 = vcombine.high %v4424_v42, %v4424_v42  ;;  %2260 = vrot.lane.b32.xlu0 %v679_v5, %s9139_s15  ;;  %v8177_v49 = vrot.slane %v4424_v42, 9 }
 0x30c   :  { %v4414_v29 = vrot.slane %v4400_v10, %v10289_v38  ;;  %v4415_v44 = vcombine.high %v4407_v58, %v4407_v58  ;;  %v8173_v24 = vrot.slane %v4407_v58, 9  ;;  %2514 = vrot.lane.b32.xlu1 %v742_v41, %s9140_s26 }
 0x30d   :  { %v4433_v9 = vcombine.high %v4431_v4, %v4431_v4  ;;  %v8178_v47 = vrot.slane %v4432_v3, 9  ;;  %v11177_v55 = vpop.permute.xlu0 %1990  ;;  %v8179_v60 = vrot.slane %v4431_v4, 9  ;;  %v5330_v52 = vmax.f32 %v4424_v42, %v8177_v49 }
 0x30e   :  { %v4416_v19 = vcombine.high %v4414_v29, %v4414_v29  ;;  %v8174_v45 = vrot.slane %v4415_v44, 9  ;;  %v8175_v53 = vrot.slane %v4414_v29, 9  ;;  %v5326_v48 = vmax.f32 %v4407_v58, %v8173_v24  ;;  %v2757_v18 = vpop.permute.xlu1 %2756  ;;  %v9106_v24 = vld [vmem:[#allocation2 + $0x1f8] sm:$0xff] }
 0x30f   :  { %1496 = vrot.lane.b32.xlu0 %v679_v5, %s9136_s10  ;;  %v8180_v20 = vrot.slane %v4433_v9, 9  ;;  %v5331_v30 = vmax.f32 %v4432_v3, %v8178_v47  ;;  %v3366_v13 = vsel %vm3328_vm12, %v3301_v27, %v2757_v18  ;;  %v5332_v35 = vmax.f32 %v4431_v4, %v8179_v60  ;;  %v807_v4 = vld [vmem:[#allocation2 + $0x27a] sm:$0xff]  ;;  %v680_v47 = vld [vmem:[#allocation2 + $0x288] sm:$0xff] }
 0x310   :  { %v8176_v17 = vrot.slane %v4416_v19, 9  ;;  %v5327_v12 = vmax.f32 %v4415_v44, %v8174_v45  ;;  %v5328_v21 = vmax.f32 %v4414_v29, %v8175_v53  ;;  %1750 = vrot.lane.b32.xlu1 %v742_v41, %s9137_s11  ;;  %v5705_v46 = vrot.slane %v5326_v48, %v10319_v33  ;;  %8670 = vmatmul.mubr.msk.f32.gmra.mrb[36].mxu0 %vm3397_vm13, %v3366_v13  ;;  %v176_v44 = vld [vmem:[%s13153_s0 + $0x1c0] sm:$0xff]  ;;  %v808_v13 = vld [vmem:[#allocation2 + $0x28a] sm:$0xff] }
 0x311   :  { %v11185_v15 = vpop.permute.xlu0 %972  ;;  %v5333_v59 = vmax.f32 %v4433_v9, %v8180_v20  ;;  %v5721_v40 = vrot.slane %v5330_v52, %v10319_v33  ;;  %v5725_v5 = vrot.slane %v5331_v30, %v10319_v33  ;;  %v5729_v22 = vrot.slane %v5332_v35, %v10319_v33  ;;  %241 = vst.msk [vmem:[#allocation2 + $0x2e9] sm:$0xff] %vm32_vm0, %v176_v44  ;;  %v9107_v20 = vld [vmem:[#allocation2 + $0x200] sm:$0xff]  ;;  %v744_v52 = vld [vmem:[#allocation2 + $0x289] sm:$0xff] }
 0x312   :  { %v5329_v25 = vmax.f32 %v4416_v19, %v8176_v17  ;;  %v5709_v7 = vrot.slane %v5327_v12, %v10319_v33  ;;  %v5713_v23 = vrot.slane %v5328_v21, %v10319_v33  ;;  %v11190_v61 = vpop.permute.xlu1 %1226  ;;  %v2912_v1 = vsel %vm32_vm0, %v9106_v24, %v11087_v16  ;;  %v681_v12 = vld [vmem:[#allocation2 + $0x290] sm:$0xff] }
 0x313   :  { %2516 = vrot.lane.b32.xlu0 %v743_v2, %s9140_s26  ;;  %v5733_v63 = vrot.slane %v5333_v59, %v10319_v33  ;;  %v2977_v9 = vsel %vm2938_vm6, %v2912_v1, %v11106_v37 }
 0x314   :  { %v5717_v51 = vrot.slane %v5329_v25, %v10319_v33  ;;  %v6096_v26 = vsel %vm13173_vm10, %v5709_v7, %v5705_v46  ;;  %2770 = vrot.lane.b32.xlu1 %v806_v34, %s9142_s1  ;;  %v3042_v19 = vsel %vm3003_vm7, %v2977_v9, %v11116_v50  ;;  %vm13174_vm10 = vcmask 146432  }
 0x315   :  { %v6097_v54 = vsel %vm6056_vm3, %v5713_v23, %v6096_v26  ;;  %v1993_v43 = vpop.permute.xlu0 %1992  ;;  %v3107_v53 = vsel %vm3068_vm8, %v3042_v19, %v11138_v36  ;;  %v177_v36 = vld [vmem:[%s13153_s0 + $0x1c8] sm:$0xff] }
 0x316   :  { %v6098_v32 = vsel %vm6058_vm4, %v5717_v51, %v6097_v54  ;;  %v2247_v31 = vpop.permute.xlu1 %2246  ;;  %v3172_v16 = vsel %vm3133_vm9, %v3107_v53, %v11177_v55  ;;  %v2913_v55 = vsel %vm32_vm0, %v9107_v20, %v11104_v6  ;;  %242 = vst.msk [vmem:[#allocation2 + $0x2f1] sm:$0xff] %vm32_vm0, %v177_v36 }
 0x317   :  { %v6099_v42 = vsel %vm6060_vm5, %v5721_v40, %v6098_v32  ;;  %986 = vrot.lane.b32.xlu0 %v742_v41, %s9135_s30  ;;  %v3237_v37 = vsel %vm13174_vm10, %v3172_v16, %v2247_v31  ;;  %v2978_v21 = vsel %vm2938_vm6, %v2913_v55, %v11114_v62  ;;  %v809_v40 = vld [vmem:[#allocation2 + $0x292] sm:$0xff]  ;;  %v746_v55 = vld [vmem:[#allocation2 + $0x2a1] sm:$0xff] }
 0x318   :  { %v6100_v10 = vsel %vm6062_vm15, %v5725_v5, %v6099_v42  ;;  %1752 = vrot.lane.b32.xlu1 %v743_v2, %s9137_s11  ;;  %v3043_v30 = vsel %vm3003_vm7, %v2978_v21, %v11133_v11  ;;  %v745_v11 = vld [vmem:[#allocation2 + $0x291] sm:$0xff] }
 0x319   :  { %v6101_v58 = vsel %vm6064_vm1, %v5729_v22, %v6100_v10  ;;  %v11208_v57 = vpop.permute.xlu0 %1228  ;;  %v3108_v6 = vsel %vm3068_vm8, %v3043_v30, %v11165_v56  ;;  %v178_v32 = vld [vmem:[%s13153_s0 + $0x1d0] sm:$0xff]  ;;  %v11299_v10 = vld [vmem:[#allocation2 + $0x2a0] sm:$0xff] }
 0x31a   :  { %v6102_v3 = vsel %vm6066_vm2, %v5733_v63, %v6101_v58  ;;  %v11211_v39 = vpop.permute.xlu1 %1482  ;;  %v3173_v27 = vsel %vm3133_vm9, %v3108_v6, %v1993_v43  ;;  %v9108_v31 = vld [vmem:[#allocation2 + $0x210] sm:$0xff]  ;;  %243 = vst.msk [vmem:[#allocation2 + $0x301] sm:$0xff] %vm32_vm0, %v178_v32 }
 0x31b   :  { %6195 = vst.msk [vmem:[#allocation3 + $0x61] sm:$0xff] %vm4114_vm14, %v6102_v3  ;;  %2006 = vrot.lane.b32.xlu0 %v806_v34, %s9138_s14  ;;  %v2914_v22 = vsel %vm32_vm0, %v9108_v31, %v11160_v14 }
 0x31c   :  { %2772 = vrot.lane.b32.xlu1 %v807_v4, %s9142_s1  ;;  %v2979_v42 = vsel %vm2938_vm6, %v2914_v22, %v11190_v61 }
 0x31d   :  { %v2249_v41 = vpop.permute.xlu0 %2248  ;;  %v3044_v58 = vsel %vm3003_vm7, %v2979_v42, %v11211_v39 }
 0x31e   :  { %v2503_v29 = vpop.permute.xlu1 %2502 }
 0x31f   :  { %988 = vrot.lane.b32.xlu0 %v743_v2, %s9135_s30  ;;  %v3302_v18 = vsel %vm3263_vm11, %v3237_v37, %v2503_v29 }
 0x320   :  { %1242 = vrot.lane.b32.xlu1 %v806_v34, %s9134_s29  ;;  %v3238_v34 = vsel %vm13174_vm10, %v3173_v27, %v2249_v41 }
 0x321   :  { %v11226_v49 = vpop.permute.xlu0 %1484 }
 0x322   :  { %v11230_v45 = vpop.permute.xlu1 %1738 }
 0x323   :  { %2008 = vrot.lane.b32.xlu0 %v807_v4, %s9138_s14  ;;  %v3109_v41 = vsel %vm3068_vm8, %v3044_v58, %v11230_v45 }
 0x324   :  { %2262 = vrot.lane.b32.xlu1 %v680_v47, %s9139_s15  ;;  %v8653_v60 = vpop.f32.mrb[24].mxu0 }
 0x325   :  { %v2505_v48 = vpop.permute.xlu0 %2504  ;;  %v3780_v17 = vpop.f32.mrb[25].mxu0 }
 0x326   :  { %v2759_v8 = vpop.permute.xlu1 %2758  ;;  %v3303_v25 = vsel %vm3263_vm11, %v3238_v34, %v2505_v48 }
 0x327   :  { %v3367_v50 = vsel %vm3328_vm12, %v3302_v18, %v2759_v8  ;;  %1244 = vrot.lane.b32.xlu0 %v807_v4, %s9134_s29  ;;  %v11306_v4 = vld [vmem:[%s13155_s2] ss:$0 sm:$0xff]  ;;  %v179_v8 = vld [vmem:[%s13153_s0 + $0x1d8] sm:$0xff] }
 0x328   :  { %1498 = vrot.lane.b32.xlu1 %v680_v47, %s9136_s10  ;;  %8672 = vmatprep.mubr.msk.f32.mxu0 %vm3397_vm13, %v3367_v50  ;;  %v4011_v14 = vadd.f32 %v11306_v4, %v8653_v60  ;;  %v4010_v61 = vadd.f32 %v11306_v4, %v3780_v17  ;;  %v683_v50 = vld [vmem:[#allocation2 + $0x2a8] sm:$0xff]  ;;  %244 = vst.msk [vmem:[#allocation2 + $0x309] sm:$0xff] %vm32_vm0, %v179_v8  ;;  %v9110_v17 = vld [vmem:[#allocation2 + $0x218] sm:$0xff] }
 0x329   :  { %v11252_v2 = vpop.permute.xlu0 %974 }
 0x32a   :  { %v11256_v46 = vpop.permute.xlu1 %1740  ;;  %v4075_v19 = vmax.f32 %v4011_v14, 0.0  ;;  %v4074_v37 = vmax.f32 %v4010_v61, 0.0 }
 0x32b   :  { %2264 = vrot.lane.b32.xlu0 %v681_v12, %s9139_s15 }
 0x32c   :  { %2518 = vrot.lane.b32.xlu1 %v744_v52, %s9140_s26 }
 0x32d   :  { %v1995_v62 = vpop.permute.xlu0 %1994 }
 0x32e   :  { %v2761_v7 = vpop.permute.xlu1 %2760  ;;  %v3174_v44 = vsel %vm3133_vm9, %v3109_v41, %v1995_v62  ;;  %v747_v41 = vld [vmem:[#allocation2 + $0x2a9] sm:$0xff] }
 0x32f   :  { %v3368_v23 = vsel %vm3328_vm12, %v3303_v25, %v2761_v7  ;;  %1500 = vrot.lane.b32.xlu0 %v681_v12, %s9136_s10  ;;  %v2915_v12 = vsel %vm32_vm0, %v9110_v17, %v11185_v15 }
 0x330   :  { %1754 = vrot.lane.b32.xlu1 %v744_v52, %s9137_s11  ;;  %8673 = vmatmul.mubr.msk.f32.gmra.mrb[38].mxu0 %vm3397_vm13, %v3368_v23  ;;  %v2980_v6 = vsel %vm2938_vm6, %v2915_v12, %v11208_v57 }
 0x331   :  { %v11269_v56 = vpop.permute.xlu0 %976  ;;  %v3045_v62 = vsel %vm3003_vm7, %v2980_v6, %v11226_v49 }
 0x332   :  { %v11271_v35 = vpop.permute.xlu1 %1230  ;;  %v3110_v15 = vsel %vm3068_vm8, %v3045_v62, %v11256_v46 }
 0x333   :  { %2520 = vrot.lane.b32.xlu0 %v745_v11, %s9140_s26 }
 0x334   :  { %2774 = vrot.lane.b32.xlu1 %v808_v13, %s9142_s1 }
 0x335   :  { %v11275_v59 = vpop.permute.xlu0 %1996 }
 0x336   :  { %v2251_v51 = vpop.permute.xlu1 %2250 }
 0x337   :  { %990 = vrot.lane.b32.xlu0 %v744_v52, %s9135_s30  ;;  %v3239_v1 = vsel %vm13174_vm10, %v3174_v44, %v2251_v51  ;;  %v3175_v51 = vsel %vm3133_vm9, %v3110_v15, %v11275_v59 }
 0x338   :  { %1756 = vrot.lane.b32.xlu1 %v745_v11, %s9137_s11 }
 0x339   :  { %v11279_v26 = vpop.permute.xlu0 %1232 }
 0x33a   :  { %v11281_v54 = vpop.permute.xlu1 %1486 }
 0x33b   :  { %2010 = vrot.lane.b32.xlu0 %v808_v13, %s9138_s14 }
 0x33c   :  { %2776 = vrot.lane.b32.xlu1 %v809_v40, %s9142_s1 }
 0x33d   :  { %v11285_v43 = vpop.permute.xlu0 %2252 }
 0x33e   :  { %v2507_v5 = vpop.permute.xlu1 %2506  ;;  %v3240_v46 = vsel %vm13174_vm10, %v3175_v51, %v11285_v43  ;;  %vm13175_vm10 = vcmask 1041409   ;;  %v180_v51 = vld [vmem:[%s13153_s0 + $0x1e0] sm:$0xff] }
 0x33f   :  { %992 = vrot.lane.b32.xlu0 %v745_v11, %s9135_s30  ;;  %v3304_v45 = vsel %vm3263_vm11, %v3239_v1, %v2507_v5  ;;  %245 = vst.msk [vmem:[#allocation2 + $0x319] sm:$0xff] %vm32_vm0, %v180_v51 }
 0x340   :  { %1246 = vrot.lane.b32.xlu1 %v808_v13, %s9134_s29 }
 0x341   :  { %v11297_v63 = vpop.permute.xlu0 %1488 }
 0x342   :  { %v11309_v3 = vpop.permute.xlu1 %1742 }
 0x343   :  { %v8656_v29 = vpop.f32.mrb[26].mxu0  ;;  %2012 = vrot.lane.b32.xlu0 %v809_v40, %s9138_s14 }
 0x344   :  { %v4013_v39 = vadd.f32 %v11306_v4, %v8656_v29  ;;  %2266 = vrot.lane.b32.xlu1 %v11299_v10, %s9139_s15  ;;  %v3790_v24 = vpop.f32.mrb[27].mxu0 }
 0x345   :  { %v4012_v9 = vadd.f32 %v11306_v4, %v3790_v24  ;;  %v2509_v47 = vpop.permute.xlu0 %2508  ;;  %v810_v24 = vld [vmem:[#allocation2 + $0x2a2] sm:$0xff] }
 0x346   :  { %v4077_v53 = vmax.f32 %v4013_v39, 0.0  ;;  %v2763_v16 = vpop.permute.xlu1 %2762 }
 0x347   :  { %v4076_v48 = vmax.f32 %v4012_v9, 0.0  ;;  %v3369_v18 = vsel %vm3328_vm12, %v3304_v45, %v2763_v16  ;;  %1248 = vrot.lane.b32.xlu0 %v809_v40, %s9134_s29  ;;  %v3305_v45 = vsel %vm3263_vm11, %v3240_v46, %v2509_v47 }
 0x348   :  { %v4179_v60 = vmax.f32 %v4075_v19, %v4077_v53  ;;  %1502 = vrot.lane.b32.xlu1 %v11299_v10, %s9136_s10  ;;  %8675 = vmatprep.mubr.msk.f32.mxu0 %vm3397_vm13, %v3369_v18 }
 0x349   :  { %v4178_v36 = vmax.f32 %v4074_v37, %v4076_v48  ;;  %v11331_v20 = vpop.permute.xlu0 %978 }
 0x34a   :  { %v4451_v21 = vcombine.high %v4179_v60, %v4179_v60  ;;  %v4458_v52 = vrot.slane %v4179_v60, %v10289_v38  ;;  %v11336_v30 = vpop.permute.xlu1 %1744 }
 0x34b   :  { %v4434_v27 = vcombine.high %v4178_v36, %v4178_v36  ;;  %v4441_v34 = vrot.slane %v4178_v36, %v10289_v38  ;;  %2268 = vrot.lane.b32.xlu0 %v683_v50, %s9139_s15 }
 0x34c   :  { %v4465_v25 = vrot.slane %v4451_v21, %v10289_v38  ;;  %v4466_v7 = vcombine.high %v4458_v52, %v4458_v52  ;;  %2522 = vrot.lane.b32.xlu1 %v746_v55, %s9140_s26  ;;  %v8185_v5 = vrot.slane %v4458_v52, 9 }
 0x34d   :  { %v4448_v23 = vrot.slane %v4434_v27, %v10289_v38  ;;  %v4449_v11 = vcombine.high %v4441_v34, %v4441_v34  ;;  %v8181_v57 = vrot.slane %v4441_v34, 9  ;;  %v11349_v13 = vpop.permute.xlu0 %1998 }
 0x34e   :  { %v4467_v40 = vcombine.high %v4465_v25, %v4465_v25  ;;  %v8186_v49 = vrot.slane %v4466_v7, 9  ;;  %v2765_v32 = vpop.permute.xlu1 %2764  ;;  %v8187_v14 = vrot.slane %v4465_v25, 9  ;;  %v5338_v1 = vmax.f32 %v4458_v52, %v8185_v5 }
 0x34f   :  { %v4450_v31 = vcombine.high %v4448_v23, %v4448_v23  ;;  %v8182_v22 = vrot.slane %v4449_v11, 9  ;;  %v8183_v42 = vrot.slane %v4448_v23, 9  ;;  %v5334_v58 = vmax.f32 %v4441_v34, %v8181_v57  ;;  %1504 = vrot.lane.b32.xlu0 %v683_v50, %s9136_s10 }
 0x350   :  { %1758 = vrot.lane.b32.xlu1 %v746_v55, %s9137_s11  ;;  %v8188_v61 = vrot.slane %v4467_v40, 9  ;;  %v5339_v9 = vmax.f32 %v4466_v7, %v8186_v49  ;;  %v3370_v48 = vsel %vm3328_vm12, %v3305_v45, %v2765_v32  ;;  %v5340_v18 = vmax.f32 %v4465_v25, %v8187_v14  ;;  %v811_v7 = vld [vmem:[#allocation2 + $0x2aa] sm:$0xff] }
 0x351   :  { %v8184_v29 = vrot.slane %v4450_v31, 9  ;;  %v5335_v59 = vmax.f32 %v4449_v11, %v8182_v22  ;;  %v5336_v44 = vmax.f32 %v4448_v23, %v8183_v42  ;;  %v11357_v39 = vpop.permute.xlu0 %980  ;;  %v5737_v19 = vrot.slane %v5334_v58, %v10319_v33  ;;  %8676 = vmatmul.mubr.msk.f32.gmra.mrb[40].mxu0 %vm3397_vm13, %v3370_v48 }
 0x352   :  { %v11361_v53 = vpop.permute.xlu1 %1234  ;;  %v5341_v8 = vmax.f32 %v4467_v40, %v8188_v61  ;;  %v5753_v36 = vrot.slane %v5338_v1, %v10319_v33  ;;  %v5757_v21 = vrot.slane %v5339_v9, %v10319_v33  ;;  %v5761_v6 = vrot.slane %v5340_v18, %v10319_v33  ;;  %v9111_v40 = vld [vmem:[#allocation2 + $0x228] sm:$0xff]  ;;  %v748_v9 = vld [vmem:[#allocation2 + $0x2b9] sm:$0xff] }
 0x353   :  { %v5337_v43 = vmax.f32 %v4450_v31, %v8184_v29  ;;  %v5741_v16 = vrot.slane %v5335_v59, %v10319_v33  ;;  %v5745_v37 = vrot.slane %v5336_v44, %v10319_v33  ;;  %2524 = vrot.lane.b32.xlu0 %v747_v41, %s9140_s26  ;;  %v2916_v5 = vsel %vm32_vm0, %v9111_v40, %v11252_v2  ;;  %v684_v31 = vld [vmem:[#allocation2 + $0x2b8] sm:$0xff]  ;;  %v9112_v29 = vld [vmem:[#allocation2 + $0x230] sm:$0xff]  ;;  %v685_v44 = vld [vmem:[#allocation2 + $0x2c0] sm:$0xff] }
 0x354   :  { %2778 = vrot.lane.b32.xlu1 %v810_v24, %s9142_s1  ;;  %v5765_v34 = vrot.slane %v5341_v8, %v10319_v33  ;;  %v2981_v49 = vsel %vm2938_vm6, %v2916_v5, %v11271_v35  ;;  %v812_v8 = vld [vmem:[#allocation2 + $0x2ba] sm:$0xff] }
 0x355   :  { %v5749_v60 = vrot.slane %v5337_v43, %v10319_v33  ;;  %v6103_v47 = vsel %vm13175_vm10, %v5741_v16, %v5737_v19  ;;  %v2001_v50 = vpop.permute.xlu0 %2000  ;;  %v3046_v22 = vsel %vm3003_vm7, %v2981_v49, %v11281_v54  ;;  %vm13176_vm10 = vcmask 146432  }
 0x356   :  { %v6104_v17 = vsel %vm6056_vm3, %v5745_v37, %v6103_v47  ;;  %v2255_v12 = vpop.permute.xlu1 %2254  ;;  %v3111_v58 = vsel %vm3068_vm8, %v3046_v22, %v11309_v3  ;;  %v181_v3 = vld [vmem:[%s13153_s0 + $0x1e8] sm:$0xff] }
 0x357   :  { %v6105_v52 = vsel %vm6058_vm4, %v5749_v60, %v6104_v17  ;;  %994 = vrot.lane.b32.xlu0 %v746_v55, %s9135_s30  ;;  %v3176_v2 = vsel %vm3133_vm9, %v3111_v58, %v11349_v13  ;;  %v2917_v13 = vsel %vm32_vm0, %v9112_v29, %v11269_v56  ;;  %246 = vst.msk [vmem:[#allocation2 + $0x321] sm:$0xff] %vm32_vm0, %v181_v3  ;;  %v813_v17 = vld [vmem:[#allocation2 + $0x2c2] sm:$0xff]  ;;  %v687_v3 = vld [vmem:[#allocation2 + $0x2d8] sm:$0xff] }
 0x358   :  { %v6106_v27 = vsel %vm6060_vm5, %v5753_v36, %v6105_v52  ;;  %1760 = vrot.lane.b32.xlu1 %v747_v41, %s9137_s11  ;;  %v3241_v35 = vsel %vm13176_vm10, %v3176_v2, %v2255_v12 }
 0x359   :  { %v6107_v62 = vsel %vm6062_vm15, %v5757_v21, %v6106_v27  ;;  %v11381_v25 = vpop.permute.xlu0 %1236  ;;  %v9113_v27 = vld [vmem:[#allocation2 + $0x240] sm:$0xff] }
 0x35a   :  { %v6108_v15 = vsel %vm6064_vm1, %v5761_v6, %v6107_v62  ;;  %v11384_v23 = vpop.permute.xlu1 %1490  ;;  %v182_v6 = vld [vmem:[%s13153_s0 + $0x1f0] sm:$0xff] }
 0x35b   :  { %v6109_v11 = vsel %vm6066_vm2, %v5765_v34, %v6108_v15  ;;  %2014 = vrot.lane.b32.xlu0 %v810_v24, %s9138_s14  ;;  %v2918_v34 = vsel %vm32_vm0, %v9113_v27, %v11331_v20  ;;  %247 = vst.msk [vmem:[#allocation2 + $0x331] sm:$0xff] %vm32_vm0, %v182_v6  ;;  %v686_v15 = vld [vmem:[#allocation2 + $0x2d0] sm:$0xff] }
 0x35c   :  { %6196 = vst.msk [vmem:[#allocation3 + $0x71] sm:$0xff] %vm4114_vm14, %v6109_v11  ;;  %2780 = vrot.lane.b32.xlu1 %v811_v7, %s9142_s1  ;;  %v2983_v62 = vsel %vm2938_vm6, %v2918_v34, %v11361_v53 }
 0x35d   :  { %v2257_v55 = vpop.permute.xlu0 %2256  ;;  %v3048_v11 = vsel %vm3003_vm7, %v2983_v62, %v11384_v23 }
 0x35e   :  { %v2511_v57 = vpop.permute.xlu1 %2510 }
 0x35f   :  { %996 = vrot.lane.b32.xlu0 %v747_v41, %s9135_s30  ;;  %v3306_v14 = vsel %vm3263_vm11, %v3241_v35, %v2511_v57 }
 0x360   :  { %1250 = vrot.lane.b32.xlu1 %v810_v24, %s9134_s29  ;;  %v2982_v24 = vsel %vm2938_vm6, %v2917_v13, %v11279_v26 }
 0x361   :  { %v11400_v32 = vpop.permute.xlu0 %1492  ;;  %v3047_v19 = vsel %vm3003_vm7, %v2982_v24, %v11297_v63  ;;  %v749_v63 = vld [vmem:[#allocation2 + $0x2c1] sm:$0xff] }
 0x362   :  { %v11404_v42 = vpop.permute.xlu1 %1746  ;;  %v3112_v56 = vsel %vm3068_vm8, %v3047_v19, %v11336_v30 }
 0x363   :  { %2016 = vrot.lane.b32.xlu0 %v811_v7, %s9138_s14  ;;  %v3177_v43 = vsel %vm3133_vm9, %v3112_v56, %v2001_v50  ;;  %v3113_v20 = vsel %vm3068_vm8, %v3048_v11, %v11404_v42 }
 0x364   :  { %2270 = vrot.lane.b32.xlu1 %v684_v31, %s9139_s15  ;;  %v8659_v61 = vpop.f32.mrb[28].mxu0  ;;  %v3242_v16 = vsel %vm13176_vm10, %v3177_v43, %v2257_v55 }
 0x365   :  { %v2513_v46 = vpop.permute.xlu0 %2512  ;;  %v3800_v59 = vpop.f32.mrb[29].mxu0  ;;  %v4015_v55 = vadd.f32 %v11306_v4, %v8659_v61  ;;  %v183_v61 = vld [vmem:[%s13153_s0 + $0x1f8] sm:$0xff] }
 0x366   :  { %v2767_v41 = vpop.permute.xlu1 %2766  ;;  %v3307_v37 = vsel %vm3263_vm11, %v3242_v16, %v2513_v46  ;;  %v4014_v51 = vadd.f32 %v11306_v4, %v3800_v59  ;;  %248 = vst.msk [vmem:[#allocation2 + $0x339] sm:$0xff] %vm32_vm0, %v183_v61  ;;  %v750_v59 = vld [vmem:[#allocation2 + $0x2d1] sm:$0xff] }
 0x367   :  { %v3371_v54 = vsel %vm3328_vm12, %v3306_v14, %v2767_v41  ;;  %1252 = vrot.lane.b32.xlu0 %v811_v7, %s9134_s29  ;;  %v4079_v58 = vmax.f32 %v4015_v55, 0.0 }
 0x368   :  { %1506 = vrot.lane.b32.xlu1 %v684_v31, %s9136_s10  ;;  %8678 = vmatprep.mubr.msk.f32.mxu0 %vm3397_vm13, %v3371_v54  ;;  %v4078_v46 = vmax.f32 %v4014_v51, 0.0 }
 0x369   :  { %v11426_v1 = vpop.permute.xlu0 %982 }
 0x36a   :  { %v11430_v45 = vpop.permute.xlu1 %1748 }
 0x36b   :  { %2272 = vrot.lane.b32.xlu0 %v685_v44, %s9139_s15 }
 0x36c   :  { %2526 = vrot.lane.b32.xlu1 %v748_v9, %s9140_s26 }
 0x36d   :  { %v2003_v26 = vpop.permute.xlu0 %2002 }
 0x36e   :  { %v2769_v48 = vpop.permute.xlu1 %2768  ;;  %v3178_v53 = vsel %vm3133_vm9, %v3113_v20, %v2003_v26  ;;  %v751_v20 = vld [vmem:[#allocation2 + $0x2d9] sm:$0xff] }
 0x36f   :  { %v3372_v18 = vsel %vm3328_vm12, %v3307_v37, %v2769_v48  ;;  %1508 = vrot.lane.b32.xlu0 %v685_v44, %s9136_s10  ;;  %v9114_v44 = vld [vmem:[#allocation2 + $0x248] sm:$0xff] }
 0x370   :  { %1762 = vrot.lane.b32.xlu1 %v748_v9, %s9137_s11  ;;  %8679 = vmatmul.mubr.msk.f32.gmra.mrb[42].mxu0 %vm3397_vm13, %v3372_v18  ;;  %v2919_v24 = vsel %vm32_vm0, %v9114_v44, %v11357_v39 }
 0x371   :  { %v11443_v30 = vpop.permute.xlu0 %984  ;;  %v2984_v43 = vsel %vm2938_vm6, %v2919_v24, %v11381_v25 }
 0x372   :  { %v11445_v60 = vpop.permute.xlu1 %1238  ;;  %v3049_v37 = vsel %vm3003_vm7, %v2984_v43, %v11400_v32 }
 0x373   :  { %2528 = vrot.lane.b32.xlu0 %v749_v63, %s9140_s26  ;;  %v3114_v39 = vsel %vm3068_vm8, %v3049_v37, %v11430_v45 }
 0x374   :  { %2782 = vrot.lane.b32.xlu1 %v812_v8, %s9142_s1 }
 0x375   :  { %v11449_v47 = vpop.permute.xlu0 %2004 }
 0x376   :  { %v2259_v50 = vpop.permute.xlu1 %2258 }
 0x377   :  { %998 = vrot.lane.b32.xlu0 %v748_v9, %s9135_s30  ;;  %v3243_v23 = vsel %vm13176_vm10, %v3178_v53, %v2259_v50 }
 0x378   :  { %1764 = vrot.lane.b32.xlu1 %v749_v63, %s9137_s11 }
 0x379   :  { %v11453_v36 = vpop.permute.xlu0 %1240 }
 0x37a   :  { %v11455_v12 = vpop.permute.xlu1 %1494 }
 0x37b   :  { %2018 = vrot.lane.b32.xlu0 %v812_v8, %s9138_s14 }
 0x37c   :  { %2784 = vrot.lane.b32.xlu1 %v813_v17, %s9142_s1 }
 0x37d   :  { %v11459_v21 = vpop.permute.xlu0 %2260 }
 0x37e   :  { %v2515_v52 = vpop.permute.xlu1 %2514 }
 0x37f   :  { %1000 = vrot.lane.b32.xlu0 %v749_v63, %s9135_s30  ;;  %v3308_v42 = vsel %vm3263_vm11, %v3243_v23, %v2515_v52 }
 0x380   :  { %1254 = vrot.lane.b32.xlu1 %v812_v8, %s9134_s29 }
 0x381   :  { %v11471_v7 = vpop.permute.xlu0 %1496 }
 0x382   :  { %v11476_v57 = vpop.permute.xlu1 %1750 }
 0x383   :  { %v8662_v40 = vpop.f32.mrb[30].mxu0  ;;  %2020 = vrot.lane.b32.xlu0 %v813_v17, %s9138_s14 }
 0x384   :  { %v4017_v5 = vadd.f32 %v11306_v4, %v8662_v40  ;;  %2274 = vrot.lane.b32.xlu1 %v686_v15, %s9139_s15  ;;  %v3810_v49 = vpop.f32.mrb[31].mxu0 }
 0x385   :  { %v4016_v31 = vadd.f32 %v11306_v4, %v3810_v49  ;;  %v2517_v22 = vpop.permute.xlu0 %2516  ;;  %v814_v49 = vld [vmem:[#allocation2 + $0x2d2] sm:$0xff] }
 0x386   :  { %v4081_v2 = vmax.f32 %v4017_v5, 0.0  ;;  %v2771_v35 = vpop.permute.xlu1 %2770 }
 0x387   :  { %v4080_v14 = vmax.f32 %v4016_v31, 0.0  ;;  %v3373_v41 = vsel %vm3328_vm12, %v3308_v42, %v2771_v35  ;;  %1256 = vrot.lane.b32.xlu0 %v813_v17, %s9134_s29  ;;  %v3179_v17 = vsel %vm3133_vm9, %v3114_v39, %v11449_v47 }
 0x388   :  { %v4181_v54 = vmax.f32 %v4079_v58, %v4081_v2  ;;  %1510 = vrot.lane.b32.xlu1 %v686_v15, %s9136_s10  ;;  %8681 = vmatprep.mubr.msk.f32.mxu0 %vm3397_vm13, %v3373_v41  ;;  %v3244_v45 = vsel %vm13176_vm10, %v3179_v17, %v11459_v21  ;;  %vm13177_vm10 = vcmask 1041409   ;;  %v9115_v17 = vld [vmem:[#allocation2 + $0x258] sm:$0xff] }
 0x389   :  { %v4180_v29 = vmax.f32 %v4078_v46, %v4080_v14  ;;  %v11496_v13 = vpop.permute.xlu0 %986  ;;  %v3309_v42 = vsel %vm3263_vm11, %v3244_v45, %v2517_v22 }
 0x38a   :  { %v4485_v9 = vcombine.high %v4181_v54, %v4181_v54  ;;  %v4492_v19 = vrot.slane %v4181_v54, %v10289_v38  ;;  %v11501_v56 = vpop.permute.xlu1 %1752 }
 0x38b   :  { %v4468_v16 = vcombine.high %v4180_v29, %v4180_v29  ;;  %v4475_v26 = vrot.slane %v4180_v29, %v10289_v38  ;;  %2276 = vrot.lane.b32.xlu0 %v687_v3, %s9139_s15 }
 0x38c   :  { %v4499_v48 = vrot.slane %v4485_v9, %v10289_v38  ;;  %v4500_v18 = vcombine.high %v4492_v19, %v4492_v19  ;;  %2530 = vrot.lane.b32.xlu1 %v750_v59, %s9140_s26  ;;  %v8193_v6 = vrot.slane %v4492_v19, 9 }
 0x38d   :  { %v4482_v63 = vrot.slane %v4468_v16, %v10289_v38  ;;  %v4483_v8 = vcombine.high %v4475_v26, %v4475_v26  ;;  %v8189_v25 = vrot.slane %v4475_v26, 9  ;;  %v11514_v50 = vpop.permute.xlu0 %2006 }
 0x38e   :  { %v4501_v52 = vcombine.high %v4499_v48, %v4499_v48  ;;  %v8194_v32 = vrot.slane %v4500_v18, 9  ;;  %v2773_v27 = vpop.permute.xlu1 %2772  ;;  %v8195_v55 = vrot.slane %v4499_v48, 9  ;;  %v5346_v23 = vmax.f32 %v4492_v19, %v8193_v6 }
 0x38f   :  { %v4484_v34 = vcombine.high %v4482_v63, %v4482_v63  ;;  %v8190_v62 = vrot.slane %v4483_v8, 9  ;;  %v8191_v15 = vrot.slane %v4482_v63, 9  ;;  %v5342_v11 = vmax.f32 %v4475_v26, %v8189_v25  ;;  %1512 = vrot.lane.b32.xlu0 %v687_v3, %s9136_s10 }
 0x390   :  { %1766 = vrot.lane.b32.xlu1 %v750_v59, %s9137_s11  ;;  %v8196_v51 = vrot.slane %v4501_v52, 9  ;;  %v5347_v31 = vmax.f32 %v4500_v18, %v8194_v32  ;;  %v3374_v14 = vsel %vm3328_vm12, %v3309_v42, %v2773_v27  ;;  %v5348_v41 = vmax.f32 %v4499_v48, %v8195_v55  ;;  %v815_v18 = vld [vmem:[#allocation2 + $0x2da] sm:$0xff]  ;;  %v688_v27 = vld [vmem:[#allocation2 + $0x2e8] sm:$0xff] }
 0x391   :  { %v8192_v40 = vrot.slane %v4484_v34, 9  ;;  %v5343_v47 = vmax.f32 %v4483_v8, %v8190_v62  ;;  %v5344_v53 = vmax.f32 %v4482_v63, %v8191_v15  ;;  %v11522_v5 = vpop.permute.xlu0 %988  ;;  %v5769_v58 = vrot.slane %v5342_v11, %v10319_v33  ;;  %8682 = vmatmul.mubr.msk.f32.gmra.mrb[44].mxu0 %vm3397_vm13, %v3374_v14  ;;  %v816_v14 = vld [vmem:[#allocation2 + $0x2ea] sm:$0xff] }
 0x392   :  { %v11526_v2 = vpop.permute.xlu1 %1242  ;;  %v5349_v61 = vmax.f32 %v4501_v52, %v8196_v51  ;;  %v5785_v29 = vrot.slane %v5346_v23, %v10319_v33  ;;  %v5789_v9 = vrot.slane %v5347_v31, %v10319_v33  ;;  %v5793_v43 = vrot.slane %v5348_v41, %v10319_v33 }
 0x393   :  { %v5345_v21 = vmax.f32 %v4484_v34, %v8192_v40  ;;  %v5773_v35 = vrot.slane %v5343_v47, %v10319_v33  ;;  %v5777_v46 = vrot.slane %v5344_v53, %v10319_v33  ;;  %2532 = vrot.lane.b32.xlu0 %v751_v20, %s9140_s26  ;;  %v2920_v52 = vsel %vm32_vm0, %v9115_v17, %v11426_v1 }
 0x394   :  { %2786 = vrot.lane.b32.xlu1 %v814_v49, %s9142_s1  ;;  %v5797_v26 = vrot.slane %v5349_v61, %v10319_v33  ;;  %v2985_v6 = vsel %vm2938_vm6, %v2920_v52, %v11445_v60 }
 0x395   :  { %v5781_v54 = vrot.slane %v5345_v21, %v10319_v33  ;;  %v6110_v22 = vsel %vm13177_vm10, %v5773_v35, %v5769_v58  ;;  %v2009_v3 = vpop.permute.xlu0 %2008  ;;  %v3050_v34 = vsel %vm3003_vm7, %v2985_v6, %v11455_v12  ;;  %vm13178_vm10 = vcmask 146432  }
 0x396   :  { %v6111_v44 = vsel %vm6056_vm3, %v5777_v46, %v6110_v22  ;;  %v2263_v24 = vpop.permute.xlu1 %2262  ;;  %v3115_v15 = vsel %vm3068_vm8, %v3050_v34, %v11476_v57  ;;  %v9116_v57 = vld [vmem:[#allocation2 + $0x260] sm:$0xff] }
 0x397   :  { %v6112_v19 = vsel %vm6058_vm4, %v5781_v54, %v6111_v44  ;;  %1002 = vrot.lane.b32.xlu0 %v750_v59, %s9135_s30  ;;  %v3180_v1 = vsel %vm3133_vm9, %v3115_v15, %v11514_v50  ;;  %v2921_v40 = vsel %vm32_vm0, %v9116_v57, %v11443_v30  ;;  %v689_v50 = vld [vmem:[#allocation2 + $0x2f0] sm:$0xff] }
 0x398   :  { %v6113_v16 = vsel %vm6060_vm5, %v5785_v29, %v6112_v19  ;;  %1768 = vrot.lane.b32.xlu1 %v751_v20, %s9137_s11  ;;  %v3245_v60 = vsel %vm13178_vm10, %v3180_v1, %v2263_v24  ;;  %v2986_v47 = vsel %vm2938_vm6, %v2921_v40, %v11453_v36 }
 0x399   :  { %v6114_v37 = vsel %vm6062_vm15, %v5789_v9, %v6113_v16  ;;  %v11546_v48 = vpop.permute.xlu0 %1244  ;;  %v3051_v23 = vsel %vm3003_vm7, %v2986_v47, %v11471_v7  ;;  %v753_v7 = vld [vmem:[#allocation2 + $0x2f1] sm:$0xff] }
 0x39a   :  { %v6115_v39 = vsel %vm6064_vm1, %v5793_v43, %v6114_v37  ;;  %v11549_v63 = vpop.permute.xlu1 %1498  ;;  %v3116_v58 = vsel %vm3068_vm8, %v3051_v23, %v11501_v56  ;;  %v9117_v9 = vld [vmem:[#allocation2 + $0x270] sm:$0xff] }
 0x39b   :  { %v6116_v8 = vsel %vm6066_vm2, %v5797_v26, %v6115_v39  ;;  %2022 = vrot.lane.b32.xlu0 %v814_v49, %s9138_s14  ;;  %v3181_v30 = vsel %vm3133_vm9, %v3116_v58, %v2009_v3  ;;  %v817_v3 = vld [vmem:[#allocation2 + $0x2f2] sm:$0xff]  ;;  %v2922_v19 = vsel %vm32_vm0, %v9117_v9, %v11496_v13  ;;  %v690_v26 = vld [vmem:[#allocation2 + $0x300] sm:$0xff] }
 0x39c   :  { %6197 = vst.msk [vmem:[#allocation3 + $0x81] sm:$0xff] %vm4114_vm14, %v6116_v8  ;;  %2788 = vrot.lane.b32.xlu1 %v815_v18, %s9142_s1  ;;  %v2987_v43 = vsel %vm2938_vm6, %v2922_v19, %v11526_v2 }
 0x39d   :  { %v2265_v59 = vpop.permute.xlu0 %2264  ;;  %v3052_v37 = vsel %vm3003_vm7, %v2987_v43, %v11549_v63 }
 0x39e   :  { %v2519_v25 = vpop.permute.xlu1 %2518  ;;  %v3246_v42 = vsel %vm13178_vm10, %v3181_v30, %v2265_v59 }
 0x39f   :  { %1004 = vrot.lane.b32.xlu0 %v751_v20, %s9135_s30  ;;  %v3310_v45 = vsel %vm3263_vm11, %v3245_v60, %v2519_v25 }
 0x3a0   :  { %1258 = vrot.lane.b32.xlu1 %v814_v49, %s9134_s29  ;;  %v752_v49 = vld [vmem:[#allocation2 + $0x2e9] sm:$0xff] }
 0x3a1   :  { %v11561_v32 = vpop.permute.xlu0 %1500 }
 0x3a2   :  { %v11565_v62 = vpop.permute.xlu1 %1754 }
 0x3a3   :  { %2024 = vrot.lane.b32.xlu0 %v815_v18, %s9138_s14  ;;  %v8665_v55 = vpop.f32.mrb[32].mxu0  ;;  %v3117_v8 = vsel %vm3068_vm8, %v3052_v37, %v11565_v62  ;;  %v755_v37 = vld [vmem:[#allocation2 + $0x309] sm:$0xff] }
 0x3a4   :  { %2278 = vrot.lane.b32.xlu1 %v688_v27, %s9139_s15  ;;  %v3820_v12 = vpop.f32.mrb[33].mxu0 }
 0x3a5   :  { %v2521_v11 = vpop.permute.xlu0 %2520  ;;  %v4018_v13 = vadd.f32 %v11306_v4, %v3820_v12  ;;  %v754_v12 = vld [vmem:[#allocation2 + $0x301] sm:$0xff] }
 0x3a6   :  { %v2775_v20 = vpop.permute.xlu1 %2774  ;;  %v3311_v21 = vsel %vm3263_vm11, %v3246_v42, %v2521_v11 }
 0x3a7   :  { %v3375_v51 = vsel %vm3328_vm12, %v3310_v45, %v2775_v20  ;;  %1260 = vrot.lane.b32.xlu0 %v815_v18, %s9134_s29  ;;  %v4019_v18 = vadd.f32 %v11306_v4, %v8665_v55  ;;  %v4082_v1 = vmax.f32 %v4018_v13, 0.0  ;;  %v691_v55 = vld [vmem:[#allocation2 + $0x308] sm:$0xff] }
 0x3a8   :  { %1514 = vrot.lane.b32.xlu1 %v688_v27, %s9136_s10  ;;  %8684 = vmatprep.mubr.msk.f32.mxu0 %vm3397_vm13, %v3375_v51  ;;  %v9118_v51 = vld [vmem:[#allocation2 + $0x278] sm:$0xff] }
 0x3a9   :  { %v11583_v53 = vpop.permute.xlu0 %990  ;;  %v4083_v27 = vmax.f32 %v4019_v18, 0.0  ;;  %v2923_v57 = vsel %vm32_vm0, %v9118_v51, %v11522_v5 }
 0x3aa   :  { %v11587_v31 = vpop.permute.xlu1 %1756 }
 0x3ab   :  { %2280 = vrot.lane.b32.xlu0 %v689_v50, %s9139_s15 }
 0x3ac   :  { %2534 = vrot.lane.b32.xlu1 %v752_v49, %s9140_s26 }
 0x3ad   :  { %v2011_v36 = vpop.permute.xlu0 %2010 }
 0x3ae   :  { %v2777_v35 = vpop.permute.xlu1 %2776  ;;  %v3182_v2 = vsel %vm3133_vm9, %v3117_v8, %v2011_v36 }
 0x3af   :  { %v3376_v46 = vsel %vm3328_vm12, %v3311_v21, %v2777_v35  ;;  %1516 = vrot.lane.b32.xlu0 %v689_v50, %s9136_s10 }
 0x3b0   :  { %1770 = vrot.lane.b32.xlu1 %v752_v49, %s9137_s11  ;;  %8685 = vmatmul.mubr.msk.f32.gmra.mrb[46].mxu0 %vm3397_vm13, %v3376_v46 }
 0x3b1   :  { %v11600_v56 = vpop.permute.xlu0 %992 }
 0x3b2   :  { %v11602_v41 = vpop.permute.xlu1 %1246 }
 0x3b3   :  { %2536 = vrot.lane.b32.xlu0 %v753_v7, %s9140_s26 }
 0x3b4   :  { %2790 = vrot.lane.b32.xlu1 %v816_v14, %s9142_s1 }
 0x3b5   :  { %v11606_v61 = vpop.permute.xlu0 %2012 }
 0x3b6   :  { %v2267_v54 = vpop.permute.xlu1 %2266 }
 0x3b7   :  { %1006 = vrot.lane.b32.xlu0 %v752_v49, %s9135_s30  ;;  %v3247_v63 = vsel %vm13178_vm10, %v3182_v2, %v2267_v54  ;;  %v2988_v49 = vsel %vm2938_vm6, %v2923_v57, %v11546_v48  ;;  %v818_v2 = vld [vmem:[#allocation2 + $0x302] sm:$0xff] }
 0x3b8   :  { %1772 = vrot.lane.b32.xlu1 %v753_v7, %s9137_s11  ;;  %v3053_v30 = vsel %vm3003_vm7, %v2988_v49, %v11561_v32 }
 0x3b9   :  { %v11610_v22 = vpop.permute.xlu0 %1248  ;;  %v3118_v5 = vsel %vm3068_vm8, %v3053_v30, %v11587_v31 }
 0x3ba   :  { %v11612_v29 = vpop.permute.xlu1 %1502 }
 0x3bb   :  { %2026 = vrot.lane.b32.xlu0 %v816_v14, %s9138_s14 }
 0x3bc   :  { %2792 = vrot.lane.b32.xlu1 %v817_v3, %s9142_s1 }
 0x3bd   :  { %v11616_v44 = vpop.permute.xlu0 %2268 }
 0x3be   :  { %v2523_v24 = vpop.permute.xlu1 %2522 }
 0x3bf   :  { %1008 = vrot.lane.b32.xlu0 %v753_v7, %s9135_s30  ;;  %v3312_v34 = vsel %vm3263_vm11, %v3247_v63, %v2523_v24  ;;  %v3183_v7 = vsel %vm3133_vm9, %v3118_v5, %v11606_v61 }
 0x3c0   :  { %1262 = vrot.lane.b32.xlu1 %v816_v14, %s9134_s29  ;;  %v3248_v31 = vsel %vm13178_vm10, %v3183_v7, %v11616_v44  ;;  %vm13179_vm10 = vcmask 1041409  }
 0x3c1   :  { %v11624_v16 = vpop.permute.xlu0 %1504 }
 0x3c2   :  { %v11629_v39 = vpop.permute.xlu1 %1758 }
 0x3c3   :  { %v8668_v59 = vpop.f32.mrb[34].mxu0  ;;  %2028 = vrot.lane.b32.xlu0 %v817_v3, %s9138_s14 }
 0x3c4   :  { %v4021_v25 = vadd.f32 %v11306_v4, %v8668_v59  ;;  %2282 = vrot.lane.b32.xlu1 %v690_v26, %s9139_s15  ;;  %v3830_v17 = vpop.f32.mrb[35].mxu0 }
 0x3c5   :  { %v4020_v52 = vadd.f32 %v11306_v4, %v3830_v17  ;;  %v2525_v6 = vpop.permute.xlu0 %2524 }
 0x3c6   :  { %v4085_v62 = vmax.f32 %v4021_v25, 0.0  ;;  %v2779_v15 = vpop.permute.xlu1 %2778 }
 0x3c7   :  { %v4084_v60 = vmax.f32 %v4020_v52, 0.0  ;;  %v3377_v11 = vsel %vm3328_vm12, %v3312_v34, %v2779_v15  ;;  %1264 = vrot.lane.b32.xlu0 %v817_v3, %s9134_s29  ;;  %v3313_v52 = vsel %vm3263_vm11, %v3248_v31, %v2525_v6 }
 0x3c8   :  { %v4183_v45 = vmax.f32 %v4083_v27, %v4085_v62  ;;  %1518 = vrot.lane.b32.xlu1 %v690_v26, %s9136_s10  ;;  %8687 = vmatprep.mubr.msk.f32.mxu0 %vm3397_vm13, %v3377_v11 }
 0x3c9   :  { %v4182_v20 = vmax.f32 %v4082_v1, %v4084_v60  ;;  %v11645_v4 = vpop.permute.xlu0 %994 }
 0x3ca   :  { %v4519_v40 = vcombine.high %v4183_v45, %v4183_v45  ;;  %v4526_v50 = vrot.slane %v4183_v45, %v10289_v38  ;;  %v11650_v47 = vpop.permute.xlu1 %1760 }
 0x3cb   :  { %v4502_v23 = vcombine.high %v4182_v20, %v4182_v20  ;;  %v4509_v58 = vrot.slane %v4182_v20, %v10289_v38  ;;  %2284 = vrot.lane.b32.xlu0 %v691_v55, %s9139_s15 }
 0x3cc   :  { %v4533_v42 = vrot.slane %v4519_v40, %v10289_v38  ;;  %v4534_v36 = vcombine.high %v4526_v50, %v4526_v50  ;;  %2538 = vrot.lane.b32.xlu1 %v754_v12, %s9140_s26  ;;  %v8201_v54 = vrot.slane %v4526_v50, 9 }
 0x3cd   :  { %v4516_v21 = vrot.slane %v4502_v23, %v10289_v38  ;;  %v4517_v35 = vcombine.high %v4509_v58, %v4509_v58  ;;  %v8197_v48 = vrot.slane %v4509_v58, 9  ;;  %v11663_v46 = vpop.permute.xlu0 %2014 }
 0x3ce   :  { %v4535_v14 = vcombine.high %v4533_v42, %v4533_v42  ;;  %v8202_v32 = vrot.slane %v4534_v36, 9  ;;  %v2781_v3 = vpop.permute.xlu1 %2780  ;;  %v8203_v26 = vrot.slane %v4533_v42, 9  ;;  %v5354_v25 = vmax.f32 %v4526_v50, %v8201_v54 }
 0x3cf   :  { %v4518_v24 = vcombine.high %v4516_v21, %v4516_v21  ;;  %v8198_v9 = vrot.slane %v4517_v35, 9  ;;  %v8199_v19 = vrot.slane %v4516_v21, 9  ;;  %v5350_v43 = vmax.f32 %v4509_v58, %v8197_v48  ;;  %1520 = vrot.lane.b32.xlu0 %v691_v55, %s9136_s10  ;;  %v9119_v48 = vld [vmem:[#allocation2 + $0x288] sm:$0xff] }
 0x3d0   :  { %1774 = vrot.lane.b32.xlu1 %v754_v12, %s9137_s11  ;;  %v8204_v18 = vrot.slane %v4535_v14, 9  ;;  %v5355_v17 = vmax.f32 %v4534_v36, %v8202_v32  ;;  %v3378_v15 = vsel %vm3328_vm12, %v3313_v52, %v2781_v3  ;;  %v5356_v1 = vmax.f32 %v4533_v42, %v8203_v26  ;;  %v819_v42 = vld [vmem:[#allocation2 + $0x30a] sm:$0xff]  ;;  %v692_v32 = vld [vmem:[#allocation2 + $0x318] sm:$0xff] }
 0x3d1   :  { %v8200_v8 = vrot.slane %v4518_v24, 9  ;;  %v5351_v61 = vmax.f32 %v4517_v35, %v8198_v9  ;;  %v5352_v13 = vmax.f32 %v4516_v21, %v8199_v19  ;;  %v11671_v59 = vpop.permute.xlu0 %996  ;;  %v5801_v63 = vrot.slane %v5350_v43, %v10319_v33  ;;  %8688 = vmatmul.mubr.msk.f32.gmra.mrb[48].mxu0 %vm3397_vm13, %v3378_v15 }
 0x3d2   :  { %v11675_v27 = vpop.permute.xlu1 %1250  ;;  %v5357_v60 = vmax.f32 %v4535_v14, %v8204_v18  ;;  %v5817_v55 = vrot.slane %v5354_v25, %v10319_v33  ;;  %v5821_v57 = vrot.slane %v5355_v17, %v10319_v33  ;;  %v5825_v50 = vrot.slane %v5356_v1, %v10319_v33 }
 0x3d3   :  { %v5353_v44 = vmax.f32 %v4518_v24, %v8200_v8  ;;  %v5805_v34 = vrot.slane %v5351_v61, %v10319_v33  ;;  %v5809_v62 = vrot.slane %v5352_v13, %v10319_v33  ;;  %2540 = vrot.lane.b32.xlu0 %v755_v37, %s9140_s26  ;;  %v2924_v7 = vsel %vm32_vm0, %v9119_v48, %v11583_v53  ;;  %v756_v13 = vld [vmem:[#allocation2 + $0x319] sm:$0xff] }
 0x3d4   :  { %2794 = vrot.lane.b32.xlu1 %v818_v2, %s9142_s1  ;;  %v5829_v23 = vrot.slane %v5357_v60, %v10319_v33  ;;  %v2989_v14 = vsel %vm2938_vm6, %v2924_v7, %v11602_v41 }
 0x3d5   :  { %v5813_v11 = vrot.slane %v5353_v44, %v10319_v33  ;;  %v6117_v6 = vsel %vm13179_vm10, %v5805_v34, %v5801_v63  ;;  %v2017_v45 = vpop.permute.xlu0 %2016  ;;  %v3054_v3 = vsel %vm3003_vm7, %v2989_v14, %v11612_v29  ;;  %vm13180_vm10 = vcmask 146432  }
 0x3d6   :  { %v6118_v20 = vsel %vm6056_vm3, %v5809_v62, %v6117_v6  ;;  %v2271_v51 = vpop.permute.xlu1 %2270  ;;  %v3119_v9 = vsel %vm3068_vm8, %v3054_v3, %v11629_v39  ;;  %v9120_v39 = vld [vmem:[#allocation2 + $0x290] sm:$0xff]  ;;  %v820_v62 = vld [vmem:[#allocation2 + $0x31a] sm:$0xff]  ;;  %v821_v6 = vld [vmem:[#allocation2 + $0x322] sm:$0xff] }
 0x3d7   :  { %v6119_v40 = vsel %vm6058_vm4, %v5813_v11, %v6118_v20  ;;  %1010 = vrot.lane.b32.xlu0 %v754_v12, %s9135_s30  ;;  %v3184_v53 = vsel %vm3133_vm9, %v3119_v9, %v11663_v46  ;;  %v2925_v18 = vsel %vm32_vm0, %v9120_v39, %v11600_v56  ;;  %v11730_v46 = vld [vmem:[#allocation2 + $0x320] sm:$0xff]  ;;  %v695_v39 = vld [vmem:[#allocation2 + $0x338] sm:$0xff] }
 0x3d8   :  { %v6120_v49 = vsel %vm6060_vm5, %v5817_v55, %v6119_v40  ;;  %1776 = vrot.lane.b32.xlu1 %v755_v37, %s9137_s11  ;;  %v3249_v41 = vsel %vm13180_vm10, %v3184_v53, %v2271_v51  ;;  %v2990_v8 = vsel %vm2938_vm6, %v2925_v18, %v11610_v22  ;;  %v2926_v51 = vsel %vm32_vm0, %v11299_v10, %v11645_v4  ;;  %v6671_v3 = vld [vmem:[%s13156_s3] sm:$0xff]  ;;  %v6689_v18 = vld [vmem:[%s13156_s3 + $0x90] sm:$0xff] }
 0x3d9   :  { %v6121_v58 = vsel %vm6062_vm15, %v5821_v57, %v6120_v49  ;;  %v11695_v30 = vpop.permute.xlu0 %1252  ;;  %v2991_v57 = vsel %vm2938_vm6, %v2926_v51, %v11675_v27 }
 0x3da   :  { %v6122_v36 = vsel %vm6064_vm1, %v5825_v50, %v6121_v58  ;;  %v11698_v5 = vpop.permute.xlu1 %1506  ;;  %v694_v50 = vld [vmem:[#allocation2 + $0x330] sm:$0xff] }
 0x3db   :  { %v6123_v21 = vsel %vm6066_vm2, %v5829_v23, %v6122_v36  ;;  %2030 = vrot.lane.b32.xlu0 %v818_v2, %s9138_s14  ;;  %v3056_v49 = vsel %vm3003_vm7, %v2991_v57, %v11698_v5  ;;  %v11785_v23 = vld [vmem:[%s13155_s2] ss:$0 sm:$0xff] }
 0x3dc   :  { %6198 = vst.msk [vmem:[#allocation3 + $0xb1] sm:$0xff] %vm4114_vm14, %v6123_v21  ;;  %2796 = vrot.lane.b32.xlu1 %v819_v42, %s9142_s1 }
 0x3dd   :  { %v2273_v12 = vpop.permute.xlu0 %2272 }
 0x3de   :  { %v2527_v35 = vpop.permute.xlu1 %2526 }
 0x3df   :  { %1012 = vrot.lane.b32.xlu0 %v755_v37, %s9135_s30  ;;  %v3314_v43 = vsel %vm3263_vm11, %v3249_v41, %v2527_v35  ;;  %v6688_v35 = vld [vmem:[%s13156_s3 + $0x88] sm:$0xff] }
 0x3e0   :  { %1266 = vrot.lane.b32.xlu1 %v818_v2, %s9134_s29  ;;  %v3055_v2 = vsel %vm3003_vm7, %v2990_v8, %v11624_v16  ;;  %v6690_v8 = vld [vmem:[%s13156_s3 + $0x98] sm:$0xff] }
 0x3e1   :  { %v11710_v54 = vpop.permute.xlu0 %1508  ;;  %v3120_v56 = vsel %vm3068_vm8, %v3055_v2, %v11650_v47  ;;  %v757_v47 = vld [vmem:[#allocation2 + $0x321] sm:$0xff] }
 0x3e2   :  { %v11714_v24 = vpop.permute.xlu1 %1762  ;;  %v3185_v17 = vsel %vm3133_vm9, %v3120_v56, %v2017_v45  ;;  %v758_v56 = vld [vmem:[#allocation2 + $0x331] sm:$0xff] }
 0x3e3   :  { %2032 = vrot.lane.b32.xlu0 %v819_v42, %s9138_s14  ;;  %v8671_v31 = vpop.f32.mrb[36].mxu0  ;;  %v3250_v22 = vsel %vm13180_vm10, %v3185_v17, %v2273_v12  ;;  %v3121_v10 = vsel %vm3068_vm8, %v3056_v49, %v11714_v24  ;;  %v6687_v12 = vld [vmem:[%s13156_s3 + $0x80] sm:$0xff]  ;;  %v6672_v24 = vld [vmem:[%s13156_s3 + $0x8] sm:$0xff]  ;;  %v8765_v17 = vpack.c.bf16 %v6690_v8, %v6689_v18 }
 0x3e4   :  { %2286 = vrot.lane.b32.xlu1 %v692_v32, %s9139_s15  ;;  %v3840_v29 = vpop.f32.mrb[37].mxu0  ;;  %v4023_v58 = vadd.f32 %v11785_v23, %v8671_v31  ;;  %v6691_v49 = vld [vmem:[%s13156_s3 + $0xa0] sm:$0xff] }
 0x3e5   :  { %v2529_v19 = vpop.permute.xlu0 %2528  ;;  %v4022_v4 = vadd.f32 %v11785_v23, %v3840_v29 }
 0x3e6   :  { %v2783_v26 = vpop.permute.xlu1 %2782  ;;  %v3315_v52 = vsel %vm3263_vm11, %v3250_v22, %v2529_v19  ;;  %v4087_v9 = vmax.f32 %v4023_v58, 0.0  ;;  %v6673_v22 = vld [vmem:[%s13156_s3 + $0x10] sm:$0xff] }
 0x3e7   :  { %v3379_v37 = vsel %vm3328_vm12, %v3314_v43, %v2783_v26  ;;  %1268 = vrot.lane.b32.xlu0 %v819_v42, %s9134_s29  ;;  %v8763_v43 = vpack.c.bf16 %v6672_v24, %v6671_v3  ;;  %v4086_v31 = vmax.f32 %v4022_v4, 0.0 }
 0x3e8   :  { %1522 = vrot.lane.b32.xlu1 %v692_v32, %s9136_s10  ;;  %8690 = vmatprep.mubr.msk.f32.mxu0 %vm3397_vm13, %v3379_v37  ;;  %v8761_v32 = vpack.c.bf16 %v6688_v35, %v6687_v12 }
 0x3e9   :  { %v11734_v61 = vpop.permute.xlu0 %998 }
 0x3ea   :  { %v11738_v25 = vpop.permute.xlu1 %1764  ;;  %8762 = vmatprep.subr.bf16.mxu1 %v8761_v32 }
 0x3eb   :  { %2288 = vrot.lane.b32.xlu0 %v11730_v46, %s9139_s15  ;;  %8764 = vmatpush3.bf16.msra.mxu1 %v8763_v43 }
 0x3ec   :  { %2542 = vrot.lane.b32.xlu1 %v756_v13, %s9140_s26  ;;  %8766 = vmatprep.subr.bf16.mxu1 %v8765_v17  ;;  %v6694_v17 = vld [vmem:[%s13156_s3 + $0xb8] sm:$0xff] }
 0x3ed   :  { %v2019_v63 = vpop.permute.xlu0 %2018 }
 0x3ee   :  { %v2785_v44 = vpop.permute.xlu1 %2784  ;;  %v3186_v36 = vsel %vm3133_vm9, %v3121_v10, %v2019_v63  ;;  %v6674_v63 = vld [vmem:[%s13156_s3 + $0x18] sm:$0xff] }
 0x3ef   :  { %v3380_v16 = vsel %vm3328_vm12, %v3315_v52, %v2785_v44  ;;  %1524 = vrot.lane.b32.xlu0 %v11730_v46, %s9136_s10  ;;  %v9122_v52 = vld [vmem:[#allocation2 + $0x2a8] sm:$0xff] }
 0x3f0   :  { %1778 = vrot.lane.b32.xlu1 %v756_v13, %s9137_s11  ;;  %8691 = vmatmul.mubr.msk.f32.gmra.mrb[50].mxu0 %vm3397_vm13, %v3380_v16  ;;  %v2927_v44 = vsel %vm32_vm0, %v9122_v52, %v11671_v59 }
 0x3f1   :  { %v11753_v34 = vpop.permute.xlu0 %1000 }
 0x3f2   :  { %v11755_v15 = vpop.permute.xlu1 %1254 }
 0x3f3   :  { %2544 = vrot.lane.b32.xlu0 %v757_v47, %s9140_s26 }
 0x3f4   :  { %2798 = vrot.lane.b32.xlu1 %v820_v62, %s9142_s1 }
 0x3f5   :  { %v11759_v1 = vpop.permute.xlu0 %2020 }
 0x3f6   :  { %v2275_v60 = vpop.permute.xlu1 %2274 }
 0x3f7   :  { %1014 = vrot.lane.b32.xlu0 %v756_v13, %s9135_s30  ;;  %v3251_v48 = vsel %vm13180_vm10, %v3186_v36, %v2275_v60  ;;  %v8767_v60 = vpack.c.bf16 %v6674_v63, %v6673_v22 }
 0x3f8   :  { %1780 = vrot.lane.b32.xlu1 %v757_v47, %s9137_s11 }
 0x3f9   :  { %v11763_v11 = vpop.permute.xlu0 %1256  ;;  %8768 = vmatpush3.bf16.msra.mxu1 %v8767_v60 }
 0x3fa   :  { %v11765_v45 = vpop.permute.xlu1 %1510 }
 0x3fb   :  { %2034 = vrot.lane.b32.xlu0 %v820_v62, %s9138_s14 }
 0x3fc   :  { %2800 = vrot.lane.b32.xlu1 %v821_v6, %s9142_s1 }
 0x3fd   :  { %v11769_v55 = vpop.permute.xlu0 %2276 }
 0x3fe   :  { %v2531_v20 = vpop.permute.xlu1 %2530 }
 0x3ff   :  { %1016 = vrot.lane.b32.xlu0 %v757_v47, %s9135_s30  ;;  %v3316_v53 = vsel %vm3263_vm11, %v3251_v48, %v2531_v20 }
 0x400   :  { %1270 = vrot.lane.b32.xlu1 %v820_v62, %s9134_s29 }
 0x401   :  { %v11778_v40 = vpop.permute.xlu0 %1512 }
 0x402   :  { %v11788_v42 = vpop.permute.xlu1 %1766 }
 0x403   :  { %v8674_v27 = vpop.f32.mrb[38].mxu0  ;;  %2036 = vrot.lane.b32.xlu0 %v821_v6, %s9138_s14 }
 0x404   :  { %v4025_v5 = vadd.f32 %v11785_v23, %v8674_v27  ;;  %2290 = vrot.lane.b32.xlu1 %v694_v50, %s9139_s15  ;;  %v3850_v21 = vpop.f32.mrb[39].mxu0 }
 0x405   :  { %v4024_v7 = vadd.f32 %v11785_v23, %v3850_v21  ;;  %v11805_v14 = vpop.permute.xlu0 %2532 }
 0x406   :  { %v4089_v41 = vmax.f32 %v4025_v5, 0.0  ;;  %v2787_v19 = vpop.permute.xlu1 %2786 }
 0x407   :  { %v4088_v26 = vmax.f32 %v4024_v7, 0.0  ;;  %v3381_v29 = vsel %vm3328_vm12, %v3316_v53, %v2787_v19  ;;  %1272 = vrot.lane.b32.xlu0 %v821_v6, %s9134_s29  ;;  %v2992_v6 = vsel %vm2938_vm6, %v2927_v44, %v11695_v30  ;;  %v6692_v30 = vld [vmem:[%s13156_s3 + $0xa8] sm:$0xff]  ;;  %v6735_v44 = vld [vmem:[%s13156_s3 + $0x200] sm:$0xff] }
 0x408   :  { %v4185_v37 = vmax.f32 %v4087_v9, %v4089_v41  ;;  %1526 = vrot.lane.b32.xlu1 %v694_v50, %s9136_s10  ;;  %8693 = vmatprep.mubr.msk.f32.mxu0 %vm3397_vm13, %v3381_v29  ;;  %v3057_v57 = vsel %vm3003_vm7, %v2992_v6, %v11710_v54  ;;  %v8769_v54 = vpack.c.bf16 %v6692_v30, %v6691_v49  ;;  %v759_v41 = vld [vmem:[#allocation2 + $0x339] sm:$0xff]  ;;  %v6677_v6 = vld [vmem:[%s13156_s3 + $0x30] sm:$0xff] }
 0x409   :  { %v4184_v13 = vmax.f32 %v4086_v31, %v4088_v26  ;;  %v11824_v2 = vpop.permute.xlu0 %1002  ;;  %v3122_v36 = vsel %vm3068_vm8, %v3057_v57, %v11738_v25  ;;  %v822_v29 = vld [vmem:[#allocation2 + $0x332] sm:$0xff]  ;;  %v6695_v30 = vld [vmem:[%s13156_s3 + $0xc0] sm:$0xff] }
 0x40a   :  { %v4553_v16 = vcombine.high %v4185_v37, %v4185_v37  ;;  %v4560_v47 = vrot.slane %v4185_v37, %v10289_v38  ;;  %v11835_v62 = vpop.permute.xlu1 %1768  ;;  %8770 = vmatprep.subr.bf16.mxu1 %v8769_v54  ;;  %v3187_v24 = vsel %vm3133_vm9, %v3122_v36, %v11759_v1  ;;  %v6675_v37 = vld [vmem:[%s13156_s3 + $0x20] sm:$0xff] }
 0x40b   :  { %v4536_v20 = vcombine.high %v4184_v13, %v4184_v13  ;;  %v4543_v51 = vrot.slane %v4184_v13, %v10289_v38  ;;  %2292 = vrot.lane.b32.xlu0 %v695_v39, %s9139_s15  ;;  %v3252_v25 = vsel %vm13180_vm10, %v3187_v24, %v11769_v55  ;;  %v6676_v55 = vld [vmem:[%s13156_s3 + $0x28] sm:$0xff]  ;;  %vm13181_vm10 = vcmask 1041409  }
 0x40c   :  { %v4567_v59 = vrot.slane %v4553_v16, %v10289_v38  ;;  %v4568_v50 = vcombine.high %v4560_v47, %v4560_v47  ;;  %2546 = vrot.lane.b32.xlu1 %v758_v56, %s9140_s26  ;;  %v8209_v21 = vrot.slane %v4560_v47, 9  ;;  %v3317_v8 = vsel %vm3263_vm11, %v3252_v25, %v11805_v14  ;;  %v6736_v16 = vld [vmem:[%s13156_s3 + $0x208] sm:$0xff] }
 0x40d   :  { %v4550_v58 = vrot.slane %v4536_v20, %v10289_v38  ;;  %v4551_v10 = vcombine.high %v4543_v51, %v4543_v51  ;;  %v8205_v4 = vrot.slane %v4543_v51, 9  ;;  %v11852_v27 = vpop.permute.xlu0 %2022  ;;  %v6678_v20 = vld [vmem:[%s13156_s3 + $0x38] sm:$0xff]  ;;  %v8825_v36 = vpack.c.bf16 %v6736_v16, %v6735_v44  ;;  %v6699_v16 = vld [vmem:[%s13156_s3 + $0xe0] sm:$0xff] }
 0x40e   :  { %v4569_v5 = vcombine.high %v4567_v59, %v4567_v59  ;;  %v8210_v12 = vrot.slane %v4568_v50, 9  ;;  %v2789_v35 = vpop.permute.xlu1 %2788  ;;  %v8211_v9 = vrot.slane %v4567_v59, 9 }
 0x40f   :  { %v4552_v48 = vcombine.high %v4550_v58, %v4550_v58  ;;  %v8206_v7 = vrot.slane %v4551_v10, 9  ;;  %v8207_v32 = vrot.slane %v4550_v58, 9  ;;  %v5358_v3 = vmax.f32 %v4543_v51, %v8205_v4  ;;  %1528 = vrot.lane.b32.xlu0 %v695_v39, %s9136_s10  ;;  %8826 = vmatprep.subr.bf16.mxu0 %v8825_v36 }
 0x410   :  { %v8212_v53 = vrot.slane %v4569_v5, 9  ;;  %1782 = vrot.lane.b32.xlu1 %v758_v56, %s9137_s11  ;;  %v5362_v39 = vmax.f32 %v4560_v47, %v8209_v21  ;;  %v5363_v1 = vmax.f32 %v4568_v50, %v8210_v12  ;;  %v6693_v56 = vld [vmem:[%s13156_s3 + $0xb0] sm:$0xff]  ;;  %v3382_v14 = vsel %vm3328_vm12, %v3317_v8, %v2789_v35  ;;  %v6738_v21 = vld [vmem:[%s13156_s3 + $0x218] sm:$0xff]  ;;  %8828 = vmatpush3.bf16.msra.mxu0 %v8825_v36 }
 0x411   :  { %v8208_v19 = vrot.slane %v4552_v48, 9  ;;  %v5359_v43 = vmax.f32 %v4551_v10, %v8206_v7  ;;  %v5360_v31 = vmax.f32 %v4550_v58, %v8207_v32  ;;  %v11862_v26 = vpop.permute.xlu0 %1004  ;;  %v5833_v18 = vrot.slane %v5358_v3, %v10319_v33  ;;  %8694 = vmatmul.mubr.msk.f32.gmra.mrb[52].mxu0 %vm3397_vm13, %v3382_v14  ;;  %v6696_v58 = vld [vmem:[%s13156_s3 + $0xc8] sm:$0xff]  ;;  %v823_v3 = vld [vmem:[#allocation2 + $0x33a] sm:$0xff]  ;;  %v697_v14 = vld [vmem:[#allocation2 + $0x350] sm:$0xff] }
 0x412   :  { %v11870_v13 = vpop.permute.xlu1 %1258  ;;  %v5364_v47 = vmax.f32 %v4567_v59, %v8211_v9  ;;  %v5365_v60 = vmax.f32 %v4569_v5, %v8212_v53  ;;  %v8771_v59 = vpack.c.bf16 %v6676_v55, %v6675_v37  ;;  %v8773_v49 = vpack.c.bf16 %v6694_v17, %v6693_v56  ;;  %v6737_v5 = vld [vmem:[%s13156_s3 + $0x210] sm:$0xff]  ;;  %v6679_v9 = vld [vmem:[%s13156_s3 + $0x40] sm:$0xff]  ;;  %v6680_v53 = vld [vmem:[%s13156_s3 + $0x48] sm:$0xff] }
 0x413   :  { %v5361_v22 = vmax.f32 %v4552_v48, %v8208_v19  ;;  %v5837_v63 = vrot.slane %v5359_v43, %v10319_v33  ;;  %v5841_v52 = vrot.slane %v5360_v31, %v10319_v33  ;;  %2548 = vrot.lane.b32.xlu0 %v759_v41, %s9140_s26  ;;  %v5849_v10 = vrot.slane %v5362_v39, %v10319_v33  ;;  %v6697_v31 = vld [vmem:[%s13156_s3 + $0xd0] sm:$0xff]  ;;  %v696_v56 = vld [vmem:[#allocation2 + $0x348] sm:$0xff] }
 0x414   :  { %2802 = vrot.lane.b32.xlu1 %v822_v29, %s9142_s1  ;;  %v5853_v12 = vrot.slane %v5363_v1, %v10319_v33  ;;  %8772 = vmatpush3.bf16.msra.mxu1 %v8771_v59  ;;  %v8775_v48 = vpack.c.bf16 %v6678_v20, %v6677_v6  ;;  %v5857_v7 = vrot.slane %v5364_v47, %v10319_v33  ;;  %v6739_v1 = vld [vmem:[%s13156_s3 + $0x220] sm:$0xff]  ;;  %v6700_v47 = vld [vmem:[%s13156_s3 + $0xe8] sm:$0xff]  ;;  %v6741_v6 = vld [vmem:[%s13156_s3 + $0x230] sm:$0xff] }
 0x415   :  { %v5845_v51 = vrot.slane %v5361_v22, %v10319_v33  ;;  %v6124_v57 = vsel %vm13181_vm10, %v5837_v63, %v5833_v18  ;;  %v11901_v50 = vpop.permute.xlu0 %2024  ;;  %8774 = vmatprep.subr.bf16.mxu1 %v8773_v49  ;;  %v8777_v24 = vpack.c.bf16 %v6696_v58, %v6695_v30  ;;  %v8829_v43 = vpack.c.bf16 %v6738_v21, %v6737_v5  ;;  %v6740_v18 = vld [vmem:[%s13156_s3 + $0x228] sm:$0xff]  ;;  %v6681_v22 = vld [vmem:[%s13156_s3 + $0x50] sm:$0xff]  ;;  %v6682_v63 = vld [vmem:[%s13156_s3 + $0x58] sm:$0xff] }
 0x416   :  { %v6125_v4 = vsel %vm6056_vm3, %v5841_v52, %v6124_v57  ;;  %v11911_v54 = vpop.permute.xlu1 %2278  ;;  %v8779_v55 = vpack.c.bf16 %v6680_v53, %v6679_v9  ;;  %v8833_v44 = vpack.c.bf16 %v6740_v18, %v6739_v1  ;;  %v6742_v20 = vld [vmem:[%s13156_s3 + $0x238] sm:$0xff]  ;;  %v760_v49 = vld [vmem:[#allocation2 + $0x349] sm:$0xff]  ;;  %v8785_v30 = vpack.c.bf16 %v6700_v47, %v6699_v16  ;;  %v6683_v58 = vld [vmem:[%s13156_s3 + $0x60] sm:$0xff] }
 0x417   :  { %v6126_v35 = vsel %vm6058_vm4, %v5845_v51, %v6125_v4  ;;  %1784 = vrot.lane.b32.xlu0 %v759_v41, %s9137_s11  ;;  %v5861_v41 = vrot.slane %v5365_v60, %v10319_v33  ;;  %8830 = vmatprep.subr.bf16.mxu0 %v8829_v43  ;;  %v8783_v51 = vpack.c.bf16 %v6682_v63, %v6681_v22  ;;  %v9123_v57 = vld [vmem:[#allocation2 + $0x2b8] sm:$0xff]  ;;  %vm13182_vm10 = vcmask 146432   ;;  %v12019_v1 = vld [vmem:[#allocation3 + $0x20] sm:$0xff]  ;;  %v12037_v16 = vld [vmem:[#allocation3 + $0x30] sm:$0xff] }
 0x418   :  { %v6127_v32 = vsel %vm6060_vm5, %v5849_v10, %v6126_v35  ;;  %2038 = vrot.lane.b32.xlu1 %v822_v29, %s9138_s14  ;;  %v6698_v29 = vld [vmem:[%s13156_s3 + $0xd8] sm:$0xff]  ;;  %8776 = vmatpush3.bf16.msra.mxu1 %v8775_v48  ;;  %v2928_v59 = vsel %vm32_vm0, %v9123_v57, %v11734_v61  ;;  %v6684_v10 = vld [vmem:[%s13156_s3 + $0x68] sm:$0xff]  ;;  %v8837_v61 = vpack.c.bf16 %v6742_v20, %v6741_v6  ;;  %v6701_v35 = vld [vmem:[%s13156_s3 + $0xf0] sm:$0xff] }
 0x419   :  { %v6128_v25 = vsel %vm6062_vm15, %v5853_v12, %v6127_v32  ;;  %v11933_v19 = vpop.permute.xlu0 %1260  ;;  %8778 = vmatprep.subr.bf16.mxu1 %v8777_v24  ;;  %v8781_v17 = vpack.c.bf16 %v6698_v29, %v6697_v31  ;;  %8832 = vmatpush3.bf16.msra.mxu0 %v8829_v43  ;;  %v2993_v4 = vsel %vm2938_vm6, %v2928_v59, %v11755_v15  ;;  %v761_v5 = vld [vmem:[#allocation2 + $0x351] sm:$0xff]  ;;  %v6222_v43 = vld [vmem:[#allocation3 + $0x1] sm:$0xff] }
 0x41a   :  { %v6129_v37 = vsel %vm6064_vm1, %v5857_v7, %v6128_v25  ;;  %v11942_v39 = vpop.permute.xlu1 %1514  ;;  %8834 = vmatprep.subr.bf16.mxu0 %v8833_v44  ;;  %v3058_v21 = vsel %vm3003_vm7, %v2993_v4, %v11765_v45  ;;  %v6702_v48 = vld [vmem:[%s13156_s3 + $0xf8] sm:$0xff]  ;;  %v8787_v7 = vpack.c.bf16 %v6684_v10, %v6683_v58  ;;  %v824_v32 = vld [vmem:[#allocation2 + $0x34a] sm:$0xff]  ;;  %v9124_v18 = vld [vmem:[#allocation2 + $0x2c0] sm:$0xff] }
 0x41b   :  { %v6130_v8 = vsel %vm6066_vm2, %v5861_v41, %v6129_v37  ;;  %2804 = vrot.lane.b32.xlu0 %v823_v3, %s9142_s1  ;;  %v3123_v15 = vsel %vm3068_vm8, %v3058_v21, %v11788_v42  ;;  %v6686_v24 = vld [vmem:[%s13156_s3 + $0x78] sm:$0xff]  ;;  %v8789_v41 = vpack.c.bf16 %v6702_v48, %v6701_v35  ;;  %v12013_v31 = vld [vmem:[#allocation3 + $0x10] sm:$0xff]  ;;  %v6261_v48 = vld [vmem:[#allocation3 + $0x80] sm:$0xff] }
 0x41c   :  { %6199 = vst.msk [vmem:[#allocation3 + $0xc1] sm:$0xff] %vm4114_vm14, %v6130_v8  ;;  %2040 = vrot.lane.b32.xlu1 %v823_v3, %s9138_s14  ;;  %8780 = vmatpush3.bf16.msra.mxu1 %v8779_v55  ;;  %v3188_v45 = vsel %vm3133_vm9, %v3123_v15, %v11852_v27  ;;  %v6685_v3 = vld [vmem:[%s13156_s3 + $0x70] sm:$0xff]  ;;  %v2929_v8 = vsel %vm32_vm0, %v9124_v18, %v11753_v34  ;;  %v6228_v15 = vld [vmem:[#allocation3 + $0x61] sm:$0xff] }
 0x41d   :  { %v11960_v52 = vpop.permute.xlu0 %2280  ;;  %8782 = vmatprep.subr.bf16.mxu1 %v8781_v17  ;;  %8836 = vmatpush3.bf16.msra.mxu0 %v8833_v44  ;;  %v3253_v42 = vsel %vm13182_vm10, %v3188_v45, %v11911_v54  ;;  %v825_v53 = vld [vmem:[#allocation2 + $0x352] sm:$0xff]  ;;  %v8791_v54 = vpack.c.bf16 %v6686_v24, %v6685_v3  ;;  %v8917_v22 = vpack.i.bf16 %v6222_v43, %v12013_v31 }
 0x41e   :  { %v2535_v60 = vpop.permute.xlu1 %2534  ;;  %8838 = vmatprep.subr.bf16.mxu0 %v8837_v61  ;;  %v6223_v63 = vld [vmem:[#allocation3 + $0x11] sm:$0xff] }
 0x41f   :  { %2294 = vrot.lane.b32.xlu0 %v696_v56, %s9139_s15  ;;  %v3318_v27 = vsel %vm3263_vm11, %v3253_v42, %v2535_v60  ;;  %v2994_v56 = vsel %vm2938_vm6, %v2929_v8, %v11763_v11  ;;  %v8922_v34 = vpack.i.bf16 %v6223_v63, %v12019_v1  ;;  %v12042_v11 = vld [vmem:[#allocation3 + $0x40] sm:$0xff]  ;;  %v6225_v57 = vld [vmem:[#allocation3 + $0x31] sm:$0xff] }
 0x420   :  { %2296 = vrot.lane.b32.xlu1 %v697_v14, %s9139_s15  ;;  %8784 = vmatpush3.bf16.msra.mxu1 %v8783_v51  ;;  %v3059_v14 = vsel %vm3003_vm7, %v2994_v56, %v11778_v40  ;;  %v6224_v40 = vld [vmem:[#allocation3 + $0x21] sm:$0xff]  ;;  %v12066_v35 = vld [vmem:[#allocation3 + $0x70] sm:$0xff] }
 0x421   :  { %v11986_v36 = vpop.permute.xlu0 %1516  ;;  %8786 = vmatprep.subr.bf16.mxu1 %v8785_v30  ;;  %8840 = vmatpush3.bf16.msra.mxu0 %v8837_v61  ;;  %v3124_v47 = vsel %vm3068_vm8, %v3059_v14, %v11835_v62  ;;  %v8927_v51 = vpack.i.bf16 %v6224_v40, %v12037_v16  ;;  %v12052_v30 = vld [vmem:[#allocation3 + $0x50] sm:$0xff]  ;;  %v8947_v45 = vpack.i.bf16 %v6228_v15, %v12066_v35  ;;  %v6230_v42 = vld [vmem:[#allocation3 + $0xa1] sm:$0xff] }
 0x422   :  { %v11990_v12 = vpop.permute.xlu1 %1770  ;;  %v3189_v60 = vsel %vm3133_vm9, %v3124_v47, %v11901_v50  ;;  %v12056_v50 = vld [vmem:[#allocation3 + $0x60] sm:$0xff]  ;;  %v9125_v8 = vld [vmem:[#allocation2 + $0x2d0] sm:$0xff] }
 0x423   :  { %2550 = vrot.lane.b32.xlu0 %v760_v49, %s9140_s26  ;;  %v3254_v6 = vsel %vm13182_vm10, %v3189_v60, %v11960_v52  ;;  %v8932_v49 = vpack.i.bf16 %v6225_v57, %v12042_v11  ;;  %v6226_v52 = vld [vmem:[#allocation3 + $0x41] sm:$0xff]  ;;  %v2930_v56 = vsel %vm32_vm0, %v9125_v8, %v11824_v2 }
 0x424   :  { %2552 = vrot.lane.b32.xlu1 %v761_v5, %s9140_s26  ;;  %v12015_v29 = vpop.f32.mrb[40].mxu0  ;;  %8788 = vmatpush3.bf16.msra.mxu1 %v8787_v7  ;;  %s9144_s26 = smov 64   ;;  %v8937_v4 = vpack.i.bf16 %v6226_v52, %v12052_v30  ;;  %v6227_v5 = vld [vmem:[#allocation3 + $0x51] sm:$0xff] }
 0x425   :  { %v2537_v9 = vpop.permute.xlu0 %2536  ;;  %v12023_v55 = vpop.f32.mrb[41].mxu0  ;;  %8790 = vmatprep.subr.bf16.mxu1 %v8789_v41  ;;  %v8942_v21 = vpack.i.bf16 %v6227_v5, %v12056_v50 }
 0x426   :  { %v2791_v25 = vpop.permute.xlu1 %2790  ;;  %v3319_v62 = vsel %vm3263_vm11, %v3254_v6, %v2537_v9  ;;  %v12073_v9 = vld [vmem:[#allocation3 + $0xb0] sm:$0xff]  ;;  %v4026_v40 = vadd.f32 %v11785_v23, %v12023_v55 }
 0x427   :  { %v3383_v37 = vsel %vm3328_vm12, %v3318_v27, %v2791_v25  ;;  %2806 = vrot.lane.b32.xlu0 %v824_v32, %s9142_s1  ;;  %v6229_v32 = vld [vmem:[#allocation3 + $0x71] sm:$0xff]  ;;  %v8957_v27 = vpack.i.bf16 %v6230_v42, %v12073_v9 }
 0x428   :  { %2808 = vrot.lane.b32.xlu1 %v825_v53, %s9142_s1  ;;  %8696 = vmatprep.mubr.msk.f32.mxu0 %vm3397_vm13, %v3383_v37  ;;  %v8952_v24 = vpack.i.bf16 %v6229_v32, %v6261_v48  ;;  %v12076_v53 = vld [vmem:[#allocation3 + $0xc0] sm:$0xff]  ;;  %v6231_v25 = vld [vmem:[#allocation3 + $0xb1] sm:$0xff] }
 0x429   :  { %v12029_v17 = vpop.permute.xlu0 %1006  ;;  %8792 = vmatpush3.bf16.msra.mxu1 %v8791_v54  ;;  %v8962_v37 = vpack.i.bf16 %v6231_v25, %v12076_v53 }
 0x42a   :  { %v12034_v44 = vpop.permute.xlu1 %1772 }
 0x42b   :  { %8918 = vrot.lane.b32.xlu0 %v8917_v22, %s9144_s26  ;;  %v2995_v22 = vsel %vm2938_vm6, %v2930_v56, %v11870_v13 }
 0x42c   :  { %8923 = vrot.lane.b32.xlu1 %v8922_v34, %s9144_s26  ;;  %v3060_v14 = vsel %vm3003_vm7, %v2995_v22, %v11942_v39  ;;  %v4027_v34 = vadd.f32 %v11785_v23, %v12015_v29 }
 0x42d   :  { %v2027_v20 = vpop.permute.xlu0 %2026  ;;  %v3125_v60 = vsel %vm3068_vm8, %v3060_v14, %v11990_v12  ;;  %v4090_v12 = vmax.f32 %v4026_v40, 0.0 }
 0x42e   :  { %v2793_v59 = vpop.permute.xlu1 %2792  ;;  %v3190_v6 = vsel %vm3133_vm9, %v3125_v60, %v2027_v20  ;;  %v4091_v29 = vmax.f32 %v4027_v34, 0.0 }
 0x42f   :  { %v3384_v58 = vsel %vm3328_vm12, %v3319_v62, %v2793_v59  ;;  %8928 = vrot.lane.b32.xlu0 %v8927_v51, %s9144_s26 }
 0x430   :  { %8697 = vmatmul.mubr.msk.f32.gmra.mrb[54].mxu0 %vm3397_vm13, %v3384_v58  ;;  %8933 = vrot.lane.b32.xlu1 %v8932_v49, %s9144_s26 }
 0x431   :  { %v12060_v10 = vpop.permute.xlu0 %1008 }
 0x432   :  { %v12063_v61 = vpop.permute.xlu1 %1262 }
 0x433   :  { %8938 = vrot.lane.b32.xlu0 %v8937_v4, %s9144_s26 }
 0x434   :  { %8943 = vrot.lane.b32.xlu1 %v8942_v21, %s9144_s26  ;;  %v9126_v21 = vld [vmem:[#allocation2 + $0x2d8] sm:$0xff] }
 0x435   :  { %v12070_v7 = vpop.permute.xlu0 %2028  ;;  %v2931_v48 = vsel %vm32_vm0, %v9126_v21, %v11862_v26 }
 0x436   :  { %v2283_v3 = vpop.permute.xlu1 %2282 }
 0x437   :  { %8948 = vrot.lane.b32.xlu0 %v8947_v45, %s9144_s26  ;;  %v3255_v57 = vsel %vm13182_vm10, %v3190_v6, %v2283_v3  ;;  %v2996_v3 = vsel %vm2938_vm6, %v2931_v48, %v11933_v19 }
 0x438   :  { %8953 = vrot.lane.b32.xlu1 %v8952_v24, %s9144_s26 }
 0x439   :  { %v12079_v41 = vpop.permute.xlu0 %1264 }
 0x43a   :  { %v12082_v43 = vpop.permute.xlu1 %1518 }
 0x43b   :  { %8958 = vrot.lane.b32.xlu0 %v8957_v27, %s9144_s26  ;;  %v3061_v27 = vsel %vm3003_vm7, %v2996_v3, %v11986_v36 }
 0x43c   :  { %8963 = vrot.lane.b32.xlu1 %v8962_v37, %s9144_s26  ;;  %v3126_v26 = vsel %vm3068_vm8, %v3061_v27, %v12034_v44 }
 0x43d   :  { %v2285_v54 = vpop.permute.xlu0 %2284  ;;  %v3191_v19 = vsel %vm3133_vm9, %v3126_v26, %v12070_v7 }
 0x43e   :  { %v2539_v18 = vpop.permute.xlu1 %2538 }
 0x43f   :  { %v3320_v59 = vsel %vm3263_vm11, %v3255_v57, %v2539_v18 }
 0x441   :  { %v12091_v63 = vpop.permute.xlu0 %1520 }
 0x442   :  { %v12097_v47 = vpop.permute.xlu1 %1774 }
 0x443   :  { %v8680_v2 = vpop.f32.mrb[42].mxu0 }
 0x444   :  { %v4029_v13 = vadd.f32 %v11785_v23, %v8680_v2  ;;  %v3870_v51 = vpop.f32.mrb[43].mxu0 }
 0x445   :  { %v4028_v39 = vadd.f32 %v11785_v23, %v3870_v51  ;;  %v2541_v62 = vpop.permute.xlu0 %2540  ;;  %v3256_v51 = vsel %vm13182_vm10, %v3191_v19, %v2285_v54  ;;  %vm13183_vm10 = vcmask 1041409  }
 0x446   :  { %v4093_v49 = vmax.f32 %v4029_v13, 0.0  ;;  %v2795_v58 = vpop.permute.xlu1 %2794 }
 0x447   :  { %v4092_v52 = vmax.f32 %v4028_v39, 0.0  ;;  %v3385_v55 = vsel %vm3328_vm12, %v3320_v59, %v2795_v58 }
 0x448   :  { %v4187_v4 = vmax.f32 %v4091_v29, %v4093_v49  ;;  %8699 = vmatprep.mubr.msk.f32.mxu0 %vm3397_vm13, %v3385_v55 }
 0x449   :  { %v4186_v20 = vmax.f32 %v4090_v12, %v4092_v52  ;;  %v12110_v5 = vpop.permute.xlu0 %1010  ;;  %v3321_v52 = vsel %vm3263_vm11, %v3256_v51, %v2541_v62 }
 0x44a   :  { %v4587_v15 = vcombine.high %v4187_v4, %v4187_v4  ;;  %v4594_v45 = vrot.slane %v4187_v4, %v10289_v38  ;;  %v12115_v32 = vpop.permute.xlu1 %1776 }
 0x44b   :  { %v4570_v24 = vcombine.high %v4186_v20, %v4186_v20  ;;  %v4577_v42 = vrot.slane %v4186_v20, %v10289_v38 }
 0x44c   :  { %v4601_v25 = vrot.slane %v4587_v15, %v10289_v38  ;;  %v4602_v37 = vcombine.high %v4594_v45, %v4594_v45  ;;  %v8217_v34 = vrot.slane %v4594_v45, 9 }
 0x44d   :  { %v4584_v18 = vrot.slane %v4570_v24, %v10289_v38  ;;  %v4585_v8 = vcombine.high %v4577_v42, %v4577_v42  ;;  %v8213_v56 = vrot.slane %v4577_v42, 9  ;;  %v2031_v22 = vpop.permute.xlu0 %2030 }
 0x44e   :  { %v4603_v14 = vcombine.high %v4601_v25, %v4601_v25  ;;  %v8218_v60 = vrot.slane %v4602_v37, 9  ;;  %v2797_v40 = vpop.permute.xlu1 %2796  ;;  %v8219_v57 = vrot.slane %v4601_v25, 9  ;;  %v5370_v58 = vmax.f32 %v4594_v45, %v8217_v34 }
 0x44f   :  { %v4586_v2 = vcombine.high %v4584_v18, %v4584_v18  ;;  %v8214_v36 = vrot.slane %v4585_v8, 9  ;;  %v8215_v6 = vrot.slane %v4584_v18, 9  ;;  %v5366_v13 = vmax.f32 %v4577_v42, %v8213_v56 }
 0x450   :  { %v8220_v44 = vrot.slane %v4603_v14, 9  ;;  %v5371_v12 = vmax.f32 %v4602_v37, %v8218_v60  ;;  %v3386_v21 = vsel %vm3328_vm12, %v3321_v52, %v2797_v40  ;;  %v5372_v48 = vmax.f32 %v4601_v25, %v8219_v57 }
 0x451   :  { %v8216_v39 = vrot.slane %v4586_v2, 9  ;;  %v5367_v29 = vmax.f32 %v4585_v8, %v8214_v36  ;;  %v5368_v59 = vmax.f32 %v4584_v18, %v8215_v6  ;;  %v12129_v49 = vpop.permute.xlu0 %1012  ;;  %v5865_v7 = vrot.slane %v5366_v13, %v10319_v33  ;;  %8700 = vmatmul.mubr.msk.f32.gmra.mrb[56].mxu0 %vm3397_vm13, %v3386_v21  ;;  %v9127_v36 = vld [vmem:[#allocation2 + $0x2e8] sm:$0xff] }
 0x452   :  { %v12133_v55 = vpop.permute.xlu1 %1266  ;;  %v5373_v15 = vmax.f32 %v4603_v14, %v8220_v44  ;;  %v5881_v62 = vrot.slane %v5370_v58, %v10319_v33  ;;  %v5885_v37 = vrot.slane %v5371_v12, %v10319_v33  ;;  %v5889_v18 = vrot.slane %v5372_v48, %v10319_v33 }
 0x453   :  { %v5369_v4 = vmax.f32 %v4586_v2, %v8216_v39  ;;  %v5869_v20 = vrot.slane %v5367_v29, %v10319_v33  ;;  %v5873_v54 = vrot.slane %v5368_v59, %v10319_v33  ;;  %v2932_v6 = vsel %vm32_vm0, %v9127_v36, %v12029_v17  ;;  %v6232_v29 = vld [vmem:[#allocation3 + $0xc1] sm:$0xff] }
 0x454   :  { %v5893_v8 = vrot.slane %v5373_v15, %v10319_v33  ;;  %v2997_v13 = vsel %vm2938_vm6, %v2932_v6, %v12063_v61 }
 0x455   :  { %v5877_v45 = vrot.slane %v5369_v4, %v10319_v33  ;;  %v6131_v3 = vsel %vm13183_vm10, %v5869_v20, %v5865_v7  ;;  %v2033_v24 = vpop.permute.xlu0 %2032  ;;  %v3062_v57 = vsel %vm3003_vm7, %v2997_v13, %v12082_v43  ;;  %vm13184_vm10 = vcmask 146432   ;;  %v9128_v20 = vld [vmem:[#allocation2 + $0x2f0] sm:$0xff] }
 0x456   :  { %v6132_v42 = vsel %vm6056_vm3, %v5873_v54, %v6131_v3  ;;  %v2287_v27 = vpop.permute.xlu1 %2286  ;;  %v3127_v39 = vsel %vm3068_vm8, %v3062_v57, %v12097_v47  ;;  %v2933_v47 = vsel %vm32_vm0, %v9128_v20, %v12060_v10 }
 0x457   :  { %v6133_v26 = vsel %vm6058_vm4, %v5877_v45, %v6132_v42  ;;  %v3192_v58 = vsel %vm3133_vm9, %v3127_v39, %v2031_v22  ;;  %v2998_v22 = vsel %vm2938_vm6, %v2933_v47, %v12079_v41  ;;  %v9130_v47 = vld [vmem:[#allocation2 + $0x308] sm:$0xff] }
 0x458   :  { %v6134_v25 = vsel %vm6060_vm5, %v5881_v62, %v6133_v26  ;;  %v3257_v17 = vsel %vm13184_vm10, %v3192_v58, %v2287_v27  ;;  %v3063_v48 = vsel %vm3003_vm7, %v2998_v22, %v12091_v63 }
 0x459   :  { %v6135_v56 = vsel %vm6062_vm15, %v5885_v37, %v6134_v25  ;;  %v12149_v19 = vpop.permute.xlu0 %1268  ;;  %v3128_v45 = vsel %vm3068_vm8, %v3063_v48, %v12115_v32 }
 0x45a   :  { %v6136_v14 = vsel %vm6064_vm1, %v5889_v18, %v6135_v56  ;;  %v1523_v34 = vpop.permute.xlu1 %1522  ;;  %v3193_v3 = vsel %vm3133_vm9, %v3128_v45, %v2033_v24  ;;  %v9129_v56 = vld [vmem:[#allocation2 + $0x300] sm:$0xff] }
 0x45b   :  { %v6137_v60 = vsel %vm6066_vm2, %v5893_v8, %v6136_v14  ;;  %v2934_v14 = vsel %vm32_vm0, %v9129_v56, %v12110_v5 }
 0x45c   :  { %6200 = vst.msk [vmem:[#allocation3 + $0xd1] sm:$0xff] %vm4114_vm14, %v6137_v60  ;;  %v2999_v60 = vsel %vm2938_vm6, %v2934_v14, %v12133_v55 }
 0x45d   :  { %v2289_v40 = vpop.permute.xlu0 %2288 }
 0x45e   :  { %v2543_v2 = vpop.permute.xlu1 %2542  ;;  %v3258_v62 = vsel %vm13184_vm10, %v3193_v3, %v2289_v40 }
 0x45f   :  { %v3322_v61 = vsel %vm3263_vm11, %v3257_v17, %v2543_v2  ;;  %v3064_v2 = vsel %vm3003_vm7, %v2999_v60, %v1523_v34 }
 0x461   :  { %v12158_v51 = vpop.permute.xlu0 %1524 }
 0x462   :  { %v1779_v44 = vpop.permute.xlu1 %1778 }
 0x463   :  { %v12164_v59 = vld [vmem:[#allocation3 + $0xd0] sm:$0xff]  ;;  %v3129_v13 = vsel %vm3068_vm8, %v3064_v2, %v1779_v44 }
 0x464   :  { %v8967_v12 = vpack.i.bf16 %v6232_v29, %v12164_v59  ;;  %v8683_v43 = vpop.f32.mrb[44].mxu0 }
 0x465   :  { %v2545_v7 = vpop.permute.xlu0 %2544  ;;  %v3880_v54 = vpop.f32.mrb[45].mxu0  ;;  %v4031_v36 = vadd.f32 %v11785_v23, %v8683_v43 }
 0x466   :  { %v2799_v52 = vpop.permute.xlu1 %2798  ;;  %8968 = vrot.lane.b32.xlu0 %v8967_v12, %s9144_s26  ;;  %v3323_v42 = vsel %vm3263_vm11, %v3258_v62, %v2545_v7  ;;  %v4030_v57 = vadd.f32 %v11785_v23, %v3880_v54  ;;  %v2935_v54 = vsel %vm32_vm0, %v9130_v47, %v12129_v49 }
 0x467   :  { %v3387_v4 = vsel %vm3328_vm12, %v3322_v61, %v2799_v52  ;;  %v4095_v34 = vmax.f32 %v4031_v36, 0.0 }
 0x468   :  { %8702 = vmatprep.mubr.msk.f32.mxu0 %vm3397_vm13, %v3387_v4  ;;  %v4094_v43 = vmax.f32 %v4030_v57, 0.0 }
 0x469   :  { %v12177_v21 = vpop.permute.xlu0 %1014 }
 0x46a   :  { %v1781_v15 = vpop.permute.xlu1 %1780 }
 0x46d   :  { %v2035_v10 = vpop.permute.xlu0 %2034 }
 0x46e   :  { %v2801_v27 = vpop.permute.xlu1 %2800  ;;  %v3194_v29 = vsel %vm3133_vm9, %v3129_v13, %v2035_v10 }
 0x46f   :  { %v3388_v37 = vsel %vm3328_vm12, %v3323_v42, %v2801_v27 }
 0x470   :  { %8703 = vmatmul.mubr.msk.f32.gmra.mrb[58].mxu0 %vm3397_vm13, %v3388_v37 }
 0x471   :  { %v12188_v41 = vpop.permute.xlu0 %1016 }
 0x472   :  { %v12190_v26 = vpop.permute.xlu1 %1270 }
 0x475   :  { %v2037_v63 = vpop.permute.xlu0 %2036 }
 0x476   :  { %v2291_v18 = vpop.permute.xlu1 %2290 }
 0x477   :  { %v3259_v55 = vsel %vm13184_vm10, %v3194_v29, %v2291_v18 }
 0x479   :  { %v12192_v25 = vpop.permute.xlu0 %1272 }
 0x47a   :  { %v12194_v32 = vpop.permute.xlu1 %1526 }
 0x47d   :  { %v2293_v24 = vpop.permute.xlu0 %2292 }
 0x47e   :  { %v2547_v8 = vpop.permute.xlu1 %2546 }
 0x47f   :  { %v3324_v7 = vsel %vm3263_vm11, %v3259_v55, %v2547_v8 }
 0x481   :  { %v12200_v40 = vpop.permute.xlu0 %1528 }
 0x482   :  { %v12204_v6 = vpop.permute.xlu1 %1782 }
 0x483   :  { %v8686_v39 = vpop.f32.mrb[46].mxu0 }
 0x484   :  { %v4033_v5 = vadd.f32 %v11785_v23, %v8686_v39  ;;  %v3890_v58 = vpop.f32.mrb[47].mxu0 }
 0x485   :  { %v4032_v12 = vadd.f32 %v11785_v23, %v3890_v58  ;;  %v2549_v17 = vpop.permute.xlu0 %2548  ;;  %v3000_v23 = vsel %vm2938_vm6, %v2935_v54, %v12149_v19  ;;  %v9131_v58 = vld [vmem:[#allocation2 + $0x318] sm:$0xff] }
 0x486   :  { %v4097_v61 = vmax.f32 %v4033_v5, 0.0  ;;  %v2803_v52 = vpop.permute.xlu1 %2802  ;;  %v3065_v10 = vsel %vm3003_vm7, %v3000_v23, %v12158_v51  ;;  %v2936_v55 = vsel %vm32_vm0, %v9131_v58, %v12177_v21  ;;  %v12273_v58 = vld [vmem:[#allocation3 + $0x22] sm:$0xff] }
 0x487   :  { %v4096_v44 = vmax.f32 %v4032_v12, 0.0  ;;  %v3389_v4 = vsel %vm3328_vm12, %v3324_v7, %v2803_v52  ;;  %v3130_v37 = vsel %vm3068_vm8, %v3065_v10, %v1781_v15  ;;  %v3001_v23 = vsel %vm2938_vm6, %v2936_v55, %v12190_v26 }
 0x488   :  { %v4189_v20 = vmax.f32 %v4095_v34, %v4097_v61  ;;  %8705 = vmatprep.mubr.msk.f32.mxu0 %vm3397_vm13, %v3389_v4  ;;  %v3195_v8 = vsel %vm3133_vm9, %v3130_v37, %v2037_v63 }
 0x489   :  { %v4188_v22 = vmax.f32 %v4094_v43, %v4096_v44  ;;  %v1785_v48 = vpop.permute.xlu0 %1784  ;;  %v3260_v2 = vsel %vm13184_vm10, %v3195_v8, %v2293_v24  ;;  %v2937_v43 = vsel %vm32_vm0, %v11730_v46, %v12188_v41  ;;  %vm13185_vm0 = vcmask 1041409  }
 0x48a   :  { %v4621_v45 = vcombine.high %v4189_v20, %v4189_v20  ;;  %v4628_v3 = vrot.slane %v4189_v20, %v10289_v38  ;;  %v2039_v62 = vpop.permute.xlu1 %2038  ;;  %v3325_v12 = vsel %vm3263_vm11, %v3260_v2, %v2549_v17  ;;  %v3002_v46 = vsel %vm2938_vm6, %v2937_v43, %v12192_v25  ;;  %vm13186_vm6 = vmmov %vm13184_vm10 }
 0x48b   :  { %v4604_v42 = vcombine.high %v4188_v22, %v4188_v22  ;;  %v4611_v27 = vrot.slane %v4188_v22, %v10289_v38  ;;  %v3067_v37 = vsel %vm3003_vm7, %v3002_v46, %v12200_v40  ;;  %v12293_v46 = vld [vmem:[#allocation3 + $0xd1] sm:$0xff]  ;;  %vm13194_vm10 = vmmov %vm13185_vm0 }
 0x48c   :  { %v4635_v18 = vrot.slane %v4621_v45, %v10289_v38  ;;  %v4636_v49 = vcombine.high %v4628_v3, %v4628_v3  ;;  %v8225_v13 = vrot.slane %v4628_v3, 9  ;;  %v3066_v45 = vsel %vm3003_vm7, %v3001_v23, %v12194_v32  ;;  %vm13187_vm7 = vmmov %vm13186_vm6  ;;  %v12291_v23 = vld [vmem:[#allocation3 + $0x52] sm:$0xff] }
 0x48d   :  { %v4618_v56 = vrot.slane %v4604_v42, %v10289_v38  ;;  %v4619_v19 = vcombine.high %v4611_v27, %v4611_v27  ;;  %v8221_v14 = vrot.slane %v4611_v27, 9  ;;  %v2805_v60 = vpop.permute.xlu0 %2804 }
 0x48e   :  { %v4637_v36 = vcombine.high %v4635_v18, %v4635_v18  ;;  %v8226_v51 = vrot.slane %v4636_v49, 9  ;;  %v2041_v57 = vpop.permute.xlu1 %2040  ;;  %v8227_v63 = vrot.slane %v4635_v18, 9  ;;  %v5378_v44 = vmax.f32 %v4628_v3, %v8225_v13 }
 0x48f   :  { %v4620_v39 = vcombine.high %v4618_v56, %v4618_v56  ;;  %v8222_v29 = vrot.slane %v4619_v19, 9  ;;  %v8223_v5 = vrot.slane %v4618_v56, 9  ;;  %v5374_v15 = vmax.f32 %v4611_v27, %v8221_v14 }
 0x490   :  { %v8228_v34 = vrot.slane %v4637_v36, 9  ;;  %v5379_v4 = vmax.f32 %v4636_v49, %v8226_v51  ;;  %v3390_v20 = vsel %vm3328_vm12, %v3325_v12, %v2805_v60  ;;  %v5380_v41 = vmax.f32 %v4635_v18, %v8227_v63  ;;  %v6238_v63 = vld [vmem:[#allocation3 + $0x2] sm:$0xff] }
 0x491   :  { %v8224_v7 = vrot.slane %v4620_v39, 9  ;;  %v5375_v61 = vmax.f32 %v4619_v19, %v8222_v29  ;;  %v5376_v52 = vmax.f32 %v4618_v56, %v8223_v5  ;;  %v2295_v24 = vpop.permute.xlu0 %2294  ;;  %v5897_v21 = vrot.slane %v5374_v15, %v10319_v33  ;;  %8706 = vmatmul.mubr.msk.f32.gmra.mrb[60].mxu0 %vm3397_vm13, %v3390_v20  ;;  %v6206_v12 = vld [vmem:[#allocation3] sm:$0xff] }
 0x492   :  { %v2297_v47 = vpop.permute.xlu1 %2296  ;;  %v5381_v3 = vmax.f32 %v4637_v36, %v8228_v34  ;;  %v3131_v49 = vsel %vm3068_vm8, %v3066_v45, %v12204_v6  ;;  %v5913_v26 = vrot.slane %v5378_v44, %v10319_v33  ;;  %v5917_v8 = vrot.slane %v5379_v4, %v10319_v33  ;;  %v12282_v44 = vld [vmem:[#allocation3 + $0x42] sm:$0xff] }
 0x493   :  { %v5377_v54 = vmax.f32 %v4620_v39, %v8224_v7  ;;  %v5901_v22 = vrot.slane %v5375_v61, %v10319_v33  ;;  %v5905_v17 = vrot.slane %v5376_v52, %v10319_v33  ;;  %v3132_v56 = vsel %vm3068_vm8, %v3067_v37, %v1785_v48  ;;  %v12299_v45 = vld [vmem:[#allocation3 + $0x62] sm:$0xff]  ;;  %vm13188_vm8 = vmmov %vm13185_vm0 }
 0x494   :  { %v3196_v19 = vsel %vm3133_vm9, %v3131_v49, %v2039_v62  ;;  %v5921_v14 = vrot.slane %v5380_v41, %v10319_v33  ;;  %v3197_v60 = vsel %vm3133_vm9, %v3132_v56, %v2041_v57  ;;  %v5925_v2 = vrot.slane %v5381_v3, %v10319_v33  ;;  %v6342_v56 = vld [vmem:[#allocation3 + $0x92] sm:$0xff]  ;;  %vm13189_vm9 = vmmov %vm13185_vm0 }
 0x495   :  { %v5909_v10 = vrot.slane %v5377_v54, %v10319_v33  ;;  %v6138_v42 = vsel %vm13185_vm0, %v5901_v22, %v5897_v21  ;;  %v2551_v27 = vpop.permute.xlu0 %2550  ;;  %v3261_v6 = vsel %vm13186_vm6, %v3196_v19, %v2295_v24  ;;  %v3262_v13 = vsel %vm13187_vm7, %v3197_v60, %v2297_v47  ;;  %v12277_v24 = vld [vmem:[#allocation3 + $0x32] sm:$0xff]  ;;  %v12327_v60 = vld [vmem:[#allocation3 + $0xc2] sm:$0xff] }
 0x496   :  { %v6139_v25 = vsel %vm6056_vm3, %v5905_v17, %v6138_v42  ;;  %v2553_v18 = vpop.permute.xlu1 %2552  ;;  %v3326_v51 = vsel %vm3263_vm11, %v3261_v6, %v2551_v27  ;;  %v12287_v54 = vld [vmem:[#allocation3 + $0x12] sm:$0xff] }
 0x497   :  { %v6140_v32 = vsel %vm6058_vm4, %v5909_v10, %v6139_v25  ;;  %v3327_v62 = vsel %vm3263_vm11, %v3262_v13, %v2553_v18  ;;  %v12312_v25 = vld [vmem:[#allocation3 + $0x72] sm:$0xff]  ;;  %vm13190_vm11 = vmmov %vm13185_vm0 }
 0x498   :  { %v6141_v40 = vsel %vm6060_vm5, %v5913_v26, %v6140_v32 }
 0x499   :  { %v6142_v36 = vsel %vm6062_vm15, %v5917_v8, %v6141_v40  ;;  %v2807_v39 = vpop.permute.xlu0 %2806  ;;  %v12318_v8 = vld [vmem:[#allocation3 + $0x82] sm:$0xff] }
 0x49a   :  { %v6143_v48 = vsel %vm6064_vm1, %v5921_v14, %v6142_v36  ;;  %v3391_v29 = vsel %vm3328_vm12, %v3326_v51, %v2807_v39  ;;  %v2809_v5 = vpop.permute.xlu1 %2808  ;;  %v12335_v51 = vld [vmem:[#allocation3 + $0xd2] sm:$0xff] }
 0x49b   :  { %v6144_v57 = vsel %vm6066_vm2, %v5925_v2, %v6143_v48  ;;  %v3392_v15 = vsel %vm3328_vm12, %v3327_v62, %v2809_v5  ;;  %8708 = vmatprep.mubr.msk.f32.mxu0 %vm3397_vm13, %v3391_v29  ;;  %vm13191_vm12 = vmmov %vm13185_vm0 }
 0x49c   :  { %6201 = vst.msk [vmem:[#allocation3 + $0xe1] sm:$0xff] %vm4114_vm14, %v6144_v57  ;;  %8709 = vmatmul.mubr.msk.f32.gmra.mrb[62].mxu0 %vm3397_vm13, %v3392_v15  ;;  %vm13192_vm13 = vmmov %vm13185_vm0 }
 0x49d   :  { %v8919_v55 = vpop.permute.xlu0 %8918  ;;  %8727 = vmatprep.mubr.msk.f32.mxu0 %vm4114_vm14, %v12273_v58 }
 0x49e   :  { %v8921_v34 = vunpack.i.h.bf16 %v8919_v55  ;;  %v8920_v7 = vunpack.i.l.bf16 %v8919_v55  ;;  %v8924_v61 = vpop.permute.xlu1 %8923 }
 0x49f   :  { %v8925_v52 = vunpack.i.l.bf16 %v8924_v61  ;;  %v8926_v20 = vunpack.i.h.bf16 %v8924_v61 }
 0x4a0   :  { %8728 = vmatmul.mubr.msk.f32.vlgmr.msra.gmra.mrb[64].mxu0 %vm4114_vm14, %v12277_v24  ;;  %v6623_v43 = vsel %vm4114_vm14, %v6238_v63, %v8920_v7  ;;  %v6607_v4 = vsel %vm4114_vm14, %v6206_v12, %v8921_v34 }
 0x4a1   :  { %6855 = vmatprep.mubr.f32.mxu1 %v6623_v43  ;;  %v8929_v47 = vpop.permute.xlu0 %8928  ;;  %8730 = vmatprep.mubr.msk.f32.mxu0 %vm4114_vm14, %v12282_v44  ;;  %v6624_v22 = vsel %vm4114_vm14, %v12287_v54, %v8925_v52  ;;  %v6608_v42 = vsel %vm4114_vm14, %v12013_v31, %v8926_v20  ;;  %v6246_v43 = vld [vmem:[#allocation3 + $0xa2] sm:$0xff] }
 0x4a2   :  { %v8930_v21 = vunpack.i.l.bf16 %v8929_v47  ;;  %6856 = vmatmul.mubr.f32.vlgmr.msra.gmra.mrb[0].mxu1 %v6607_v4  ;;  %v8934_v17 = vpop.permute.xlu1 %8933  ;;  %v8931_v10 = vunpack.i.h.bf16 %v8929_v47 }
 0x4a3   :  { %6860 = vmatprep.mubr.f32.mxu1 %v6624_v22  ;;  %v12295_v41 = vld [vmem:[#allocation3 + $0xe0] sm:$0xff]  ;;  %v8935_v27 = vunpack.i.l.bf16 %v8934_v17  ;;  %v8936_v31 = vunpack.i.h.bf16 %v8934_v17  ;;  %v12359_v17 = vld [vmem:[#allocation3 + $0xb2] sm:$0xff] }
 0x4a4   :  { %8731 = vmatmul.mubr.msk.f32.gmra.mrb[66].mxu0 %vm4114_vm14, %v12291_v23  ;;  %v8972_v3 = vpack.i.bf16 %v12293_v46, %v12295_v41  ;;  %v6625_v37 = vsel %vm4114_vm14, %v12273_v58, %v8930_v21  ;;  %v12310_v49 = vpop.f32.mrb[48].mxu0  ;;  %v6609_v32 = vsel %vm4114_vm14, %v12019_v1, %v8931_v10  ;;  %v12339_v39 = vld [vmem:[#allocation3 + $0xe2] sm:$0xff] }
 0x4a5   :  { %8733 = vmatprep.mubr.msk.f32.mxu0 %vm4114_vm14, %v12299_v45  ;;  %v8939_v26 = vpop.permute.xlu0 %8938  ;;  %v12314_v18 = vpop.f32.mrb[49].mxu0  ;;  %v6626_v14 = vsel %vm4114_vm14, %v12277_v24, %v8935_v27  ;;  %v6610_v2 = vsel %vm4114_vm14, %v12037_v16, %v8936_v31  ;;  %v6214_v21 = vld [vmem:[#allocation3 + $0xa0] sm:$0xff] }
 0x4a6   :  { %8973 = vrot.lane.b32.xlu1 %v8972_v3, %s9144_s26  ;;  %6861 = vmatmul.mubr.f32.gmra.mrb[2].mxu1 %v6608_v42  ;;  %v8940_v19 = vunpack.i.l.bf16 %v8939_v26  ;;  %v8944_v40 = vpop.permute.xlu1 %8943  ;;  %v8941_v6 = vunpack.i.h.bf16 %v8939_v26  ;;  %v12364_v3 = vld [vmem:[%s13155_s2] ss:$0 sm:$0xff] }
 0x4a7   :  { %6865 = vmatprep.mubr.f32.mxu1 %v6625_v37  ;;  %v8945_v1 = vunpack.i.l.bf16 %v8944_v40  ;;  %v8946_v48 = vunpack.i.h.bf16 %v8944_v40  ;;  %v4035_v10 = vadd.f32 %v12364_v3, %v12310_v49  ;;  %v4034_v42 = vadd.f32 %v12364_v3, %v12314_v18 }
 0x4a8   :  { %8734 = vmatmul.mubr.msk.f32.gmra.mrb[68].mxu0 %vm4114_vm14, %v12312_v25  ;;  %v6627_v36 = vsel %vm4114_vm14, %v12282_v44, %v8940_v19  ;;  %v6611_v16 = vsel %vm4114_vm14, %v12042_v11, %v8941_v6 }
 0x4a9   :  { %8736 = vmatprep.mubr.msk.f32.mxu0 %vm4114_vm14, %v12318_v8  ;;  %v8949_v13 = vpop.permute.xlu0 %8948  ;;  %v6628_v29 = vsel %vm4114_vm14, %v12291_v23, %v8945_v1  ;;  %v6612_v15 = vsel %vm4114_vm14, %v12052_v30, %v8946_v48  ;;  %v4098_v49 = vmax.f32 %v4034_v42, 0.0 }
 0x4aa   :  { %6866 = vmatmul.mubr.f32.gmra.mrb[4].mxu1 %v6609_v32  ;;  %v8950_v62 = vunpack.i.l.bf16 %v8949_v13  ;;  %v8954_v5 = vpop.permute.xlu1 %8953  ;;  %v8951_v57 = vunpack.i.h.bf16 %v8949_v13 }
 0x4ab   :  { %6870 = vmatprep.mubr.f32.mxu1 %v6626_v14  ;;  %v8955_v55 = vunpack.i.l.bf16 %v8954_v5  ;;  %v8956_v34 = vunpack.i.h.bf16 %v8954_v5 }
 0x4ac   :  { %8737 = vmatmul.mubr.msk.f32.gmra.mrb[70].mxu0 %vm4114_vm14, %v6342_v56  ;;  %v6629_v63 = vsel %vm4114_vm14, %v12299_v45, %v8950_v62  ;;  %v6613_v11 = vsel %vm4114_vm14, %v12056_v50, %v8951_v57  ;;  %v4099_v56 = vmax.f32 %v4035_v10, 0.0 }
 0x4ad   :  { %8739 = vmatprep.mubr.msk.f32.mxu0 %vm4114_vm14, %v12327_v60  ;;  %v8959_v12 = vpop.permute.xlu0 %8958  ;;  %v6630_v61 = vsel %vm4114_vm14, %v12312_v25, %v8955_v55  ;;  %v6614_v4 = vsel %vm4114_vm14, %v12066_v35, %v8956_v34 }
 0x4ae   :  { %6871 = vmatmul.mubr.f32.gmra.mrb[6].mxu1 %v6610_v2  ;;  %v8960_v7 = vunpack.i.l.bf16 %v8959_v12  ;;  %v8964_v52 = vpop.permute.xlu1 %8963  ;;  %v8961_v30 = vunpack.i.h.bf16 %v8959_v12 }
 0x4af   :  { %6875 = vmatprep.mubr.f32.mxu1 %v6627_v36  ;;  %v8965_v20 = vunpack.i.l.bf16 %v8964_v52  ;;  %v8966_v22 = vunpack.i.h.bf16 %v8964_v52 }
 0x4b0   :  { %8740 = vmatmul.mubr.msk.f32.gmra.mrb[72].mxu0 %vm4114_vm14, %v12335_v51  ;;  %v6631_v47 = vsel %vm4114_vm14, %v6246_v43, %v8960_v7  ;;  %v6615_v50 = vsel %vm4114_vm14, %v6214_v21, %v8961_v30 }
 0x4b1   :  { %8742 = vmatprep.mubr.msk.f32.mxu0 %vm4114_vm14, %v12339_v39  ;;  %v6632_v35 = vsel %vm4114_vm14, %v12359_v17, %v8965_v20  ;;  %v6616_v32 = vsel %vm4114_vm14, %v12073_v9, %v8966_v22 }
 0x4b2   :  { %6876 = vmatmul.mubr.f32.gmra.mrb[8].mxu1 %v6611_v16 }
 0x4b3   :  { %6880 = vmatprep.mubr.f32.mxu1 %v6628_v29 }
 0x4b6   :  { %6881 = vmatmul.mubr.f32.gmra.mrb[10].mxu1 %v6612_v15 }
 0x4b7   :  { %6885 = vmatprep.mubr.f32.mxu1 %v6629_v63 }
 0x4ba   :  { %6886 = vmatmul.mubr.f32.gmra.mrb[12].mxu1 %v6613_v11 }
 0x4bb   :  { %6890 = vmatprep.mubr.f32.mxu1 %v6630_v61 }
 0x4be   :  { %6891 = vmatmul.mubr.f32.gmra.mrb[14].mxu1 %v6614_v4 }
 0x4bf   :  { %6895 = vmatprep.mubr.f32.mxu1 %v6631_v47 }
 0x4c2   :  { %6896 = vmatmul.mubr.f32.gmra.mrb[16].mxu1 %v6615_v50 }
 0x4c3   :  { %v8692_v27 = vpop.f32.mrb[50].mxu0  ;;  %6900 = vmatprep.mubr.f32.mxu1 %v6632_v35 }
 0x4c4   :  { %v4037_v37 = vadd.f32 %v12364_v3, %v8692_v27  ;;  %v3910_v26 = vpop.f32.mrb[51].mxu0 }
 0x4c5   :  { %v4036_v31 = vadd.f32 %v12364_v3, %v3910_v26 }
 0x4c6   :  { %v4101_v19 = vmax.f32 %v4037_v37, 0.0  ;;  %6901 = vmatmul.mubr.f32.gmra.mrb[18].mxu1 %v6616_v32 }
 0x4c7   :  { %v4100_v14 = vmax.f32 %v4036_v31, 0.0 }
 0x4c8   :  { %v4191_v40 = vmax.f32 %v4099_v56, %v4101_v19 }
 0x4c9   :  { %v4190_v6 = vmax.f32 %v4098_v49, %v4100_v14 }
 0x4ca   :  { %v4655_v2 = vcombine.high %v4191_v40, %v4191_v40  ;;  %v4662_v18 = vrot.slane %v4191_v40, %v10289_v38 }
 0x4cb   :  { %v4638_v1 = vcombine.high %v4190_v6, %v4190_v6  ;;  %v4645_v36 = vrot.slane %v4190_v6, %v10289_v38 }
 0x4cc   :  { %v4669_v13 = vrot.slane %v4655_v2, %v10289_v38  ;;  %v4670_v48 = vcombine.high %v4662_v18, %v4662_v18  ;;  %v8233_v5 = vrot.slane %v4662_v18, 9 }
 0x4cd   :  { %v4652_v16 = vrot.slane %v4638_v1, %v10289_v38  ;;  %v4653_v62 = vcombine.high %v4645_v36, %v4645_v36  ;;  %v8229_v9 = vrot.slane %v4645_v36, 9 }
 0x4ce   :  { %v4671_v29 = vcombine.high %v4669_v13, %v4669_v13  ;;  %v8234_v57 = vrot.slane %v4670_v48, 9  ;;  %v8235_v34 = vrot.slane %v4669_v13, 9  ;;  %v5386_v43 = vmax.f32 %v4662_v18, %v8233_v5 }
 0x4cf   :  { %v4654_v15 = vcombine.high %v4652_v16, %v4652_v16  ;;  %v8230_v55 = vrot.slane %v4653_v62, 9  ;;  %v8231_v63 = vrot.slane %v4652_v16, 9  ;;  %v5382_v12 = vmax.f32 %v4645_v36, %v8229_v9 }
 0x4d0   :  { %v8236_v11 = vrot.slane %v4671_v29, 9  ;;  %v5387_v30 = vmax.f32 %v4670_v48, %v8234_v57  ;;  %v5388_v22 = vmax.f32 %v4669_v13, %v8235_v34  ;;  %v5945_v42 = vrot.slane %v5386_v43, %v10319_v33  ;;  %v12402_v13 = vld [vmem:[#allocation3 + $0xe1] sm:$0xff] }
 0x4d1   :  { %v8232_v7 = vrot.slane %v4654_v15, 9  ;;  %v5383_v61 = vmax.f32 %v4653_v62, %v8230_v55  ;;  %v5384_v52 = vmax.f32 %v4652_v16, %v8231_v63  ;;  %v5929_v20 = vrot.slane %v5382_v12, %v10319_v33 }
 0x4d2   :  { %v5389_v50 = vmax.f32 %v4671_v29, %v8236_v11  ;;  %v5949_v37 = vrot.slane %v5387_v30, %v10319_v33  ;;  %v5953_v31 = vrot.slane %v5388_v22, %v10319_v33 }
 0x4d3   :  { %v5385_v4 = vmax.f32 %v4654_v15, %v8232_v7  ;;  %v5933_v47 = vrot.slane %v5383_v61, %v10319_v33  ;;  %v5937_v21 = vrot.slane %v5384_v52, %v10319_v33 }
 0x4d4   :  { %v5957_v19 = vrot.slane %v5389_v50, %v10319_v33 }
 0x4d5   :  { %v5941_v10 = vrot.slane %v5385_v4, %v10319_v33  ;;  %v6145_v35 = vsel %vm13188_vm8, %v5933_v47, %v5929_v20 }
 0x4d6   :  { %v6146_v27 = vsel %vm6056_vm3, %v5937_v21, %v6145_v35 }
 0x4d7   :  { %v6147_v26 = vsel %vm6058_vm4, %v5941_v10, %v6146_v27 }
 0x4d8   :  { %v6148_v32 = vsel %vm6060_vm5, %v5945_v42, %v6147_v26  ;;  %v8969_v56 = vpop.permute.xlu0 %8968 }
 0x4d9   :  { %v6149_v49 = vsel %vm6062_vm15, %v5949_v37, %v6148_v32  ;;  %v8971_v14 = vunpack.i.h.bf16 %v8969_v56  ;;  %v8970_v40 = vunpack.i.l.bf16 %v8969_v56 }
 0x4da   :  { %v6150_v6 = vsel %vm6064_vm1, %v5953_v31, %v6149_v49 }
 0x4db   :  { %v6151_v2 = vsel %vm6066_vm2, %v5957_v19, %v6150_v6  ;;  %v6633_v18 = vsel %vm4114_vm14, %v12327_v60, %v8970_v40  ;;  %v6617_v1 = vsel %vm4114_vm14, %v12076_v53, %v8971_v14 }
 0x4dc   :  { %6202 = vst.msk [vmem:[#allocation3 + $0xf1] sm:$0xff] %vm4114_vm14, %v6151_v2  ;;  %6905 = vmatprep.mubr.f32.mxu1 %v6633_v18 }
 0x4dd   :  { %6906 = vmatmul.mubr.f32.gmra.mrb[20].mxu1 %v6617_v1 }
 0x4e3   :  { %v12400_v36 = vld [vmem:[#allocation3 + $0xf2] sm:$0xff] }
 0x4e4   :  { %v12404_v48 = vld [vmem:[#allocation3 + $0xf0] sm:$0xff]  ;;  %8743 = vmatmul.mubr.msk.f32.gmra.mrb[74].mxu0 %vm4114_vm14, %v12400_v36  ;;  %v8695_v62 = vpop.f32.mrb[52].mxu0 }
 0x4e5   :  { %v8977_v16 = vpack.i.bf16 %v12402_v13, %v12404_v48  ;;  %v3920_v53 = vpop.f32.mrb[53].mxu0  ;;  %v4039_v9 = vadd.f32 %v12364_v3, %v8695_v62 }
 0x4e6   :  { %v4038_v29 = vadd.f32 %v12364_v3, %v3920_v53 }
 0x4e7   :  { %8978 = vrot.lane.b32.xlu0 %v8977_v16, %s9144_s26  ;;  %v4103_v63 = vmax.f32 %v4039_v9, 0.0 }
 0x4e8   :  { %v4102_v34 = vmax.f32 %v4038_v29, 0.0 }
 0x503   :  { %v8698_v5 = vpop.f32.mrb[54].mxu0 }
 0x504   :  { %v4041_v57 = vadd.f32 %v12364_v3, %v8698_v5  ;;  %v3930_v15 = vpop.f32.mrb[55].mxu0 }
 0x505   :  { %v4040_v55 = vadd.f32 %v12364_v3, %v3930_v15 }
 0x506   :  { %v4105_v12 = vmax.f32 %v4041_v57, 0.0 }
 0x507   :  { %v4104_v11 = vmax.f32 %v4040_v55, 0.0 }
 0x508   :  { %v4193_v7 = vmax.f32 %v4103_v63, %v4105_v12 }
 0x509   :  { %v4192_v61 = vmax.f32 %v4102_v34, %v4104_v11 }
 0x50a   :  { %v4689_v52 = vcombine.high %v4193_v7, %v4193_v7  ;;  %v4696_v43 = vrot.slane %v4193_v7, %v10289_v38 }
 0x50b   :  { %v4672_v30 = vcombine.high %v4192_v61, %v4192_v61  ;;  %v4679_v4 = vrot.slane %v4192_v61, %v10289_v38 }
 0x50c   :  { %v4703_v20 = vrot.slane %v4689_v52, %v10289_v38  ;;  %v4704_v47 = vcombine.high %v4696_v43, %v4696_v43  ;;  %v8241_v35 = vrot.slane %v4696_v43, 9 }
 0x50d   :  { %v4686_v21 = vrot.slane %v4672_v30, %v10289_v38  ;;  %v4687_v22 = vcombine.high %v4679_v4, %v4679_v4  ;;  %v8237_v50 = vrot.slane %v4679_v4, 9 }
 0x50e   :  { %v4705_v10 = vcombine.high %v4703_v20, %v4703_v20  ;;  %v8242_v42 = vrot.slane %v4704_v47, 9  ;;  %v8243_v32 = vrot.slane %v4703_v20, 9  ;;  %v5394_v40 = vmax.f32 %v4696_v43, %v8241_v35  ;;  %v6719_v35 = vld [vmem:[%s13156_s3 + $0x180] sm:$0xff] }
 0x50f   :  { %v4688_v27 = vcombine.high %v4686_v21, %v4686_v21  ;;  %v8238_v37 = vrot.slane %v4687_v22, 9  ;;  %v8239_v26 = vrot.slane %v4686_v21, 9  ;;  %v5390_v31 = vmax.f32 %v4679_v4, %v8237_v50 }
 0x510   :  { %v8244_v56 = vrot.slane %v4705_v10, 9  ;;  %v5395_v6 = vmax.f32 %v4704_v47, %v8242_v42  ;;  %v5396_v62 = vmax.f32 %v4703_v20, %v8243_v32  ;;  %v5977_v5 = vrot.slane %v5394_v40, %v10319_v33  ;;  %v6720_v42 = vld [vmem:[%s13156_s3 + $0x188] sm:$0xff]  ;;  %v6722_v32 = vld [vmem:[%s13156_s3 + $0x198] sm:$0xff] }
 0x511   :  { %v8240_v19 = vrot.slane %v4688_v27, 9  ;;  %v5391_v49 = vmax.f32 %v4687_v22, %v8238_v37  ;;  %v5392_v14 = vmax.f32 %v4686_v21, %v8239_v26  ;;  %v5961_v18 = vrot.slane %v5390_v31, %v10319_v33  ;;  %v12441_v21 = vld [vmem:[#allocation3 + $0xf1] sm:$0xff]  ;;  %v6704_v26 = vld [vmem:[%s13156_s3 + $0x108] sm:$0xff] }
 0x512   :  { %v5397_v53 = vmax.f32 %v4705_v10, %v8244_v56  ;;  %v5981_v15 = vrot.slane %v5395_v6, %v10319_v33  ;;  %v5985_v63 = vrot.slane %v5396_v62, %v10319_v33  ;;  %v8793_v37 = vpack.c.bf16 %v6720_v42, %v6719_v35  ;;  %v6721_v31 = vld [vmem:[%s13156_s3 + $0x190] sm:$0xff] }
 0x513   :  { %v5393_v2 = vmax.f32 %v4688_v27, %v8240_v19  ;;  %v5965_v1 = vrot.slane %v5391_v49, %v10319_v33  ;;  %v5969_v16 = vrot.slane %v5392_v14, %v10319_v33  ;;  %v6703_v27 = vld [vmem:[%s13156_s3 + $0x100] sm:$0xff]  ;;  %v8797_v19 = vpack.c.bf16 %v6722_v32, %v6721_v31  ;;  %v6705_v49 = vld [vmem:[%s13156_s3 + $0x110] sm:$0xff]  ;;  %v6706_v14 = vld [vmem:[%s13156_s3 + $0x118] sm:$0xff] }
 0x514   :  { %v5989_v11 = vrot.slane %v5397_v53, %v10319_v33  ;;  %v8795_v56 = vpack.c.bf16 %v6704_v26, %v6703_v27  ;;  %8794 = vmatprep.subr.bf16.mxu1 %v8793_v37  ;;  %v8799_v40 = vpack.c.bf16 %v6706_v14, %v6705_v49 }
 0x515   :  { %v5973_v9 = vrot.slane %v5393_v2, %v10319_v33  ;;  %v6152_v29 = vsel %vm13189_vm9, %v5965_v1, %v5961_v18 }
 0x516   :  { %v6153_v57 = vsel %vm6056_vm3, %v5969_v16, %v6152_v29  ;;  %8796 = vmatpush3.bf16.msra.mxu1 %v8795_v56 }
 0x517   :  { %v6154_v55 = vsel %vm6058_vm4, %v5973_v9, %v6153_v57  ;;  %8798 = vmatprep.subr.bf16.mxu1 %v8797_v19 }
 0x518   :  { %v6155_v12 = vsel %vm6060_vm5, %v5977_v5, %v6154_v55  ;;  %v8974_v34 = vpop.permute.xlu1 %8973 }
 0x519   :  { %v6156_v7 = vsel %vm6062_vm15, %v5981_v15, %v6155_v12  ;;  %v8976_v61 = vunpack.i.h.bf16 %v8974_v34  ;;  %v8975_v52 = vunpack.i.l.bf16 %v8974_v34 }
 0x51a   :  { %v6157_v43 = vsel %vm6064_vm1, %v5985_v63, %v6156_v7  ;;  %8800 = vmatpush3.bf16.msra.mxu1 %v8799_v40 }
 0x51b   :  { %v6158_v30 = vsel %vm6066_vm2, %v5989_v11, %v6157_v43  ;;  %v6634_v4 = vsel %vm4114_vm14, %v12335_v51, %v8975_v52  ;;  %v6618_v20 = vsel %vm4114_vm14, %v12164_v59, %v8976_v61 }
 0x51c   :  { %6203 = vst.msk [vmem:[#allocation3 + $0x101] sm:$0xff] %vm4114_vm14, %v6158_v30  ;;  %6910 = vmatprep.mubr.f32.mxu1 %v6634_v4 }
 0x51d   :  { %6911 = vmatmul.mubr.f32.gmra.mrb[22].mxu1 %v6618_v20 }
 0x523   :  { %v12439_v47 = vld [vmem:[#allocation3 + $0x102] sm:$0xff] }
 0x524   :  { %v12443_v22 = vld [vmem:[#allocation3 + $0x100] sm:$0xff]  ;;  %8745 = vmatprep.mubr.msk.f32.mxu0 %vm4114_vm14, %v12439_v47  ;;  %v8701_v10 = vpop.f32.mrb[56].mxu0 }
 0x525   :  { %v8982_v50 = vpack.i.bf16 %v12441_v21, %v12443_v22  ;;  %v3940_v59 = vpop.f32.mrb[57].mxu0  ;;  %v4043_v6 = vadd.f32 %v12364_v3, %v8701_v10 }
 0x526   :  { %v4042_v2 = vadd.f32 %v12364_v3, %v3940_v59 }
 0x527   :  { %8983 = vrot.lane.b32.xlu1 %v8982_v50, %s9144_s26  ;;  %v4107_v53 = vmax.f32 %v4043_v6, 0.0 }
 0x528   :  { %v4106_v29 = vmax.f32 %v4042_v2, 0.0 }
 0x543   :  { %v8704_v18 = vpop.f32.mrb[58].mxu0 }
 0x544   :  { %v4045_v1 = vadd.f32 %v12364_v3, %v8704_v18  ;;  %v3950_v16 = vpop.f32.mrb[59].mxu0 }
 0x545   :  { %v4044_v62 = vadd.f32 %v12364_v3, %v3950_v16 }
 0x546   :  { %v4109_v9 = vmax.f32 %v4045_v1, 0.0 }
 0x547   :  { %v4108_v5 = vmax.f32 %v4044_v62, 0.0 }
 0x548   :  { %v4195_v57 = vmax.f32 %v4107_v53, %v4109_v9 }
 0x549   :  { %v4194_v15 = vmax.f32 %v4106_v29, %v4108_v5 }
 0x54a   :  { %v4723_v55 = vcombine.high %v4195_v57, %v4195_v57  ;;  %v4730_v63 = vrot.slane %v4195_v57, %v10289_v38 }
 0x54b   :  { %v4706_v12 = vcombine.high %v4194_v15, %v4194_v15  ;;  %v4713_v34 = vrot.slane %v4194_v15, %v10289_v38 }
 0x54c   :  { %v4737_v11 = vrot.slane %v4723_v55, %v10289_v38  ;;  %v4738_v7 = vcombine.high %v4730_v63, %v4730_v63  ;;  %v8249_v4 = vrot.slane %v4730_v63, 9 }
 0x54d   :  { %v4720_v61 = vrot.slane %v4706_v12, %v10289_v38  ;;  %v4721_v52 = vcombine.high %v4713_v34, %v4713_v34  ;;  %v8245_v43 = vrot.slane %v4713_v34, 9 }
 0x54e   :  { %v4739_v30 = vcombine.high %v4737_v11, %v4737_v11  ;;  %v8250_v20 = vrot.slane %v4738_v7, 9  ;;  %v8251_v42 = vrot.slane %v4737_v11, 9  ;;  %v5402_v32 = vmax.f32 %v4730_v63, %v8249_v4 }
 0x54f   :  { %v4722_v50 = vcombine.high %v4720_v61, %v4720_v61  ;;  %v8246_v10 = vrot.slane %v4721_v52, 9  ;;  %v8247_v59 = vrot.slane %v4720_v61, 9  ;;  %v5398_v35 = vmax.f32 %v4713_v34, %v8245_v43  ;;  %v6724_v43 = vld [vmem:[%s13156_s3 + $0x1a8] sm:$0xff] }
 0x550   :  { %v8252_v27 = vrot.slane %v4739_v30, 9  ;;  %v5403_v56 = vmax.f32 %v4738_v7, %v8250_v20  ;;  %v5404_v6 = vmax.f32 %v4737_v11, %v8251_v42  ;;  %v6009_v16 = vrot.slane %v5402_v32, %v10319_v33  ;;  %v12524_v42 = vld [vmem:[#allocation3 + $0x21] sm:$0xff] }
 0x551   :  { %v8248_v37 = vrot.slane %v4722_v50, 9  ;;  %v5399_v26 = vmax.f32 %v4721_v52, %v8246_v10  ;;  %v5400_v31 = vmax.f32 %v4720_v61, %v8247_v59  ;;  %v5993_v49 = vrot.slane %v5398_v35, %v10319_v33  ;;  %v6723_v52 = vld [vmem:[%s13156_s3 + $0x1a0] sm:$0xff] }
 0x552   :  { %v5405_v2 = vmax.f32 %v4739_v30, %v8252_v27  ;;  %v6013_v53 = vrot.slane %v5403_v56, %v10319_v33  ;;  %v6017_v29 = vrot.slane %v5404_v6, %v10319_v33  ;;  %v6707_v30 = vld [vmem:[%s13156_s3 + $0x120] sm:$0xff]  ;;  %v8801_v4 = vpack.c.bf16 %v6724_v43, %v6723_v52  ;;  %v6725_v27 = vld [vmem:[%s13156_s3 + $0x1b0] sm:$0xff]  ;;  %v6710_v56 = vld [vmem:[%s13156_s3 + $0x138] sm:$0xff] }
 0x553   :  { %v5401_v19 = vmax.f32 %v4722_v50, %v8248_v37  ;;  %v5997_v14 = vrot.slane %v5399_v26, %v10319_v33  ;;  %v6001_v40 = vrot.slane %v5400_v31, %v10319_v33  ;;  %v12516_v10 = vld [vmem:[#allocation3 + $0x101] sm:$0xff]  ;;  %v6726_v37 = vld [vmem:[%s13156_s3 + $0x1b8] sm:$0xff]  ;;  %v6709_v26 = vld [vmem:[%s13156_s3 + $0x130] sm:$0xff] }
 0x554   :  { %v6021_v15 = vrot.slane %v5405_v2, %v10319_v33  ;;  %8802 = vmatprep.subr.bf16.mxu1 %v8801_v4  ;;  %v8805_v32 = vpack.c.bf16 %v6726_v37, %v6725_v27  ;;  %v12546_v2 = vld [vmem:[#allocation3 + $0x61] sm:$0xff] }
 0x555   :  { %v6005_v18 = vrot.slane %v5401_v19, %v10319_v33  ;;  %v6159_v1 = vsel %vm13190_vm11, %v5997_v14, %v5993_v49  ;;  %v8807_v49 = vpack.c.bf16 %v6710_v56, %v6709_v26  ;;  %v8997_v14 = vpack.i.bf16 %v12287_v54, %v12524_v42  ;;  %v6711_v54 = vld [vmem:[%s13156_s3 + $0x140] sm:$0xff]  ;;  %v6732_v56 = vld [vmem:[%s13156_s3 + $0x1e8] sm:$0xff] }
 0x556   :  { %v6160_v62 = vsel %vm6056_vm3, %v6001_v40, %v6159_v1  ;;  %v12541_v40 = vld [vmem:[#allocation3 + $0x41] sm:$0xff] }
 0x557   :  { %v6161_v9 = vsel %vm6058_vm4, %v6005_v18, %v6160_v62  ;;  %v9007_v6 = vpack.i.bf16 %v12277_v24, %v12541_v40  ;;  %v6727_v18 = vld [vmem:[%s13156_s3 + $0x1c0] sm:$0xff]  ;;  %v6728_v1 = vld [vmem:[%s13156_s3 + $0x1c8] sm:$0xff] }
 0x558   :  { %v6162_v5 = vsel %vm6060_vm5, %v6009_v16, %v6161_v9  ;;  %v8809_v62 = vpack.c.bf16 %v6728_v1, %v6727_v18  ;;  %v6712_v24 = vld [vmem:[%s13156_s3 + $0x148] sm:$0xff]  ;;  %v6715_v1 = vld [vmem:[%s13156_s3 + $0x160] sm:$0xff] }
 0x559   :  { %v8979_v57 = vpop.permute.xlu0 %8978  ;;  %v6163_v55 = vsel %vm6062_vm15, %v6013_v53, %v6162_v5 }
 0x55a   :  { %v8981_v63 = vunpack.i.h.bf16 %v8979_v57  ;;  %v8980_v12 = vunpack.i.l.bf16 %v8979_v57  ;;  %v6164_v34 = vsel %vm6064_vm1, %v6017_v29, %v6163_v55  ;;  %v8811_v29 = vpack.c.bf16 %v6712_v24, %v6711_v54  ;;  %v6716_v54 = vld [vmem:[%s13156_s3 + $0x168] sm:$0xff] }
 0x55b   :  { %v6165_v11 = vsel %vm6066_vm2, %v6021_v15, %v6164_v34  ;;  %v9017_v15 = vpack.i.bf16 %v12291_v23, %v12546_v2 }
 0x55c   :  { %v6635_v7 = vsel %vm4114_vm14, %v12339_v39, %v8980_v12  ;;  %v6619_v61 = vsel %vm4114_vm14, %v12295_v41, %v8981_v63  ;;  %6204 = vst.msk [vmem:[#allocation3 + $0x111] sm:$0xff] %vm4114_vm14, %v6165_v11  ;;  %v6708_v41 = vld [vmem:[%s13156_s3 + $0x128] sm:$0xff] }
 0x55d   :  { %6915 = vmatprep.mubr.f32.mxu1 %v6635_v7  ;;  %v8803_v20 = vpack.c.bf16 %v6708_v41, %v6707_v30  ;;  %v12567_v63 = vld [vmem:[#allocation3 + $0x81] sm:$0xff]  ;;  %v6729_v41 = vld [vmem:[%s13156_s3 + $0x1d0] sm:$0xff] }
 0x55e   :  { %6916 = vmatmul.mubr.f32.gmra.mrb[24].mxu1 %v6619_v61  ;;  %v9027_v23 = vpack.i.bf16 %v12312_v25, %v12567_v63  ;;  %v12576_v30 = vld [vmem:[#allocation3 + $0xc1] sm:$0xff] }
 0x55f   :  { %8804 = vmatpush3.bf16.msra.mxu1 %v8803_v20  ;;  %v6730_v20 = vld [vmem:[%s13156_s3 + $0x1d8] sm:$0xff] }
 0x560   :  { %8806 = vmatprep.subr.bf16.mxu1 %v8805_v32  ;;  %v8813_v26 = vpack.c.bf16 %v6730_v20, %v6729_v41  ;;  %v6731_v32 = vld [vmem:[%s13156_s3 + $0x1e0] sm:$0xff] }
 0x563   :  { %v12514_v50 = vld [vmem:[#allocation3 + $0x112] sm:$0xff]  ;;  %8808 = vmatpush3.bf16.msra.mxu1 %v8807_v49 }
 0x564   :  { %v12518_v59 = vld [vmem:[#allocation3 + $0x110] sm:$0xff]  ;;  %8746 = vmatmul.mubr.msk.f32.gmra.mrb[76].mxu0 %vm4114_vm14, %v12514_v50  ;;  %v8707_v31 = vpop.f32.mrb[60].mxu0  ;;  %8810 = vmatprep.subr.bf16.mxu1 %v8809_v62 }
 0x565   :  { %v8987_v35 = vpack.i.bf16 %v12516_v10, %v12518_v59  ;;  %v3960_v19 = vpop.f32.mrb[61].mxu0  ;;  %v4047_v16 = vadd.f32 %v12364_v3, %v8707_v31  ;;  %v6714_v31 = vld [vmem:[%s13156_s3 + $0x158] sm:$0xff] }
 0x566   :  { %v4046_v53 = vadd.f32 %v12364_v3, %v3960_v19 }
 0x567   :  { %8988 = vrot.lane.b32.xlu0 %v8987_v35, %s9144_s26  ;;  %8812 = vmatpush3.bf16.msra.mxu1 %v8811_v29  ;;  %v4111_v12 = vmax.f32 %v4047_v16, 0.0  ;;  %v6713_v35 = vld [vmem:[%s13156_s3 + $0x150] sm:$0xff] }
 0x568   :  { %v4110_v11 = vmax.f32 %v4046_v53, 0.0  ;;  %v8815_v18 = vpack.c.bf16 %v6714_v31, %v6713_v35  ;;  %v9037_v53 = vpack.i.bf16 %v12359_v17, %v12576_v30  ;;  %8814 = vmatprep.subr.bf16.mxu1 %v8813_v26  ;;  %v9047_v35 = vpack.i.bf16 %v12335_v51, %v12402_v13 }
 0x56b   :  { %8998 = vrot.lane.b32.xlu0 %v8997_v14, %s9144_s26  ;;  %8816 = vmatpush3.bf16.msra.mxu1 %v8815_v18 }
 0x56f   :  { %9008 = vrot.lane.b32.xlu0 %v9007_v6, %s9144_s26  ;;  %v8710_v9 = vpop.f32.mrb[62].mxu0 }
 0x570   :  { %v4049_v5 = vadd.f32 %v12364_v3, %v8710_v9  ;;  %v3970_v57 = vpop.f32.mrb[63].mxu0  ;;  %v8817_v9 = vpack.c.bf16 %v6732_v56, %v6731_v32  ;;  %v6733_v56 = vld [vmem:[%s13156_s3 + $0x1f0] sm:$0xff] }
 0x571   :  { %v4048_v55 = vadd.f32 %v12364_v3, %v3970_v57 }
 0x572   :  { %v4113_v34 = vmax.f32 %v4049_v5, 0.0  ;;  %8818 = vmatprep.subr.bf16.mxu1 %v8817_v9 }
 0x573   :  { %9018 = vrot.lane.b32.xlu0 %v9017_v15, %s9144_s26  ;;  %v4112_v7 = vmax.f32 %v4048_v55, 0.0  ;;  %v12570_v61 = vpop.f32.mrb[64].mxu0  ;;  %v8819_v55 = vpack.c.bf16 %v6716_v54, %v6715_v1 }
 0x574   :  { %v4197_v52 = vmax.f32 %v4111_v12, %v4113_v34  ;;  %v12572_v43 = vpop.f32.mrb[65].mxu0 }
 0x575   :  { %v4196_v3 = vmax.f32 %v4110_v11, %v4112_v7  ;;  %v8411_v4 = vpop.f32.mrb[0].mxu1  ;;  %8820 = vmatpush3.bf16.msra.mxu1 %v8819_v55 }
 0x576   :  { %v4757_v27 = vcombine.high %v4197_v52, %v4197_v52  ;;  %v4764_v37 = vrot.slane %v4197_v52, %v10289_v38  ;;  %v8412_v25 = vpop.f32.mrb[1].mxu1 }
 0x577   :  { %9028 = vrot.lane.b32.xlu0 %v9027_v23, %s9144_s26  ;;  %v4740_v19 = vcombine.high %v4196_v3, %v4196_v3  ;;  %v4747_v49 = vrot.slane %v4196_v3, %v10289_v38  ;;  %v12599_v14 = vadd.f32 %v8412_v25, %v8411_v4  ;;  %v12601_v6 = vpop.f32.mrb[66].mxu0 }
 0x578   :  { %v4771_v16 = vrot.slane %v4757_v27, %v10289_v38  ;;  %v4772_v62 = vcombine.high %v4764_v37, %v4764_v37  ;;  %v12610_v24 = vpop.f32.mrb[67].mxu0  ;;  %v8257_v34 = vrot.slane %v4764_v37, 9 }
 0x579   :  { %v4754_v29 = vrot.slane %v4740_v19, %v10289_v38  ;;  %v4755_v5 = vcombine.high %v4747_v49, %v4747_v49  ;;  %v8253_v57 = vrot.slane %v4747_v49, 9  ;;  %v8414_v15 = vpop.f32.mrb[2].mxu1  ;;  %v6734_v19 = vld [vmem:[%s13156_s3 + $0x1f8] sm:$0xff] }
 0x57a   :  { %v4773_v12 = vcombine.high %v4771_v16, %v4771_v16  ;;  %v8258_v11 = vrot.slane %v4772_v62, 9  ;;  %v8415_v7 = vpop.f32.mrb[3].mxu1  ;;  %v8259_v41 = vrot.slane %v4771_v16, 9 }
 0x57b   :  { %9038 = vrot.lane.b32.xlu0 %v9037_v53, %s9144_s26  ;;  %v4756_v52 = vcombine.high %v4754_v29, %v4754_v29  ;;  %v8254_v23 = vrot.slane %v4755_v5, 9  ;;  %v8255_v3 = vrot.slane %v4754_v29, 9  ;;  %v5406_v17 = vmax.f32 %v4747_v49, %v8253_v57  ;;  %v12616_v4 = vpop.f32.mrb[68].mxu0 }
 0x57c   :  { %v12618_v20 = vpop.f32.mrb[69].mxu0  ;;  %v8260_v27 = vrot.slane %v4773_v12, 9  ;;  %v5410_v49 = vmax.f32 %v4764_v37, %v8257_v34  ;;  %v5411_v18 = vmax.f32 %v4772_v62, %v8258_v11  ;;  %v12629_v54 = vadd.f32 %v8415_v7, %v8414_v15 }
 0x57d   :  { %v8256_v25 = vrot.slane %v4756_v52, 9  ;;  %v5407_v26 = vmax.f32 %v4755_v5, %v8254_v23  ;;  %v5408_v31 = vmax.f32 %v4754_v29, %v8255_v3  ;;  %v8417_v32 = vpop.f32.mrb[4].mxu1  ;;  %v6025_v1 = vrot.slane %v5406_v17, %v10319_v33 }
 0x57e   :  { %v8418_v51 = vpop.f32.mrb[5].mxu1  ;;  %v5412_v57 = vmax.f32 %v4771_v16, %v8259_v41  ;;  %v9057_v37 = vpack.i.bf16 %v12400_v36, %v12516_v10  ;;  %v8821_v15 = vpack.c.bf16 %v6734_v19, %v6733_v56  ;;  %v5413_v55 = vmax.f32 %v4773_v12, %v8260_v27  ;;  %v6717_v56 = vld [vmem:[%s13156_s3 + $0x170] sm:$0xff]  ;;  %v6718_v19 = vld [vmem:[%s13156_s3 + $0x178] sm:$0xff] }
 0x57f   :  { %9048 = vrot.lane.b32.xlu0 %v9047_v35, %s9144_s26  ;;  %v5409_v13 = vmax.f32 %v4756_v52, %v8256_v25  ;;  %v6029_v53 = vrot.slane %v5407_v26, %v10319_v33  ;;  %v6033_v9 = vrot.slane %v5408_v31, %v10319_v33  ;;  %v12634_v29 = vadd.f32 %v8418_v51, %v8417_v32  ;;  %v12636_v5 = vpop.f32.mrb[70].mxu0 }
 0x580   :  { %v12640_v62 = vpop.f32.mrb[71].mxu0  ;;  %v6041_v52 = vrot.slane %v5410_v49, %v10319_v33  ;;  %8822 = vmatprep.subr.bf16.mxu1 %v8821_v15  ;;  %v6045_v16 = vrot.slane %v5411_v18, %v10319_v33  ;;  %v6049_v35 = vrot.slane %v5412_v57, %v10319_v33  ;;  %v6053_v26 = vrot.slane %v5413_v55, %v10319_v33  ;;  %v12672_v55 = vld [vmem:[#allocation3 + $0x111] sm:$0xff] }
 0x581   :  { %v6037_v34 = vrot.slane %v5409_v13, %v10319_v33  ;;  %v6166_v11 = vsel %vm13191_vm12, %v6029_v53, %v6025_v1  ;;  %v8420_v7 = vpop.f32.mrb[6].mxu1  ;;  %v8823_v1 = vpack.c.bf16 %v6718_v19, %v6717_v56 }
 0x582   :  { %v6167_v23 = vsel %vm6056_vm3, %v6033_v9, %v6166_v11  ;;  %v8421_v3 = vpop.f32.mrb[7].mxu1 }
 0x583   :  { %9058 = vrot.lane.b32.xlu0 %v9057_v37, %s9144_s26  ;;  %v6168_v17 = vsel %vm6058_vm4, %v6037_v34, %v6167_v23  ;;  %v12649_v41 = vadd.f32 %v8421_v3, %v8420_v7  ;;  %v12651_v12 = vpop.f32.mrb[72].mxu0  ;;  %8824 = vmatpush3.bf16.msra.mxu1 %v8823_v1 }
 0x584   :  { %v6169_v27 = vsel %vm6060_vm5, %v6041_v52, %v6168_v17  ;;  %v12655_v25 = vpop.f32.mrb[73].mxu0  ;;  %v12685_v17 = vld [vmem:[#allocation3 + $0x31] sm:$0xff] }
 0x585   :  { %v6170_v31 = vsel %vm6062_vm15, %v6045_v16, %v6169_v27  ;;  %v8423_v32 = vpop.f32.mrb[8].mxu1 }
 0x586   :  { %v6171_v49 = vsel %vm6064_vm1, %v6049_v35, %v6170_v31  ;;  %v8424_v18 = vpop.f32.mrb[9].mxu1 }
 0x587   :  { %v6172_v51 = vsel %vm6066_vm2, %v6053_v26, %v6171_v49  ;;  %v12667_v13 = vadd.f32 %v8424_v18, %v8423_v32  ;;  %v9002_v26 = vpack.i.bf16 %v12273_v58, %v12685_v17  ;;  %v12693_v32 = vld [vmem:[#allocation3 + $0x51] sm:$0xff] }
 0x588   :  { %6205 = vst.msk [vmem:[#allocation3 + $0x121] sm:$0xff] %vm4114_vm14, %v6172_v51  ;;  %v9012_v18 = vpack.i.bf16 %v12282_v44, %v12693_v32 }
 0x589   :  { %v8426_v53 = vpop.f32.mrb[10].mxu1 }
 0x58a   :  { %v8427_v9 = vpop.f32.mrb[11].mxu1 }
 0x58b   :  { %v12670_v57 = vadd.f32 %v8427_v9, %v8426_v53  ;;  %v12700_v9 = vld [vmem:[#allocation3 + $0x71] sm:$0xff] }
 0x58c   :  { %v9022_v44 = vpack.i.bf16 %v12299_v45, %v12700_v9  ;;  %v9062_v45 = vpack.i.bf16 %v12439_v47, %v12672_v55 }
 0x58d   :  { %v8429_v37 = vpop.f32.mrb[12].mxu1 }
 0x58e   :  { %v8430_v15 = vpop.f32.mrb[13].mxu1 }
 0x58f   :  { %v12674_v34 = vadd.f32 %v8430_v15, %v8429_v37  ;;  %v6349_v11 = vld [vmem:[#allocation3 + $0x122] sm:$0xff] }
 0x590   :  { %v12676_v7 = vld [vmem:[#allocation3 + $0x121] sm:$0xff]  ;;  %8748 = vmatprep.mubr.msk.f32.mxu0 %vm4114_vm14, %v6349_v11 }
 0x591   :  { %v12678_v52 = vld [vmem:[#allocation3 + $0x120] sm:$0xff]  ;;  %v9067_v23 = vpack.i.bf16 %v12514_v50, %v12676_v7  ;;  %v8432_v16 = vpop.f32.mrb[14].mxu1 }
 0x592   :  { %v8992_v3 = vpack.i.bf16 %v12672_v55, %v12678_v52  ;;  %v8433_v35 = vpop.f32.mrb[15].mxu1 }
 0x593   :  { %9068 = vrot.lane.b32.xlu0 %v9067_v23, %s9144_s26  ;;  %v12689_v27 = vadd.f32 %v8433_v35, %v8432_v16  ;;  %v9042_v35 = vpack.i.bf16 %v12327_v60, %v12293_v46 }
 0x594   :  { %8993 = vrot.lane.b32.xlu1 %v8992_v3, %s9144_s26  ;;  %v6326_v3 = vld [vmem:[#allocation3 + $0x91] sm:$0xff] }
 0x595   :  { %v8435_v31 = vpop.f32.mrb[16].mxu1  ;;  %v9032_v16 = vpack.i.bf16 %v12318_v8, %v6326_v3 }
 0x596   :  { %v8436_v56 = vpop.f32.mrb[17].mxu1 }
 0x597   :  { %v12696_v19 = vadd.f32 %v8436_v56, %v8435_v31 }
 0x598   :  { %9003 = vrot.lane.b32.xlu1 %v9002_v26, %s9144_s26 }
 0x599   :  { %v8984_v49 = vpop.permute.xlu1 %8983  ;;  %v8438_v53 = vpop.f32.mrb[18].mxu1 }
 0x59a   :  { %v8986_v1 = vunpack.i.h.bf16 %v8984_v49  ;;  %v8985_v51 = vunpack.i.l.bf16 %v8984_v49  ;;  %v8439_v37 = vpop.f32.mrb[19].mxu1 }
 0x59b   :  { %v12703_v58 = vadd.f32 %v8439_v37, %v8438_v53 }
 0x59c   :  { %9013 = vrot.lane.b32.xlu1 %v9012_v18, %s9144_s26  ;;  %v6636_v15 = vsel %vm4114_vm14, %v12400_v36, %v8985_v51  ;;  %v6620_v23 = vsel %vm4114_vm14, %v12404_v48, %v8986_v1  ;;  %v9052_v36 = vpack.i.bf16 %v12339_v39, %v12441_v21  ;;  %v6334_v48 = vld [vmem:[#allocation3 + $0x131] sm:$0xff] }
 0x59d   :  { %6920 = vmatprep.mubr.f32.mxu1 %v6636_v15  ;;  %v9072_v8 = vpack.i.bf16 %v6349_v11, %v6334_v48  ;;  %v6350_v39 = vld [vmem:[#allocation3 + $0x132] sm:$0xff] }
 0x59e   :  { %6921 = vmatmul.mubr.f32.gmra.mrb[26].mxu1 %v6620_v23  ;;  %8749 = vmatmul.mubr.msk.f32.gmra.mrb[78].mxu0 %vm4114_vm14, %v6350_v39 }
 0x5a0   :  { %9023 = vrot.lane.b32.xlu1 %v9022_v44, %s9144_s26 }
 0x5a4   :  { %9033 = vrot.lane.b32.xlu1 %v9032_v16, %s9144_s26 }
 0x5a8   :  { %9043 = vrot.lane.b32.xlu1 %v9042_v35, %s9144_s26 }
 0x5ac   :  { %9053 = vrot.lane.b32.xlu1 %v9052_v36, %s9144_s26 }
 0x5b0   :  { %9063 = vrot.lane.b32.xlu1 %v9062_v45, %s9144_s26  ;;  %v8441_v26 = vpop.f32.mrb[20].mxu1 }
 0x5b1   :  { %v8442_v31 = vpop.f32.mrb[21].mxu1 }
 0x5b2   :  { %v12723_v56 = vadd.f32 %v8442_v31, %v8441_v26  ;;  %v6303_v26 = vld [vmem:[#allocation3 + $0x20] sm:$0xff] }
 0x5b4   :  { %9073 = vrot.lane.b32.xlu1 %v9072_v8, %s9144_s26 }
 0x5b7   :  { %v12726_v46 = vpop.f32.mrb[74].mxu0 }
 0x5b8   :  { %v12728_v60 = vpop.f32.mrb[75].mxu0 }
 0x5d9   :  { %v8989_v49 = vpop.permute.xlu0 %8988 }
 0x5da   :  { %v8991_v18 = vunpack.i.h.bf16 %v8989_v49  ;;  %v8990_v1 = vunpack.i.l.bf16 %v8989_v49  ;;  %v6270_v49 = vld [vmem:[#allocation3 + $0x11] sm:$0xff] }
 0x5dc   :  { %v6637_v51 = vsel %vm4114_vm14, %v12439_v47, %v8990_v1  ;;  %v6621_v11 = vsel %vm4114_vm14, %v12443_v22, %v8991_v18 }
 0x5dd   :  { %6925 = vmatprep.mubr.f32.mxu1 %v6637_v51  ;;  %v8999_v23 = vpop.permute.xlu0 %8998  ;;  %v6304_v51 = vld [vmem:[#allocation3 + $0x30] sm:$0xff] }
 0x5de   :  { %6926 = vmatmul.mubr.f32.gmra.mrb[28].mxu1 %v6621_v11  ;;  %v9000_v3 = vunpack.i.l.bf16 %v8999_v23  ;;  %v9001_v45 = vunpack.i.h.bf16 %v8999_v23 }
 0x5e0   :  { %v6655_v31 = vsel %vm4114_vm14, %v6303_v26, %v9000_v3  ;;  %v6639_v1 = vsel %vm4114_vm14, %v6270_v49, %v9001_v45  ;;  %v6306_v45 = vld [vmem:[#allocation3 + $0x50] sm:$0xff] }
 0x5e1   :  { %v9009_v39 = vpop.permute.xlu0 %9008 }
 0x5e2   :  { %v9010_v11 = vunpack.i.l.bf16 %v9009_v39 }
 0x5f0   :  { %v8444_v53 = vpop.f32.mrb[22].mxu1 }
 0x5f1   :  { %v8445_v37 = vpop.f32.mrb[23].mxu1 }
 0x5f2   :  { %v12735_v15 = vadd.f32 %v8445_v37, %v8444_v53  ;;  %v9011_v37 = vunpack.i.h.bf16 %v9009_v39  ;;  %v6307_v39 = vld [vmem:[#allocation3 + $0x60] sm:$0xff] }
 0x606   :  { %v8994_v44 = vpop.permute.xlu1 %8993 }
 0x607   :  { %v8996_v16 = vunpack.i.h.bf16 %v8994_v44  ;;  %v8995_v35 = vunpack.i.l.bf16 %v8994_v44  ;;  %v6305_v44 = vld [vmem:[#allocation3 + $0x40] sm:$0xff] }
 0x608   :  { %v6657_v3 = vsel %vm4114_vm14, %v6305_v44, %v9010_v11  ;;  %v6308_v11 = vld [vmem:[#allocation3 + $0x70] sm:$0xff]  ;;  %v6309_v44 = vld [vmem:[#allocation3 + $0x80] sm:$0xff] }
 0x609   :  { %v6638_v36 = vsel %vm4114_vm14, %v12514_v50, %v8995_v35  ;;  %v6622_v47 = vsel %vm4114_vm14, %v12518_v59, %v8996_v16  ;;  %v9019_v35 = vpop.permute.xlu0 %9018 }
 0x60a   :  { %v9004_v48 = vpop.permute.xlu1 %9003  ;;  %6930 = vmatprep.mubr.f32.mxu1 %v6638_v36 }
 0x60b   :  { %v9005_v8 = vunpack.i.l.bf16 %v9004_v48  ;;  %6931 = vmatmul.mubr.f32.gmra.mrb[30].mxu1 %v6622_v47  ;;  %v9006_v18 = vunpack.i.h.bf16 %v9004_v48  ;;  %v6641_v47 = vsel %vm4114_vm14, %v12685_v17, %v9011_v37  ;;  %v9020_v48 = vunpack.i.l.bf16 %v9019_v35 }
 0x60c   :  { %7000 = vmatprep.mubr.f32.mxu1 %v6655_v31  ;;  %v9021_v31 = vunpack.i.h.bf16 %v9019_v35 }
 0x60d   :  { %v6656_v50 = vsel %vm4114_vm14, %v6304_v51, %v9005_v8  ;;  %v6640_v23 = vsel %vm4114_vm14, %v12524_v42, %v9006_v18  ;;  %v6659_v18 = vsel %vm4114_vm14, %v6307_v39, %v9020_v48 }
 0x60e   :  { %v9014_v53 = vpop.permute.xlu1 %9013  ;;  %v6643_v17 = vsel %vm4114_vm14, %v12693_v32, %v9021_v31  ;;  %v6311_v31 = vld [vmem:[#allocation3 + $0xc0] sm:$0xff] }
 0x60f   :  { %7001 = vmatmul.mubr.f32.vlgmr.msra.gmra.mrb[32].mxu1 %v6639_v1  ;;  %v9015_v16 = vunpack.i.l.bf16 %v9014_v53  ;;  %v9016_v36 = vunpack.i.h.bf16 %v9014_v53  ;;  %v9029_v1 = vpop.permute.xlu0 %9028 }
 0x610   :  { %7005 = vmatprep.mubr.f32.mxu1 %v6656_v50  ;;  %v9030_v50 = vunpack.i.l.bf16 %v9029_v1 }
 0x611   :  { %v6658_v26 = vsel %vm4114_vm14, %v6306_v45, %v9015_v16  ;;  %v6642_v42 = vsel %vm4114_vm14, %v12541_v40, %v9016_v36  ;;  %v6310_v36 = vld [vmem:[#allocation3 + $0x90] sm:$0xff] }
 0x612   :  { %v9024_v8 = vpop.permute.xlu1 %9023 }
 0x613   :  { %7006 = vmatmul.mubr.f32.gmra.mrb[34].mxu1 %v6640_v23  ;;  %v9025_v49 = vunpack.i.l.bf16 %v9024_v8  ;;  %v9026_v51 = vunpack.i.h.bf16 %v9024_v8  ;;  %v9031_v23 = vunpack.i.h.bf16 %v9029_v1  ;;  %v9039_v35 = vpop.permute.xlu0 %9038 }
 0x614   :  { %7010 = vmatprep.mubr.f32.mxu1 %v6657_v3  ;;  %v6661_v3 = vsel %vm4114_vm14, %v6309_v44, %v9030_v50  ;;  %v9040_v45 = vunpack.i.l.bf16 %v9039_v35  ;;  %v9041_v8 = vunpack.i.h.bf16 %v9039_v35 }
 0x615   :  { %v6660_v53 = vsel %vm4114_vm14, %v6308_v11, %v9025_v49  ;;  %v6644_v40 = vsel %vm4114_vm14, %v12546_v2, %v9026_v51  ;;  %v6312_v51 = vld [vmem:[#allocation3 + $0xd0] sm:$0xff] }
 0x616   :  { %v9034_v37 = vpop.permute.xlu1 %9033  ;;  %v6663_v39 = vsel %vm4114_vm14, %v6311_v31, %v9040_v45  ;;  %v6314_v45 = vld [vmem:[#allocation3 + $0xf0] sm:$0xff] }
 0x617   :  { %7011 = vmatmul.mubr.f32.gmra.mrb[36].mxu1 %v6641_v47  ;;  %v9035_v16 = vunpack.i.l.bf16 %v9034_v37  ;;  %v9036_v32 = vunpack.i.h.bf16 %v9034_v37  ;;  %v6645_v47 = vsel %vm4114_vm14, %v12700_v9, %v9031_v23  ;;  %v9049_v49 = vpop.permute.xlu0 %9048  ;;  %v6313_v23 = vld [vmem:[#allocation3 + $0xe0] sm:$0xff] }
 0x618   :  { %7015 = vmatprep.mubr.f32.mxu1 %v6658_v26 }
 0x619   :  { %v6662_v48 = vsel %vm4114_vm14, %v6310_v36, %v9035_v16  ;;  %v6646_v2 = vsel %vm4114_vm14, %v12567_v63, %v9036_v32  ;;  %v6280_v36 = vld [vmem:[#allocation3 + $0xd1] sm:$0xff] }
 0x61a   :  { %v9044_v26 = vpop.permute.xlu1 %9043 }
 0x61b   :  { %7016 = vmatmul.mubr.f32.gmra.mrb[38].mxu1 %v6642_v42  ;;  %v9045_v42 = vunpack.i.l.bf16 %v9044_v26  ;;  %v9046_v1 = vunpack.i.h.bf16 %v9044_v26 }
 0x61c   :  { %7020 = vmatprep.mubr.f32.mxu1 %v6659_v18  ;;  %v6278_v18 = vld [vmem:[#allocation3 + $0xb1] sm:$0xff] }
 0x61d   :  { %v6647_v9 = vsel %vm4114_vm14, %v6278_v18, %v9041_v8  ;;  %v6664_v11 = vsel %vm4114_vm14, %v6312_v51, %v9045_v42  ;;  %v6648_v37 = vsel %vm4114_vm14, %v12576_v30, %v9046_v1 }
 0x61e   :  { %v9054_v50 = vpop.permute.xlu1 %9053 }
 0x61f   :  { %7021 = vmatmul.mubr.f32.gmra.mrb[40].mxu1 %v6643_v17  ;;  %v9050_v17 = vunpack.i.l.bf16 %v9049_v49  ;;  %v9056_v32 = vunpack.i.h.bf16 %v9054_v50 }
 0x620   :  { %7025 = vmatprep.mubr.f32.mxu1 %v6660_v53  ;;  %v9051_v53 = vunpack.i.h.bf16 %v9049_v49 }
 0x621   :  { %v6665_v16 = vsel %vm4114_vm14, %v6313_v23, %v9050_v17  ;;  %v6318_v23 = vld [vmem:[#allocation3 + $0x130] sm:$0xff] }
 0x622   :  { %v9064_v30 = vpop.permute.xlu1 %9063 }
 0x623   :  { %7026 = vmatmul.mubr.f32.gmra.mrb[42].mxu1 %v6644_v40  ;;  %v9055_v40 = vunpack.i.l.bf16 %v9054_v50  ;;  %v9065_v49 = vunpack.i.l.bf16 %v9064_v30 }
 0x624   :  { %7030 = vmatprep.mubr.f32.mxu1 %v6661_v3  ;;  %v9059_v3 = vpop.permute.xlu0 %9058 }
 0x625   :  { %v6666_v26 = vsel %vm4114_vm14, %v6314_v45, %v9055_v40  ;;  %v9061_v31 = vunpack.i.h.bf16 %v9059_v3  ;;  %v7581_v45 = vld [vmem:[%s13157_s5 + $0x20] sm:$0xff] }
 0x626   :  { %v9074_v50 = vpop.permute.xlu1 %9073 }
 0x627   :  { %7031 = vmatmul.mubr.f32.gmra.mrb[44].mxu1 %v6645_v47  ;;  %v6649_v47 = vsel %vm4114_vm14, %v6280_v36, %v9051_v53  ;;  %v6651_v51 = vsel %vm4114_vm14, %v12441_v21, %v9061_v31  ;;  %v9076_v40 = vunpack.i.h.bf16 %v9074_v50  ;;  %v7582_v36 = vld [vmem:[%s13157_s5 + $0x28] sm:$0xff] }
 0x628   :  { %7035 = vmatprep.mubr.f32.mxu1 %v6662_v48  ;;  %v9060_v48 = vunpack.i.l.bf16 %v9059_v3  ;;  %v9069_v1 = vpop.permute.xlu0 %9068  ;;  %v7586_v31 = vld [vmem:[%s13157_s5 + $0x48] sm:$0xff] }
 0x629   :  { %v9070_v17 = vunpack.i.l.bf16 %v9069_v1  ;;  %v9071_v53 = vunpack.i.h.bf16 %v9069_v1  ;;  %v7585_v1 = vld [vmem:[%s13157_s5 + $0x40] sm:$0xff] }
 0x62a   :  { %v6667_v18 = vsel %vm4114_vm14, %v12443_v22, %v9060_v48  ;;  %v7583_v48 = vld [vmem:[%s13157_s5 + $0x30] sm:$0xff] }
 0x62b   :  { %7036 = vmatmul.mubr.f32.gmra.mrb[46].mxu1 %v6646_v2  ;;  %v6281_v2 = vld [vmem:[#allocation3 + $0xe1] sm:$0xff]  ;;  %v6669_v22 = vsel %vm4114_vm14, %v12678_v52, %v9070_v17  ;;  %v6653_v21 = vsel %vm4114_vm14, %v12672_v55, %v9071_v53  ;;  %v7580_v52 = vld [vmem:[%s13157_s5 + $0x18] sm:$0xff] }
 0x62c   :  { %7040 = vmatprep.mubr.f32.mxu1 %v6663_v39  ;;  %v6650_v39 = vsel %vm4114_vm14, %v6281_v2, %v9056_v32  ;;  %v7577_v55 = vld [vmem:[%s13157_s5] sm:$0xff]  ;;  %v7584_v32 = vld [vmem:[%s13157_s5 + $0x38] sm:$0xff]  ;;  %v7590_v17 = vld [vmem:[%s13157_s5 + $0x68] sm:$0xff] }
 0x62d   :  { %v7589_v53 = vld [vmem:[%s13157_s5 + $0x60] sm:$0xff] }
 0x62f   :  { %7041 = vmatmul.mubr.f32.gmra.mrb[48].mxu1 %v6647_v9  ;;  %v9066_v9 = vunpack.i.h.bf16 %v9064_v30 }
 0x630   :  { %7045 = vmatprep.mubr.f32.mxu1 %v6664_v11  ;;  %v6668_v11 = vsel %vm4114_vm14, %v12518_v59, %v9065_v49 }
 0x631   :  { %v8447_v63 = vpop.f32.mrb[24].mxu1 }
 0x632   :  { %v8448_v44 = vpop.f32.mrb[25].mxu1 }
 0x633   :  { %7046 = vmatmul.mubr.f32.gmra.mrb[50].mxu1 %v6648_v37  ;;  %v12770_v35 = vadd.f32 %v8448_v44, %v8447_v63  ;;  %v6652_v63 = vsel %vm4114_vm14, %v12516_v10, %v9066_v9  ;;  %v9075_v37 = vunpack.i.l.bf16 %v9074_v50  ;;  %v6654_v44 = vsel %vm4114_vm14, %v12676_v7, %v9076_v40  ;;  %v7578_v10 = vld [vmem:[%s13157_s5 + $0x8] sm:$0xff]  ;;  %v7579_v7 = vld [vmem:[%s13157_s5 + $0x10] sm:$0xff] }
 0x634   :  { %7050 = vmatprep.mubr.f32.mxu1 %v6665_v16  ;;  %v8841_v16 = vpack.c.bf16 %v7580_v52, %v7578_v10  ;;  %v8843_v3 = vpack.c.bf16 %v7579_v7, %v7577_v55  ;;  %v7587_v9 = vld [vmem:[%s13157_s5 + $0x50] sm:$0xff]  ;;  %v7598_v10 = vld [vmem:[%s13157_s5 + $0xa8] sm:$0xff]  ;;  %v7600_v52 = vld [vmem:[%s13157_s5 + $0xb8] sm:$0xff] }
 0x635   :  { %v6670_v59 = vsel %vm4114_vm14, %v6318_v23, %v9075_v37  ;;  %v7596_v23 = vld [vmem:[%s13157_s5 + $0x98] sm:$0xff]  ;;  %v7597_v55 = vld [vmem:[%s13157_s5 + $0xa0] sm:$0xff]  ;;  %v7599_v7 = vld [vmem:[%s13157_s5 + $0xb0] sm:$0xff] }
 0x636   :  { %8842 = vmatprep.subr.bf16.mxu1 %v8841_v16  ;;  %v8861_v16 = vpack.c.bf16 %v7600_v52, %v7598_v10  ;;  %v7912_v10 = vld [vmem:[%s13158_s7 + $0x10] sm:$0xff]  ;;  %v7913_v52 = vld [vmem:[%s13158_s7 + $0x18] sm:$0xff]  ;;  %vm13193_vm14 = vmmov %vm13185_vm0 }
 0x637   :  { %7051 = vmatmul.mubr.f32.gmra.mrb[52].mxu1 %v6649_v47  ;;  %v12774_v8 = vpop.f32.mrb[76].mxu0  ;;  %v8845_v47 = vpack.c.bf16 %v7584_v32, %v7582_v36  ;;  %v7602_v36 = vld [vmem:[%s13157_s5 + $0xc8] sm:$0xff]  ;;  %v7604_v32 = vld [vmem:[%s13157_s5 + $0xd8] sm:$0xff] }
 0x638   :  { %7055 = vmatprep.mubr.f32.mxu1 %v6666_v26  ;;  %v12776_v42 = vpop.f32.mrb[77].mxu0  ;;  %8844 = vmatpush1.bf16.msra.mxu1 %v8843_v3  ;;  %v8847_v26 = vpack.c.bf16 %v7583_v48, %v7581_v45  ;;  %v8863_v3 = vpack.c.bf16 %v7599_v7, %v7597_v55  ;;  %v7601_v45 = vld [vmem:[%s13157_s5 + $0xc0] sm:$0xff]  ;;  %v7603_v48 = vld [vmem:[%s13157_s5 + $0xd0] sm:$0xff]  ;;  %v7931_v55 = vld [vmem:[%s13158_s7 + $0xa8] sm:$0xff]  ;;  %v8879_v7 = vpack.c.bf16 %v7913_v52, %v7912_v10 }
 0x639   :  { %8846 = vmatprep.subr.bf16.mxu1 %v8845_v47  ;;  %v8865_v47 = vpack.c.bf16 %v7604_v32, %v7602_v36  ;;  %v7914_v36 = vld [vmem:[%s13158_s7 + $0x20] sm:$0xff]  ;;  %v7915_v32 = vld [vmem:[%s13158_s7 + $0x28] sm:$0xff] }
 0x63b   :  { %7056 = vmatmul.mubr.f32.gmra.mrb[54].mxu1 %v6650_v39  ;;  %v7588_v39 = vld [vmem:[%s13157_s5 + $0x58] sm:$0xff] }
 0x63c   :  { %7060 = vmatprep.mubr.f32.mxu1 %v6667_v18  ;;  %8848 = vmatpush1.bf16.msra.mxu1 %v8847_v26  ;;  %v8849_v18 = vpack.c.bf16 %v7588_v39, %v7586_v31  ;;  %v8867_v26 = vpack.c.bf16 %v7603_v48, %v7601_v45  ;;  %v7605_v39 = vld [vmem:[%s13157_s5 + $0xe0] sm:$0xff]  ;;  %v7933_v45 = vld [vmem:[%s13158_s7 + $0xb8] sm:$0xff]  ;;  %v8883_v48 = vpack.c.bf16 %v7915_v32, %v7914_v36 }
 0x63e   :  { %8850 = vmatprep.subr.bf16.mxu1 %v8849_v18  ;;  %v7607_v18 = vld [vmem:[%s13157_s5 + $0xf0] sm:$0xff] }
 0x63f   :  { %7061 = vmatmul.mubr.f32.gmra.mrb[56].mxu1 %v6651_v51  ;;  %v8851_v51 = vpack.c.bf16 %v7587_v9, %v7585_v1  ;;  %v8871_v1 = vpack.c.bf16 %v7607_v18, %v7605_v39  ;;  %v7935_v39 = vld [vmem:[%s13158_s7 + $0xc8] sm:$0xff] }
 0x640   :  { %7065 = vmatprep.mubr.f32.mxu1 %v6668_v11  ;;  %v7592_v11 = vld [vmem:[%s13157_s5 + $0x78] sm:$0xff] }
 0x641   :  { %8852 = vmatpush1.bf16.msra.mxu1 %v8851_v51  ;;  %v8853_v50 = vpack.c.bf16 %v7592_v11, %v7590_v17 }
 0x643   :  { %7066 = vmatmul.mubr.f32.gmra.mrb[58].mxu1 %v6652_v63  ;;  %v7591_v63 = vld [vmem:[%s13157_s5 + $0x70] sm:$0xff]  ;;  %8854 = vmatprep.subr.bf16.mxu1 %v8853_v50 }
 0x644   :  { %7070 = vmatprep.mubr.f32.mxu1 %v6669_v22  ;;  %v8855_v37 = vpack.c.bf16 %v7591_v63, %v7589_v53  ;;  %v7594_v22 = vld [vmem:[%s13157_s5 + $0x88] sm:$0xff]  ;;  %v7926_v53 = vld [vmem:[%s13158_s7 + $0x80] sm:$0xff] }
 0x645   :  { %v8857_v40 = vpack.c.bf16 %v7596_v23, %v7594_v22  ;;  %v7927_v63 = vld [vmem:[%s13158_s7 + $0x88] sm:$0xff] }
 0x646   :  { %8856 = vmatpush1.bf16.msra.mxu1 %v8855_v37  ;;  %v7910_v37 = vld [vmem:[%s13158_s7] sm:$0xff]  ;;  %v8873_v22 = vpack.c.bf16 %v7927_v63, %v7926_v53  ;;  %v7911_v23 = vld [vmem:[%s13158_s7 + $0x8] sm:$0xff]  ;;  %v7936_v53 = vld [vmem:[%s13158_s7 + $0xd0] sm:$0xff] }
 0x647   :  { %7071 = vmatmul.mubr.f32.gmra.mrb[60].mxu1 %v6653_v21  ;;  %v7593_v21 = vld [vmem:[%s13157_s5 + $0x80] sm:$0xff]  ;;  %8858 = vmatprep.subr.bf16.mxu1 %v8857_v40  ;;  %v7928_v40 = vld [vmem:[%s13158_s7 + $0x90] sm:$0xff]  ;;  %v7937_v63 = vld [vmem:[%s13158_s7 + $0xd8] sm:$0xff] }
 0x648   :  { %7075 = vmatprep.mubr.f32.mxu1 %v6670_v59  ;;  %v7595_v59 = vld [vmem:[%s13157_s5 + $0x90] sm:$0xff]  ;;  %8874 = vmatprep.subr.bf16.mxu0 %v8873_v22  ;;  %v8893_v22 = vpack.c.bf16 %v7937_v63, %v7936_v53 }
 0x64b   :  { %7076 = vmatmul.mubr.f32.gmra.mrb[62].mxu1 %v6654_v44  ;;  %v8859_v44 = vpack.c.bf16 %v7595_v59, %v7593_v21  ;;  %v7929_v21 = vld [vmem:[%s13158_s7 + $0x98] sm:$0xff]  ;;  %v8875_v59 = vpack.c.bf16 %v7911_v23, %v7910_v37  ;;  %v7920_v23 = vld [vmem:[%s13158_s7 + $0x50] sm:$0xff] }
 0x64c   :  { %7877 = vmatprep.mubr.f32.mxu1 %v9133_v0 }
 0x64d   :  { %8860 = vmatpush1.bf16.msra.mxu1 %v8859_v44  ;;  %v8877_v44 = vpack.c.bf16 %v7929_v21, %v7928_v40  ;;  %8876 = vmatpush3.bf16.msra.mxu0 %v8875_v59  ;;  %v7921_v40 = vld [vmem:[%s13158_s7 + $0x58] sm:$0xff]  ;;  %v7938_v21 = vld [vmem:[%s13158_s7 + $0xe0] sm:$0xff]  ;;  %v7939_v59 = vld [vmem:[%s13158_s7 + $0xe8] sm:$0xff] }
 0x64e   :  { %8862 = vmatprep.subr.bf16.mxu1 %v8861_v16  ;;  %v7930_v16 = vld [vmem:[%s13158_s7 + $0xa0] sm:$0xff]  ;;  %v8897_v10 = vpack.c.bf16 %v7939_v59, %v7938_v21 }
 0x64f   :  { %8878 = vmatprep.subr.bf16.mxu0 %v8877_v44  ;;  %v8895_v44 = vpack.c.bf16 %v7921_v40, %v7920_v23 }
 0x651   :  { %8864 = vmatpush1.bf16.msra.mxu1 %v8863_v3  ;;  %v8881_v3 = vpack.c.bf16 %v7931_v55, %v7930_v16  ;;  %8880 = vmatpush3.bf16.msra.mxu0 %v8879_v7 }
 0x652   :  { %8866 = vmatprep.subr.bf16.mxu1 %v8865_v47  ;;  %v7932_v47 = vld [vmem:[%s13158_s7 + $0xb0] sm:$0xff] }
 0x653   :  { %8882 = vmatprep.subr.bf16.mxu0 %v8881_v3 }
 0x655   :  { %8868 = vmatpush1.bf16.msra.mxu1 %v8867_v26  ;;  %v8885_v26 = vpack.c.bf16 %v7933_v45, %v7932_v47  ;;  %8884 = vmatpush3.bf16.msra.mxu0 %v8883_v48 }
 0x657   :  { %8886 = vmatprep.subr.bf16.mxu0 %v8885_v26 }
 0x671   :  { %v8450_v30 = vpop.f32.mrb[26].mxu1  ;;  %v12893_v9 = vpop.f32.mrb[78].mxu0 }
 0x672   :  { %v8451_v2 = vpop.f32.mrb[27].mxu1  ;;  %v12895_v51 = vpop.f32.mrb[79].mxu0 }
 0x673   :  { %v12825_v49 = vadd.f32 %v8451_v2, %v8450_v30  ;;  %v7606_v30 = vld [vmem:[%s13157_s5 + $0xe8] sm:$0xff]  ;;  %v7608_v2 = vld [vmem:[%s13157_s5 + $0xf8] sm:$0xff] }
 0x674   :  { %v8869_v31 = vpack.c.bf16 %v7608_v2, %v7606_v30  ;;  %v7916_v30 = vld [vmem:[%s13158_s7 + $0x30] sm:$0xff]  ;;  %v7917_v2 = vld [vmem:[%s13158_s7 + $0x38] sm:$0xff] }
 0x675   :  { %v8887_v18 = vpack.c.bf16 %v7917_v2, %v7916_v30  ;;  %v12984_v30 = vld [vmem:[%s13159_s4] ss:$0 sm:$0xff] }
 0x676   :  { %8870 = vmatprep.subr.bf16.mxu1 %v8869_v31  ;;  %v7934_v31 = vld [vmem:[%s13158_s7 + $0xc0] sm:$0xff] }
 0x677   :  { %8872 = vmatpush1.bf16.msra.mxu1 %v8871_v1  ;;  %v8889_v1 = vpack.c.bf16 %v7935_v39, %v7934_v31  ;;  %8888 = vmatpush3.bf16.msra.mxu0 %v8887_v18 }
 0x679   :  { %8890 = vmatprep.subr.bf16.mxu0 %v8889_v1 }
 0x6b1   :  { %v8453_v17 = vpop.f32.mrb[28].mxu1 }
 0x6b2   :  { %v8454_v11 = vpop.f32.mrb[29].mxu1 }
 0x6b3   :  { %v12897_v50 = vadd.f32 %v8454_v11, %v8453_v17  ;;  %v7918_v17 = vld [vmem:[%s13158_s7 + $0x40] sm:$0xff]  ;;  %v7919_v11 = vld [vmem:[%s13158_s7 + $0x48] sm:$0xff] }
 0x6b4   :  { %v8891_v37 = vpack.c.bf16 %v7919_v11, %v7918_v17 }
 0x6b6   :  { %8892 = vmatpush3.bf16.msra.mxu0 %v8891_v37 }
 0x6b7   :  { %8894 = vmatprep.subr.bf16.mxu0 %v8893_v22 }
 0x6ba   :  { %8896 = vmatpush3.bf16.msra.mxu0 %v8895_v44 }
 0x6bb   :  { %8898 = vmatprep.subr.bf16.mxu0 %v8897_v10 }
 0x6de   :  { %v8456_v52 = vpop.f32.mrb[30].mxu1 }
 0x6df   :  { %v8457_v16 = vpop.f32.mrb[31].mxu1 }
 0x6e0   :  { %v12977_v55 = vadd.f32 %v8457_v16, %v8456_v52 }
 0x6e2   :  { %v8491_v7 = vpop.f32.mrb[32].mxu1 }
 0x6e3   :  { %v8492_v3 = vpop.f32.mrb[33].mxu1 }
 0x6e4   :  { %v8493_v36 = vadd.f32 %v8492_v3, %v8491_v7 }
 0x6e6   :  { %v7003_v32 = vadd.f32 %v8493_v36, %v12599_v14  ;;  %v8494_v47 = vpop.f32.mrb[34].mxu1 }
 0x6e7   :  { %v8495_v45 = vpop.f32.mrb[35].mxu1 }
 0x6e8   :  { %v7148_v48 = vadd.f32 %v12572_v43, %v7003_v32  ;;  %v8496_v26 = vadd.f32 %v8495_v45, %v8494_v47 }
 0x6ea   :  { %v7008_v2 = vadd.f32 %v8496_v26, %v12629_v54  ;;  %v8497_v31 = vpop.f32.mrb[36].mxu1  ;;  %v7233_v18 = vadd.f32 %v12984_v30, %v7148_v48 }
 0x6eb   :  { %v8498_v39 = vpop.f32.mrb[37].mxu1 }
 0x6ec   :  { %v7153_v1 = vadd.f32 %v12570_v61, %v7008_v2  ;;  %v8499_v17 = vadd.f32 %v8498_v39, %v8497_v31  ;;  %v7249_v63 = vmax.f32 %v7233_v18, 0.0 }
 0x6ee   :  { %v7234_v14 = vadd.f32 %v12984_v30, %v7153_v1  ;;  %v7013_v11 = vadd.f32 %v8499_v17, %v12634_v29  ;;  %v8500_v43 = vpop.f32.mrb[38].mxu1 }
 0x6ef   :  { %v8501_v53 = vpop.f32.mrb[39].mxu1 }
 0x6f0   :  { %v7250_v37 = vmax.f32 %v7234_v14, 0.0  ;;  %v7158_v22 = vadd.f32 %v12610_v24, %v7013_v11  ;;  %v8502_v23 = vadd.f32 %v8501_v53, %v8500_v43 }
 0x6f2   :  { %v7265_v40 = vmax.f32 %v7249_v63, %v7250_v37  ;;  %v7018_v54 = vadd.f32 %v8502_v23, %v12649_v41  ;;  %v8503_v21 = vpop.f32.mrb[40].mxu1  ;;  %v7235_v52 = vadd.f32 %v12984_v30, %v7158_v22 }
 0x6f3   :  { %v8504_v59 = vpop.f32.mrb[41].mxu1 }
 0x6f4   :  { %v7281_v44 = vcombine.high %v7265_v40, %v7265_v40  ;;  %v7288_v61 = vrot.slane %v7265_v40, %v10289_v38  ;;  %v7163_v10 = vadd.f32 %v12601_v6, %v7018_v54  ;;  %v8505_v29 = vadd.f32 %v8504_v59, %v8503_v21 }
 0x6f5   :  { %v7251_v2 = vmax.f32 %v7235_v52, 0.0 }
 0x6f6   :  { %v7295_v16 = vrot.slane %v7281_v44, %v10289_v38  ;;  %v7296_v7 = vcombine.high %v7288_v61, %v7288_v61  ;;  %v8278_v3 = vrot.slane %v7288_v61, 9  ;;  %v7236_v24 = vadd.f32 %v12984_v30, %v7163_v10  ;;  %v8506_v36 = vpop.f32.mrb[42].mxu1 }
 0x6f7   :  { %v7023_v32 = vadd.f32 %v8505_v29, %v12667_v13  ;;  %v8507_v41 = vpop.f32.mrb[43].mxu1 }
 0x6f8   :  { %v7297_v47 = vcombine.high %v7295_v16, %v7295_v16  ;;  %v8279_v45 = vrot.slane %v7296_v7, 9  ;;  %v8280_v48 = vrot.slane %v7295_v16, 9  ;;  %v7545_v26 = vmax.f32 %v7288_v61, %v8278_v3 }
 0x6f9   :  { %v7252_v31 = vmax.f32 %v7236_v24, 0.0  ;;  %v7168_v6 = vadd.f32 %v12618_v20, %v7023_v32  ;;  %v8508_v39 = vadd.f32 %v8507_v41, %v8506_v36 }
 0x6fa   :  { %v8281_v18 = vrot.slane %v7297_v47, 9  ;;  %v7546_v1 = vmax.f32 %v7296_v7, %v8279_v45  ;;  %v7547_v17 = vmax.f32 %v7295_v16, %v8280_v48  ;;  %v8509_v14 = vpop.f32.mrb[44].mxu1  ;;  %v7656_v11 = vrot.slane %v7545_v26, %v10319_v33 }
 0x6fb   :  { %v7266_v43 = vmax.f32 %v7251_v2, %v7252_v31  ;;  %v7237_v53 = vadd.f32 %v12984_v30, %v7168_v6  ;;  %v7028_v13 = vadd.f32 %v8508_v39, %v12670_v57  ;;  %v8510_v63 = vpop.f32.mrb[45].mxu1 }
 0x6fc   :  { %v7548_v37 = vmax.f32 %v7297_v47, %v8281_v18  ;;  %v7660_v22 = vrot.slane %v7546_v1, %v10319_v33  ;;  %v7664_v23 = vrot.slane %v7547_v17, %v10319_v33  ;;  %v8511_v40 = vadd.f32 %v8510_v63, %v8509_v14 }
 0x6fd   :  { %v7298_v20 = vcombine.high %v7266_v43, %v7266_v43  ;;  %v7305_v54 = vrot.slane %v7266_v43, %v10289_v38  ;;  %v7173_v21 = vadd.f32 %v12616_v4, %v7028_v13  ;;  %v7253_v3 = vmax.f32 %v7237_v53, 0.0 }
 0x6fe   :  { %v7033_v59 = vadd.f32 %v8511_v40, %v12674_v34  ;;  %v8512_v44 = vpop.f32.mrb[46].mxu1  ;;  %v7668_v61 = vrot.slane %v7548_v37, %v10319_v33  ;;  %v7781_v10 = vsel %vm13192_vm13, %v7660_v22, %v7656_v11 }
 0x6ff   :  { %v7312_v57 = vrot.slane %v7298_v20, %v10289_v38  ;;  %v7313_v52 = vcombine.high %v7305_v54, %v7305_v54  ;;  %v8282_v29 = vrot.slane %v7305_v54, 9  ;;  %v7238_v16 = vadd.f32 %v12984_v30, %v7173_v21  ;;  %v8513_v7 = vpop.f32.mrb[47].mxu1 }
 0x700   :  { %v7178_v24 = vadd.f32 %v12640_v62, %v7033_v59  ;;  %v8514_v36 = vadd.f32 %v8513_v7, %v8512_v44  ;;  %v7782_v4 = vsel %vm6056_vm3, %v7664_v23, %v7781_v10 }
 0x701   :  { %v8283_v32 = vrot.slane %v7313_v52, 9  ;;  %v7549_v34 = vmax.f32 %v7305_v54, %v8282_v29  ;;  %v7254_v41 = vmax.f32 %v7238_v16, 0.0  ;;  %v7314_v47 = vcombine.high %v7312_v57, %v7312_v57 }
 0x702   :  { %v7239_v45 = vadd.f32 %v12984_v30, %v7178_v24  ;;  %v7038_v48 = vadd.f32 %v8514_v36, %v12689_v27  ;;  %v8515_v26 = vpop.f32.mrb[48].mxu1  ;;  %v8284_v2 = vrot.slane %v7312_v57, 9  ;;  %v7783_v31 = vsel %vm6058_vm4, %v7668_v61, %v7782_v4 }
 0x703   :  { %v7267_v6 = vmax.f32 %v7253_v3, %v7254_v41  ;;  %v8516_v39 = vpop.f32.mrb[49].mxu1  ;;  %v8285_v18 = vrot.slane %v7314_v47, 9  ;;  %v7550_v1 = vmax.f32 %v7313_v52, %v8283_v32  ;;  %v7672_v62 = vrot.slane %v7549_v34, %v10319_v33 }
 0x704   :  { %v7255_v17 = vmax.f32 %v7239_v45, 0.0  ;;  %v7183_v14 = vadd.f32 %v12636_v5, %v7038_v48  ;;  %v8517_v11 = vadd.f32 %v8516_v39, %v8515_v26  ;;  %v7551_v43 = vmax.f32 %v7312_v57, %v8284_v2 }
 0x705   :  { %v7315_v53 = vcombine.high %v7267_v6, %v7267_v6  ;;  %v7322_v13 = vrot.slane %v7267_v6, %v10289_v38  ;;  %v7552_v63 = vmax.f32 %v7314_v47, %v8285_v18  ;;  %v7676_v27 = vrot.slane %v7550_v1, %v10319_v33 }
 0x706   :  { %v7240_v37 = vadd.f32 %v12984_v30, %v7183_v14  ;;  %v7043_v22 = vadd.f32 %v8517_v11, %v12696_v19  ;;  %v8518_v23 = vpop.f32.mrb[50].mxu1  ;;  %v7680_v40 = vrot.slane %v7551_v43, %v10319_v33  ;;  %v7784_v20 = vsel %vm6060_vm5, %v7672_v62, %v7783_v31 }
 0x707   :  { %v7329_v54 = vrot.slane %v7315_v53, %v10289_v38  ;;  %v7330_v5 = vcombine.high %v7322_v13, %v7322_v13  ;;  %v8286_v21 = vrot.slane %v7322_v13, 9  ;;  %v8519_v59 = vpop.f32.mrb[51].mxu1  ;;  %v7684_v44 = vrot.slane %v7552_v63, %v10319_v33 }
 0x708   :  { %v7256_v61 = vmax.f32 %v7240_v37, 0.0  ;;  %v7188_v10 = vadd.f32 %v12655_v25, %v7043_v22  ;;  %v8520_v57 = vadd.f32 %v8519_v59, %v8518_v23  ;;  %v7785_v52 = vsel %vm6062_vm15, %v7676_v27, %v7784_v20 }
 0x709   :  { %v7331_v29 = vcombine.high %v7329_v54, %v7329_v54  ;;  %v8287_v19 = vrot.slane %v7330_v5, 9  ;;  %v8288_v16 = vrot.slane %v7329_v54, 9  ;;  %v7553_v7 = vmax.f32 %v7322_v13, %v8286_v21 }
 0x70a   :  { %v7268_v3 = vmax.f32 %v7255_v17, %v7256_v61  ;;  %v7241_v24 = vadd.f32 %v12984_v30, %v7188_v10  ;;  %v7048_v36 = vadd.f32 %v8520_v57, %v12703_v58  ;;  %v7786_v4 = vsel %vm6064_vm1, %v7680_v40, %v7785_v52  ;;  %v8521_v32 = vpop.f32.mrb[52].mxu1 }
 0x70b   :  { %v7554_v34 = vmax.f32 %v7330_v5, %v8287_v19  ;;  %v7555_v41 = vmax.f32 %v7329_v54, %v8288_v16  ;;  %v7787_v47 = vsel %vm6066_vm2, %v7684_v44, %v7786_v4  ;;  %v8522_v25 = vpop.f32.mrb[53].mxu1  ;;  %v7688_v45 = vrot.slane %v7553_v7, %v10319_v33 }
 0x70c   :  { %v7332_v48 = vcombine.high %v7268_v3, %v7268_v3  ;;  %v7339_v26 = vrot.slane %v7268_v3, %v10289_v38  ;;  %v7193_v2 = vadd.f32 %v12651_v12, %v7048_v36  ;;  %7878 = vmatmul.mubr.f32.vlgmr.msra.gmra.mrb[64].mxu1 %v7787_v47  ;;  %v7257_v6 = vmax.f32 %v7241_v24, 0.0 }
 0x70d   :  { %v7692_v31 = vrot.slane %v7554_v34, %v10319_v33  ;;  %v8523_v58 = vadd.f32 %v8522_v25, %v8521_v32  ;;  %7883 = vmatprep.mubr.f32.mxu1 %v9133_v0  ;;  %v8289_v39 = vrot.slane %v7331_v29, 9  ;;  %v7696_v12 = vrot.slane %v7555_v41, %v10319_v33 }
 0x70e   :  { %v7346_v18 = vrot.slane %v7332_v48, %v10289_v38  ;;  %v8290_v1 = vrot.slane %v7339_v26, 9  ;;  %v7242_v62 = vadd.f32 %v12984_v30, %v7193_v2  ;;  %v8524_v17 = vpop.f32.mrb[54].mxu1  ;;  %v7347_v14 = vcombine.high %v7339_v26, %v7339_v26 }
 0x70f   :  { %v7053_v11 = vadd.f32 %v8523_v58, %v12723_v56  ;;  %v8525_v43 = vpop.f32.mrb[55].mxu1  ;;  %v7556_v53 = vmax.f32 %v7331_v29, %v8289_v39  ;;  %v7788_v13 = vsel %vm13193_vm14, %v7692_v31, %v7688_v45 }
 0x710   :  { %v7258_v63 = vmax.f32 %v7242_v62, 0.0  ;;  %v8526_v27 = vadd.f32 %v8525_v43, %v8524_v17  ;;  %v7348_v37 = vcombine.high %v7346_v18, %v7346_v18  ;;  %v8291_v22 = vrot.slane %v7347_v14, 9 }
 0x711   :  { %v7198_v23 = vadd.f32 %v12728_v60, %v7053_v11  ;;  %v8292_v40 = vrot.slane %v7346_v18, 9  ;;  %v7557_v20 = vmax.f32 %v7339_v26, %v8290_v1  ;;  %v7700_v57 = vrot.slane %v7556_v53, %v10319_v33 }
 0x712   :  { %v7269_v54 = vmax.f32 %v7257_v6, %v7258_v63  ;;  %v7058_v5 = vadd.f32 %v8526_v27, %v12735_v15  ;;  %v8527_v21 = vpop.f32.mrb[56].mxu1  ;;  %v8293_v59 = vrot.slane %v7348_v37, 9  ;;  %v7558_v56 = vmax.f32 %v7347_v14, %v8291_v22 }
 0x713   :  { %v7243_v44 = vadd.f32 %v12984_v30, %v7198_v23  ;;  %v8528_v61 = vpop.f32.mrb[57].mxu1  ;;  %v7559_v10 = vmax.f32 %v7346_v18, %v8292_v40  ;;  %v7789_v52 = vsel %vm6056_vm3, %v7696_v12, %v7788_v13  ;;  %v7704_v15 = vrot.slane %v7557_v20, %v10319_v33 }
 0x714   :  { %v7349_v29 = vcombine.high %v7269_v54, %v7269_v54  ;;  %v7356_v19 = vrot.slane %v7269_v54, %v10289_v38  ;;  %v7203_v60 = vadd.f32 %v12726_v46, %v7058_v5  ;;  %v8529_v16 = vadd.f32 %v8528_v61, %v8527_v21 }
 0x715   :  { %v7259_v7 = vmax.f32 %v7243_v44, 0.0  ;;  %v7560_v3 = vmax.f32 %v7348_v37, %v8293_v59  ;;  %v7708_v24 = vrot.slane %v7558_v56, %v10319_v33  ;;  %v7712_v45 = vrot.slane %v7559_v10, %v10319_v33 }
 0x716   :  { %v7363_v36 = vrot.slane %v7349_v29, %v10289_v38  ;;  %v7364_v4 = vcombine.high %v7356_v19, %v7356_v19  ;;  %v8294_v32 = vrot.slane %v7356_v19, 9  ;;  %v7244_v34 = vadd.f32 %v12984_v30, %v7203_v60  ;;  %v8530_v41 = vpop.f32.mrb[58].mxu1 }
 0x717   :  { %v7063_v47 = vadd.f32 %v8529_v16, %v12770_v35  ;;  %v8531_v25 = vpop.f32.mrb[59].mxu1  ;;  %v7716_v46 = vrot.slane %v7560_v3, %v10319_v33  ;;  %v7790_v48 = vsel %vm6058_vm4, %v7700_v57, %v7789_v52 }
 0x718   :  { %v7365_v26 = vcombine.high %v7363_v36, %v7363_v36  ;;  %v8295_v2 = vrot.slane %v7364_v4, 9  ;;  %v8296_v31 = vrot.slane %v7363_v36, 9  ;;  %v7561_v6 = vmax.f32 %v7356_v19, %v8294_v32 }
 0x719   :  { %v7260_v58 = vmax.f32 %v7244_v34, 0.0  ;;  %v7208_v39 = vadd.f32 %v12776_v42, %v7063_v47  ;;  %v8532_v18 = vadd.f32 %v8531_v25, %v8530_v41  ;;  %v7791_v1 = vsel %vm6060_vm5, %v7704_v15, %v7790_v48 }
 0x71a   :  { %v7562_v62 = vmax.f32 %v7364_v4, %v8295_v2  ;;  %v7563_v17 = vmax.f32 %v7363_v36, %v8296_v31  ;;  %v7720_v35 = vrot.slane %v7561_v6, %v10319_v33  ;;  %v7792_v14 = vsel %vm6062_vm15, %v7708_v24, %v7791_v1  ;;  %v8533_v11 = vpop.f32.mrb[60].mxu1 }
 0x71b   :  { %v7270_v43 = vmax.f32 %v7259_v7, %v7260_v58  ;;  %v7245_v53 = vadd.f32 %v12984_v30, %v7208_v39  ;;  %v7068_v12 = vadd.f32 %v8532_v18, %v12825_v49  ;;  %v7793_v13 = vsel %vm6064_vm1, %v7712_v45, %v7792_v14  ;;  %v8534_v63 = vpop.f32.mrb[61].mxu1 }
 0x71c   :  { %v7724_v42 = vrot.slane %v7562_v62, %v10319_v33  ;;  %v7794_v27 = vsel %vm6066_vm2, %v7716_v46, %v7793_v13  ;;  %v8535_v37 = vadd.f32 %v8534_v63, %v8533_v11  ;;  %v8297_v22 = vrot.slane %v7365_v26, 9 }
 0x71d   :  { %v7366_v23 = vcombine.high %v7270_v43, %v7270_v43  ;;  %v7373_v40 = vrot.slane %v7270_v43, %v10289_v38  ;;  %v7261_v20 = vmax.f32 %v7245_v53, 0.0  ;;  %v7213_v54 = vadd.f32 %v12774_v8, %v7068_v12  ;;  %7884 = vmatmul.mubr.f32.gmra.mrb[66].mxu1 %v7794_v27 }
 0x71e   :  { %v8536_v5 = vpop.f32.mrb[62].mxu1  ;;  %v7073_v21 = vadd.f32 %v8535_v37, %v12897_v50  ;;  %7889 = vmatprep.mubr.f32.mxu1 %v9133_v0  ;;  %v7564_v49 = vmax.f32 %v7365_v26, %v8297_v22  ;;  %v7728_v59 = vrot.slane %v7563_v17, %v10319_v33  ;;  %v7795_v56 = vsel %vm13194_vm10, %v7724_v42, %v7720_v35 }
 0x71f   :  { %v7380_v44 = vrot.slane %v7366_v23, %v10289_v38  ;;  %v8298_v61 = vrot.slane %v7373_v40, 9  ;;  %v7246_v10 = vadd.f32 %v12984_v30, %v7213_v54  ;;  %v8537_v57 = vpop.f32.mrb[63].mxu1  ;;  %v7381_v52 = vcombine.high %v7373_v40, %v7373_v40 }
 0x720   :  { %v8538_v29 = vadd.f32 %v8537_v57, %v8536_v5  ;;  %v7218_v8 = vadd.f32 %v12895_v51, %v7073_v21  ;;  %v7732_v19 = vrot.slane %v7564_v49, %v10319_v33  ;;  %v7796_v50 = vsel %vm6056_vm3, %v7728_v59, %v7795_v56 }
 0x721   :  { %v7262_v60 = vmax.f32 %v7246_v10, 0.0  ;;  %v7382_v16 = vcombine.high %v7380_v44, %v7380_v44  ;;  %v8299_v7 = vrot.slane %v7381_v52, 9  ;;  %v8300_v3 = vrot.slane %v7380_v44, 9 }
 0x722   :  { %v7078_v15 = vadd.f32 %v8538_v29, %v12977_v55  ;;  %v7565_v24 = vmax.f32 %v7373_v40, %v8298_v61  ;;  %v7247_v47 = vadd.f32 %v12984_v30, %v7218_v8  ;;  %v7797_v25 = vsel %vm6058_vm4, %v7732_v19, %v7796_v50 }
 0x723   :  { %v7271_v36 = vmax.f32 %v7261_v20, %v7262_v60  ;;  %v8301_v4 = vrot.slane %v7382_v16, 9  ;;  %v7566_v32 = vmax.f32 %v7381_v52, %v8299_v7  ;;  %v7567_v34 = vmax.f32 %v7380_v44, %v8300_v3 }
 0x724   :  { %v7223_v41 = vadd.f32 %v12893_v9, %v7078_v15  ;;  %v7736_v51 = vrot.slane %v7565_v24, %v10319_v33  ;;  %v7263_v18 = vmax.f32 %v7247_v47, 0.0  ;;  %v7922_v24 = vld [vmem:[%s13158_s7 + $0x60] sm:$0xff] }
 0x725   :  { %v7383_v45 = vcombine.high %v7271_v36, %v7271_v36  ;;  %v7390_v46 = vrot.slane %v7271_v36, %v10289_v38  ;;  %v7568_v48 = vmax.f32 %v7382_v16, %v8301_v4  ;;  %v7740_v26 = vrot.slane %v7566_v32, %v10319_v33  ;;  %v7923_v36 = vld [vmem:[%s13158_s7 + $0x68] sm:$0xff]  ;;  %v7940_v32 = vld [vmem:[%s13158_s7 + $0xf0] sm:$0xff] }
 0x726   :  { %v7248_v55 = vadd.f32 %v12984_v30, %v7223_v41  ;;  %v7744_v2 = vrot.slane %v7567_v34, %v10319_v33  ;;  %v7798_v31 = vsel %vm6060_vm5, %v7736_v51, %v7797_v25  ;;  %v8899_v4 = vpack.c.bf16 %v7923_v36, %v7922_v24  ;;  %v7941_v34 = vld [vmem:[%s13158_s7 + $0xf8] sm:$0xff]  ;;  %v7924_v41 = vld [vmem:[%s13158_s7 + $0x70] sm:$0xff] }
 0x727   :  { %v7397_v9 = vrot.slane %v7383_v45, %v10289_v38  ;;  %v7398_v6 = vcombine.high %v7390_v46, %v7390_v46  ;;  %v8302_v58 = vrot.slane %v7390_v46, 9  ;;  %v7748_v39 = vrot.slane %v7568_v48, %v10319_v33  ;;  %v7925_v51 = vld [vmem:[%s13158_s7 + $0x78] sm:$0xff]  ;;  %v7609_v45 = vld [vmem:[%s13160_s6] sm:$0x3] }
 0x728   :  { %v7264_v1 = vmax.f32 %v7248_v55, 0.0  ;;  %v7799_v62 = vsel %vm6062_vm15, %v7740_v26, %v7798_v31  ;;  %8900 = vmatpush3.bf16.msra.mxu0 %v8899_v4  ;;  %v8901_v47 = vpack.c.bf16 %v7941_v34, %v7940_v32  ;;  %v8903_v25 = vpack.c.bf16 %v7925_v51, %v7924_v41 }
 0x729   :  { %v7399_v17 = vcombine.high %v7397_v9, %v7397_v9  ;;  %v8303_v35 = vrot.slane %v7398_v6, 9  ;;  %v8304_v14 = vrot.slane %v7397_v9, 9  ;;  %v7569_v11 = vmax.f32 %v7390_v46, %v8302_v58 }
 0x72a   :  { %v7272_v43 = vmax.f32 %v7263_v18, %v7264_v1  ;;  %v7800_v30 = vsel %vm6064_vm1, %v7744_v2, %v7799_v62  ;;  %8902 = vmatprep.subr.bf16.mxu0 %v8901_v47  ;;  %v7617_v46 = vsub.s32 1, %v10275_v28  ;;  %v7614_v48 = vrot.slane %v7609_v45, %v10319_v33 }
 0x72b   :  { %v7570_v53 = vmax.f32 %v7398_v6, %v8303_v35  ;;  %v7571_v12 = vmax.f32 %v7397_v9, %v8304_v14  ;;  %v7801_v13 = vsel %vm6066_vm2, %v7748_v39, %v7800_v30  ;;  %v8305_v27 = vrot.slane %v7399_v17, 9 }
 0x72c   :  { %v7400_v63 = vcombine.high %v7272_v43, %v7272_v43  ;;  %v7407_v42 = vrot.slane %v7272_v43, %v10289_v38  ;;  %7890 = vmatmul.mubr.f32.gmra.mrb[68].mxu1 %v7801_v13  ;;  %v7752_v37 = vrot.slane %v7569_v11, %v10319_v33  ;;  %8904 = vmatpush3.bf16.msra.mxu0 %v8903_v25 }
 0x72d   :  { %v7756_v22 = vrot.slane %v7570_v53, %v10319_v33  ;;  %7895 = vmatprep.mubr.f32.mxu1 %v9133_v0  ;;  %v7760_v23 = vrot.slane %v7571_v12, %v10319_v33  ;;  %v7572_v5 = vmax.f32 %v7399_v17, %v8305_v27  ;;  %v7618_v26 = vrot.slane %v7609_v45, %v7617_v46 }
 0x72e   :  { %v7414_v40 = vrot.slane %v7400_v63, %v10289_v38  ;;  %v7415_v20 = vcombine.high %v7407_v42, %v7407_v42  ;;  %v8306_v54 = vrot.slane %v7407_v42, 9 }
 0x72f   :  { %v7802_v21 = vsel %vm13185_vm0, %v7756_v22, %v7752_v37  ;;  %v7764_v61 = vrot.slane %v7572_v5, %v10319_v33  ;;  %v8310_v22 = vld [vmem:[%s13161_s8] ss:$0 sm:$0xff] }
 0x730   :  { %v8307_v49 = vrot.slane %v7415_v20, 9  ;;  %v7573_v59 = vmax.f32 %v7407_v42, %v8306_v54  ;;  %v7416_v56 = vcombine.high %v7414_v40, %v7414_v40  ;;  %v8308_v44 = vrot.slane %v7414_v40, 9 }
 0x731   :  { %v7803_v10 = vsel %vm6056_vm3, %v7760_v23, %v7802_v21 }
 0x732   :  { %v8309_v57 = vrot.slane %v7416_v56, 9  ;;  %v7574_v52 = vmax.f32 %v7415_v20, %v8307_v49  ;;  %v7575_v0 = vmax.f32 %v7414_v40, %v8308_v44  ;;  %v7768_v29 = vrot.slane %v7573_v59, %v10319_v33 }
 0x733   :  { %v7804_v38 = vsel %vm6058_vm4, %v7764_v61, %v7803_v10 }
 0x734   :  { %v7576_v8 = vmax.f32 %v7416_v56, %v8309_v57  ;;  %v7772_v19 = vrot.slane %v7574_v52, %v10319_v33  ;;  %v7776_v50 = vrot.slane %v7575_v0, %v10319_v33  ;;  %v7805_v60 = vsel %vm6060_vm5, %v7768_v29, %v7804_v38 }
 0x736   :  { %v7780_v16 = vrot.slane %v7576_v8, %v10319_v33  ;;  %v7806_v7 = vsel %vm6062_vm15, %v7772_v19, %v7805_v60 }
 0x737   :  { %v7807_v3 = vsel %vm6064_vm1, %v7776_v50, %v7806_v7 }
 0x738   :  { %v7808_v15 = vsel %vm6066_vm2, %v7780_v16, %v7807_v3  ;;  %vm8058_vm2 = vcmask 392192  }
 0x739   :  { %7896 = vmatmul.mubr.f32.gmra.mrb[70].mxu1 %v7808_v15 }
 0x7df   :  { %v7879_v55 = vpop.f32.mrb[64].mxu1 }
 0x7e0   :  { %v7880_v2 = vadd.f32 %v7879_v55, %v7614_v48  ;;  %v7881_v31 = vpop.f32.mrb[65].mxu1 }
 0x7e1   :  { %v7882_v9 = vadd.f32 %v7881_v31, %v7618_v26 }
 0x7e2   :  { %v7902_v58 = vmax.f32 %v7880_v2, 0.0 }
 0x7e3   :  { %v7903_v6 = vmax.f32 %v7882_v9, 0.0 }
 0x7e5   :  { %8013 = vmatprep.mubr.f32.mxu0 %v7903_v6 }
 0x7e6   :  { %8014 = vmatmul.mubr.f32.vlgmr.msra.gmra.mrb[80].mxu0 %v7902_v58 }
 0x7f0   :  { %v7885_v39 = vpop.f32.mrb[66].mxu1 }
 0x7f1   :  { %v7886_v18 = vadd.f32 %v7885_v39, %v7614_v48  ;;  %v7887_v1 = vpop.f32.mrb[67].mxu1 }
 0x7f2   :  { %v7888_v62 = vadd.f32 %v7887_v1, %v7618_v26 }
 0x7f3   :  { %v7904_v35 = vmax.f32 %v7886_v18, 0.0 }
 0x7f4   :  { %v7905_v17 = vmax.f32 %v7888_v62, 0.0 }
 0x7f6   :  { %8018 = vmatprep.mubr.f32.mxu0 %v7905_v17 }
 0x7f7   :  { %8019 = vmatmul.mubr.f32.gmra.mrb[82].mxu0 %v7904_v35 }
 0x7ff   :  { %v7891_v28 = vpop.f32.mrb[68].mxu1 }
 0x800   :  { %v7892_v14 = vadd.f32 %v7891_v28, %v7614_v48  ;;  %v7893_v33 = vpop.f32.mrb[69].mxu1 }
 0x801   :  { %v7894_v11 = vadd.f32 %v7893_v33, %v7618_v26 }
 0x802   :  { %v7906_v30 = vmax.f32 %v7892_v14, 0.0 }
 0x803   :  { %v7907_v43 = vmax.f32 %v7894_v11, 0.0 }
 0x805   :  { %8023 = vmatprep.mubr.f32.mxu0 %v7907_v43 }
 0x806   :  { %8024 = vmatmul.mubr.f32.gmra.mrb[84].mxu0 %v7906_v30 }
 0x80c   :  { %v7897_v53 = vpop.f32.mrb[70].mxu1 }
 0x80d   :  { %v7898_v12 = vadd.f32 %v7897_v53, %v7614_v48  ;;  %v7899_v13 = vpop.f32.mrb[71].mxu1 }
 0x80e   :  { %v7900_v63 = vadd.f32 %v7899_v13, %v7618_v26 }
 0x80f   :  { %v7908_v27 = vmax.f32 %v7898_v12, 0.0 }
 0x810   :  { %v7909_v42 = vmax.f32 %v7900_v63, 0.0 }
 0x812   :  { %8028 = vmatprep.mubr.f32.mxu0 %v7909_v42 }
 0x813   :  { %8029 = vmatmul.mubr.f32.gmra.mrb[86].mxu0 %v7908_v27 }
 0x8b9   :  { %v8595_v37 = vpop.f32.mrb[80].mxu0 }
 0x8ba   :  { %v8596_v23 = vpop.f32.mrb[81].mxu0 }
 0x8bb   :  { %v8597_v40 = vadd.f32 %v8596_v23, %v8595_v37 }
 0x8bd   :  { %v8016_v20 = vadd.f32 %v8597_v40, %v8310_v22 }
 0x8bf   :  { %v8034_v54 = vsub.f32 0.0, %v8016_v20 }
 0x8c1   :  { %v8038_v5 = vmul.f32 1.442695, %v8034_v54 }
 0x8c3   :  { %9077 = vpow2.f32 %v8038_v5 }
 0x8ca   :  { %v8598_v21 = vpop.f32.mrb[82].mxu0 }
 0x8cb   :  { %v8599_v49 = vpop.f32.mrb[83].mxu0 }
 0x8cc   :  { %v8600_v59 = vadd.f32 %v8599_v49, %v8598_v21 }
 0x8cd   :  { %v9078_v56 = vpop.eup %9077 }
 0x8ce   :  { %v8046_v44 = vadd.f32 1.0, %v9078_v56  ;;  %v8021_v61 = vadd.f32 %v8600_v59, %v8310_v22 }
 0x8d0   :  { %9079 = vrcp.f32 %v8046_v44  ;;  %v8035_v10 = vsub.f32 0.0, %v8021_v61 }
 0x8d2   :  { %v8040_v57 = vmul.f32 1.442695, %v8035_v10 }
 0x8d4   :  { %9081 = vpow2.f32 %v8040_v57 }
 0x8d9   :  { %v8601_v52 = vpop.f32.mrb[84].mxu0 }
 0x8da   :  { %v9080_v0 = vpop.eup %9079  ;;  %v8602_v29 = vpop.f32.mrb[85].mxu0 }
 0x8db   :  { %8059 = vst.msk [vmem:[%s13162_s9] sm:$0xff] %vm8058_vm2, %v9080_v0  ;;  %v8603_v38 = vadd.f32 %v8602_v29, %v8601_v52 }
 0x8dd   :  { %v8026_v8 = vadd.f32 %v8603_v38, %v8310_v22 }
 0x8de   :  { %v9082_v19 = vpop.eup %9081 }
 0x8df   :  { %v8047_v50 = vadd.f32 1.0, %v9082_v19  ;;  %v8036_v60 = vsub.f32 0.0, %v8026_v8 }
 0x8e1   :  { %9083 = vrcp.f32 %v8047_v50  ;;  %v8042_v16 = vmul.f32 1.442695, %v8036_v60 }
 0x8e3   :  { %9085 = vpow2.f32 %v8042_v16 }
 0x8e6   :  { %v8604_v7 = vpop.f32.mrb[86].mxu0 }
 0x8e7   :  { %v8605_v3 = vpop.f32.mrb[87].mxu0 }
 0x8e8   :  { %v8606_v15 = vadd.f32 %v8605_v3, %v8604_v7 }
 0x8ea   :  { %v8031_v24 = vadd.f32 %v8606_v15, %v8310_v22 }
 0x8eb   :  { %v9084_v36 = vpop.eup %9083 }
 0x8ec   :  { %8060 = vst.msk [vmem:[%s13162_s9 + $0x8] sm:$0xff] %vm8058_vm2, %v9084_v36  ;;  %v8037_v4 = vsub.f32 0.0, %v8031_v24 }
 0x8ed   :  { %v9086_v32 = vpop.eup %9085 }
 0x8ee   :  { %v8048_v34 = vadd.f32 1.0, %v9086_v32  ;;  %v8044_v41 = vmul.f32 1.442695, %v8037_v4 }
 0x8f0   :  { %9087 = vrcp.f32 %v8048_v34 }
 0x8f1   :  { %9089 = vpow2.f32 %v8044_v41 }
 0x8fa   :  { %v9088_v47 = vpop.eup %9087 }
 0x8fb   :  { %v9090_v51 = vpop.eup %9089  ;;  %8061 = vst.msk [vmem:[%s13162_s9 + $0x10] sm:$0xff] %vm8058_vm2, %v9088_v47 }
 0x8fc   :  { %v8049_v25 = vadd.f32 1.0, %v9090_v51 }
 0x8fe   :  { %9091 = vrcp.f32 %v8049_v25 }
 0x908   :  { %v9092_v45 = vpop.eup %9091 }
 0x909   :  { %8062 = vst.msk [vmem:[%s13162_s9 + $0x18] sm:$0xff] %vm8058_vm2, %v9092_v45 }

</bundles_post_ra>
